<compile_context>
chip_gen: v6e
topology: v6e:2x2x1
jax: 0.10.0
libtpu: 0.0.40
codegen_flags: <defaults>
</compile_context>

<pallas_src>
import functools

import jax
import jax.numpy as jnp
from jax.experimental import pallas as pl
from jax.experimental.pallas import tpu as pltpu


OUT_PAD = 128   # logits padded 10 -> 128 lanes for unmasked (lane-dense) stores


# ----------------------------------------------------------------------------
# Fused kernel: conv(Ci->Co, 3x3, pad=1) + flatten + Linear(Co*H*W -> 10)
# One grid step == one block of NB images.
# ----------------------------------------------------------------------------
def _fused_kernel(x_ref, bd_ref, cb_ref, w3_ref, fb_ref, o_ref, acc_ref,
                  *, H, W, Ci, Co, KH, NB):
    """
    x_ref  : (H+2, NB, (W+2)*Ci) bf16  zero-padded activations; (w, ci) folded in lanes,
                                       batch in sublanes, height in the major dim
    bd_ref : (KH, (W+2)*Ci, W*Co) bf16 per-dh banded conv weights (dw taps folded in)
    cb_ref : (1, W*Co)            f32  conv bias tiled per output column block
    w3_ref : (H, W*Co, OUT_PAD)   bf16 fc weight in [h, w*Co+c] row order, 128-padded cols
    fb_ref : (1, OUT_PAD)         f32  fc bias (128-padded)
    o_ref  : (NB, OUT_PAD)        f32  logits block
    acc_ref: (H*NB, W*Co)         f32  VMEM conv accumulator, rows ordered (h, n)
    """
    Wp = (W + 2) * Ci

    # ---- conv: KH accumulated GEMMs, M = H*NB, K = (W+2)*Ci, N = W*Co -------
    for dh in range(KH):
        xs = x_ref[dh:dh + H].reshape(H * NB, Wp)          # layout-trivial merge
        part = jnp.dot(xs, bd_ref[dh], preferred_element_type=jnp.float32)
        if dh == 0:
            acc_ref[...] = part
        else:
            acc_ref[...] += part

    # ---- fc: H accumulated GEMMs of (NB, W*Co) x (W*Co, OUT_PAD) ------------
    out = jnp.zeros((NB, OUT_PAD), jnp.float32)
    for h in range(H):
        ch = (acc_ref[h * NB:(h + 1) * NB, :] + cb_ref[...]).astype(jnp.bfloat16)
        out = out + jnp.dot(ch, w3_ref[h], preferred_element_type=jnp.float32)
    o_ref[...] = out + fb_ref[...]


# ----------------------------------------------------------------------------
# One-time weight re-layout (run OUTSIDE the jitted forward).
# ----------------------------------------------------------------------------
def prepare_params(params, *, H=16, W=16):
    conv_w = params["conv_w"]            # (Co, Ci, KH, KW)  PyTorch OIHW
    conv_b = params["conv_b"]            # (Co,)
    fc_w = params["fc_w"]                # (10, Co*H*W)      PyTorch (out, in), NCHW flatten
    fc_b = params["fc_b"]                # (10,)
    Co, Ci, KH, KW = conv_w.shape
    n_out = fc_w.shape[0]

    # Banded per-dh conv weights folding the KW lane taps:
    #   bd[dh, u*Ci+ci, v*Co+co] = conv_w[co, ci, dh, u-v]  if 0 <= u-v < KW else 0
    wt = jnp.transpose(conv_w, (2, 3, 1, 0))                           # (KH, KW, Ci, Co)
    u = jnp.arange(W + 2)
    v = jnp.arange(W)
    shift = (u[None, :, None] == (v[None, None, :] + jnp.arange(KW)[:, None, None]))
    shift = shift.astype(conv_w.dtype)                                 # (KW, W+2, W)
    bd = jnp.einsum("duv,hdio->huivo", shift, wt)
    bd = bd.reshape(KH, (W + 2) * Ci, W * Co)

    # Conv bias tiled per output column block: cb[0, w*Co + co] = conv_b[co]
    cb = jnp.tile(conv_b, (W,)).reshape(1, W * Co)

    # fc weight regrouped from NCHW-flatten order (c*H*W + h*W + w) to [h, w*Co + c]
    # rows, pre-"transposed" to (in, out) and zero-padded to 128 output lanes.
    w3 = (fc_w.reshape(n_out, Co, H, W)        # [o, c, h, w]
               .transpose(2, 3, 1, 0)           # [h, w, c, o]
               .reshape(H, W * Co, n_out))      # [h, w*Co + c, o]
    w3 = jnp.pad(w3, ((0, 0), (0, 0), (0, OUT_PAD - n_out)))
    fb = jnp.pad(fc_b, (0, OUT_PAD - n_out)).reshape(1, OUT_PAD)

    return {
        "bd": bd.astype(jnp.bfloat16),
        "cb": cb.astype(jnp.float32),
        "w3": w3.astype(jnp.bfloat16),
        "fb": fb.astype(jnp.float32),
    }


# ----------------------------------------------------------------------------
# Forward pass (jit-able). x is NCHW like PyTorch.
# ----------------------------------------------------------------------------
def cifar_model_forward(x_nchw, prep, n_out=10):
    bd, cb, w3, fb = prep["bd"], prep["cb"], prep["w3"], prep["fb"]
    N, Ci, H, W = x_nchw.shape
    KH, Wp, WCo = bd.shape
    Co = WCo // W
    assert Wp == (W + 2) * Ci and w3.shape == (H, WCo, OUT_PAD)

    # Batch blocking: NB images per grid step (MXU M = NB*H = 256, a multiple of 128
    # for v5e and 256 for v6e/v7x); at least 2 grid steps so both v7x TCs get work.
    NB = 16
    num_blocks = max(2, -(-N // NB))
    N_pad = NB * num_blocks

    # Glue (one small fused XLA pass): NCHW -> (H, N, W, Ci), zero-pad spatially and on
    # the batch, fold (w, ci) into lanes, cast bf16.
    # TODO(synk): accept NHWC / pre-padded input to drop this transpose+pad pass entirely.
    x = jnp.transpose(x_nchw, (2, 0, 3, 1))                            # (H, N, W, Ci)
    x = jnp.pad(x, ((1, 1), (0, N_pad - N), (1, 1), (0, 0)))
    x3 = x.reshape(H + 2, N_pad, (W + 2) * Ci).astype(jnp.bfloat16)

    kern = functools.partial(_fused_kernel, H=H, W=W, Ci=Ci, Co=Co, KH=KH, NB=NB)

    flops = num_blocks * (2 * (NB * H) * Wp * WCo * KH + 2 * NB * WCo * OUT_PAD * H)
    bytes_accessed = (x3.size * 2 + bd.size * 2 + w3.size * 2
                      + cb.size * 4 + fb.size * 4 + N_pad * OUT_PAD * 4)

    out = pl.pallas_call(
        kern,
        out_shape=jax.ShapeDtypeStruct((N_pad, OUT_PAD), jnp.float32),
        grid=(num_blocks,),
        in_specs=[
            pl.BlockSpec((H + 2, NB, Wp), lambda b: (0, b, 0)),
            pl.BlockSpec((KH, Wp, WCo), lambda b: (0, 0, 0)),
            pl.BlockSpec((1, WCo), lambda b: (0, 0)),
            pl.BlockSpec((H, WCo, OUT_PAD), lambda b: (0, 0, 0)),
            pl.BlockSpec((1, OUT_PAD), lambda b: (0, 0)),
        ],
        out_specs=pl.BlockSpec((NB, OUT_PAD), lambda b: (b, 0)),
        scratch_shapes=[pltpu.VMEM((H * NB, WCo), jnp.float32)],
        compiler_params=pltpu.CompilerParams(
            dimension_semantics=("parallel",)),
        cost_estimate=pl.CostEstimate(
            flops=flops, transcendentals=0, bytes_accessed=bytes_accessed),
    )(x3, bd, cb, w3, fb)
    return out[:N, :n_out]


# ----------------------------------------------------------------------------
# Pure-JAX f32 reference (correctness check only)
# ----------------------------------------------------------------------------
def reference_forward(x_nchw, params):
    conv = jax.lax.conv_general_dilated(
        x_nchw, params["conv_w"], window_strides=(1, 1),
        padding=((1, 1), (1, 1)),
        dimension_numbers=("NCHW", "OIHW", "NCHW"))
    conv = conv + params["conv_b"][None, :, None, None]
    feat = conv.reshape(conv.shape[0], -1)                   # PyTorch NCHW flatten
    return feat @ params["fc_w"].T + params["fc_b"]


if __name__ == "__main__":
    key = jax.random.PRNGKey(0)
    k_x, k_cw, k_cb, k_fw, k_fb = jax.random.split(key, 5)

    # Shapes consistent with fc input 9216: Co=36, H=W=16 -> 36*16*16 = 9216
    N, Ci, H, W = 2, 4, 16, 16
    Co, KH, KW = 36, 3, 3

    x = jax.random.normal(k_x, (N, Ci, H, W), dtype=jnp.float32)
    params = {
        "conv_w": 0.05 * jax.random.normal(k_cw, (Co, Ci, KH, KW), dtype=jnp.float32),
        "conv_b": 0.05 * jax.random.normal(k_cb, (Co,), dtype=jnp.float32),
        "fc_w":   0.02 * jax.random.normal(k_fw, (10, Co * H * W), dtype=jnp.float32),
        "fc_b":   0.02 * jax.random.normal(k_fb, (10,), dtype=jnp.float32),
    }

    prep = prepare_params(params, H=H, W=W)      # one-time weight re-layout

    fwd = jax.jit(cifar_model_forward)
    out = jax.block_until_ready(fwd(x, prep))

    ref = reference_forward(x, params)
    assert out.shape == (N, 10)
    # bf16 matmul operands with f32 accumulation -> loosened tolerance vs f32 reference
    assert jnp.allclose(out, ref, rtol=3e-2, atol=3e-2), "mismatch vs reference"

    print("KERNEL_OK")
</pallas_src>

<mosaic_0001>
module attributes {stable_mosaic.version = 11 : i64} {
  func.func @_fused_kernel(%arg0: i32, %arg1: memref<18x16x72xbf16, #tpu.memory_space<vmem>>, %arg2: memref<3x72x576xbf16, #tpu.memory_space<vmem>>, %arg3: memref<1x576xf32, #tpu.memory_space<vmem>>, %arg4: memref<16x576x128xbf16, #tpu.memory_space<vmem>>, %arg5: memref<1x128xf32, #tpu.memory_space<vmem>>, %arg6: memref<16x128xf32, #tpu.memory_space<vmem>>, %arg7: memref<256x576xf32, #tpu.memory_space<vmem>>) attributes {dimension_semantics = [#tpu.dimension_semantics<parallel>], iteration_bounds = array<i64: 2>, scalar_prefetch = 0 : i64, scratch_operands = 1 : i64, tpu.core_type = #tpu.core_type<tc>, window_params = [{transform_indices = @transform_0, window_bounds = array<i64: 18, 16, 72>}, {pipeline_mode = #tpu.pipeline_mode<synchronous>, transform_indices = @transform_1, window_bounds = array<i64: 3, 72, 576>}, {pipeline_mode = #tpu.pipeline_mode<synchronous>, transform_indices = @transform_2, window_bounds = array<i64: 1, 576>}, {pipeline_mode = #tpu.pipeline_mode<synchronous>, transform_indices = @transform_3, window_bounds = array<i64: 16, 576, 128>}, {pipeline_mode = #tpu.pipeline_mode<synchronous>, transform_indices = @transform_4, window_bounds = array<i64: 1, 128>}, {transform_indices = @transform_5, window_bounds = array<i64: 16, 128>}]} {
    %c0 = arith.constant 0 : index
    %c0_0 = arith.constant 0 : index
    %c0_1 = arith.constant 0 : index
    %0 = vector.load %arg1[%c0, %c0_0, %c0_1] : memref<18x16x72xbf16, #tpu.memory_space<vmem>>, vector<16x16x72xbf16>
    %1 = vector.shape_cast %0 : vector<16x16x72xbf16> to vector<256x72xbf16>
    %c0_2 = arith.constant 0 : index
    %c0_3 = arith.constant 0 : index
    %c0_4 = arith.constant 0 : index
    %2 = vector.load %arg2[%c0_2, %c0_3, %c0_4] : memref<3x72x576xbf16, #tpu.memory_space<vmem>>, vector<1x72x576xbf16>
    %3 = vector.shape_cast %2 : vector<1x72x576xbf16> to vector<72x576xbf16>
    %cst = arith.constant dense<0.000000e+00> : vector<256x576xf32>
    %4 = tpu.matmul %1, %3, %cst {dimension_numbers = #tpu.dot_dimension_numbers<[1], [0], [0], [1], [0, 0, 1, 1], [], []>} : vector<256x72xbf16>, vector<72x576xbf16>, vector<256x576xf32> -> vector<256x576xf32>
    %c0_5 = arith.constant 0 : index
    %c0_6 = arith.constant 0 : index
    %5 = vector.load %arg7[%c0_5, %c0_6] : memref<256x576xf32, #tpu.memory_space<vmem>>, vector<256x576xf32>
    tpu.vector_store %arg7[%c0_5, %c0_6], %4 {strides = array<i32>} : memref<256x576xf32, #tpu.memory_space<vmem>>, vector<256x576xf32>,
    %c1 = arith.constant 1 : index
    %c0_7 = arith.constant 0 : index
    %c0_8 = arith.constant 0 : index
    %6 = vector.load %arg1[%c1, %c0_7, %c0_8] : memref<18x16x72xbf16, #tpu.memory_space<vmem>>, vector<16x16x72xbf16>
    %7 = vector.shape_cast %6 : vector<16x16x72xbf16> to vector<256x72xbf16>
    %c1_9 = arith.constant 1 : index
    %c0_10 = arith.constant 0 : index
    %c0_11 = arith.constant 0 : index
    %8 = vector.load %arg2[%c1_9, %c0_10, %c0_11] : memref<3x72x576xbf16, #tpu.memory_space<vmem>>, vector<1x72x576xbf16>
    %9 = vector.shape_cast %8 : vector<1x72x576xbf16> to vector<72x576xbf16>
    %cst_12 = arith.constant dense<0.000000e+00> : vector<256x576xf32>
    %10 = tpu.matmul %7, %9, %cst_12 {dimension_numbers = #tpu.dot_dimension_numbers<[1], [0], [0], [1], [0, 0, 1, 1], [], []>} : vector<256x72xbf16>, vector<72x576xbf16>, vector<256x576xf32> -> vector<256x576xf32>
    %c0_13 = arith.constant 0 : index
    %c0_14 = arith.constant 0 : index
    %11 = vector.load %arg7[%c0_13, %c0_14] : memref<256x576xf32, #tpu.memory_space<vmem>>, vector<256x576xf32>
    %12 = arith.addf %11, %10 : vector<256x576xf32>
    %c0_15 = arith.constant 0 : index
    %c0_16 = arith.constant 0 : index
    %13 = vector.load %arg7[%c0_15, %c0_16] : memref<256x576xf32, #tpu.memory_space<vmem>>, vector<256x576xf32>
    tpu.vector_store %arg7[%c0_15, %c0_16], %12 {strides = array<i32>} : memref<256x576xf32, #tpu.memory_space<vmem>>, vector<256x576xf32>,
    %c2 = arith.constant 2 : index
    %c0_17 = arith.constant 0 : index
    %c0_18 = arith.constant 0 : index
    %14 = vector.load %arg1[%c2, %c0_17, %c0_18] : memref<18x16x72xbf16, #tpu.memory_space<vmem>>, vector<16x16x72xbf16>
    %15 = vector.shape_cast %14 : vector<16x16x72xbf16> to vector<256x72xbf16>
    %c2_19 = arith.constant 2 : index
    %c0_20 = arith.constant 0 : index
    %c0_21 = arith.constant 0 : index
    %16 = vector.load %arg2[%c2_19, %c0_20, %c0_21] : memref<3x72x576xbf16, #tpu.memory_space<vmem>>, vector<1x72x576xbf16>
    %17 = vector.shape_cast %16 : vector<1x72x576xbf16> to vector<72x576xbf16>
    %cst_22 = arith.constant dense<0.000000e+00> : vector<256x576xf32>
    %18 = tpu.matmul %15, %17, %cst_22 {dimension_numbers = #tpu.dot_dimension_numbers<[1], [0], [0], [1], [0, 0, 1, 1], [], []>} : vector<256x72xbf16>, vector<72x576xbf16>, vector<256x576xf32> -> vector<256x576xf32>
    %c0_23 = arith.constant 0 : index
    %c0_24 = arith.constant 0 : index
    %19 = vector.load %arg7[%c0_23, %c0_24] : memref<256x576xf32, #tpu.memory_space<vmem>>, vector<256x576xf32>
    %20 = arith.addf %19, %18 : vector<256x576xf32>
    %c0_25 = arith.constant 0 : index
    %c0_26 = arith.constant 0 : index
    %21 = vector.load %arg7[%c0_25, %c0_26] : memref<256x576xf32, #tpu.memory_space<vmem>>, vector<256x576xf32>
    tpu.vector_store %arg7[%c0_25, %c0_26], %20 {strides = array<i32>} : memref<256x576xf32, #tpu.memory_space<vmem>>, vector<256x576xf32>,
    %cst_27 = arith.constant 0.000000e+00 : f32
    %22 = vector.broadcast %cst_27 : f32 to vector<16x128xf32>
    %c0_28 = arith.constant 0 : index
    %c0_29 = arith.constant 0 : index
    %23 = vector.load %arg7[%c0_28, %c0_29] : memref<256x576xf32, #tpu.memory_space<vmem>>, vector<16x576xf32>
    %c0_30 = arith.constant 0 : index
    %c0_31 = arith.constant 0 : index
    %24 = vector.load %arg3[%c0_30, %c0_31] : memref<1x576xf32, #tpu.memory_space<vmem>>, vector<1x576xf32>
    %25 = vector.broadcast %24 : vector<1x576xf32> to vector<16x576xf32>
    %26 = arith.addf %23, %25 : vector<16x576xf32>
    %27 = arith.truncf %26 : vector<16x576xf32> to vector<16x576xbf16>
    %c0_32 = arith.constant 0 : index
    %c0_33 = arith.constant 0 : index
    %c0_34 = arith.constant 0 : index
    %28 = vector.load %arg4[%c0_32, %c0_33, %c0_34] : memref<16x576x128xbf16, #tpu.memory_space<vmem>>, vector<1x576x128xbf16>
    %29 = vector.shape_cast %28 : vector<1x576x128xbf16> to vector<576x128xbf16>
    %cst_35 = arith.constant dense<0.000000e+00> : vector<16x128xf32>
    %30 = tpu.matmul %27, %29, %cst_35 {dimension_numbers = #tpu.dot_dimension_numbers<[1], [0], [0], [1], [0, 0, 1, 1], [], []>} : vector<16x576xbf16>, vector<576x128xbf16>, vector<16x128xf32> -> vector<16x128xf32>
    %31 = arith.addf %22, %30 : vector<16x128xf32>
    %c16 = arith.constant 16 : index
    %c0_36 = arith.constant 0 : index
    %32 = vector.load %arg7[%c16, %c0_36] : memref<256x576xf32, #tpu.memory_space<vmem>>, vector<16x576xf32>
    %c0_37 = arith.constant 0 : index
    %c0_38 = arith.constant 0 : index
    %33 = vector.load %arg3[%c0_37, %c0_38] : memref<1x576xf32, #tpu.memory_space<vmem>>, vector<1x576xf32>
    %34 = vector.broadcast %33 : vector<1x576xf32> to vector<16x576xf32>
    %35 = arith.addf %32, %34 : vector<16x576xf32>
    %36 = arith.truncf %35 : vector<16x576xf32> to vector<16x576xbf16>
    %c1_39 = arith.constant 1 : index
    %c0_40 = arith.constant 0 : index
    %c0_41 = arith.constant 0 : index
    %37 = vector.load %arg4[%c1_39, %c0_40, %c0_41] : memref<16x576x128xbf16, #tpu.memory_space<vmem>>, vector<1x576x128xbf16>
    %38 = vector.shape_cast %37 : vector<1x576x128xbf16> to vector<576x128xbf16>
    %cst_42 = arith.constant dense<0.000000e+00> : vector<16x128xf32>
    %39 = tpu.matmul %36, %38, %cst_42 {dimension_numbers = #tpu.dot_dimension_numbers<[1], [0], [0], [1], [0, 0, 1, 1], [], []>} : vector<16x576xbf16>, vector<576x128xbf16>, vector<16x128xf32> -> vector<16x128xf32>
    %40 = arith.addf %31, %39 : vector<16x128xf32>
    %c32 = arith.constant 32 : index
    %c0_43 = arith.constant 0 : index
    %41 = vector.load %arg7[%c32, %c0_43] : memref<256x576xf32, #tpu.memory_space<vmem>>, vector<16x576xf32>
    %c0_44 = arith.constant 0 : index
    %c0_45 = arith.constant 0 : index
    %42 = vector.load %arg3[%c0_44, %c0_45] : memref<1x576xf32, #tpu.memory_space<vmem>>, vector<1x576xf32>
    %43 = vector.broadcast %42 : vector<1x576xf32> to vector<16x576xf32>
    %44 = arith.addf %41, %43 : vector<16x576xf32>
    %45 = arith.truncf %44 : vector<16x576xf32> to vector<16x576xbf16>
    %c2_46 = arith.constant 2 : index
    %c0_47 = arith.constant 0 : index
    %c0_48 = arith.constant 0 : index
    %46 = vector.load %arg4[%c2_46, %c0_47, %c0_48] : memref<16x576x128xbf16, #tpu.memory_space<vmem>>, vector<1x576x128xbf16>
    %47 = vector.shape_cast %46 : vector<1x576x128xbf16> to vector<576x128xbf16>
    %cst_49 = arith.constant dense<0.000000e+00> : vector<16x128xf32>
    %48 = tpu.matmul %45, %47, %cst_49 {dimension_numbers = #tpu.dot_dimension_numbers<[1], [0], [0], [1], [0, 0, 1, 1], [], []>} : vector<16x576xbf16>, vector<576x128xbf16>, vector<16x128xf32> -> vector<16x128xf32>
    %49 = arith.addf %40, %48 : vector<16x128xf32>
    %c48 = arith.constant 48 : index
    %c0_50 = arith.constant 0 : index
    %50 = vector.load %arg7[%c48, %c0_50] : memref<256x576xf32, #tpu.memory_space<vmem>>, vector<16x576xf32>
    %c0_51 = arith.constant 0 : index
    %c0_52 = arith.constant 0 : index
    %51 = vector.load %arg3[%c0_51, %c0_52] : memref<1x576xf32, #tpu.memory_space<vmem>>, vector<1x576xf32>
    %52 = vector.broadcast %51 : vector<1x576xf32> to vector<16x576xf32>
    %53 = arith.addf %50, %52 : vector<16x576xf32>
    %54 = arith.truncf %53 : vector<16x576xf32> to vector<16x576xbf16>
    %c3 = arith.constant 3 : index
    %c0_53 = arith.constant 0 : index
    %c0_54 = arith.constant 0 : index
    %55 = vector.load %arg4[%c3, %c0_53, %c0_54] : memref<16x576x128xbf16, #tpu.memory_space<vmem>>, vector<1x576x128xbf16>
    %56 = vector.shape_cast %55 : vector<1x576x128xbf16> to vector<576x128xbf16>
    %cst_55 = arith.constant dense<0.000000e+00> : vector<16x128xf32>
    %57 = tpu.matmul %54, %56, %cst_55 {dimension_numbers = #tpu.dot_dimension_numbers<[1], [0], [0], [1], [0, 0, 1, 1], [], []>} : vector<16x576xbf16>, vector<576x128xbf16>, vector<16x128xf32> -> vector<16x128xf32>
    %58 = arith.addf %49, %57 : vector<16x128xf32>
    %c64 = arith.constant 64 : index
    %c0_56 = arith.constant 0 : index
    %59 = vector.load %arg7[%c64, %c0_56] : memref<256x576xf32, #tpu.memory_space<vmem>>, vector<16x576xf32>
    %c0_57 = arith.constant 0 : index
    %c0_58 = arith.constant 0 : index
    %60 = vector.load %arg3[%c0_57, %c0_58] : memref<1x576xf32, #tpu.memory_space<vmem>>, vector<1x576xf32>
    %61 = vector.broadcast %60 : vector<1x576xf32> to vector<16x576xf32>
    %62 = arith.addf %59, %61 : vector<16x576xf32>
    %63 = arith.truncf %62 : vector<16x576xf32> to vector<16x576xbf16>
    %c4 = arith.constant 4 : index
    %c0_59 = arith.constant 0 : index
    %c0_60 = arith.constant 0 : index
    %64 = vector.load %arg4[%c4, %c0_59, %c0_60] : memref<16x576x128xbf16, #tpu.memory_space<vmem>>, vector<1x576x128xbf16>
    %65 = vector.shape_cast %64 : vector<1x576x128xbf16> to vector<576x128xbf16>
    %cst_61 = arith.constant dense<0.000000e+00> : vector<16x128xf32>
    %66 = tpu.matmul %63, %65, %cst_61 {dimension_numbers = #tpu.dot_dimension_numbers<[1], [0], [0], [1], [0, 0, 1, 1], [], []>} : vector<16x576xbf16>, vector<576x128xbf16>, vector<16x128xf32> -> vector<16x128xf32>
    %67 = arith.addf %58, %66 : vector<16x128xf32>
    %c80 = arith.constant 80 : index
    %c0_62 = arith.constant 0 : index
    %68 = vector.load %arg7[%c80, %c0_62] : memref<256x576xf32, #tpu.memory_space<vmem>>, vector<16x576xf32>
    %c0_63 = arith.constant 0 : index
    %c0_64 = arith.constant 0 : index
    %69 = vector.load %arg3[%c0_63, %c0_64] : memref<1x576xf32, #tpu.memory_space<vmem>>, vector<1x576xf32>
    %70 = vector.broadcast %69 : vector<1x576xf32> to vector<16x576xf32>
    %71 = arith.addf %68, %70 : vector<16x576xf32>
    %72 = arith.truncf %71 : vector<16x576xf32> to vector<16x576xbf16>
    %c5 = arith.constant 5 : index
    %c0_65 = arith.constant 0 : index
    %c0_66 = arith.constant 0 : index
    %73 = vector.load %arg4[%c5, %c0_65, %c0_66] : memref<16x576x128xbf16, #tpu.memory_space<vmem>>, vector<1x576x128xbf16>
    %74 = vector.shape_cast %73 : vector<1x576x128xbf16> to vector<576x128xbf16>
    %cst_67 = arith.constant dense<0.000000e+00> : vector<16x128xf32>
    %75 = tpu.matmul %72, %74, %cst_67 {dimension_numbers = #tpu.dot_dimension_numbers<[1], [0], [0], [1], [0, 0, 1, 1], [], []>} : vector<16x576xbf16>, vector<576x128xbf16>, vector<16x128xf32> -> vector<16x128xf32>
    %76 = arith.addf %67, %75 : vector<16x128xf32>
    %c96 = arith.constant 96 : index
    %c0_68 = arith.constant 0 : index
    %77 = vector.load %arg7[%c96, %c0_68] : memref<256x576xf32, #tpu.memory_space<vmem>>, vector<16x576xf32>
    %c0_69 = arith.constant 0 : index
    %c0_70 = arith.constant 0 : index
    %78 = vector.load %arg3[%c0_69, %c0_70] : memref<1x576xf32, #tpu.memory_space<vmem>>, vector<1x576xf32>
    %79 = vector.broadcast %78 : vector<1x576xf32> to vector<16x576xf32>
    %80 = arith.addf %77, %79 : vector<16x576xf32>
    %81 = arith.truncf %80 : vector<16x576xf32> to vector<16x576xbf16>
    %c6 = arith.constant 6 : index
    %c0_71 = arith.constant 0 : index
    %c0_72 = arith.constant 0 : index
    %82 = vector.load %arg4[%c6, %c0_71, %c0_72] : memref<16x576x128xbf16, #tpu.memory_space<vmem>>, vector<1x576x128xbf16>
    %83 = vector.shape_cast %82 : vector<1x576x128xbf16> to vector<576x128xbf16>
    %cst_73 = arith.constant dense<0.000000e+00> : vector<16x128xf32>
    %84 = tpu.matmul %81, %83, %cst_73 {dimension_numbers = #tpu.dot_dimension_numbers<[1], [0], [0], [1], [0, 0, 1, 1], [], []>} : vector<16x576xbf16>, vector<576x128xbf16>, vector<16x128xf32> -> vector<16x128xf32>
    %85 = arith.addf %76, %84 : vector<16x128xf32>
    %c112 = arith.constant 112 : index
    %c0_74 = arith.constant 0 : index
    %86 = vector.load %arg7[%c112, %c0_74] : memref<256x576xf32, #tpu.memory_space<vmem>>, vector<16x576xf32>
    %c0_75 = arith.constant 0 : index
    %c0_76 = arith.constant 0 : index
    %87 = vector.load %arg3[%c0_75, %c0_76] : memref<1x576xf32, #tpu.memory_space<vmem>>, vector<1x576xf32>
    %88 = vector.broadcast %87 : vector<1x576xf32> to vector<16x576xf32>
    %89 = arith.addf %86, %88 : vector<16x576xf32>
    %90 = arith.truncf %89 : vector<16x576xf32> to vector<16x576xbf16>
    %c7 = arith.constant 7 : index
    %c0_77 = arith.constant 0 : index
    %c0_78 = arith.constant 0 : index
    %91 = vector.load %arg4[%c7, %c0_77, %c0_78] : memref<16x576x128xbf16, #tpu.memory_space<vmem>>, vector<1x576x128xbf16>
    %92 = vector.shape_cast %91 : vector<1x576x128xbf16> to vector<576x128xbf16>
    %cst_79 = arith.constant dense<0.000000e+00> : vector<16x128xf32>
    %93 = tpu.matmul %90, %92, %cst_79 {dimension_numbers = #tpu.dot_dimension_numbers<[1], [0], [0], [1], [0, 0, 1, 1], [], []>} : vector<16x576xbf16>, vector<576x128xbf16>, vector<16x128xf32> -> vector<16x128xf32>
    %94 = arith.addf %85, %93 : vector<16x128xf32>
    %c128 = arith.constant 128 : index
    %c0_80 = arith.constant 0 : index
    %95 = vector.load %arg7[%c128, %c0_80] : memref<256x576xf32, #tpu.memory_space<vmem>>, vector<16x576xf32>
    %c0_81 = arith.constant 0 : index
    %c0_82 = arith.constant 0 : index
    %96 = vector.load %arg3[%c0_81, %c0_82] : memref<1x576xf32, #tpu.memory_space<vmem>>, vector<1x576xf32>
    %97 = vector.broadcast %96 : vector<1x576xf32> to vector<16x576xf32>
    %98 = arith.addf %95, %97 : vector<16x576xf32>
    %99 = arith.truncf %98 : vector<16x576xf32> to vector<16x576xbf16>
    %c8 = arith.constant 8 : index
    %c0_83 = arith.constant 0 : index
    %c0_84 = arith.constant 0 : index
    %100 = vector.load %arg4[%c8, %c0_83, %c0_84] : memref<16x576x128xbf16, #tpu.memory_space<vmem>>, vector<1x576x128xbf16>
    %101 = vector.shape_cast %100 : vector<1x576x128xbf16> to vector<576x128xbf16>
    %cst_85 = arith.constant dense<0.000000e+00> : vector<16x128xf32>
    %102 = tpu.matmul %99, %101, %cst_85 {dimension_numbers = #tpu.dot_dimension_numbers<[1], [0], [0], [1], [0, 0, 1, 1], [], []>} : vector<16x576xbf16>, vector<576x128xbf16>, vector<16x128xf32> -> vector<16x128xf32>
    %103 = arith.addf %94, %102 : vector<16x128xf32>
    %c144 = arith.constant 144 : index
    %c0_86 = arith.constant 0 : index
    %104 = vector.load %arg7[%c144, %c0_86] : memref<256x576xf32, #tpu.memory_space<vmem>>, vector<16x576xf32>
    %c0_87 = arith.constant 0 : index
    %c0_88 = arith.constant 0 : index
    %105 = vector.load %arg3[%c0_87, %c0_88] : memref<1x576xf32, #tpu.memory_space<vmem>>, vector<1x576xf32>
    %106 = vector.broadcast %105 : vector<1x576xf32> to vector<16x576xf32>
    %107 = arith.addf %104, %106 : vector<16x576xf32>
    %108 = arith.truncf %107 : vector<16x576xf32> to vector<16x576xbf16>
    %c9 = arith.constant 9 : index
    %c0_89 = arith.constant 0 : index
    %c0_90 = arith.constant 0 : index
    %109 = vector.load %arg4[%c9, %c0_89, %c0_90] : memref<16x576x128xbf16, #tpu.memory_space<vmem>>, vector<1x576x128xbf16>
    %110 = vector.shape_cast %109 : vector<1x576x128xbf16> to vector<576x128xbf16>
    %cst_91 = arith.constant dense<0.000000e+00> : vector<16x128xf32>
    %111 = tpu.matmul %108, %110, %cst_91 {dimension_numbers = #tpu.dot_dimension_numbers<[1], [0], [0], [1], [0, 0, 1, 1], [], []>} : vector<16x576xbf16>, vector<576x128xbf16>, vector<16x128xf32> -> vector<16x128xf32>
    %112 = arith.addf %103, %111 : vector<16x128xf32>
    %c160 = arith.constant 160 : index
    %c0_92 = arith.constant 0 : index
    %113 = vector.load %arg7[%c160, %c0_92] : memref<256x576xf32, #tpu.memory_space<vmem>>, vector<16x576xf32>
    %c0_93 = arith.constant 0 : index
    %c0_94 = arith.constant 0 : index
    %114 = vector.load %arg3[%c0_93, %c0_94] : memref<1x576xf32, #tpu.memory_space<vmem>>, vector<1x576xf32>
    %115 = vector.broadcast %114 : vector<1x576xf32> to vector<16x576xf32>
    %116 = arith.addf %113, %115 : vector<16x576xf32>
    %117 = arith.truncf %116 : vector<16x576xf32> to vector<16x576xbf16>
    %c10 = arith.constant 10 : index
    %c0_95 = arith.constant 0 : index
    %c0_96 = arith.constant 0 : index
    %118 = vector.load %arg4[%c10, %c0_95, %c0_96] : memref<16x576x128xbf16, #tpu.memory_space<vmem>>, vector<1x576x128xbf16>
    %119 = vector.shape_cast %118 : vector<1x576x128xbf16> to vector<576x128xbf16>
    %cst_97 = arith.constant dense<0.000000e+00> : vector<16x128xf32>
    %120 = tpu.matmul %117, %119, %cst_97 {dimension_numbers = #tpu.dot_dimension_numbers<[1], [0], [0], [1], [0, 0, 1, 1], [], []>} : vector<16x576xbf16>, vector<576x128xbf16>, vector<16x128xf32> -> vector<16x128xf32>
    %121 = arith.addf %112, %120 : vector<16x128xf32>
    %c176 = arith.constant 176 : index
    %c0_98 = arith.constant 0 : index
    %122 = vector.load %arg7[%c176, %c0_98] : memref<256x576xf32, #tpu.memory_space<vmem>>, vector<16x576xf32>
    %c0_99 = arith.constant 0 : index
    %c0_100 = arith.constant 0 : index
    %123 = vector.load %arg3[%c0_99, %c0_100] : memref<1x576xf32, #tpu.memory_space<vmem>>, vector<1x576xf32>
    %124 = vector.broadcast %123 : vector<1x576xf32> to vector<16x576xf32>
    %125 = arith.addf %122, %124 : vector<16x576xf32>
    %126 = arith.truncf %125 : vector<16x576xf32> to vector<16x576xbf16>
    %c11 = arith.constant 11 : index
    %c0_101 = arith.constant 0 : index
    %c0_102 = arith.constant 0 : index
    %127 = vector.load %arg4[%c11, %c0_101, %c0_102] : memref<16x576x128xbf16, #tpu.memory_space<vmem>>, vector<1x576x128xbf16>
    %128 = vector.shape_cast %127 : vector<1x576x128xbf16> to vector<576x128xbf16>
    %cst_103 = arith.constant dense<0.000000e+00> : vector<16x128xf32>
    %129 = tpu.matmul %126, %128, %cst_103 {dimension_numbers = #tpu.dot_dimension_numbers<[1], [0], [0], [1], [0, 0, 1, 1], [], []>} : vector<16x576xbf16>, vector<576x128xbf16>, vector<16x128xf32> -> vector<16x128xf32>
    %130 = arith.addf %121, %129 : vector<16x128xf32>
    %c192 = arith.constant 192 : index
    %c0_104 = arith.constant 0 : index
    %131 = vector.load %arg7[%c192, %c0_104] : memref<256x576xf32, #tpu.memory_space<vmem>>, vector<16x576xf32>
    %c0_105 = arith.constant 0 : index
    %c0_106 = arith.constant 0 : index
    %132 = vector.load %arg3[%c0_105, %c0_106] : memref<1x576xf32, #tpu.memory_space<vmem>>, vector<1x576xf32>
    %133 = vector.broadcast %132 : vector<1x576xf32> to vector<16x576xf32>
    %134 = arith.addf %131, %133 : vector<16x576xf32>
    %135 = arith.truncf %134 : vector<16x576xf32> to vector<16x576xbf16>
    %c12 = arith.constant 12 : index
    %c0_107 = arith.constant 0 : index
    %c0_108 = arith.constant 0 : index
    %136 = vector.load %arg4[%c12, %c0_107, %c0_108] : memref<16x576x128xbf16, #tpu.memory_space<vmem>>, vector<1x576x128xbf16>
    %137 = vector.shape_cast %136 : vector<1x576x128xbf16> to vector<576x128xbf16>
    %cst_109 = arith.constant dense<0.000000e+00> : vector<16x128xf32>
    %138 = tpu.matmul %135, %137, %cst_109 {dimension_numbers = #tpu.dot_dimension_numbers<[1], [0], [0], [1], [0, 0, 1, 1], [], []>} : vector<16x576xbf16>, vector<576x128xbf16>, vector<16x128xf32> -> vector<16x128xf32>
    %139 = arith.addf %130, %138 : vector<16x128xf32>
    %c208 = arith.constant 208 : index
    %c0_110 = arith.constant 0 : index
    %140 = vector.load %arg7[%c208, %c0_110] : memref<256x576xf32, #tpu.memory_space<vmem>>, vector<16x576xf32>
    %c0_111 = arith.constant 0 : index
    %c0_112 = arith.constant 0 : index
    %141 = vector.load %arg3[%c0_111, %c0_112] : memref<1x576xf32, #tpu.memory_space<vmem>>, vector<1x576xf32>
    %142 = vector.broadcast %141 : vector<1x576xf32> to vector<16x576xf32>
    %143 = arith.addf %140, %142 : vector<16x576xf32>
    %144 = arith.truncf %143 : vector<16x576xf32> to vector<16x576xbf16>
    %c13 = arith.constant 13 : index
    %c0_113 = arith.constant 0 : index
    %c0_114 = arith.constant 0 : index
    %145 = vector.load %arg4[%c13, %c0_113, %c0_114] : memref<16x576x128xbf16, #tpu.memory_space<vmem>>, vector<1x576x128xbf16>
    %146 = vector.shape_cast %145 : vector<1x576x128xbf16> to vector<576x128xbf16>
    %cst_115 = arith.constant dense<0.000000e+00> : vector<16x128xf32>
    %147 = tpu.matmul %144, %146, %cst_115 {dimension_numbers = #tpu.dot_dimension_numbers<[1], [0], [0], [1], [0, 0, 1, 1], [], []>} : vector<16x576xbf16>, vector<576x128xbf16>, vector<16x128xf32> -> vector<16x128xf32>
    %148 = arith.addf %139, %147 : vector<16x128xf32>
    %c224 = arith.constant 224 : index
    %c0_116 = arith.constant 0 : index
    %149 = vector.load %arg7[%c224, %c0_116] : memref<256x576xf32, #tpu.memory_space<vmem>>, vector<16x576xf32>
    %c0_117 = arith.constant 0 : index
    %c0_118 = arith.constant 0 : index
    %150 = vector.load %arg3[%c0_117, %c0_118] : memref<1x576xf32, #tpu.memory_space<vmem>>, vector<1x576xf32>
    %151 = vector.broadcast %150 : vector<1x576xf32> to vector<16x576xf32>
    %152 = arith.addf %149, %151 : vector<16x576xf32>
    %153 = arith.truncf %152 : vector<16x576xf32> to vector<16x576xbf16>
    %c14 = arith.constant 14 : index
    %c0_119 = arith.constant 0 : index
    %c0_120 = arith.constant 0 : index
    %154 = vector.load %arg4[%c14, %c0_119, %c0_120] : memref<16x576x128xbf16, #tpu.memory_space<vmem>>, vector<1x576x128xbf16>
    %155 = vector.shape_cast %154 : vector<1x576x128xbf16> to vector<576x128xbf16>
    %cst_121 = arith.constant dense<0.000000e+00> : vector<16x128xf32>
    %156 = tpu.matmul %153, %155, %cst_121 {dimension_numbers = #tpu.dot_dimension_numbers<[1], [0], [0], [1], [0, 0, 1, 1], [], []>} : vector<16x576xbf16>, vector<576x128xbf16>, vector<16x128xf32> -> vector<16x128xf32>
    %157 = arith.addf %148, %156 : vector<16x128xf32>
    %c240 = arith.constant 240 : index
    %c0_122 = arith.constant 0 : index
    %158 = vector.load %arg7[%c240, %c0_122] : memref<256x576xf32, #tpu.memory_space<vmem>>, vector<16x576xf32>
    %c0_123 = arith.constant 0 : index
    %c0_124 = arith.constant 0 : index
    %159 = vector.load %arg3[%c0_123, %c0_124] : memref<1x576xf32, #tpu.memory_space<vmem>>, vector<1x576xf32>
    %160 = vector.broadcast %159 : vector<1x576xf32> to vector<16x576xf32>
    %161 = arith.addf %158, %160 : vector<16x576xf32>
    %162 = arith.truncf %161 : vector<16x576xf32> to vector<16x576xbf16>
    %c15 = arith.constant 15 : index
    %c0_125 = arith.constant 0 : index
    %c0_126 = arith.constant 0 : index
    %163 = vector.load %arg4[%c15, %c0_125, %c0_126] : memref<16x576x128xbf16, #tpu.memory_space<vmem>>, vector<1x576x128xbf16>
    %164 = vector.shape_cast %163 : vector<1x576x128xbf16> to vector<576x128xbf16>
    %cst_127 = arith.constant dense<0.000000e+00> : vector<16x128xf32>
    %165 = tpu.matmul %162, %164, %cst_127 {dimension_numbers = #tpu.dot_dimension_numbers<[1], [0], [0], [1], [0, 0, 1, 1], [], []>} : vector<16x576xbf16>, vector<576x128xbf16>, vector<16x128xf32> -> vector<16x128xf32>
    %166 = arith.addf %157, %165 : vector<16x128xf32>
    %c0_128 = arith.constant 0 : index
    %c0_129 = arith.constant 0 : index
    %167 = vector.load %arg5[%c0_128, %c0_129] : memref<1x128xf32, #tpu.memory_space<vmem>>, vector<1x128xf32>
    %168 = vector.broadcast %167 : vector<1x128xf32> to vector<16x128xf32>
    %169 = arith.addf %166, %168 : vector<16x128xf32>
    %c0_130 = arith.constant 0 : index
    %c0_131 = arith.constant 0 : index
    %170 = vector.load %arg6[%c0_130, %c0_131] : memref<16x128xf32, #tpu.memory_space<vmem>>, vector<16x128xf32>
    tpu.vector_store %arg6[%c0_130, %c0_131], %169 {strides = array<i32>} : memref<16x128xf32, #tpu.memory_space<vmem>>, vector<16x128xf32>,
    return
  }
  func.func @transform_0(%arg0: i32) -> (i32, i32, i32) {
    %c0_i32 = arith.constant 0 : i32
    %c0_i32_0 = arith.constant 0 : i32
    %c0_i32_1 = arith.constant 0 : i32
    return %c0_i32, %arg0, %c0_i32_0 : i32, i32, i32
  }
  func.func @transform_1(%arg0: i32) -> (i32, i32, i32) {
    %c0_i32 = arith.constant 0 : i32
    %c0_i32_0 = arith.constant 0 : i32
    %c0_i32_1 = arith.constant 0 : i32
    %c0_i32_2 = arith.constant 0 : i32
    return %c0_i32, %c0_i32_0, %c0_i32_1 : i32, i32, i32
  }
  func.func @transform_2(%arg0: i32) -> (i32, i32) {
    %c0_i32 = arith.constant 0 : i32
    %c0_i32_0 = arith.constant 0 : i32
    %c0_i32_1 = arith.constant 0 : i32
    return %c0_i32, %c0_i32_0 : i32, i32
  }
  func.func @transform_3(%arg0: i32) -> (i32, i32, i32) {
    %c0_i32 = arith.constant 0 : i32
    %c0_i32_0 = arith.constant 0 : i32
    %c0_i32_1 = arith.constant 0 : i32
    %c0_i32_2 = arith.constant 0 : i32
    return %c0_i32, %c0_i32_0, %c0_i32_1 : i32, i32, i32
  }
  func.func @transform_4(%arg0: i32) -> (i32, i32) {
    %c0_i32 = arith.constant 0 : i32
    %c0_i32_0 = arith.constant 0 : i32
    %c0_i32_1 = arith.constant 0 : i32
    return %c0_i32, %c0_i32_0 : i32, i32
  }
  func.func @transform_5(%arg0: i32) -> (i32, i32) {
    %c0_i32 = arith.constant 0 : i32
    %c0_i32_0 = arith.constant 0 : i32
    return %arg0, %c0_i32 : i32, i32
  }
}

</mosaic_0001>

<bundles_post_ra>
// kernel: cifar_model_forward.1
= control target key start
LH: loop header
LB: loop body
LE: loop exit
PB: predicated region body
PF: predicated region fallthrough
CT: control target
= control target key end

     0   :  { %10 = vsyncpa [#allocation5], 0  ;;  %s15822_s0 = inlined_call_operand.vmem [shape: bf16[18,32,72], index: 0, kind: input, shape index: {}]   ;;  %s15823_s1 = inlined_call_operand.hbm [shape: bf16[3,72,576], index: 1, kind: input, shape index: {}]   ;;  %s15824_s2 = inlined_call_operand.hbm [shape: f32[1,576], index: 2, kind: input, shape index: {}]   ;;  %s15825_s3 = inlined_call_operand.hbm [shape: bf16[16,576,128], index: 3, kind: input, shape index: {}]   ;;  %s15826_s4 = inlined_call_operand.hbm [shape: f32[1,128], index: 4, kind: input, shape index: {}]   ;;  %s15827_s5 = inlined_call_operand.vmem [shape: f32[32,128], index: 5, kind: output, shape index: {}]  }
   0x1   :  { %11 = vsyncpa [#allocation7], 0 }
   0x2   :  { %12 = vsyncpa [#allocation10], 0  ;;  %s14514_s18 = smov 0   ;;  %s14516_s19 = smov 0  }
   0x3   :  { %s14518_s20 = smov 0  }
   0x4 LB: > { %s11400_s21 = sadd.s32 4294967295, %s14471_s20   ;;  %s14531_s22 = sadd.s32 1, %s14471_s20   ;;  %s14471_s20 = sphi %s14518_s20, %s15834_s20   ;;  %s14467_s19 = sphi %s14516_s19, %s15833_s19   ;;  %s14463_s18 = sphi %s14514_s18, %s15832_s18  }
   0x5   : > { %s22_s23 = ssub.s32 %s14471_s20, %s14531_s22  ;;  %s25_s24 = sadd.s32 1, %s14467_s19 }
   0x6   : > { %p23_p0 = scmp.eq.s32.totalorder %s22_s23, 0  ;;  %p32_p1 = scmp.ne.s32.totalorder %s14467_s19, %s14463_s18 }
   0x7   : > { %p33_p2 = scmp.eq.s32.totalorder %s14471_s20, 0  ;;  %p11402_p3 = scmp.ge.s32.totalorder %s14471_s20, 1 }
   0x8   : > { %s14541_s25 = scalar_select %p23_p0, %s14467_s19, %s25_s24  }
   0x9   : > { %p14543_p4 = por %p33_p2, %p32_p1  ;;  %p159_p5 = scmp.lt.s32.totalorder %s14471_s20, 3 }
   0xa   : > { %p14550_p6 = scmp.eq.s32.totalorder %s11400_s21, 0  ;;  %s14473_s29 = smov [#allocation6]  }
   0xb   : > { %p14554_p7 = pnand %p11402_p3, %p159_p5  ;;  %s185_s30 = sshll.u32 %s14473_s29, 4  ;;  %s186_s30 = int_to_ptr.vmem [resolvable:$true] %s185_s30 }
   0xc   : > { %s14474_s6 = smov [#allocation4]   ;;  %s14475_s9 = smov [#allocation8]  }
   0xd   : > { %p13536_p8 = pneg %p14554_p7  ;;  %s171_s7 = sshll.u32 %s14474_s6, 4  ;;  %s14566_s7 = int_to_ptr.vmem [resolvable:$true] %s171_s7 }
   0xe   : > { %s195_s10 = sshll.u32 %s14475_s9, 4  ;;  %s14344_s11 = scalar_lea.vmem %s186_s30, 80  ;;  %s196_s10 = int_to_ptr.vmem [resolvable:$true] %s195_s10 }
   0xf   : > { %p14562_p9 = pnand %p14550_p6, %p13536_p8  ;;  %p14345_p11 = scmp.ne.s32.totalorder %s186_s30, %s14344_s11 }
  0x10   : > { %s14351_s12 = scalar_lea.vmem %s186_s30, 96  ;;  %p14352_p0 = scmp.lt.s32.totalorder %s186_s30, %s186_s30 }
  0x11   : > { %p14335_p10 = pneg %p14562_p9  ;;  %p14353_p1 = scmp.lt.s32.totalorder %s14351_s12, %s14344_s11 }
  0x13   : > { %p14347_p12 = pnand %p14345_p11, %p14335_p10  ;;  %p14354_p2 = por %p14353_p1, %p14352_p0 }
  0x15   : > { %p14348_p13 = pneg %p14347_p12 }
  0x17   : > { %p14355_p3 = pnand %p14354_p2, %p14348_p13 }
  0x19   : > { %14358 = shalt.err (!%p14355_p3)
}
  0x1a   : > { %13542 = dma.hbm_to_vmem [thread:$0]  (!%p14562_p9), %s15824_s2, 80, %s186_s30, [#allocation7]  }
  0x1b   : > { %s14370_s15 = scalar_lea.vmem %s14566_s7, 8640  ;;  %p14378_p12 = scmp.lt.s32.totalorder %s14566_s7, %s14566_s7 }
  0x1c   : > { %p14371_p5 = scmp.ne.s32.totalorder %s14566_s7, %s14370_s15  ;;  %p14379_p13 = scmp.lt.s32.totalorder %s14370_s15, %s14370_s15 }
  0x1e   : > { %p14373_p8 = pnand %p14371_p5, %p14335_p10  ;;  %p14380_p0 = por %p14379_p13, %p14378_p12 }
  0x20   : > { %p14374_p11 = pneg %p14373_p8 }
  0x22   : > { %p14381_p1 = pnand %p14380_p0, %p14374_p11 }
  0x24   : > { %14384 = shalt.err (!%p14381_p1)
}
  0x25   : > { %s14476_s16 = smov 320   ;;  %s14477_s17 = smov 20  }
  0x26   : > { %13539 = dma.hbm_to_vmem [thread:$0]  (!%p14562_p9), %s15823_s1, 8640, %s14566_s7, [#allocation5], %s14476_s16, %s14476_s16, %s14477_s17  }
  0x27   : > { %s14396_s29 = scalar_lea.vmem %s196_s10, 73728  ;;  %p14404_p8 = scmp.lt.s32.totalorder %s196_s10, %s196_s10 }
  0x28   : > { %p14397_p2 = scmp.ne.s32.totalorder %s196_s10, %s14396_s29  ;;  %p14405_p11 = scmp.lt.s32.totalorder %s14396_s29, %s14396_s29 }
  0x2a   : > { %p14399_p3 = pnand %p14397_p2, %p14335_p10  ;;  %p14406_p12 = por %p14405_p11, %p14404_p8 }
  0x2c   : > { %p14400_p5 = pneg %p14399_p3 }
  0x2e   : > { %p14407_p13 = pnand %p14406_p12, %p14400_p5 }
  0x30   : > { %14410 = shalt.err (!%p14407_p13)
}
  0x31   : > { %s14478_s30 = smov 64   ;;  %s14479_s6 = smov 4  }
  0x32   : > { %13545 = dma.hbm_to_vmem [thread:$0]  (!%p14562_p9), %s15825_s3, 73728, %s196_s10, [#allocation7], %s14478_s30, %s14478_s30, %s14479_s6  }
  0x33   : > { %s14480_s7 = smov [#allocation9]  }
  0x34   : > { %s209_s12 = sshll.u32 %s14480_s7, 4  ;;  %s210_s12 = int_to_ptr.vmem [resolvable:$true] %s209_s12 }
  0x35   : > { %s14422_s13 = scalar_lea.vmem %s210_s12, 16  ;;  %s14429_s14 = scalar_lea.vmem %s210_s12, 32 }
  0x36   : > { %p14423_p0 = scmp.ne.s32.totalorder %s210_s12, %s14422_s13  ;;  %p14430_p3 = scmp.lt.s32.totalorder %s210_s12, %s210_s12 }
  0x37   : > { %p14431_p5 = scmp.lt.s32.totalorder %s14429_s14, %s14422_s13 }
  0x38   : > { %p14425_p1 = pnand %p14423_p0, %p14335_p10 }
  0x39   : > { %p14432_p8 = por %p14431_p5, %p14430_p3 }
  0x3a   : > { %p14426_p2 = pneg %p14425_p1 }
  0x3c   : > { %p14433_p11 = pnand %p14432_p8, %p14426_p2 }
  0x3e   : > { %14436 = shalt.err (!%p14433_p11)
}
  0x3f   : > { %13548 = dma.hbm_to_vmem [thread:$0]  (!%p14562_p9), %s15826_s4, 16, %s210_s12, [#allocation10]  }
  0x40   : > { %p11407_p12 = scmp.ge.s32.totalorder %s14471_s20, 2 }
  0x42   : > { %216 = sbr.rel (%p11407_p12) target bundleno = 84 (0x54), region = 32 }
  0x47   : > { %219 = sbr.rel (!%p14543_p4) target bundleno = 84 (0x54), region = 36  ;;  %s221_s10 = sand.u32 (%p14543_p4), 1, %s14467_s19  }
  0x48   : > { %s12349_s17 = sshll.u32 (%p14543_p4), %s14471_s20, 3  ;;  %s13518_s23 = smul.u32 (%p14543_p4), 144, %s221_s10 }
  0x49   : > { %s14615_s30 = scalar_lea.vmem (%p14543_p4), %s15822_s0, %s12349_s17 }
  0x4a   : > { %v243_v0 = vld [vmem:[%s14615_s30] sm:$0xff] (%p14543_p4)   ;;  %v247_v1 = vld [vmem:[%s14615_s30 + $0x10] sm:$0xff] (%p14543_p4)   ;;  %s223_s26 = scalar_lea.vmem (%p14543_p4), [#allocation3], %s13518_s23 }
  0x4b   : > { %v251_v2 = vld [vmem:[%s14615_s30 + $0x20] sm:$0xff] (%p14543_p4)   ;;  %v255_v3 = vld [vmem:[%s14615_s30 + $0x30] sm:$0xff] (%p14543_p4)   ;;  %244 = vst [vmem:[%s223_s26] sm:$0xff] (%p14543_p4), %v243_v0   ;;  %248 = vst [vmem:[%s223_s26 + $0x8] sm:$0xff] (%p14543_p4), %v247_v1  }
  0x4c   : > { %v259_v4 = vld [vmem:[%s14615_s30 + $0x40] sm:$0xff]   ;;  %v263_v5 = vld [vmem:[%s14615_s30 + $0x50] sm:$0xff]   ;;  %252 = vst [vmem:[%s223_s26 + $0x10] sm:$0xff] %v251_v2   ;;  %256 = vst [vmem:[%s223_s26 + $0x18] sm:$0xff] %v255_v3  }
  0x4d   : > { %260 = vst [vmem:[%s223_s26 + $0x20] sm:$0xff] %v259_v4   ;;  %264 = vst [vmem:[%s223_s26 + $0x28] sm:$0xff] %v263_v5   ;;  %v267_v6 = vld [vmem:[%s14615_s30 + $0x60] sm:$0xff]   ;;  %v271_v7 = vld [vmem:[%s14615_s30 + $0x70] sm:$0xff]  }
  0x4e   : > { %v275_v8 = vld [vmem:[%s14615_s30 + $0x80] sm:$0xff]   ;;  %268 = vst [vmem:[%s223_s26 + $0x30] sm:$0xff] %v267_v6   ;;  %272 = vst [vmem:[%s223_s26 + $0x38] sm:$0xff] %v271_v7   ;;  %v279_v9 = vld [vmem:[%s14615_s30 + $0x90] sm:$0xff]  }
  0x4f   : > { %276 = vst [vmem:[%s223_s26 + $0x40] sm:$0xff] %v275_v8   ;;  %v283_v10 = vld [vmem:[%s14615_s30 + $0xa0] sm:$0xff]   ;;  %v287_v11 = vld [vmem:[%s14615_s30 + $0xb0] sm:$0xff]   ;;  %280 = vst [vmem:[%s223_s26 + $0x48] sm:$0xff] %v279_v9  }
  0x50   : > { %284 = vst [vmem:[%s223_s26 + $0x50] sm:$0xff] %v283_v10   ;;  %288 = vst [vmem:[%s223_s26 + $0x58] sm:$0xff] %v287_v11   ;;  %v291_v12 = vld [vmem:[%s14615_s30 + $0xc0] sm:$0xff]   ;;  %v295_v13 = vld [vmem:[%s14615_s30 + $0xd0] sm:$0xff]  }
  0x51   : > { %v299_v14 = vld [vmem:[%s14615_s30 + $0xe0] sm:$0xff]   ;;  %292 = vst [vmem:[%s223_s26 + $0x60] sm:$0xff] %v291_v12   ;;  %296 = vst [vmem:[%s223_s26 + $0x68] sm:$0xff] %v295_v13   ;;  %v303_v15 = vld [vmem:[%s14615_s30 + $0xf0] sm:$0xff]  }
  0x52   : > { %300 = vst [vmem:[%s223_s26 + $0x70] sm:$0xff] %v299_v14   ;;  %v307_v16 = vld [vmem:[%s14615_s30 + $0x100] sm:$0xff]   ;;  %v311_v17 = vld [vmem:[%s14615_s30 + $0x110] sm:$0xff]   ;;  %304 = vst [vmem:[%s223_s26 + $0x78] sm:$0xff] %v303_v15  }
  0x53   : > { %308 = vst [vmem:[%s223_s26 + $0x80] sm:$0xff] %v307_v16   ;;  %312 = vst [vmem:[%s223_s26 + $0x88] sm:$0xff] %v311_v17  }
  0x54 PF: > { %413 = sbr.rel (%p14554_p7) target bundleno = 1572 (0x624), region = 77  ;;  %s416_s8 = sand.u32 (!%p14554_p7), 1, %s14463_s18  }
  0x55   : > { %s13519_s6 = smul.u32 (!%p14554_p7), 144, %s416_s8 }
  0x57   : > { %s14638_s9 = scalar_lea.vmem (!%p14554_p7), [#allocation3], %s13519_s6 }
  0x59   : > { %14450 = dma.done.wait (%p14550_p6), [#allocation5], 8640  }
  0x5a   : > { %14452 = vsyncadd (%p14550_p6), [#allocation5], 4294958656 }
  0x5b   : > { %14454 = dma.done.wait (%p14550_p6), [#allocation7], 73808  }
  0x5c   : > { %14456 = vsyncadd (%p14550_p6), [#allocation7], 4294893488 }
  0x5d   : > { %14458 = dma.done.wait (%p14550_p6), [#allocation10], 16  }
  0x5e   : > { %14460 = vsyncadd (%p14550_p6), [#allocation10], 4294967280  ;;  %v14481_v18 = vmov 0   ;;  %v523_v19 = vld [vmem:[#allocation4 + $0xa0] sm:$0xff]  ;;  %vm772_vm0 = vcmask 1043456   ;;  %v524_v20 = vld [vmem:[#allocation4 + $0xa8] sm:$0xff] }
  0x5f   : > { %820 = vmatprep.mubr.bf16.mxu0 %v14481_v18  ;;  %1013 = vmatprep.mubr.bf16.mxu1 %v14481_v18  ;;  %v11454_v21 = vcombine.high %v523_v19, %v523_v19  ;;  %v11456_v22 = vcombine.high %v524_v20, %v524_v20  ;;  %v11453_v23 = vcombine.low %v523_v19, %v523_v19  ;;  %v13596_v25 = vld [vmem:[#allocation4 + $0x7c] ss:$20 sps:$4 sm:$0xff]   ;;  %v13598_v26 = vld [vmem:[#allocation4 + $0x84] ss:$20 sps:$4 sm:$0xff]   ;;  %v13601_v30 = vld [vmem:[#allocation4 + $0x80] ss:$20 sps:$4 sm:$0xff]  }
  0x60   : > { %v11455_v24 = vcombine.low %v524_v20, %v524_v20  ;;  %v13600_v29 = vld [vmem:[#allocation4 + $0x78] ss:$20 sps:$4 sm:$0xff]   ;;  %v13602_v31 = vld [vmem:[#allocation4 + $0x54] ss:$20 sps:$4 sm:$0xff]   ;;  %v13604_v32 = vld [vmem:[#allocation4 + $0x5c] ss:$20 sps:$4 sm:$0xff]  }
  0x61   : > { %11458 = vmatprep.subr.msk.bf16.mxu0 %vm772_vm0, %v11454_v21  ;;  %11475 = vmatprep.subr.msk.bf16.mxu1 %vm772_vm0, %v11456_v22  ;;  %v774_v27 = vsel %vm772_vm0, %v11453_v23, 0  ;;  %v13606_v33 = vld [vmem:[#allocation4 + $0x50] ss:$20 sps:$4 sm:$0xff]   ;;  %v13607_v34 = vld [vmem:[#allocation4 + $0x58] ss:$20 sps:$4 sm:$0xff]   ;;  %vm723_vm1 = vcmask 588800  }
  0x62   : > { %v780_v28 = vsel %vm772_vm0, %v11455_v24, 0  ;;  %795 = vmatpush1.bf16.msra.mxu0 %v774_v27  ;;  %v13608_v35 = vld [vmem:[#allocation4 + $0x2c] ss:$20 sps:$4 sm:$0xff]   ;;  %v13610_v36 = vld [vmem:[#allocation4 + $0x34] ss:$20 sps:$4 sm:$0xff]   ;;  %vm1339_vm2 = vcmask 523264  }
  0x63   : > { %988 = vmatpush1.bf16.msra.mxu1 %v780_v28  ;;  %796 = vmatprep.subr.bf16.mxu0 %v13596_v25  ;;  %v13612_v37 = vld [vmem:[#allocation4 + $0x28] ss:$20 sps:$4 sm:$0xff]   ;;  %v13613_v38 = vld [vmem:[#allocation4 + $0x30] ss:$20 sps:$4 sm:$0xff]   ;;  %v13616_v40 = vld [vmem:[#allocation4 + $0xc] ss:$20 sps:$4 sm:$0xff]  }
  0x64   : > { %989 = vmatprep.subr.bf16.mxu1 %v13598_v26  ;;  %v13614_v39 = vld [vmem:[#allocation4 + $0x4] ss:$20 sps:$4 sm:$0xff]   ;;  %v13618_v41 = vld [vmem:[#allocation4] ss:$20 sps:$4 sm:$0xff]   ;;  %v13619_v42 = vld [vmem:[#allocation4 + $0x8] ss:$20 sps:$4 sm:$0xff]  }
  0x65   : > { %v13621_v43 = vld [vmem:[#allocation4 + $0xb0] ss:$0 sps:$4 sm:$0xff]   ;;  %v13625_v46 = vld [vmem:[#allocation4 + $0x88] ss:$20 sps:$4 sm:$0xff]   ;;  %v13629_v47 = vld [vmem:[#allocation4 + $0x60] ss:$20 sps:$4 sm:$0xff]  }
  0x66   : > { %797 = vmatpush1.bf16.msra.mxu0 %v13600_v29  ;;  %v14659_v44 = vld [vmem:[%s14638_s9] sm:$0xff]   ;;  %v786_v45 = vsel %vm772_vm0, %v13621_v43, 0  ;;  %v14670_v48 = vld [vmem:[%s14638_s9 + $0x8] sm:$0xff]   ;;  %v14681_v57 = vld [vmem:[%s14638_s9 + $0x10] sm:$0xff]   ;;  %vm14483_vm3 = vmmov 0   ;;  %s11415_s18 = sshll.u32 %s11400_s21, 1 }
  0x67   : > { %990 = vmatpush1.bf16.msra.mxu1 %v13601_v30  ;;  %798 = vmatprep.subr.bf16.mxu0 %v13602_v31  ;;  %v1554_v49 = vld [vmem:[#allocation4 + $0x154] sm:$0xff]  ;;  %v13644_v54 = vld [vmem:[#allocation4 + $0x130] ss:$20 sps:$4 sm:$0xff]   ;;  %v13642_v56 = vld [vmem:[#allocation4 + $0x12c] ss:$20 sps:$4 sm:$0xff]   ;;  %p461_p4 = scmp.lt.s32.totalorder %s11415_s18, 3 }
  0x68   : > { %991 = vmatprep.subr.bf16.mxu1 %v13604_v32  ;;  %v11577_v50 = vcombine.high %v1554_v49, %v1554_v49  ;;  %v11576_v51 = vcombine.low %v1554_v49, %v1554_v49  ;;  %v13633_v52 = vld [vmem:[#allocation4 + $0x38] ss:$20 sps:$4 sm:$0xff]   ;;  %v13639_v55 = vld [vmem:[#allocation4 + $0x10] ss:$20 sps:$4 sm:$0xff]   ;;  %v13647_v58 = vld [vmem:[#allocation4 + $0x108] ss:$20 sps:$4 sm:$0xff]  }
  0x69   : > { %v13645_v59 = vld [vmem:[#allocation4 + $0x104] ss:$20 sps:$4 sm:$0xff]   ;;  %v14683_v60 = vld [vmem:[#allocation4 + $0x15c] sm:$0xff]  ;;  %v13652_v1 = vld [vmem:[#allocation4 + $0xb4] ss:$20 sps:$4 sm:$0xff]   ;;  %s15836_s18 = smov (!%p461_p4, %s11415_s18), 3 }
  0x6a   : > { %799 = vmatpush1.bf16.msra.mxu0 %v13606_v33  ;;  %v1803_v53 = vsel %vm772_vm0, %v11576_v51, 0  ;;  %v13651_v61 = vld [vmem:[#allocation4 + $0xe0] ss:$20 sps:$4 sm:$0xff]   ;;  %v11579_v62 = vcombine.high %v14683_v60, %v14683_v60  ;;  %v14694_v63 = vld [vmem:[%s14638_s9 + $0x18] sm:$0xff]   ;;  %v14713_v4 = vld [vmem:[%s14638_s9 + $0x28] sm:$0xff]   ;;  %v11578_v16 = vcombine.low %v14683_v60, %v14683_v60  ;;  %s11416_s27 = sshll.u32 %s15836_s18, 3 }
  0x6b   : > { %992 = vmatpush1.bf16.msra.mxu1 %v13607_v34  ;;  %800 = vmatprep.subr.bf16.mxu0 %v13608_v35  ;;  %v13649_v0 = vld [vmem:[#allocation4 + $0xdc] ss:$20 sps:$4 sm:$0xff]   ;;  %v13654_v2 = vld [vmem:[#allocation4 + $0xb8] ss:$20 sps:$4 sm:$0xff]   ;;  %v13687_v13 = vld [vmem:[#allocation4 + $0x164] ss:$0 sps:$4 sm:$0xff]   ;;  %s464_s28 = scalar_lea.vmem %s15827_s5, %s11416_s27 }
  0x6c   : > { %993 = vmatprep.subr.bf16.mxu1 %v13610_v36  ;;  %v14704_v3 = vld [vmem:[%s14638_s9 + $0x20] sm:$0xff]   ;;  %v14722_v5 = vld [vmem:[%s14638_s9 + $0x30] sm:$0xff]   ;;  %v14731_v6 = vld [vmem:[%s14638_s9 + $0x38] sm:$0xff]   ;;  %v1809_v19 = vsel %vm772_vm0, %v11578_v16, 0  ;;  %v1815_v20 = vsel %vm772_vm0, %v13687_v13, 0 }
  0x6d   : > { %v14740_v7 = vld [vmem:[%s14638_s9 + $0x40] sm:$0xff]   ;;  %v14749_v8 = vld [vmem:[%s14638_s9 + $0x48] sm:$0xff]   ;;  %v14758_v9 = vld [vmem:[%s14638_s9 + $0x50] sm:$0xff]  }
  0x6e   : > { %801 = vmatpush1.bf16.msra.mxu0 %v13612_v37  ;;  %v14767_v10 = vld [vmem:[%s14638_s9 + $0x58] sm:$0xff]   ;;  %v14776_v11 = vld [vmem:[%s14638_s9 + $0x60] sm:$0xff]   ;;  %v14785_v12 = vld [vmem:[%s14638_s9 + $0x68] sm:$0xff]  }
  0x6f   : > { %994 = vmatpush1.bf16.msra.mxu1 %v13613_v38  ;;  %802 = vmatprep.subr.bf16.mxu0 %v13614_v39  ;;  %v14795_v14 = vld [vmem:[%s14638_s9 + $0x70] sm:$0xff]   ;;  %v14804_v15 = vld [vmem:[%s14638_s9 + $0x78] sm:$0xff]   ;;  %v14816_v17 = vld [vmem:[%s14638_s9 + $0x8] sm:$0xff]  }
  0x70   : > { %995 = vmatprep.subr.bf16.mxu1 %v13616_v40  ;;  %v13661_v21 = vld [vmem:[#allocation4 + $0x138] ss:$20 sps:$4 sm:$0xff]   ;;  %v13690_v22 = vld [vmem:[#allocation4 + $0x13c] ss:$20 sps:$4 sm:$0xff]   ;;  %v13659_v23 = vld [vmem:[#allocation4 + $0x134] ss:$20 sps:$4 sm:$0xff]  }
  0x71   : > { %v13666_v24 = vld [vmem:[#allocation4 + $0x110] ss:$20 sps:$4 sm:$0xff]   ;;  %v13664_v26 = vld [vmem:[#allocation4 + $0x10c] ss:$20 sps:$4 sm:$0xff]   ;;  %v13691_v27 = vld [vmem:[#allocation4 + $0x114] ss:$20 sps:$4 sm:$0xff]  }
  0x72   : > { %803 = vmatpush1.bf16.msra.mxu0 %v13618_v41  ;;  %v14828_v25 = vld [vmem:[%s14638_s9 + $0x10] sm:$0xff]   ;;  %v13670_v28 = vld [vmem:[#allocation4 + $0xe8] ss:$20 sps:$4 sm:$0xff]   ;;  %v14848_v37 = vld [vmem:[%s14638_s9 + $0x20] sm:$0xff]  }
  0x73   : > { %996 = vmatpush1.bf16.msra.mxu1 %v13619_v42  ;;  %13515 = vmatprep.subr.msk.bf16.mxu0 %vm772_vm0, %v13621_v43  ;;  %v13696_v29 = vld [vmem:[#allocation4 + $0xec] ss:$20 sps:$4 sm:$0xff]   ;;  %v13668_v30 = vld [vmem:[#allocation4 + $0xe4] ss:$20 sps:$4 sm:$0xff]   ;;  %v13673_v34 = vld [vmem:[#allocation4 + $0xbc] ss:$20 sps:$4 sm:$0xff]  }
  0x74   : > { %11581 = vmatprep.subr.msk.bf16.mxu1 %vm772_vm0, %v11577_v50  ;;  %v13675_v31 = vld [vmem:[#allocation4 + $0xc0] ss:$20 sps:$4 sm:$0xff]   ;;  %v14838_v32 = vld [vmem:[%s14638_s9 + $0x18] sm:$0xff]   ;;  %v14859_v38 = vld [vmem:[%s14638_s9 + $0x28] sm:$0xff]  }
  0x75   : > { %11459 = vmatmul.mubr.msk.bf16.vlgmr.msra.gmra.mxu0 %vm723_vm1, %v14659_v44  ;;  %v2902_v33 = vld [vmem:[#allocation4 + $0x208] sm:$0xff]  ;;  %v13697_v35 = vld [vmem:[#allocation4 + $0xc4] ss:$20 sps:$4 sm:$0xff]   ;;  %v14878_v40 = vld [vmem:[#allocation4 + $0x210] sm:$0xff] }
  0x76   : > { %11476 = vmatmul.mubr.msk.bf16.vlgmr.msra.gmra.mxu1 %vm723_vm1, %v14659_v44  ;;  %13198 = vmatpush3.bf16.msra.mxu0 %v786_v45  ;;  %v11700_v36 = vcombine.high %v2902_v33, %v2902_v33  ;;  %v14869_v39 = vld [vmem:[%s14638_s9 + $0x30] sm:$0xff]   ;;  %v11702_v41 = vcombine.high %v14878_v40, %v14878_v40  ;;  %v14883_v42 = vld [vmem:[%s14638_s9 + $0x38] sm:$0xff]   ;;  %v14894_v43 = vld [vmem:[%s14638_s9 + $0x40] sm:$0xff]  }
  0x77   : > { %830 = vmatprep.mubr.bf16.mxu0 %v14481_v18  ;;  %1023 = vmatprep.mubr.bf16.mxu1 %v14481_v18  ;;  %v14903_v45 = vld [vmem:[%s14638_s9 + $0x48] sm:$0xff]   ;;  %v14954_v16 = vld [vmem:[%s14638_s9 + $0x60] sm:$0xff]  }
  0x78   : > { %13199 = vmatprep.subr.bf16.mxu0 %v13625_v46  ;;  %1824 = vmatpush1.bf16.msra.mxu1 %v1803_v53  ;;  %v13694_v51 = vld [vmem:[#allocation4 + $0x1bc] ss:$20 sps:$4 sm:$0xff]   ;;  %v13700_v60 = vld [vmem:[#allocation4 + $0x194] ss:$20 sps:$4 sm:$0xff]  }
  0x79   : > { %1825 = vmatprep.subr.bf16.mxu1 %v13644_v54  ;;  %v14917_v54 = vld [vmem:[%s14638_s9 + $0x50] sm:$0xff]  }
  0x7a   : > { %13200 = vmatpush3.bf16.msra.mxu0 %v13625_v46 }
  0x7b   : > { %13201 = vmatprep.subr.bf16.mxu0 %v13629_v47 }
  0x7c   : > { %1826 = vmatpush1.bf16.msra.mxu1 %v13642_v56 }
  0x7d   : > { %11460 = vmatmul.mubr.msk.bf16.gmra.mxu0 %vm723_vm1, %v14670_v48  ;;  %1827 = vmatprep.subr.bf16.mxu1 %v13647_v58 }
  0x7e   : > { %11477 = vmatmul.mubr.msk.bf16.gmra.mxu1 %vm723_vm1, %v14670_v48  ;;  %840 = vmatprep.mubr.bf16.mxu0 %v14481_v18 }
  0x7f   : > { %1033 = vmatprep.mubr.bf16.mxu1 %v14481_v18  ;;  %13202 = vmatpush3.bf16.msra.mxu0 %v13629_v47  ;;  %v13685_v47 = vld [vmem:[#allocation4 + $0x1e4] ss:$20 sps:$4 sm:$0xff]  }
  0x80   : > { %13203 = vmatprep.subr.bf16.mxu0 %v13633_v52  ;;  %1828 = vmatpush1.bf16.msra.mxu1 %v13645_v59 }
  0x81   : > { %1829 = vmatprep.subr.bf16.mxu1 %v13651_v61 }
  0x83   : > { %13204 = vmatpush3.bf16.msra.mxu0 %v13633_v52 }
  0x84   : > { %13205 = vmatprep.subr.bf16.mxu0 %v13639_v55  ;;  %1830 = vmatpush1.bf16.msra.mxu1 %v13649_v0 }
  0x85   : > { %11461 = vmatmul.mubr.msk.bf16.gmra.mxu0 %vm723_vm1, %v14681_v57  ;;  %1831 = vmatprep.subr.bf16.mxu1 %v13654_v2  ;;  %v13703_v2 = vld [vmem:[#allocation4 + $0x16c] ss:$20 sps:$4 sm:$0xff]  }
  0x86   : > { %11478 = vmatmul.mubr.msk.bf16.gmra.mxu1 %vm723_vm1, %v14681_v57  ;;  %850 = vmatprep.mubr.bf16.mxu0 %v14481_v18 }
  0x87   : > { %1043 = vmatprep.mubr.bf16.mxu1 %v14481_v18  ;;  %13206 = vmatpush3.bf16.msra.mxu0 %v13639_v55 }
  0x88   : > { %11598 = vmatprep.subr.msk.bf16.mxu0 %vm772_vm0, %v11579_v62  ;;  %1832 = vmatpush1.bf16.msra.mxu1 %v13652_v1 }
  0x89   : > { %13516 = vmatprep.subr.msk.bf16.mxu1 %vm772_vm0, %v13687_v13 }
  0x8d   : > { %11462 = vmatmul.mubr.msk.bf16.gmra.mxu0 %vm723_vm1, %v14694_v63 }
  0x8e   : > { %11479 = vmatmul.mubr.msk.bf16.gmra.mxu1 %vm723_vm1, %v14694_v63  ;;  %860 = vmatprep.mubr.bf16.mxu0 %v14481_v18 }
  0x8f   : > { %1053 = vmatprep.mubr.bf16.mxu1 %v14481_v18 }
  0x95   : > { %11463 = vmatmul.mubr.msk.bf16.gmra.mxu0 %vm723_vm1, %v14704_v3 }
  0x96   : > { %11480 = vmatmul.mubr.msk.bf16.gmra.mxu1 %vm723_vm1, %v14704_v3  ;;  %870 = vmatprep.mubr.bf16.mxu0 %v14481_v18 }
  0x97   : > { %1063 = vmatprep.mubr.bf16.mxu1 %v14481_v18 }
  0x9d   : > { %11464 = vmatmul.mubr.msk.bf16.gmra.mxu0 %vm723_vm1, %v14713_v4 }
  0x9e   : > { %11481 = vmatmul.mubr.msk.bf16.gmra.mxu1 %vm723_vm1, %v14713_v4  ;;  %880 = vmatprep.mubr.bf16.mxu0 %v14481_v18 }
  0x9f   : > { %1073 = vmatprep.mubr.bf16.mxu1 %v14481_v18 }
  0xa5   : > { %11465 = vmatmul.mubr.msk.bf16.gmra.mxu0 %vm723_vm1, %v14722_v5 }
  0xa6   : > { %11482 = vmatmul.mubr.msk.bf16.gmra.mxu1 %vm723_vm1, %v14722_v5  ;;  %890 = vmatprep.mubr.bf16.mxu0 %v14481_v18 }
  0xa7   : > { %1083 = vmatprep.mubr.bf16.mxu1 %v14481_v18 }
  0xad   : > { %11466 = vmatmul.mubr.msk.bf16.gmra.mxu0 %vm723_vm1, %v14731_v6 }
  0xae   : > { %11483 = vmatmul.mubr.msk.bf16.gmra.mxu1 %vm723_vm1, %v14731_v6  ;;  %900 = vmatprep.mubr.bf16.mxu0 %v14481_v18 }
  0xaf   : > { %1093 = vmatprep.mubr.bf16.mxu1 %v14481_v18 }
  0xb5   : > { %11467 = vmatmul.mubr.msk.bf16.gmra.mxu0 %vm723_vm1, %v14740_v7 }
  0xb6   : > { %11484 = vmatmul.mubr.msk.bf16.gmra.mxu1 %vm723_vm1, %v14740_v7  ;;  %910 = vmatprep.mubr.bf16.mxu0 %v14481_v18 }
  0xb7   : > { %1103 = vmatprep.mubr.bf16.mxu1 %v14481_v18 }
  0xbd   : > { %11468 = vmatmul.mubr.msk.bf16.gmra.mxu0 %vm723_vm1, %v14749_v8 }
  0xbe   : > { %11485 = vmatmul.mubr.msk.bf16.gmra.mxu1 %vm723_vm1, %v14749_v8  ;;  %920 = vmatprep.mubr.bf16.mxu0 %v14481_v18 }
  0xbf   : > { %1113 = vmatprep.mubr.bf16.mxu1 %v14481_v18 }
  0xc5   : > { %11469 = vmatmul.mubr.msk.bf16.gmra.mxu0 %vm723_vm1, %v14758_v9 }
  0xc6   : > { %11486 = vmatmul.mubr.msk.bf16.gmra.mxu1 %vm723_vm1, %v14758_v9  ;;  %930 = vmatprep.mubr.bf16.mxu0 %v14481_v18 }
  0xc7   : > { %1123 = vmatprep.mubr.bf16.mxu1 %v14481_v18 }
  0xcd   : > { %11470 = vmatmul.mubr.msk.bf16.gmra.mxu0 %vm723_vm1, %v14767_v10 }
  0xce   : > { %11487 = vmatmul.mubr.msk.bf16.gmra.mxu1 %vm723_vm1, %v14767_v10  ;;  %940 = vmatprep.mubr.bf16.mxu0 %v14481_v18 }
  0xcf   : > { %1133 = vmatprep.mubr.bf16.mxu1 %v14481_v18 }
  0xd5   : > { %11471 = vmatmul.mubr.msk.bf16.gmra.mxu0 %vm723_vm1, %v14776_v11 }
  0xd6   : > { %11488 = vmatmul.mubr.msk.bf16.gmra.mxu1 %vm723_vm1, %v14776_v11  ;;  %950 = vmatprep.mubr.bf16.mxu0 %v14481_v18 }
  0xd7   : > { %1143 = vmatprep.mubr.bf16.mxu1 %v14481_v18 }
  0xdd   : > { %11472 = vmatmul.mubr.msk.bf16.gmra.mxu0 %vm723_vm1, %v14785_v12 }
  0xde   : > { %11489 = vmatmul.mubr.msk.bf16.gmra.mxu1 %vm723_vm1, %v14785_v12  ;;  %960 = vmatprep.mubr.bf16.mxu0 %v14481_v18 }
  0xdf   : > { %1153 = vmatprep.mubr.bf16.mxu1 %v14481_v18 }
  0xe5   : > { %11473 = vmatmul.mubr.msk.bf16.gmra.mxu0 %vm723_vm1, %v14795_v14 }
  0xe6   : > { %11490 = vmatmul.mubr.msk.bf16.gmra.mxu1 %vm723_vm1, %v14795_v14  ;;  %970 = vmatprep.mubr.bf16.mxu0 %v14481_v18 }
  0xe7   : > { %1163 = vmatprep.mubr.bf16.mxu1 %v14481_v18 }
  0xed   : > { %11474 = vmatmul.mubr.msk.bf16.gmra.mxu0 %vm723_vm1, %v14804_v15 }
  0xee   : > { %11491 = vmatmul.mubr.msk.bf16.gmra.mxu1 %vm723_vm1, %v14804_v15  ;;  %13207 = vmatprep.mubr.msk.bf16.mxu0 %vm723_vm1, %v14659_v44  ;;  %v11699_v44 = vcombine.low %v2902_v33, %v2902_v33 }
  0xef   : > { %1849 = vmatprep.mubr.bf16.mxu1 %v14481_v18 }
  0xf0   : > { %v3151_v46 = vsel %vm772_vm0, %v11699_v44, 0 }
  0xf5   : > { %13208 = vmatmul.mubr.msk.bf16.vlgmr.msra.gmra.mxu0 %vm723_vm1, %v14670_v48  ;;  %v13683_v48 = vld [vmem:[#allocation4 + $0x1e0] ss:$20 sps:$4 sm:$0xff]  }
  0xf6   : > { %11582 = vmatmul.mubr.msk.bf16.vlgmr.msra.gmra.mxu1 %vm723_vm1, %v14816_v17  ;;  %2017 = vmatpush1.bf16.msra.mxu0 %v1809_v19 }
  0xf7   : > { %13211 = vmatprep.mubr.msk.bf16.mxu0 %vm723_vm1, %v14681_v57  ;;  %1859 = vmatprep.mubr.bf16.mxu1 %v14481_v18  ;;  %v13692_v57 = vld [vmem:[#allocation4 + $0x1b8] ss:$20 sps:$4 sm:$0xff]  }
  0xf8   : > { %2018 = vmatprep.subr.bf16.mxu0 %v13661_v21  ;;  %13240 = vmatpush3.bf16.msra.mxu1 %v1815_v20 }
  0xf9   : > { %13241 = vmatprep.subr.bf16.mxu1 %v13690_v22 }
  0xfa   : > { %2019 = vmatpush1.bf16.msra.mxu0 %v13659_v23 }
  0xfb   : > { %2020 = vmatprep.subr.bf16.mxu0 %v13666_v24 }
  0xfc   : > { %13242 = vmatpush3.bf16.msra.mxu1 %v13690_v22 }
  0xfd   : > { %13212 = vmatmul.mubr.msk.bf16.gmra.mxu0 %vm723_vm1, %v14694_v63  ;;  %13243 = vmatprep.subr.bf16.mxu1 %v13691_v27  ;;  %v13698_v63 = vld [vmem:[#allocation4 + $0x190] ss:$20 sps:$4 sm:$0xff]  }
  0xfe   : > { %11583 = vmatmul.mubr.msk.bf16.gmra.mxu1 %vm723_vm1, %v14828_v25  ;;  %13215 = vmatprep.mubr.msk.bf16.mxu0 %vm723_vm1, %v14704_v3 }
  0xff   : > { %1869 = vmatprep.mubr.bf16.mxu1 %v14481_v18  ;;  %2021 = vmatpush1.bf16.msra.mxu0 %v13664_v26  ;;  %v14971_v26 = vld [vmem:[%s14638_s9 + $0x68] sm:$0xff]  }
 0x100   : > { %2022 = vmatprep.subr.bf16.mxu0 %v13670_v28  ;;  %13244 = vmatpush3.bf16.msra.mxu1 %v13691_v27 }
 0x101   : > { %13245 = vmatprep.subr.bf16.mxu1 %v13696_v29 }
 0x103   : > { %2023 = vmatpush1.bf16.msra.mxu0 %v13668_v30 }
 0x104   : > { %2024 = vmatprep.subr.bf16.mxu0 %v13675_v31  ;;  %13246 = vmatpush3.bf16.msra.mxu1 %v13696_v29 }
 0x105   : > { %13216 = vmatmul.mubr.msk.bf16.gmra.mxu0 %vm723_vm1, %v14713_v4  ;;  %13247 = vmatprep.subr.bf16.mxu1 %v13697_v35 }
 0x106   : > { %11584 = vmatmul.mubr.msk.bf16.gmra.mxu1 %vm723_vm1, %v14838_v32  ;;  %13219 = vmatprep.mubr.msk.bf16.mxu0 %vm723_vm1, %v14722_v5  ;;  %v14936_v5 = vld [vmem:[%s14638_s9 + $0x58] sm:$0xff]  }
 0x107   : > { %1879 = vmatprep.mubr.bf16.mxu1 %v14481_v18  ;;  %2025 = vmatpush1.bf16.msra.mxu0 %v13673_v34 }
 0x108   : > { %11704 = vmatprep.subr.msk.bf16.mxu0 %vm772_vm0, %v11700_v36  ;;  %13248 = vmatpush3.bf16.msra.mxu1 %v13697_v35  ;;  %v14988_v35 = vld [vmem:[%s14638_s9 + $0x70] sm:$0xff]  }
 0x109   : > { %11721 = vmatprep.subr.msk.bf16.mxu1 %vm772_vm0, %v11702_v41 }
 0x10d   : > { %13220 = vmatmul.mubr.msk.bf16.gmra.mxu0 %vm723_vm1, %v14731_v6 }
 0x10e   : > { %11585 = vmatmul.mubr.msk.bf16.gmra.mxu1 %vm723_vm1, %v14848_v37  ;;  %13223 = vmatprep.mubr.msk.bf16.mxu0 %vm723_vm1, %v14740_v7 }
 0x10f   : > { %1889 = vmatprep.mubr.bf16.mxu1 %v14481_v18 }
 0x115   : > { %13224 = vmatmul.mubr.msk.bf16.gmra.mxu0 %vm723_vm1, %v14749_v8  ;;  %v13701_v8 = vld [vmem:[#allocation4 + $0x168] ss:$20 sps:$4 sm:$0xff]  }
 0x116   : > { %11586 = vmatmul.mubr.msk.bf16.gmra.mxu1 %vm723_vm1, %v14859_v38  ;;  %13227 = vmatprep.mubr.msk.bf16.mxu0 %vm723_vm1, %v14758_v9  ;;  %v13719_v9 = vld [vmem:[#allocation4 + $0x218] ss:$0 sps:$4 sm:$0xff]  }
 0x117   : > { %1899 = vmatprep.mubr.bf16.mxu1 %v14481_v18 }
 0x11d   : > { %13228 = vmatmul.mubr.msk.bf16.gmra.mxu0 %vm723_vm1, %v14767_v10 }
 0x11e   : > { %11587 = vmatmul.mubr.msk.bf16.gmra.mxu1 %vm723_vm1, %v14869_v39  ;;  %13231 = vmatprep.mubr.msk.bf16.mxu0 %vm723_vm1, %v14776_v11 }
 0x11f   : > { %1909 = vmatprep.mubr.bf16.mxu1 %v14481_v18 }
 0x125   : > { %13232 = vmatmul.mubr.msk.bf16.gmra.mxu0 %vm723_vm1, %v14785_v12 }
 0x126   : > { %11588 = vmatmul.mubr.msk.bf16.gmra.mxu1 %vm723_vm1, %v14883_v42  ;;  %13235 = vmatprep.mubr.msk.bf16.mxu0 %vm723_vm1, %v14795_v14 }
 0x127   : > { %1919 = vmatprep.mubr.bf16.mxu1 %v14481_v18 }
 0x12d   : > { %13236 = vmatmul.mubr.msk.bf16.gmra.mxu0 %vm723_vm1, %v14804_v15 }
 0x12e   : > { %11589 = vmatmul.mubr.msk.bf16.gmra.mxu1 %vm723_vm1, %v14894_v43  ;;  %2042 = vmatprep.mubr.bf16.mxu0 %v14481_v18 }
 0x12f   : > { %1929 = vmatprep.mubr.bf16.mxu1 %v14481_v18 }
 0x135   : > { %v14906_v49 = vpop.f32.mrf.mxu0  ;;  %11599 = vmatmul.mubr.msk.bf16.vlgmr.msra.gmra.mxu0 %vm723_vm1, %v14816_v17 }
 0x136   : > { %v1015_v50 = vpop.f32.mrf.mxu1  ;;  %11590 = vmatmul.mubr.msk.bf16.gmra.mxu1 %vm723_vm1, %v14903_v45  ;;  %3172 = vmatpush1.bf16.msra.mxu0 %v3151_v46 }
 0x137   : > { %1337 = vst [vmem:[#allocation2 + $0x10] sm:$0xff] %v1015_v50  ;;  %1939 = vmatprep.mubr.bf16.mxu1 %v14481_v18  ;;  %v14913_v52 = vpop.f32.mrf.mxu0  ;;  %2052 = vmatprep.mubr.bf16.mxu0 %v14481_v18 }
 0x138   : > { %v1017_v53 = vpop.f32.mrf.mxu1  ;;  %3173 = vmatprep.subr.bf16.mxu0 %v13685_v47 }
 0x139   : > { %1338 = vst [vmem:[#allocation2 + $0x18] sm:$0xff] %v1017_v53  ;;  %v14919_v55 = vpop.f32.mrf.mxu0 }
 0x13a   : > { %v1019_v56 = vpop.f32.mrf.mxu1  ;;  %3174 = vmatpush1.bf16.msra.mxu0 %v13683_v48 }
 0x13b   : > { %1343 = vst [vmem:[#allocation2 + $0x38] sm:$0xff] %v1019_v56  ;;  %v14921_v58 = vpop.f32.mrf.mxu0  ;;  %3175 = vmatprep.subr.bf16.mxu0 %v13694_v51  ;;  %v15005_v51 = vld [vmem:[%s14638_s9 + $0x78] sm:$0xff]  }
 0x13c   : > { %v1021_v59 = vpop.f32.mrf.mxu1 }
 0x13d   : > { %1344 = vst [vmem:[#allocation2 + $0x40] sm:$0xff] %v1021_v59  ;;  %v14923_v61 = vpop.f32.mrf.mxu0  ;;  %11600 = vmatmul.mubr.msk.bf16.gmra.mxu0 %vm723_vm1, %v14828_v25 }
 0x13e   : > { %v1025_v62 = vpop.f32.mrf.mxu1  ;;  %11591 = vmatmul.mubr.msk.bf16.gmra.mxu1 %vm723_vm1, %v14917_v54  ;;  %2062 = vmatprep.mubr.bf16.mxu0 %v14481_v18 }
 0x13f   : > { %1348 = vst [vmem:[#allocation2 + $0x60] sm:$0xff] %v1025_v62  ;;  %1949 = vmatprep.mubr.bf16.mxu1 %v14481_v18  ;;  %v14931_v0 = vpop.f32.mrf.mxu0  ;;  %3176 = vmatpush1.bf16.msra.mxu0 %v13692_v57 }
 0x140   : > { %v1027_v1 = vpop.f32.mrf.mxu1  ;;  %3177 = vmatprep.subr.bf16.mxu0 %v13700_v60 }
 0x141   : > { %1349 = vst [vmem:[#allocation2 + $0x68] sm:$0xff] %v1027_v1  ;;  %v14933_v3 = vpop.f32.mrf.mxu0 }
 0x142   : > { %v1029_v4 = vpop.f32.mrf.mxu1 }
 0x143   : > { %1353 = vst [vmem:[#allocation2 + $0x88] sm:$0xff] %v1029_v4  ;;  %v14938_v6 = vpop.f32.mrf.mxu0  ;;  %3178 = vmatpush1.bf16.msra.mxu0 %v13698_v63 }
 0x144   : > { %v1031_v7 = vpop.f32.mrf.mxu1  ;;  %3179 = vmatprep.subr.bf16.mxu0 %v13703_v2  ;;  %v15022_v2 = vld [vmem:[%s14638_s9 + $0x80] sm:$0xff]  }
 0x145   : > { %1354 = vst [vmem:[#allocation2 + $0x90] sm:$0xff] %v1031_v7  ;;  %v14940_v10 = vpop.f32.mrf.mxu0  ;;  %11601 = vmatmul.mubr.msk.bf16.gmra.mxu0 %vm723_vm1, %v14838_v32 }
 0x146   : > { %v1035_v11 = vpop.f32.mrf.mxu1  ;;  %11592 = vmatmul.mubr.msk.bf16.gmra.mxu1 %vm723_vm1, %v14936_v5  ;;  %2072 = vmatprep.mubr.bf16.mxu0 %v14481_v18 }
 0x147   : > { %1358 = vst [vmem:[#allocation2 + $0xb0] sm:$0xff] %v1035_v11  ;;  %1959 = vmatprep.mubr.bf16.mxu1 %v14481_v18  ;;  %v14948_v12 = vpop.f32.mrf.mxu0  ;;  %3180 = vmatpush1.bf16.msra.mxu0 %v13701_v8  ;;  %v14315_v11 = vld [vmem:[%s14638_s9 + $0x8] sm:$0xff]  }
 0x148   : > { %v1037_v13 = vpop.f32.mrf.mxu1  ;;  %13517 = vmatprep.subr.msk.bf16.mxu0 %vm772_vm0, %v13719_v9 }
 0x149   : > { %1359 = vst [vmem:[#allocation2 + $0xb8] sm:$0xff] %v1037_v13  ;;  %v14951_v14 = vpop.f32.mrf.mxu0 }
 0x14a   : > { %v1039_v15 = vpop.f32.mrf.mxu1 }
 0x14b   : > { %1363 = vst [vmem:[#allocation2 + $0xd8] sm:$0xff] %v1039_v15  ;;  %v14956_v17 = vpop.f32.mrf.mxu0 }
 0x14c   : > { %v1041_v19 = vpop.f32.mrf.mxu1 }
 0x14d   : > { %1364 = vst [vmem:[#allocation2 + $0xe0] sm:$0xff] %v1041_v19  ;;  %v14958_v20 = vpop.f32.mrf.mxu0  ;;  %11602 = vmatmul.mubr.msk.bf16.gmra.mxu0 %vm723_vm1, %v14848_v37  ;;  %v11701_v19 = vcombine.low %v14878_v40, %v14878_v40  ;;  %v14316_v40 = vld [vmem:[%s14638_s9 + $0x10] sm:$0xff]  }
 0x14e   : > { %v1045_v21 = vpop.f32.mrf.mxu1  ;;  %11593 = vmatmul.mubr.msk.bf16.gmra.mxu1 %vm723_vm1, %v14954_v16  ;;  %2082 = vmatprep.mubr.bf16.mxu0 %v14481_v18 }
 0x14f   : > { %1368 = vst [vmem:[#allocation2 + $0x100] sm:$0xff] %v1045_v21  ;;  %1969 = vmatprep.mubr.bf16.mxu1 %v14481_v18  ;;  %v14966_v22 = vpop.f32.mrf.mxu0 }
 0x150   : > { %v1047_v23 = vpop.f32.mrf.mxu1 }
 0x151   : > { %1369 = vst [vmem:[#allocation2 + $0x108] sm:$0xff] %v1047_v23  ;;  %v14968_v24 = vpop.f32.mrf.mxu0 }
 0x152   : > { %v1049_v25 = vpop.f32.mrf.mxu1 }
 0x153   : > { %1373 = vst [vmem:[#allocation2 + $0x128] sm:$0xff] %v1049_v25  ;;  %v14973_v27 = vpop.f32.mrf.mxu0 }
 0x154   : > { %v1051_v28 = vpop.f32.mrf.mxu1 }
 0x155   : > { %1374 = vst [vmem:[#allocation2 + $0x130] sm:$0xff] %v1051_v28  ;;  %v14975_v29 = vpop.f32.mrf.mxu0  ;;  %11603 = vmatmul.mubr.msk.bf16.gmra.mxu0 %vm723_vm1, %v14859_v38 }
 0x156   : > { %v1055_v30 = vpop.f32.mrf.mxu1  ;;  %11594 = vmatmul.mubr.msk.bf16.gmra.mxu1 %vm723_vm1, %v14971_v26  ;;  %2092 = vmatprep.mubr.bf16.mxu0 %v14481_v18 }
 0x157   : > { %1378 = vst [vmem:[#allocation2 + $0x150] sm:$0xff] %v1055_v30  ;;  %1979 = vmatprep.mubr.bf16.mxu1 %v14481_v18  ;;  %v14983_v31 = vpop.f32.mrf.mxu0  ;;  %v3157_v30 = vsel %vm772_vm0, %v11701_v19, 0 }
 0x158   : > { %v1057_v32 = vpop.f32.mrf.mxu1 }
 0x159   : > { %1379 = vst [vmem:[#allocation2 + $0x158] sm:$0xff] %v1057_v32  ;;  %v14985_v33 = vpop.f32.mrf.mxu0  ;;  %v13708_v32 = vld [vmem:[#allocation4 + $0x1ec] ss:$20 sps:$4 sm:$0xff]  }
 0x15a   : > { %v1059_v34 = vpop.f32.mrf.mxu1 }
 0x15b   : > { %1383 = vst [vmem:[#allocation2 + $0x178] sm:$0xff] %v1059_v34  ;;  %v14990_v36 = vpop.f32.mrf.mxu0 }
 0x15c   : > { %v1061_v37 = vpop.f32.mrf.mxu1 }
 0x15d   : > { %1384 = vst [vmem:[#allocation2 + $0x180] sm:$0xff] %v1061_v37  ;;  %v14992_v41 = vpop.f32.mrf.mxu0  ;;  %11604 = vmatmul.mubr.msk.bf16.gmra.mxu0 %vm723_vm1, %v14869_v39 }
 0x15e   : > { %v1065_v44 = vpop.f32.mrf.mxu1  ;;  %11595 = vmatmul.mubr.msk.bf16.gmra.mxu1 %vm723_vm1, %v14988_v35  ;;  %2102 = vmatprep.mubr.bf16.mxu0 %v14481_v18 }
 0x15f   : > { %1388 = vst [vmem:[#allocation2 + $0x1a0] sm:$0xff] %v1065_v44  ;;  %1989 = vmatprep.mubr.bf16.mxu1 %v14481_v18  ;;  %v15000_v46 = vpop.f32.mrf.mxu0  ;;  %v13706_v44 = vld [vmem:[#allocation4 + $0x1e8] ss:$20 sps:$4 sm:$0xff]  }
 0x160   : > { %v1067_v47 = vpop.f32.mrf.mxu1 }
 0x161   : > { %1389 = vst [vmem:[#allocation2 + $0x1a8] sm:$0xff] %v1067_v47  ;;  %v15002_v48 = vpop.f32.mrf.mxu0  ;;  %v14317_v47 = vld [vmem:[%s14638_s9 + $0x18] sm:$0xff]  }
 0x162   : > { %v1069_v50 = vpop.f32.mrf.mxu1 }
 0x163   : > { %1393 = vst [vmem:[#allocation2 + $0x1c8] sm:$0xff] %v1069_v50  ;;  %v15007_v53 = vpop.f32.mrf.mxu0 }
 0x164   : > { %v1071_v56 = vpop.f32.mrf.mxu1 }
 0x165   : > { %1394 = vst [vmem:[#allocation2 + $0x1d0] sm:$0xff] %v1071_v56  ;;  %v15009_v57 = vpop.f32.mrf.mxu0  ;;  %11605 = vmatmul.mubr.msk.bf16.gmra.mxu0 %vm723_vm1, %v14883_v42 }
 0x166   : > { %v1075_v59 = vpop.f32.mrf.mxu1  ;;  %11596 = vmatmul.mubr.msk.bf16.gmra.mxu1 %vm723_vm1, %v15005_v51  ;;  %2112 = vmatprep.mubr.bf16.mxu0 %v14481_v18 }
 0x167   : > { %1398 = vst [vmem:[#allocation2 + $0x1f0] sm:$0xff] %v1075_v59  ;;  %1999 = vmatprep.mubr.bf16.mxu1 %v14481_v18  ;;  %v15017_v60 = vpop.f32.mrf.mxu0  ;;  %v13711_v59 = vld [vmem:[#allocation4 + $0x1c4] ss:$20 sps:$4 sm:$0xff]  }
 0x168   : > { %v1077_v62 = vpop.f32.mrf.mxu1 }
 0x169   : > { %1399 = vst [vmem:[#allocation2 + $0x1f8] sm:$0xff] %v1077_v62  ;;  %v15019_v63 = vpop.f32.mrf.mxu0 }
 0x16a   : > { %v1079_v1 = vpop.f32.mrf.mxu1 }
 0x16b   : > { %1403 = vst [vmem:[#allocation2 + $0x218] sm:$0xff] %v1079_v1  ;;  %v15024_v4 = vpop.f32.mrf.mxu0 }
 0x16c   : > { %v1081_v7 = vpop.f32.mrf.mxu1 }
 0x16d   : > { %1404 = vst [vmem:[#allocation2 + $0x220] sm:$0xff] %v1081_v7  ;;  %v15026_v8 = vpop.f32.mrf.mxu0  ;;  %11606 = vmatmul.mubr.msk.bf16.gmra.mxu0 %vm723_vm1, %v14894_v43 }
 0x16e   : > { %v1085_v9 = vpop.f32.mrf.mxu1  ;;  %11597 = vmatmul.mubr.msk.bf16.gmra.mxu1 %vm723_vm1, %v15022_v2  ;;  %2122 = vmatprep.mubr.bf16.mxu0 %v14481_v18 }
 0x16f   : > { %1408 = vst [vmem:[#allocation2 + $0x240] sm:$0xff] %v1085_v9  ;;  %13249 = vmatprep.mubr.msk.bf16.mxu1 %vm723_vm1, %v14315_v11  ;;  %v15035_v13 = vpop.f32.mrf.mxu0  ;;  %v13709_v11 = vld [vmem:[#allocation4 + $0x1c0] ss:$20 sps:$4 sm:$0xff]  }
 0x170   : > { %v1087_v15 = vpop.f32.mrf.mxu1 }
 0x171   : > { %1409 = vst [vmem:[#allocation2 + $0x248] sm:$0xff] %v1087_v15  ;;  %v15039_v21 = vpop.f32.mrf.mxu0  ;;  %v13714_v15 = vld [vmem:[#allocation4 + $0x19c] ss:$20 sps:$4 sm:$0xff]  }
 0x172   : > { %v1089_v23 = vpop.f32.mrf.mxu1 }
 0x173   : > { %1413 = vst [vmem:[#allocation2 + $0x268] sm:$0xff] %v1089_v23  ;;  %v15041_v25 = vpop.f32.mrf.mxu0 }
 0x174   : > { %v1091_v28 = vpop.f32.mrf.mxu1 }
 0x175   : > { %1414 = vst [vmem:[#allocation2 + $0x270] sm:$0xff] %v1091_v28  ;;  %v15044_v34 = vpop.f32.mrf.mxu0  ;;  %11607 = vmatmul.mubr.msk.bf16.gmra.mxu0 %vm723_vm1, %v14903_v45  ;;  %v14318_v28 = vld [vmem:[%s14638_s9 + $0x20] sm:$0xff]  }
 0x176   : > { %v1095_v37 = vpop.f32.mrf.mxu1  ;;  %13250 = vmatmul.mubr.msk.bf16.vlgmr.msra.gmra.mxu1 %vm723_vm1, %v14316_v40  ;;  %2132 = vmatprep.mubr.bf16.mxu0 %v14481_v18  ;;  %v13717_v40 = vld [vmem:[#allocation4 + $0x174] ss:$20 sps:$4 sm:$0xff]  }
 0x177   : > { %1418 = vst [vmem:[#allocation2 + $0x290] sm:$0xff] %v1095_v37  ;;  %13253 = vmatprep.mubr.msk.bf16.mxu1 %vm723_vm1, %v14317_v47  ;;  %v15053_v50 = vpop.f32.mrf.mxu0  ;;  %3365 = vmatpush1.bf16.msra.mxu1 %v3157_v30  ;;  %v13712_v30 = vld [vmem:[#allocation4 + $0x198] ss:$20 sps:$4 sm:$0xff]  }
 0x178   : > { %v1097_v56 = vpop.f32.mrf.mxu1  ;;  %3366 = vmatprep.subr.bf16.mxu1 %v13708_v32 }
 0x179   : > { %1419 = vst [vmem:[#allocation2 + $0x298] sm:$0xff] %v1097_v56  ;;  %v15055_v62 = vpop.f32.mrf.mxu0 }
 0x17a   : > { %v1099_v1 = vpop.f32.mrf.mxu1 }
 0x17b   : > { %1423 = vst [vmem:[#allocation2 + $0x2b8] sm:$0xff] %v1099_v1  ;;  %v15057_v7 = vpop.f32.mrf.mxu0  ;;  %3367 = vmatpush1.bf16.msra.mxu1 %v13706_v44  ;;  %v13715_v1 = vld [vmem:[#allocation4 + $0x170] ss:$20 sps:$4 sm:$0xff]  }
 0x17c   : > { %v1101_v9 = vpop.f32.mrf.mxu1  ;;  %3368 = vmatprep.subr.bf16.mxu1 %v13711_v59 }
 0x17d   : > { %1424 = vst [vmem:[#allocation2 + $0x2c0] sm:$0xff] %v1101_v9  ;;  %v15059_v19 = vpop.f32.mrf.mxu0  ;;  %11608 = vmatmul.mubr.msk.bf16.gmra.mxu0 %vm723_vm1, %v14917_v54 }
 0x17e   : > { %v1105_v23 = vpop.f32.mrf.mxu1  ;;  %13254 = vmatmul.mubr.msk.bf16.gmra.mxu1 %vm723_vm1, %v14318_v28  ;;  %2142 = vmatprep.mubr.bf16.mxu0 %v14481_v18 }
 0x17f   : > { %1428 = vst [vmem:[#allocation2 + $0x2e0] sm:$0xff] %v1105_v23  ;;  %13257 = vmatprep.mubr.msk.bf16.mxu1 %vm723_vm1, %v14859_v38  ;;  %v15068_v32 = vpop.f32.mrf.mxu0  ;;  %3369 = vmatpush1.bf16.msra.mxu1 %v13709_v11 }
 0x180   : > { %v1107_v37 = vpop.f32.mrf.mxu1  ;;  %3370 = vmatprep.subr.bf16.mxu1 %v13714_v15 }
 0x181   : > { %1429 = vst [vmem:[#allocation2 + $0x2e8] sm:$0xff] %v1107_v37  ;;  %v15070_v44 = vpop.f32.mrf.mxu0 }
 0x182   : > { %v1109_v47 = vpop.f32.mrf.mxu1 }
 0x183   : > { %1433 = vst [vmem:[#allocation2 + $0x308] sm:$0xff] %v1109_v47  ;;  %v15072_v56 = vpop.f32.mrf.mxu0  ;;  %3371 = vmatpush1.bf16.msra.mxu1 %v13712_v30 }
 0x184   : > { %v1111_v59 = vpop.f32.mrf.mxu1  ;;  %3372 = vmatprep.subr.bf16.mxu1 %v13717_v40 }
 0x185   : > { %1434 = vst [vmem:[#allocation2 + $0x310] sm:$0xff] %v1111_v59  ;;  %v15074_v9 = vpop.f32.mrf.mxu0  ;;  %11609 = vmatmul.mubr.msk.bf16.gmra.mxu0 %vm723_vm1, %v14936_v5 }
 0x186   : > { %v1115_v38 = vpop.f32.mrf.mxu1  ;;  %13258 = vmatmul.mubr.msk.bf16.gmra.mxu1 %vm723_vm1, %v14869_v39  ;;  %2152 = vmatprep.mubr.bf16.mxu0 %v14481_v18 }
 0x187   : > { %1438 = vst [vmem:[#allocation2 + $0x330] sm:$0xff] %v1115_v38  ;;  %13261 = vmatprep.mubr.msk.bf16.mxu1 %vm723_vm1, %v14883_v42  ;;  %v15083_v11 = vpop.f32.mrf.mxu0  ;;  %3373 = vmatpush1.bf16.msra.mxu1 %v13715_v1 }
 0x188   : > { %v1117_v15 = vpop.f32.mrf.mxu1 }
 0x189   : > { %1439 = vst [vmem:[#allocation2 + $0x338] sm:$0xff] %v1117_v15  ;;  %v926_v23 = vpop.f32.mrf.mxu0 }
 0x18a   : > { %v1119_v28 = vpop.f32.mrf.mxu1  ;;  %1441 = vst [vmem:[#allocation2 + $0x348] sm:$0xff] %v926_v23 }
 0x18b   : > { %1443 = vst [vmem:[#allocation2 + $0x358] sm:$0xff] %v1119_v28  ;;  %v928_v30 = vpop.f32.mrf.mxu0 }
 0x18c   : > { %v1121_v37 = vpop.f32.mrf.mxu1  ;;  %1442 = vst [vmem:[#allocation2 + $0x350] sm:$0xff] %v928_v30 }
 0x18d   : > { %1444 = vst [vmem:[#allocation2 + $0x360] sm:$0xff] %v1121_v37  ;;  %v932_v39 = vpop.f32.mrf.mxu0  ;;  %11610 = vmatmul.mubr.msk.bf16.gmra.mxu0 %vm723_vm1, %v14954_v16 }
 0x18e   : > { %v1125_v40 = vpop.f32.mrf.mxu1  ;;  %13262 = vmatmul.mubr.msk.bf16.gmra.mxu1 %vm723_vm1, %v14894_v43  ;;  %1446 = vst [vmem:[#allocation2 + $0x370] sm:$0xff] %v932_v39  ;;  %2162 = vmatprep.mubr.bf16.mxu0 %v14481_v18 }
 0x18f   : > { %1448 = vst [vmem:[#allocation2 + $0x380] sm:$0xff] %v1125_v40  ;;  %13265 = vmatprep.mubr.msk.bf16.mxu1 %vm723_vm1, %v14903_v45  ;;  %v934_v42 = vpop.f32.mrf.mxu0 }
 0x190   : > { %v1127_v47 = vpop.f32.mrf.mxu1  ;;  %1447 = vst [vmem:[#allocation2 + $0x378] sm:$0xff] %v934_v42 }
 0x191   : > { %1449 = vst [vmem:[#allocation2 + $0x388] sm:$0xff] %v1127_v47  ;;  %v936_v59 = vpop.f32.mrf.mxu0 }
 0x192   : > { %v1129_v1 = vpop.f32.mrf.mxu1  ;;  %1451 = vst [vmem:[#allocation2 + $0x398] sm:$0xff] %v936_v59 }
 0x193   : > { %1453 = vst [vmem:[#allocation2 + $0x3a8] sm:$0xff] %v1129_v1  ;;  %v938_v38 = vpop.f32.mrf.mxu0 }
 0x194   : > { %v1131_v15 = vpop.f32.mrf.mxu1  ;;  %1452 = vst [vmem:[#allocation2 + $0x3a0] sm:$0xff] %v938_v38 }
 0x195   : > { %1454 = vst [vmem:[#allocation2 + $0x3b0] sm:$0xff] %v1131_v15  ;;  %v942_v43 = vpop.f32.mrf.mxu0  ;;  %11611 = vmatmul.mubr.msk.bf16.gmra.mxu0 %vm723_vm1, %v14971_v26 }
 0x196   : > { %v1135_v23 = vpop.f32.mrf.mxu1  ;;  %13266 = vmatmul.mubr.msk.bf16.gmra.mxu1 %vm723_vm1, %v14917_v54  ;;  %1456 = vst [vmem:[#allocation2 + $0x3c0] sm:$0xff] %v942_v43  ;;  %2172 = vmatprep.mubr.bf16.mxu0 %v14481_v18 }
 0x197   : > { %1458 = vst [vmem:[#allocation2 + $0x3d0] sm:$0xff] %v1135_v23  ;;  %13269 = vmatprep.mubr.msk.bf16.mxu1 %vm723_vm1, %v14936_v5  ;;  %v944_v45 = vpop.f32.mrf.mxu0 }
 0x198   : > { %v1137_v28 = vpop.f32.mrf.mxu1  ;;  %1457 = vst [vmem:[#allocation2 + $0x3c8] sm:$0xff] %v944_v45 }
 0x199   : > { %1459 = vst [vmem:[#allocation2 + $0x3d8] sm:$0xff] %v1137_v28  ;;  %v946_v30 = vpop.f32.mrf.mxu0 }
 0x19a   : > { %v1139_v37 = vpop.f32.mrf.mxu1  ;;  %1461 = vst [vmem:[#allocation2 + $0x3e8] sm:$0xff] %v946_v30 }
 0x19b   : > { %1463 = vst [vmem:[#allocation2 + $0x3f8] sm:$0xff] %v1139_v37  ;;  %v948_v39 = vpop.f32.mrf.mxu0 }
 0x19c   : > { %v1141_v40 = vpop.f32.mrf.mxu1  ;;  %1462 = vst [vmem:[#allocation2 + $0x3f0] sm:$0xff] %v948_v39 }
 0x19d   : > { %1464 = vst [vmem:[#allocation2 + $0x400] sm:$0xff] %v1141_v40  ;;  %v952_v54 = vpop.f32.mrf.mxu0  ;;  %11612 = vmatmul.mubr.msk.bf16.gmra.mxu0 %vm723_vm1, %v14988_v35 }
 0x19e   : > { %v1145_v42 = vpop.f32.mrf.mxu1  ;;  %13270 = vmatmul.mubr.msk.bf16.gmra.mxu1 %vm723_vm1, %v14954_v16  ;;  %1466 = vst [vmem:[#allocation2 + $0x410] sm:$0xff] %v952_v54  ;;  %2182 = vmatprep.mubr.bf16.mxu0 %v14481_v18 }
 0x19f   : > { %1468 = vst [vmem:[#allocation2 + $0x420] sm:$0xff] %v1145_v42  ;;  %13273 = vmatprep.mubr.msk.bf16.mxu1 %vm723_vm1, %v14971_v26  ;;  %v954_v5 = vpop.f32.mrf.mxu0 }
 0x1a0   : > { %v1147_v47 = vpop.f32.mrf.mxu1  ;;  %1467 = vst [vmem:[#allocation2 + $0x418] sm:$0xff] %v954_v5  ;;  %v13718_v5 = vld [vmem:[%s14638_s9 + $0x10] sm:$0xff]  }
 0x1a1   : > { %1469 = vst [vmem:[#allocation2 + $0x428] sm:$0xff] %v1147_v47  ;;  %v956_v59 = vpop.f32.mrf.mxu0 }
 0x1a2   : > { %v1149_v1 = vpop.f32.mrf.mxu1  ;;  %1471 = vst [vmem:[#allocation2 + $0x438] sm:$0xff] %v956_v59 }
 0x1a3   : > { %1473 = vst [vmem:[#allocation2 + $0x448] sm:$0xff] %v1149_v1  ;;  %v958_v38 = vpop.f32.mrf.mxu0  ;;  %v14319_v1 = vld [vmem:[#allocation4 + $0x218] ss:$0 sps:$4 sm:$0xff]  }
 0x1a4   : > { %v1151_v15 = vpop.f32.mrf.mxu1  ;;  %1472 = vst [vmem:[#allocation2 + $0x440] sm:$0xff] %v958_v38  ;;  %v13723_v38 = vld [vmem:[#allocation4 + $0x1f0] ss:$20 sps:$4 sm:$0xff]  }
 0x1a5   : > { %1474 = vst [vmem:[#allocation2 + $0x450] sm:$0xff] %v1151_v15  ;;  %v962_v16 = vpop.f32.mrf.mxu0  ;;  %11613 = vmatmul.mubr.msk.bf16.gmra.mxu0 %vm723_vm1, %v15005_v51 }
 0x1a6   : > { %v1155_v43 = vpop.f32.mrf.mxu1  ;;  %13274 = vmatmul.mubr.msk.bf16.gmra.mxu1 %vm723_vm1, %v14988_v35  ;;  %1476 = vst [vmem:[#allocation2 + $0x460] sm:$0xff] %v962_v16  ;;  %2192 = vmatprep.mubr.bf16.mxu0 %v14481_v18 }
 0x1a7   : > { %1478 = vst [vmem:[#allocation2 + $0x470] sm:$0xff] %v1155_v43  ;;  %13277 = vmatprep.mubr.msk.bf16.mxu1 %vm723_vm1, %v15005_v51  ;;  %v964_v26 = vpop.f32.mrf.mxu0 }
 0x1a8   : > { %v1157_v23 = vpop.f32.mrf.mxu1  ;;  %1477 = vst [vmem:[#allocation2 + $0x468] sm:$0xff] %v964_v26 }
 0x1a9   : > { %1479 = vst [vmem:[#allocation2 + $0x478] sm:$0xff] %v1157_v23  ;;  %v966_v45 = vpop.f32.mrf.mxu0 }
 0x1aa   : > { %v1159_v28 = vpop.f32.mrf.mxu1  ;;  %1481 = vst [vmem:[#allocation2 + $0x488] sm:$0xff] %v966_v45  ;;  %v13727_v45 = vld [vmem:[#allocation4 + $0x1c8] ss:$20 sps:$4 sm:$0xff]  }
 0x1ab   : > { %1483 = vst [vmem:[#allocation2 + $0x498] sm:$0xff] %v1159_v28  ;;  %v968_v30 = vpop.f32.mrf.mxu0 }
 0x1ac   : > { %v1161_v37 = vpop.f32.mrf.mxu1  ;;  %1482 = vst [vmem:[#allocation2 + $0x490] sm:$0xff] %v968_v30 }
 0x1ad   : > { %1484 = vst [vmem:[#allocation2 + $0x4a0] sm:$0xff] %v1161_v37  ;;  %v972_v35 = vpop.f32.mrf.mxu0  ;;  %11614 = vmatmul.mubr.msk.bf16.gmra.mxu0 %vm723_vm1, %v15022_v2 }
 0x1ae   : > { %v1165_v39 = vpop.f32.mrf.mxu1  ;;  %13278 = vmatmul.mubr.msk.bf16.gmra.mxu1 %vm723_vm1, %v15022_v2  ;;  %1486 = vst [vmem:[#allocation2 + $0x4b0] sm:$0xff] %v972_v35  ;;  %3197 = vmatprep.mubr.bf16.mxu0 %v14481_v18  ;;  %v3163_v2 = vsel %vm772_vm0, %v14319_v1, 0  ;;  %v13720_v35 = vld [vmem:[%s14638_s9 + $0x18] sm:$0xff]  }
 0x1af   : > { %1488 = vst [vmem:[#allocation2 + $0x4c0] sm:$0xff] %v1165_v39  ;;  %3390 = vmatprep.mubr.bf16.mxu1 %v14481_v18  ;;  %v974_v51 = vpop.f32.mrf.mxu0 }
 0x1b0   : > { %v1167_v40 = vpop.f32.mrf.mxu1  ;;  %1487 = vst [vmem:[#allocation2 + $0x4b8] sm:$0xff] %v974_v51 }
 0x1b1   : > { %1489 = vst [vmem:[#allocation2 + $0x4c8] sm:$0xff] %v1167_v40  ;;  %v976_v54 = vpop.f32.mrf.mxu0  ;;  %v13731_v40 = vld [vmem:[#allocation4 + $0x1a0] ss:$20 sps:$4 sm:$0xff]  }
 0x1b2   : > { %v1169_v42 = vpop.f32.mrf.mxu1  ;;  %1491 = vst [vmem:[#allocation2 + $0x4d8] sm:$0xff] %v976_v54 }
 0x1b3   : > { %1493 = vst [vmem:[#allocation2 + $0x4e8] sm:$0xff] %v1169_v42  ;;  %v978_v47 = vpop.f32.mrf.mxu0 }
 0x1b4   : > { %v1171_v59 = vpop.f32.mrf.mxu1  ;;  %1492 = vst [vmem:[#allocation2 + $0x4e0] sm:$0xff] %v978_v47 }
 0x1b5   : > { %1494 = vst [vmem:[#allocation2 + $0x4f0] sm:$0xff] %v1171_v59  ;;  %v13209_v15 = vpop.f32.mrf.mxu0  ;;  %11705 = vmatmul.mubr.msk.bf16.vlgmr.msra.gmra.mxu0 %vm723_vm1, %v13718_v5 }
 0x1b6   : > { %v1851_v16 = vpop.f32.mrf.mxu1  ;;  %11722 = vmatmul.mubr.msk.bf16.vlgmr.msra.gmra.mxu1 %vm723_vm1, %v13718_v5  ;;  %1350 = vst.msk [vmem:[#allocation2 + $0x70] sm:$0xff] %vm1339_vm2, %v13209_v15  ;;  %13282 = vmatpush3.bf16.msra.mxu0 %v3163_v2 }
 0x1b7   : > { %v2524_v43 = vadd.f32 %v1851_v16, %v14906_v49  ;;  %3207 = vmatprep.mubr.bf16.mxu0 %v14481_v18  ;;  %v1208_v26 = vpop.f32.mrf.mxu0  ;;  %3400 = vmatprep.mubr.bf16.mxu1 %v14481_v18 }
 0x1b8   : > { %v1853_v23 = vpop.f32.mrf.mxu1  ;;  %13283 = vmatprep.subr.bf16.mxu0 %v13723_v38  ;;  %1340 = vst.msk [vmem:[#allocation2 + $0x20] sm:$0xff] %vm1339_vm2, %v1208_v26 }
 0x1b9   : > { %2684 = vst [vmem:[#allocation2] sm:$0xff] %v2524_v43  ;;  %v2525_v28 = vadd.f32 %v1853_v23, %v14913_v52  ;;  %v13210_v30 = vpop.f32.mrf.mxu0 }
 0x1ba   : > { %v1855_v37 = vpop.f32.mrf.mxu1  ;;  %1355 = vst.msk [vmem:[#allocation2 + $0x98] sm:$0xff] %vm1339_vm2, %v13210_v30  ;;  %13284 = vmatpush3.bf16.msra.mxu0 %v13723_v38  ;;  %v13721_v38 = vld [vmem:[%s14638_s9 + $0x20] sm:$0xff]  }
 0x1bb   : > { %2685 = vst [vmem:[#allocation2 + $0x8] sm:$0xff] %v2525_v28  ;;  %v2529_v49 = vadd.f32 %v1855_v37, %v14919_v55  ;;  %v1211_v39 = vpop.f32.mrf.mxu0  ;;  %13285 = vmatprep.subr.bf16.mxu0 %v13727_v45  ;;  %v13722_v37 = vld [vmem:[%s14638_s9 + $0x28] sm:$0xff]  }
 0x1bc   : > { %v1857_v51 = vpop.f32.mrf.mxu1  ;;  %1345 = vst.msk [vmem:[#allocation2 + $0x48] sm:$0xff] %vm1339_vm2, %v1211_v39 }
 0x1bd   : > { %2689 = vst [vmem:[#allocation2 + $0x28] sm:$0xff] %v2529_v49  ;;  %v2530_v54 = vadd.f32 %v1857_v51, %v14921_v58  ;;  %v13213_v42 = vpop.f32.mrf.mxu0  ;;  %11706 = vmatmul.mubr.msk.bf16.gmra.mxu0 %vm723_vm1, %v13720_v35  ;;  %v13735_v58 = vld [vmem:[#allocation4 + $0x178] ss:$20 sps:$4 sm:$0xff]  }
 0x1be   : > { %v1861_v52 = vpop.f32.mrf.mxu1  ;;  %11723 = vmatmul.mubr.msk.bf16.gmra.mxu1 %vm723_vm1, %v13720_v35  ;;  %1370 = vst.msk [vmem:[#allocation2 + $0x110] sm:$0xff] %vm1339_vm2, %v13213_v42  ;;  %3217 = vmatprep.mubr.bf16.mxu0 %v14481_v18 }
 0x1bf   : > { %2690 = vst [vmem:[#allocation2 + $0x30] sm:$0xff] %v2530_v54  ;;  %v2534_v55 = vadd.f32 %v1861_v52, %v14923_v61  ;;  %3410 = vmatprep.mubr.bf16.mxu1 %v14481_v18  ;;  %v1224_v5 = vpop.f32.mrf.mxu0  ;;  %13286 = vmatpush3.bf16.msra.mxu0 %v13727_v45 }
 0x1c0   : > { %v1863_v47 = vpop.f32.mrf.mxu1  ;;  %1360 = vst.msk [vmem:[#allocation2 + $0xc0] sm:$0xff] %vm1339_vm2, %v1224_v5  ;;  %13287 = vmatprep.subr.bf16.mxu0 %v13731_v40 }
 0x1c1   : > { %2694 = vst [vmem:[#allocation2 + $0x50] sm:$0xff] %v2534_v55  ;;  %v2535_v59 = vadd.f32 %v1863_v47, %v14931_v0  ;;  %v13214_v1 = vpop.f32.mrf.mxu0  ;;  %v13724_v55 = vld [vmem:[%s14638_s9 + $0x30] sm:$0xff]  }
 0x1c2   : > { %v1865_v2 = vpop.f32.mrf.mxu1  ;;  %1375 = vst.msk [vmem:[#allocation2 + $0x138] sm:$0xff] %vm1339_vm2, %v13214_v1 }
 0x1c3   : > { %2695 = vst [vmem:[#allocation2 + $0x58] sm:$0xff] %v2535_v59  ;;  %v2539_v61 = vadd.f32 %v1865_v2, %v14933_v3  ;;  %v1227_v15 = vpop.f32.mrf.mxu0  ;;  %13288 = vmatpush3.bf16.msra.mxu0 %v13731_v40 }
 0x1c4   : > { %v1867_v16 = vpop.f32.mrf.mxu1  ;;  %1365 = vst.msk [vmem:[#allocation2 + $0xe8] sm:$0xff] %vm1339_vm2, %v1227_v15  ;;  %13289 = vmatprep.subr.bf16.mxu0 %v13735_v58  ;;  %v13725_v15 = vld [vmem:[%s14638_s9 + $0x38] sm:$0xff]  }
 0x1c5   : > { %2699 = vst [vmem:[#allocation2 + $0x78] sm:$0xff] %v2539_v61  ;;  %v2540_v43 = vadd.f32 %v1867_v16, %v14938_v6  ;;  %v13217_v26 = vpop.f32.mrf.mxu0  ;;  %11707 = vmatmul.mubr.msk.bf16.gmra.mxu0 %vm723_vm1, %v13721_v38 }
 0x1c6   : > { %v1871_v0 = vpop.f32.mrf.mxu1  ;;  %11724 = vmatmul.mubr.msk.bf16.gmra.mxu1 %vm723_vm1, %v13721_v38  ;;  %1390 = vst.msk [vmem:[#allocation2 + $0x1b0] sm:$0xff] %vm1339_vm2, %v13217_v26  ;;  %3227 = vmatprep.mubr.bf16.mxu0 %v14481_v18 }
 0x1c7   : > { %2700 = vst [vmem:[#allocation2 + $0x80] sm:$0xff] %v2540_v43  ;;  %v2544_v3 = vadd.f32 %v1871_v0, %v14940_v10  ;;  %3420 = vmatprep.mubr.bf16.mxu1 %v14481_v18  ;;  %v1240_v23 = vpop.f32.mrf.mxu0  ;;  %13290 = vmatpush3.bf16.msra.mxu0 %v13735_v58 }
 0x1c8   : > { %v1873_v45 = vpop.f32.mrf.mxu1  ;;  %1380 = vst.msk [vmem:[#allocation2 + $0x160] sm:$0xff] %vm1339_vm2, %v1240_v23 }
 0x1c9   : > { %2704 = vst [vmem:[#allocation2 + $0xa0] sm:$0xff] %v2544_v3  ;;  %v2545_v6 = vadd.f32 %v1873_v45, %v14948_v12  ;;  %v13218_v28 = vpop.f32.mrf.mxu0  ;;  %v13740_v3 = vld [vmem:[#allocation8 + $0x158] sm:$0xff]  }
 0x1ca   : > { %v1875_v30 = vpop.f32.mrf.mxu1  ;;  %1395 = vst.msk [vmem:[#allocation2 + $0x1d8] sm:$0xff] %vm1339_vm2, %v13218_v28 }
 0x1cb   : > { %2705 = vst [vmem:[#allocation2 + $0xa8] sm:$0xff] %v2545_v6  ;;  %v2549_v10 = vadd.f32 %v1875_v30, %v14951_v14  ;;  %v1243_v35 = vpop.f32.mrf.mxu0 }
 0x1cc   : > { %v1877_v49 = vpop.f32.mrf.mxu1  ;;  %1385 = vst.msk [vmem:[#allocation2 + $0x188] sm:$0xff] %vm1339_vm2, %v1243_v35 }
 0x1cd   : > { %2709 = vst [vmem:[#allocation2 + $0xc8] sm:$0xff] %v2549_v10  ;;  %v2550_v39 = vadd.f32 %v1877_v49, %v14956_v17  ;;  %v13221_v51 = vpop.f32.mrf.mxu0  ;;  %11708 = vmatmul.mubr.msk.bf16.gmra.mxu0 %vm723_vm1, %v13722_v37  ;;  %v13743_v10 = vld [vmem:[#allocation8 + $0x78] sm:$0xff]  }
 0x1ce   : > { %v1881_v40 = vpop.f32.mrf.mxu1  ;;  %11725 = vmatmul.mubr.msk.bf16.gmra.mxu1 %vm723_vm1, %v13722_v37  ;;  %1410 = vst.msk [vmem:[#allocation2 + $0x250] sm:$0xff] %vm1339_vm2, %v13221_v51  ;;  %3237 = vmatprep.mubr.bf16.mxu0 %v14481_v18  ;;  %v13726_v37 = vld [vmem:[%s14638_s9 + $0x40] sm:$0xff]  }
 0x1cf   : > { %2710 = vst [vmem:[#allocation2 + $0xd0] sm:$0xff] %v2550_v39  ;;  %v2554_v12 = vadd.f32 %v1881_v40, %v14958_v20  ;;  %3430 = vmatprep.mubr.bf16.mxu1 %v14481_v18  ;;  %v1256_v14 = vpop.f32.mrf.mxu0  ;;  %12462 = vmatprep.subr.bf16.mxu0 %v13743_v10 }
 0x1d0   : > { %v1883_v54 = vpop.f32.mrf.mxu1  ;;  %1400 = vst.msk [vmem:[#allocation2 + $0x200] sm:$0xff] %vm1339_vm2, %v1256_v14 }
 0x1d1   : > { %2714 = vst [vmem:[#allocation2 + $0xf0] sm:$0xff] %v2554_v12  ;;  %v2555_v17 = vadd.f32 %v1883_v54, %v14966_v22  ;;  %v13222_v42 = vpop.f32.mrf.mxu0 }
 0x1d2   : > { %v1885_v52 = vpop.f32.mrf.mxu1  ;;  %1415 = vst.msk [vmem:[#allocation2 + $0x278] sm:$0xff] %vm1339_vm2, %v13222_v42 }
 0x1d3   : > { %2715 = vst [vmem:[#allocation2 + $0xf8] sm:$0xff] %v2555_v17  ;;  %v2559_v5 = vadd.f32 %v1885_v52, %v14968_v24  ;;  %v1259_v20 = vpop.f32.mrf.mxu0  ;;  %v13728_v17 = vld [vmem:[%s14638_s9 + $0x48] sm:$0xff]  }
 0x1d4   : > { %v1887_v47 = vpop.f32.mrf.mxu1  ;;  %1405 = vst.msk [vmem:[#allocation2 + $0x228] sm:$0xff] %vm1339_vm2, %v1259_v20  ;;  %v13742_v20 = vld [vmem:[#allocation8 + $0x150] sm:$0xff]  }
 0x1d5   : > { %2719 = vst [vmem:[#allocation2 + $0x118] sm:$0xff] %v2559_v5  ;;  %v2560_v58 = vadd.f32 %v1887_v47, %v14973_v27  ;;  %v13225_v59 = vpop.f32.mrf.mxu0  ;;  %11709 = vmatmul.mubr.msk.bf16.gmra.mxu0 %vm723_vm1, %v13724_v55 }
 0x1d6   : > { %v1891_v1 = vpop.f32.mrf.mxu1  ;;  %11726 = vmatmul.mubr.msk.bf16.gmra.mxu1 %vm723_vm1, %v13724_v55  ;;  %1430 = vst.msk [vmem:[#allocation2 + $0x2f0] sm:$0xff] %vm1339_vm2, %v13225_v59  ;;  %3247 = vmatprep.mubr.bf16.mxu0 %v14481_v18 }
 0x1d7   : > { %2720 = vst [vmem:[#allocation2 + $0x120] sm:$0xff] %v2560_v58  ;;  %v2564_v22 = vadd.f32 %v1891_v1, %v14975_v29  ;;  %3440 = vmatprep.mubr.bf16.mxu1 %v14481_v18  ;;  %v1272_v24 = vpop.f32.mrf.mxu0  ;;  %v13739_v29 = vld [vmem:[#allocation8 + $0x198] sm:$0xff]   ;;  %v13750_v1 = vld [vmem:[#allocation8 + $0x188] sm:$0xff]  }
 0x1d8   : > { %v1893_v2 = vpop.f32.mrf.mxu1  ;;  %1420 = vst.msk [vmem:[#allocation2 + $0x2a0] sm:$0xff] %vm1339_vm2, %v1272_v24  ;;  %12413 = vmatprep.subr.bf16.mxu1 %v13739_v29 }
 0x1d9   : > { %2724 = vst [vmem:[#allocation2 + $0x140] sm:$0xff] %v2564_v22  ;;  %v2565_v27 = vadd.f32 %v1893_v2, %v14983_v31  ;;  %v13226_v38 = vpop.f32.mrf.mxu0  ;;  %12414 = vmatpush3.bf16.msra.mxu1 %v13740_v3  ;;  %v13729_v2 = vld [vmem:[%s14638_s9 + $0x50] sm:$0xff]  }
 0x1da   : > { %v1895_v61 = vpop.f32.mrf.mxu1  ;;  %1435 = vst.msk [vmem:[#allocation2 + $0x318] sm:$0xff] %vm1339_vm2, %v13226_v38 }
 0x1db   : > { %2725 = vst [vmem:[#allocation2 + $0x148] sm:$0xff] %v2565_v27  ;;  %v2569_v16 = vadd.f32 %v1895_v61, %v14985_v33  ;;  %v1275_v43 = vpop.f32.mrf.mxu0  ;;  %v13752_v27 = vld [vmem:[#allocation8 + $0x148] sm:$0xff]  }
 0x1dc   : > { %v1897_v26 = vpop.f32.mrf.mxu1  ;;  %1425 = vst.msk [vmem:[#allocation2 + $0x2c8] sm:$0xff] %vm1339_vm2, %v1275_v43  ;;  %v2366_v43 = vld [vmem:[#allocation2 + $0x10] sm:$0xff] }
 0x1dd   : > { %2729 = vst [vmem:[#allocation2 + $0x168] sm:$0xff] %v2569_v16  ;;  %v2570_v0 = vadd.f32 %v1897_v26, %v14990_v36  ;;  %v13229_v23 = vpop.f32.mrf.mxu0  ;;  %11710 = vmatmul.mubr.msk.bf16.gmra.mxu0 %vm723_vm1, %v13725_v15  ;;  %v13756_v26 = vld [vmem:[#allocation8 + $0x140] sm:$0xff]  }
 0x1de   : > { %v1901_v31 = vpop.f32.mrf.mxu1  ;;  %11727 = vmatmul.mubr.msk.bf16.gmra.mxu1 %vm723_vm1, %v13725_v15  ;;  %1450 = vst.msk [vmem:[#allocation2 + $0x390] sm:$0xff] %vm1339_vm2, %v13229_v23  ;;  %3257 = vmatprep.mubr.bf16.mxu0 %v14481_v18  ;;  %v2367_v23 = vld [vmem:[#allocation2 + $0x18] sm:$0xff] }
 0x1df   : > { %2730 = vst [vmem:[#allocation2 + $0x170] sm:$0xff] %v2570_v0  ;;  %v2574_v33 = vadd.f32 %v1901_v31, %v14992_v41  ;;  %3450 = vmatprep.mubr.bf16.mxu1 %v14481_v18  ;;  %v1288_v45 = vpop.f32.mrf.mxu0 }
 0x1e0   : > { %v1903_v36 = vpop.f32.mrf.mxu1  ;;  %1440 = vst.msk [vmem:[#allocation2 + $0x340] sm:$0xff] %vm1339_vm2, %v1288_v45  ;;  %v13759_v45 = vld [vmem:[#allocation8 + $0x178] sm:$0xff]  }
 0x1e1   : > { %2734 = vst [vmem:[#allocation2 + $0x190] sm:$0xff] %v2574_v33  ;;  %v2575_v6 = vadd.f32 %v1903_v36, %v15000_v46  ;;  %v13230_v28 = vpop.f32.mrf.mxu0 }
 0x1e2   : > { %v1905_v30 = vpop.f32.mrf.mxu1  ;;  %1455 = vst.msk [vmem:[#allocation2 + $0x3b8] sm:$0xff] %vm1339_vm2, %v13230_v28  ;;  %v13730_v28 = vld [vmem:[%s14638_s9 + $0x58] sm:$0xff]  }
 0x1e3   : > { %2735 = vst [vmem:[#allocation2 + $0x198] sm:$0xff] %v2575_v6  ;;  %v2579_v41 = vadd.f32 %v1905_v30, %v15002_v48  ;;  %v1291_v35 = vpop.f32.mrf.mxu0  ;;  %v13760_v30 = vld [vmem:[#allocation8 + $0x138] sm:$0xff]  }
 0x1e4   : > { %v1907_v49 = vpop.f32.mrf.mxu1  ;;  %1445 = vst.msk [vmem:[#allocation2 + $0x368] sm:$0xff] %vm1339_vm2, %v1291_v35 }
 0x1e5   : > { %2739 = vst [vmem:[#allocation2 + $0x1b8] sm:$0xff] %v2579_v41  ;;  %v2580_v39 = vadd.f32 %v1907_v49, %v15007_v53  ;;  %v13233_v51 = vpop.f32.mrf.mxu0  ;;  %11711 = vmatmul.mubr.msk.bf16.gmra.mxu0 %vm723_vm1, %v13726_v37  ;;  %v2372_v49 = vld [vmem:[#allocation2 + $0x40] sm:$0xff] }
 0x1e6   : > { %v1911_v46 = vpop.f32.mrf.mxu1  ;;  %11728 = vmatmul.mubr.msk.bf16.gmra.mxu1 %vm723_vm1, %v13726_v37  ;;  %1470 = vst.msk [vmem:[#allocation2 + $0x430] sm:$0xff] %vm1339_vm2, %v13233_v51  ;;  %3267 = vmatprep.mubr.bf16.mxu0 %v14481_v18  ;;  %v13763_v51 = vld [vmem:[#allocation8 + $0x170] sm:$0xff]  }
 0x1e7   : > { %2740 = vst [vmem:[#allocation2 + $0x1c0] sm:$0xff] %v2580_v39  ;;  %v2584_v48 = vadd.f32 %v1911_v46, %v15009_v57  ;;  %3460 = vmatprep.mubr.bf16.mxu1 %v14481_v18  ;;  %v1304_v40 = vpop.f32.mrf.mxu0  ;;  %v13741_v57 = vld [vmem:[#allocation8 + $0x190] sm:$0xff]  }
 0x1e8   : > { %v1913_v12 = vpop.f32.mrf.mxu1  ;;  %1460 = vst.msk [vmem:[#allocation2 + $0x3e0] sm:$0xff] %vm1339_vm2, %v1304_v40  ;;  %12415 = vmatprep.subr.bf16.mxu1 %v13741_v57  ;;  %v2376_v40 = vld [vmem:[#allocation2 + $0x60] sm:$0xff]  ;;  %v13767_v57 = vld [vmem:[#allocation8 + $0x168] sm:$0xff]  }
 0x1e9   : > { %2744 = vst [vmem:[#allocation2 + $0x1e0] sm:$0xff] %v2584_v48  ;;  %v2585_v53 = vadd.f32 %v1913_v12, %v15017_v60  ;;  %v13234_v14 = vpop.f32.mrf.mxu0  ;;  %12416 = vmatpush3.bf16.msra.mxu1 %v13742_v20  ;;  %v13768_v20 = vld [vmem:[#allocation8 + $0x128] sm:$0xff]  }
 0x1ea   : > { %v1915_v54 = vpop.f32.mrf.mxu1  ;;  %1475 = vst.msk [vmem:[#allocation2 + $0x458] sm:$0xff] %vm1339_vm2, %v13234_v14  ;;  %12417 = vmatprep.subr.bf16.mxu1 %v13750_v1  ;;  %v13769_v1 = vld [vmem:[#allocation8 + $0x160] sm:$0xff]  }
 0x1eb   : > { %2745 = vst [vmem:[#allocation2 + $0x1e8] sm:$0xff] %v2585_v53  ;;  %v2589_v42 = vadd.f32 %v1915_v54, %v15019_v63  ;;  %v1307_v52 = vpop.f32.mrf.mxu0  ;;  %v2377_v54 = vld [vmem:[#allocation2 + $0x68] sm:$0xff] }
 0x1ec   : > { %v1917_v55 = vpop.f32.mrf.mxu1  ;;  %1465 = vst.msk [vmem:[#allocation2 + $0x408] sm:$0xff] %vm1339_vm2, %v1307_v52 }
 0x1ed   : > { %2749 = vst [vmem:[#allocation2 + $0x208] sm:$0xff] %v2589_v42  ;;  %v2590_v5 = vadd.f32 %v1917_v55, %v15024_v4  ;;  %v13237_v47 = vpop.f32.mrf.mxu0  ;;  %11712 = vmatmul.mubr.msk.bf16.gmra.mxu0 %vm723_vm1, %v13728_v17  ;;  %12418 = vmatpush3.bf16.msra.mxu1 %v13752_v27  ;;  %v13770_v27 = vld [vmem:[#allocation8 + $0x120] sm:$0xff]  }
 0x1ee   : > { %v1921_v60 = vpop.f32.mrf.mxu1  ;;  %11729 = vmatmul.mubr.msk.bf16.gmra.mxu1 %vm723_vm1, %v13728_v17  ;;  %1490 = vst.msk [vmem:[#allocation2 + $0x4d0] sm:$0xff] %vm1339_vm2, %v13237_v47  ;;  %3277 = vmatprep.mubr.bf16.mxu0 %v14481_v18 }
 0x1ef   : > { %2750 = vst [vmem:[#allocation2 + $0x210] sm:$0xff] %v2590_v5  ;;  %v2594_v63 = vadd.f32 %v1921_v60, %v15026_v8  ;;  %3470 = vmatprep.mubr.bf16.mxu1 %v14481_v18  ;;  %v1320_v58 = vpop.f32.mrf.mxu0  ;;  %v13732_v5 = vld [vmem:[%s14638_s9 + $0x60] sm:$0xff]  }
 0x1f0   : > { %v1923_v4 = vpop.f32.mrf.mxu1  ;;  %1480 = vst.msk [vmem:[#allocation2 + $0x480] sm:$0xff] %vm1339_vm2, %v1320_v58 }
 0x1f1   : > { %2754 = vst [vmem:[#allocation2 + $0x230] sm:$0xff] %v2594_v63  ;;  %v2595_v59 = vadd.f32 %v1923_v4, %v15035_v13  ;;  %v13238_v22 = vpop.f32.mrf.mxu0  ;;  %v13755_v13 = vld [vmem:[#allocation8 + $0x180] sm:$0xff]   ;;  %v2382_v4 = vld [vmem:[#allocation2 + $0x90] sm:$0xff] }
 0x1f2   : > { %v1925_v24 = vpop.f32.mrf.mxu1  ;;  %1495 = vst.msk [vmem:[#allocation2 + $0x4f8] sm:$0xff] %vm1339_vm2, %v13238_v22  ;;  %12419 = vmatprep.subr.bf16.mxu1 %v13755_v13 }
 0x1f3   : > { %2755 = vst [vmem:[#allocation2 + $0x238] sm:$0xff] %v2595_v59  ;;  %v2599_v8 = vadd.f32 %v1925_v24, %v15039_v21  ;;  %v1323_v38 = vpop.f32.mrf.mxu0  ;;  %12420 = vmatpush3.bf16.msra.mxu1 %v13756_v26  ;;  %v2469_v26 = vld [vmem:[#allocation2 + $0x348] sm:$0xff] }
 0x1f4   : > { %v1927_v61 = vpop.f32.mrf.mxu1  ;;  %1485 = vst.msk [vmem:[#allocation2 + $0x4a8] sm:$0xff] %vm1339_vm2, %v1323_v38  ;;  %12421 = vmatprep.subr.bf16.mxu1 %v13759_v45 }
 0x1f5   : > { %2759 = vst [vmem:[#allocation2 + $0x258] sm:$0xff] %v2599_v8  ;;  %v2600_v15 = vadd.f32 %v1927_v61, %v15041_v25  ;;  %v2044_v29 = vpop.f32.mrf.mxu0  ;;  %11713 = vmatmul.mubr.msk.bf16.gmra.mxu0 %vm723_vm1, %v13729_v2 }
 0x1f6   : > { %v1931_v16 = vpop.f32.mrf.mxu1  ;;  %11730 = vmatmul.mubr.msk.bf16.gmra.mxu1 %vm723_vm1, %v13729_v2  ;;  %v2526_v0 = vadd.f32 %v2366_v43, %v2044_v29  ;;  %3287 = vmatprep.mubr.bf16.mxu0 %v14481_v18  ;;  %v2386_v2 = vld [vmem:[#allocation2 + $0xb0] sm:$0xff]  ;;  %v13771_v29 = vld [vmem:[#allocation8 + $0x218] sm:$0xff]  }
 0x1f7   : > { %2760 = vst [vmem:[#allocation2 + $0x260] sm:$0xff] %v2600_v15  ;;  %v2604_v21 = vadd.f32 %v1931_v16, %v15044_v34  ;;  %3480 = vmatprep.mubr.bf16.mxu1 %v14481_v18  ;;  %v2046_v25 = vpop.f32.mrf.mxu0  ;;  %v2371_v34 = vld [vmem:[#allocation2 + $0x38] sm:$0xff]  ;;  %12422 = vmatpush3.bf16.msra.mxu1 %v13760_v30  ;;  %v2474_v30 = vld [vmem:[#allocation2 + $0x370] sm:$0xff] }
 0x1f8   : > { %v1933_v3 = vpop.f32.mrf.mxu1  ;;  %2686 = vst [vmem:[#allocation2 + $0x10] sm:$0xff] %v2526_v0  ;;  %v2527_v33 = vadd.f32 %v2367_v23, %v2046_v25  ;;  %12423 = vmatprep.subr.bf16.mxu1 %v13763_v51  ;;  %v2387_v15 = vld [vmem:[#allocation2 + $0xb8] sm:$0xff] }
 0x1f9   : > { %2764 = vst [vmem:[#allocation2 + $0x280] sm:$0xff] %v2604_v21  ;;  %v2605_v31 = vadd.f32 %v1933_v3, %v15053_v50  ;;  %v2048_v6 = vpop.f32.mrf.mxu0  ;;  %v2391_v21 = vld [vmem:[#allocation2 + $0xd8] sm:$0xff] }
 0x1fa   : > { %v1935_v36 = vpop.f32.mrf.mxu1  ;;  %2687 = vst [vmem:[#allocation2 + $0x18] sm:$0xff] %v2527_v33  ;;  %v2531_v10 = vadd.f32 %v2371_v34, %v2048_v6  ;;  %v13733_v0 = vld [vmem:[%s14638_s9 + $0x68] sm:$0xff]   ;;  %v2470_v33 = vld [vmem:[#allocation2 + $0x350] sm:$0xff] }
 0x1fb   : > { %2765 = vst [vmem:[#allocation2 + $0x288] sm:$0xff] %v2605_v31  ;;  %v2609_v37 = vadd.f32 %v1935_v36, %v15055_v62  ;;  %v2050_v35 = vpop.f32.mrf.mxu0  ;;  %v13764_v62 = vld [vmem:[#allocation8 + $0x130] sm:$0xff]   ;;  %v2392_v36 = vld [vmem:[#allocation2 + $0xe0] sm:$0xff] }
 0x1fc   : > { %v1937_v41 = vpop.f32.mrf.mxu1  ;;  %2691 = vst [vmem:[#allocation2 + $0x38] sm:$0xff] %v2531_v10  ;;  %v2532_v39 = vadd.f32 %v2372_v49, %v2050_v35  ;;  %12424 = vmatpush3.bf16.msra.mxu1 %v13764_v62  ;;  %v2396_v10 = vld [vmem:[#allocation2 + $0x100] sm:$0xff]  ;;  %v2475_v51 = vld [vmem:[#allocation2 + $0x378] sm:$0xff] }
 0x1fd   : > { %2769 = vst [vmem:[#allocation2 + $0x2a8] sm:$0xff] %v2609_v37  ;;  %v2610_v50 = vadd.f32 %v1937_v41, %v15057_v7  ;;  %v2054_v48 = vpop.f32.mrf.mxu0  ;;  %11714 = vmatmul.mubr.msk.bf16.gmra.mxu0 %vm723_vm1, %v13730_v28  ;;  %12425 = vmatprep.subr.bf16.mxu1 %v13767_v57  ;;  %v4202_v41 = vld [vmem:[#allocation6] sm:$0x1f] }
 0x1fe   : > { %v1941_v46 = vpop.f32.mrf.mxu1  ;;  %11731 = vmatmul.mubr.msk.bf16.gmra.mxu1 %vm723_vm1, %v13730_v28  ;;  %2692 = vst [vmem:[#allocation2 + $0x40] sm:$0xff] %v2532_v39  ;;  %v2536_v53 = vadd.f32 %v2376_v40, %v2054_v48  ;;  %3297 = vmatprep.mubr.bf16.mxu0 %v14481_v18  ;;  %v2397_v48 = vld [vmem:[#allocation2 + $0x108] sm:$0xff] }
 0x1ff   : > { %2770 = vst [vmem:[#allocation2 + $0x2b0] sm:$0xff] %v2610_v50  ;;  %v2614_v12 = vadd.f32 %v1941_v46, %v15059_v19  ;;  %3490 = vmatprep.mubr.bf16.mxu1 %v14481_v18  ;;  %v2056_v14 = vpop.f32.mrf.mxu0  ;;  %v2381_v19 = vld [vmem:[#allocation2 + $0x88] sm:$0xff] }
 0x200   : > { %v1943_v7 = vpop.f32.mrf.mxu1  ;;  %2696 = vst [vmem:[#allocation2 + $0x60] sm:$0xff] %v2536_v53  ;;  %v2537_v42 = vadd.f32 %v2377_v54, %v2056_v14  ;;  %12426 = vmatpush3.bf16.msra.mxu1 %v13768_v20  ;;  %v2479_v53 = vld [vmem:[#allocation2 + $0x398] sm:$0xff]  ;;  %v2401_v14 = vld [vmem:[#allocation2 + $0x128] sm:$0xff]  ;;  %v15260_v54 = vld [vmem:[%s14638_s9 + $0x70] sm:$0xff]  }
 0x201   : > { %2774 = vst [vmem:[#allocation2 + $0x2d0] sm:$0xff] %v2614_v12  ;;  %v2615_v17 = vadd.f32 %v1943_v7, %v15068_v32  ;;  %v2058_v55 = vpop.f32.mrf.mxu0  ;;  %12427 = vmatprep.subr.bf16.mxu1 %v13769_v1  ;;  %v2485_v1 = vld [vmem:[#allocation2 + $0x3c8] sm:$0xff] }
 0x202   : > { %v1945_v52 = vpop.f32.mrf.mxu1  ;;  %2697 = vst [vmem:[#allocation2 + $0x68] sm:$0xff] %v2537_v42  ;;  %v2541_v60 = vadd.f32 %v2381_v19, %v2058_v55  ;;  %v2402_v19 = vld [vmem:[#allocation2 + $0x130] sm:$0xff] }
 0x203   : > { %2775 = vst [vmem:[#allocation2 + $0x2d8] sm:$0xff] %v2615_v17  ;;  %v2619_v47 = vadd.f32 %v1945_v52, %v15070_v44  ;;  %v2060_v58 = vpop.f32.mrf.mxu0  ;;  %v4204_v44 = vlaneseq  ;;  %v2480_v52 = vld [vmem:[#allocation2 + $0x3a0] sm:$0xff] }
 0x204   : > { %v1947_v63 = vpop.f32.mrf.mxu1  ;;  %2701 = vst [vmem:[#allocation2 + $0x88] sm:$0xff] %v2541_v60  ;;  %v2542_v59 = vadd.f32 %v2382_v4, %v2060_v58  ;;  %12428 = vmatpush3.bf16.msra.mxu1 %v13770_v27  ;;  %v2484_v60 = vld [vmem:[#allocation2 + $0x3c0] sm:$0xff]  ;;  %v2406_v58 = vld [vmem:[#allocation2 + $0x150] sm:$0xff] }
 0x205   : > { %2779 = vst [vmem:[#allocation2 + $0x2f8] sm:$0xff] %v2619_v47  ;;  %v2620_v32 = vadd.f32 %v1947_v63, %v15072_v56  ;;  %v2064_v24 = vpop.f32.mrf.mxu0  ;;  %11715 = vmatmul.mubr.msk.bf16.gmra.mxu0 %vm723_vm1, %v13732_v5  ;;  %v15250_v3 = vshrl.u32 %v4204_v44, 7  ;;  %12435 = vmatprep.subr.bf16.mxu1 %v13771_v29  ;;  %v2490_v29 = vld [vmem:[#allocation2 + $0x3f0] sm:$0xff] }
 0x206   : > { %v1951_v22 = vpop.f32.mrf.mxu1  ;;  %11732 = vmatmul.mubr.msk.bf16.gmra.mxu1 %vm723_vm1, %v13732_v5  ;;  %2702 = vst [vmem:[#allocation2 + $0x90] sm:$0xff] %v2542_v59  ;;  %v2546_v38 = vadd.f32 %v2386_v2, %v2064_v24  ;;  %3307 = vmatprep.mubr.bf16.mxu0 %v14481_v18  ;;  %v2407_v24 = vld [vmem:[#allocation2 + $0x158] sm:$0xff] }
 0x207   : > { %2780 = vst [vmem:[#allocation2 + $0x300] sm:$0xff] %v2620_v32  ;;  %v2624_v8 = vadd.f32 %v1951_v22, %v15074_v9  ;;  %3500 = vmatprep.mubr.bf16.mxu1 %v14481_v18  ;;  %v2066_v61 = vpop.f32.mrf.mxu0  ;;  %v4222_v34 = vsub.s32 4, %v15250_v3 }
 0x208   : > { %v1953_v56 = vpop.f32.mrf.mxu1  ;;  %2706 = vst [vmem:[#allocation2 + $0xb0] sm:$0xff] %v2546_v38  ;;  %v2547_v16 = vadd.f32 %v2387_v15, %v2066_v61  ;;  %v15269_v61 = vld [vmem:[%s14638_s9 + $0x78] sm:$0xff]  }
 0x209   : > { %2784 = vst [vmem:[#allocation2 + $0x320] sm:$0xff] %v2624_v8  ;;  %v2625_v13 = vadd.f32 %v1953_v56, %v15083_v11  ;;  %v2068_v9 = vpop.f32.mrf.mxu0  ;;  %v15257_v50 = vrot.slane %v4202_v41, %v4222_v34  ;;  %v2489_v8 = vld [vmem:[#allocation2 + $0x3e8] sm:$0xff]  ;;  %v2411_v56 = vld [vmem:[#allocation2 + $0x178] sm:$0xff] }
 0x20a   : > { %v1955_v43 = vpop.f32.mrf.mxu1  ;;  %2707 = vst [vmem:[#allocation2 + $0xb8] sm:$0xff] %v2547_v16  ;;  %v2551_v23 = vadd.f32 %v2391_v21, %v2068_v9  ;;  %v2417_v34 = vld [vmem:[#allocation2 + $0x1a8] sm:$0xff] }
 0x20b   : > { %2785 = vst [vmem:[#allocation2 + $0x328] sm:$0xff] %v2625_v13  ;;  %v2629_v25 = vadd.f32 %v2469_v26, %v1955_v43  ;;  %v2070_v45 = vpop.f32.mrf.mxu0  ;;  %v2412_v26 = vld [vmem:[#allocation2 + $0x180] sm:$0xff] }
 0x20c   : > { %v1957_v31 = vpop.f32.mrf.mxu1  ;;  %2711 = vst [vmem:[#allocation2 + $0xd8] sm:$0xff] %v2551_v23  ;;  %v2552_v6 = vadd.f32 %v2392_v36, %v2070_v45 }
 0x20d   : > { %2789 = vst [vmem:[#allocation2 + $0x348] sm:$0xff] %v2629_v25  ;;  %v2630_v11 = vadd.f32 %v2470_v33, %v1957_v31  ;;  %v2074_v37 = vpop.f32.mrf.mxu0  ;;  %11716 = vmatmul.mubr.msk.bf16.gmra.mxu0 %vm723_vm1, %v13733_v0  ;;  %v2494_v25 = vld [vmem:[#allocation2 + $0x410] sm:$0xff]  ;;  %v2416_v31 = vld [vmem:[#allocation2 + $0x1a0] sm:$0xff] }
 0x20e   : > { %v1961_v28 = vpop.f32.mrf.mxu1  ;;  %11733 = vmatmul.mubr.msk.bf16.gmra.mxu1 %vm723_vm1, %v13733_v0  ;;  %2712 = vst [vmem:[#allocation2 + $0xe0] sm:$0xff] %v2552_v6  ;;  %v2556_v49 = vadd.f32 %v2396_v10, %v2074_v37  ;;  %3317 = vmatprep.mubr.bf16.mxu0 %v14481_v18  ;;  %v2499_v10 = vld [vmem:[#allocation2 + $0x438] sm:$0xff] }
 0x20f   : > { %2790 = vst [vmem:[#allocation2 + $0x350] sm:$0xff] %v2630_v11  ;;  %v2634_v35 = vadd.f32 %v2474_v30, %v1961_v28  ;;  %3510 = vmatprep.mubr.bf16.mxu1 %v14481_v18  ;;  %v2076_v46 = vpop.f32.mrf.mxu0  ;;  %v2495_v11 = vld [vmem:[#allocation2 + $0x418] sm:$0xff] }
 0x210   : > { %v1963_v39 = vpop.f32.mrf.mxu1  ;;  %2716 = vst [vmem:[#allocation2 + $0x100] sm:$0xff] %v2556_v49  ;;  %v2557_v62 = vadd.f32 %v2397_v48, %v2076_v46  ;;  %v15278_v49 = vld [vmem:[%s14638_s9 + $0x80] sm:$0xff]  }
 0x211   : > { %2794 = vst [vmem:[#allocation2 + $0x370] sm:$0xff] %v2634_v35  ;;  %v2635_v40 = vadd.f32 %v2475_v51, %v1963_v39  ;;  %v2078_v7 = vpop.f32.mrf.mxu0  ;;  %v2421_v35 = vld [vmem:[#allocation2 + $0x1c8] sm:$0xff]  ;;  %v2500_v48 = vld [vmem:[#allocation2 + $0x440] sm:$0xff] }
 0x212   : > { %v1965_v12 = vpop.f32.mrf.mxu1  ;;  %2717 = vst [vmem:[#allocation2 + $0x108] sm:$0xff] %v2557_v62  ;;  %v2561_v42 = vadd.f32 %v2401_v14, %v2078_v7  ;;  %v2422_v62 = vld [vmem:[#allocation2 + $0x1d0] sm:$0xff]  ;;  %v2504_v14 = vld [vmem:[#allocation2 + $0x460] sm:$0xff] }
 0x213   : > { %2795 = vst [vmem:[#allocation2 + $0x378] sm:$0xff] %v2635_v40  ;;  %v2639_v17 = vadd.f32 %v2479_v53, %v1965_v12  ;;  %v2080_v55 = vpop.f32.mrf.mxu0 }
 0x214   : > { %v1967_v57 = vpop.f32.mrf.mxu1  ;;  %2721 = vst [vmem:[#allocation2 + $0x128] sm:$0xff] %v2561_v42  ;;  %v2562_v20 = vadd.f32 %v2402_v19, %v2080_v55  ;;  %v2426_v42 = vld [vmem:[#allocation2 + $0x1f0] sm:$0xff]  ;;  %v2427_v55 = vld [vmem:[#allocation2 + $0x1f8] sm:$0xff] }
 0x215   : > { %2799 = vst [vmem:[#allocation2 + $0x398] sm:$0xff] %v2639_v17  ;;  %v2640_v5 = vadd.f32 %v2480_v52, %v1967_v57  ;;  %v2084_v63 = vpop.f32.mrf.mxu0  ;;  %11717 = vmatmul.mubr.msk.bf16.gmra.mxu0 %vm723_vm1, %v15260_v54 }
 0x216   : > { %v1971_v47 = vpop.f32.mrf.mxu1  ;;  %11734 = vmatmul.mubr.msk.bf16.gmra.mxu1 %vm723_vm1, %v15260_v54  ;;  %2722 = vst [vmem:[#allocation2 + $0x130] sm:$0xff] %v2562_v20  ;;  %v2566_v32 = vadd.f32 %v2406_v58, %v2084_v63  ;;  %3327 = vmatprep.mubr.bf16.mxu0 %v14481_v18 }
 0x217   : > { %2800 = vst [vmem:[#allocation2 + $0x3a0] sm:$0xff] %v2640_v5  ;;  %v2644_v4 = vadd.f32 %v2484_v60, %v1971_v47  ;;  %3520 = vmatprep.mubr.bf16.mxu1 %v14481_v18  ;;  %v2086_v22 = vpop.f32.mrf.mxu0  ;;  %v2505_v5 = vld [vmem:[#allocation2 + $0x468] sm:$0xff]  ;;  %v2431_v47 = vld [vmem:[#allocation2 + $0x218] sm:$0xff] }
 0x218   : > { %v1973_v59 = vpop.f32.mrf.mxu1  ;;  %2726 = vst [vmem:[#allocation2 + $0x150] sm:$0xff] %v2566_v32  ;;  %v2567_v44 = vadd.f32 %v2407_v24, %v2086_v22 }
 0x219   : > { %2804 = vst [vmem:[#allocation2 + $0x3c0] sm:$0xff] %v2644_v4  ;;  %v2645_v2 = vadd.f32 %v2485_v1, %v1973_v59  ;;  %v2088_v38 = vpop.f32.mrf.mxu0  ;;  %v2509_v4 = vld [vmem:[#allocation2 + $0x488] sm:$0xff]  ;;  %v2432_v59 = vld [vmem:[#allocation2 + $0x220] sm:$0xff] }
 0x21a   : > { %v1975_v27 = vpop.f32.mrf.mxu1  ;;  %2727 = vst [vmem:[#allocation2 + $0x158] sm:$0xff] %v2567_v44  ;;  %v2571_v13 = vadd.f32 %v2411_v56, %v2088_v38  ;;  %v15287_v1 = vld [vmem:[%s14638_s9 + $0x88] sm:$0xff]  }
 0x21b   : > { %2805 = vst [vmem:[#allocation2 + $0x3c8] sm:$0xff] %v2645_v2  ;;  %v2649_v15 = vadd.f32 %v2489_v8, %v1975_v27  ;;  %v2090_v43 = vpop.f32.mrf.mxu0  ;;  %v2436_v27 = vld [vmem:[#allocation2 + $0x240] sm:$0xff] }
 0x21c   : > { %v1977_v16 = vpop.f32.mrf.mxu1  ;;  %2731 = vst [vmem:[#allocation2 + $0x178] sm:$0xff] %v2571_v13  ;;  %v2572_v21 = vadd.f32 %v2412_v26, %v2090_v43  ;;  %v14320_v26 = vld [vmem:[%s14638_s9 + $0x10] sm:$0xff]  }
 0x21d   : > { %2809 = vst [vmem:[#allocation2 + $0x3e8] sm:$0xff] %v2649_v15  ;;  %v2650_v9 = vadd.f32 %v2490_v29, %v1977_v16  ;;  %v2094_v23 = vpop.f32.mrf.mxu0  ;;  %11718 = vmatmul.mubr.msk.bf16.gmra.mxu0 %vm723_vm1, %v15269_v61  ;;  %v2514_v15 = vld [vmem:[#allocation2 + $0x4b0] sm:$0xff]  ;;  %v2437_v16 = vld [vmem:[#allocation2 + $0x248] sm:$0xff] }
 0x21e   : > { %v1981_v0 = vpop.f32.mrf.mxu1  ;;  %11735 = vmatmul.mubr.msk.bf16.gmra.mxu1 %vm723_vm1, %v15269_v61  ;;  %2732 = vst [vmem:[#allocation2 + $0x180] sm:$0xff] %v2572_v21  ;;  %v2576_v45 = vadd.f32 %v2416_v31, %v2094_v23  ;;  %3337 = vmatprep.mubr.bf16.mxu0 %v14481_v18  ;;  %v2515_v21 = vld [vmem:[#allocation2 + $0x4b8] sm:$0xff] }
 0x21f   : > { %2810 = vst [vmem:[#allocation2 + $0x3f0] sm:$0xff] %v2650_v9  ;;  %v2654_v33 = vadd.f32 %v2494_v25, %v1981_v0  ;;  %3530 = vmatprep.mubr.bf16.mxu1 %v14481_v18  ;;  %v2096_v6 = vpop.f32.mrf.mxu0  ;;  %v2441_v25 = vld [vmem:[#allocation2 + $0x268] sm:$0xff] }
 0x220   : > { %v1983_v36 = vpop.f32.mrf.mxu1  ;;  %2736 = vst [vmem:[#allocation2 + $0x1a0] sm:$0xff] %v2576_v45  ;;  %v2577_v30 = vadd.f32 %v2417_v34, %v2096_v6  ;;  %v2519_v45 = vld [vmem:[#allocation2 + $0x4d8] sm:$0xff] }
 0x221   : > { %2814 = vst [vmem:[#allocation2 + $0x410] sm:$0xff] %v2654_v33  ;;  %v2655_v28 = vadd.f32 %v2495_v11, %v1983_v36  ;;  %v2098_v41 = vpop.f32.mrf.mxu0  ;;  %v2442_v11 = vld [vmem:[#allocation2 + $0x270] sm:$0xff]  ;;  %v13744_v6 = vld [vmem:[#allocation8 + $0x38] sm:$0xff]  }
 0x222   : > { %v1985_v37 = vpop.f32.mrf.mxu1  ;;  %2737 = vst [vmem:[#allocation2 + $0x1a8] sm:$0xff] %v2577_v30  ;;  %v2581_v51 = vadd.f32 %v2421_v35, %v2098_v41  ;;  %v2446_v41 = vld [vmem:[#allocation2 + $0x290] sm:$0xff] }
 0x223   : > { %2815 = vst [vmem:[#allocation2 + $0x418] sm:$0xff] %v2655_v28  ;;  %v2659_v39 = vadd.f32 %v2499_v10, %v1985_v37  ;;  %v2100_v40 = vpop.f32.mrf.mxu0  ;;  %v2520_v37 = vld [vmem:[#allocation2 + $0x4e0] sm:$0xff]  ;;  %v13745_v35 = vld [vmem:[#allocation8 + $0x70] sm:$0xff]  }
 0x224   : > { %v1987_v46 = vpop.f32.mrf.mxu1  ;;  %2741 = vst [vmem:[#allocation2 + $0x1c8] sm:$0xff] %v2581_v51  ;;  %v2582_v53 = vadd.f32 %v2422_v62, %v2100_v40  ;;  %v2378_v40 = vld [vmem:[#allocation2 + $0x70] sm:$0xff]  ;;  %v14321_v62 = vld [vmem:[%s14638_s9 + $0x18] sm:$0xff]  }
 0x225   : > { %2819 = vst [vmem:[#allocation2 + $0x438] sm:$0xff] %v2659_v39  ;;  %v2660_v12 = vadd.f32 %v2500_v48, %v1987_v46  ;;  %v2104_v17 = vpop.f32.mrf.mxu0  ;;  %11719 = vmatmul.mubr.msk.bf16.gmra.mxu0 %vm723_vm1, %v15278_v49 }
 0x226   : > { %v1991_v7 = vpop.f32.mrf.mxu1  ;;  %11736 = vmatmul.mubr.msk.bf16.gmra.mxu1 %vm723_vm1, %v15278_v49  ;;  %2742 = vst [vmem:[#allocation2 + $0x1d0] sm:$0xff] %v2582_v53  ;;  %v2586_v52 = vadd.f32 %v2426_v42, %v2104_v17  ;;  %3347 = vmatprep.mubr.bf16.mxu0 %v14481_v18  ;;  %v13746_v53 = vld [vmem:[#allocation8 + $0x30] sm:$0xff]  }
 0x227   : > { %2820 = vst [vmem:[#allocation2 + $0x440] sm:$0xff] %v2660_v12  ;;  %v2664_v57 = vadd.f32 %v2504_v14, %v1991_v7  ;;  %3540 = vmatprep.mubr.bf16.mxu1 %v14481_v18  ;;  %v2106_v20 = vpop.f32.mrf.mxu0  ;;  %v2510_v18 = vld [vmem:[#allocation2 + $0x490] sm:$0xff]  ;;  %v2447_v12 = vld [vmem:[#allocation2 + $0x298] sm:$0xff] }
 0x228   : > { %v1993_v19 = vpop.f32.mrf.mxu1  ;;  %2746 = vst [vmem:[#allocation2 + $0x1f0] sm:$0xff] %v2586_v52  ;;  %v2587_v63 = vadd.f32 %v2427_v55, %v2106_v20  ;;  %v14322_v17 = vld [vmem:[%s14638_s9 + $0x20] sm:$0xff]   ;;  %v2451_v55 = vld [vmem:[#allocation2 + $0x2b8] sm:$0xff] }
 0x229   : > { %2824 = vst [vmem:[#allocation2 + $0x460] sm:$0xff] %v2664_v57  ;;  %v2665_v60 = vadd.f32 %v2505_v5, %v1993_v19  ;;  %v2108_v32 = vpop.f32.mrf.mxu0  ;;  %v2368_v52 = vld [vmem:[#allocation2 + $0x20] sm:$0xff]  ;;  %v13747_v19 = vld [vmem:[#allocation8 + $0x68] sm:$0xff]  }
 0x22a   : > { %v1995_v58 = vpop.f32.mrf.mxu1  ;;  %2747 = vst [vmem:[#allocation2 + $0x1f8] sm:$0xff] %v2587_v63  ;;  %v2591_v24 = vadd.f32 %v2431_v47, %v2108_v32  ;;  %v2383_v63 = vld [vmem:[#allocation2 + $0x98] sm:$0xff] }
 0x22b   : > { %2825 = vst [vmem:[#allocation2 + $0x468] sm:$0xff] %v2665_v60  ;;  %v2669_v22 = vadd.f32 %v2509_v4, %v1995_v58  ;;  %v2110_v44 = vpop.f32.mrf.mxu0  ;;  %v2452_v58 = vld [vmem:[#allocation2 + $0x2c0] sm:$0xff]  ;;  %v13748_v4 = vld [vmem:[#allocation8 + $0x28] sm:$0xff]  }
 0x22c   : > { %v1997_v2 = vpop.f32.mrf.mxu1  ;;  %2751 = vst [vmem:[#allocation2 + $0x218] sm:$0xff] %v2591_v24  ;;  %v2592_v38 = vadd.f32 %v2432_v59, %v2110_v44  ;;  %v13749_v44 = vld [vmem:[#allocation8 + $0x60] sm:$0xff]  }
 0x22d   : > { %2829 = vst [vmem:[#allocation2 + $0x488] sm:$0xff] %v2669_v22  ;;  %v2670_v8 = vadd.f32 %v2510_v18, %v1997_v2  ;;  %v2114_v13 = vpop.f32.mrf.mxu0  ;;  %11720 = vmatmul.mubr.msk.bf16.gmra.mxu0 %vm723_vm1, %v15287_v1  ;;  %v2373_v2 = vld [vmem:[#allocation2 + $0x48] sm:$0xff]  ;;  %v2456_v18 = vld [vmem:[#allocation2 + $0x2e0] sm:$0xff] }
 0x22e   : > { %v2001_v56 = vpop.f32.mrf.mxu1  ;;  %11737 = vmatmul.mubr.msk.bf16.gmra.mxu1 %vm723_vm1, %v15287_v1  ;;  %2752 = vst [vmem:[#allocation2 + $0x220] sm:$0xff] %v2592_v38  ;;  %v2596_v43 = vadd.f32 %v2436_v27, %v2114_v13  ;;  %13291 = vmatprep.mubr.msk.bf16.mxu0 %vm723_vm1, %v14320_v26  ;;  %v14323_v13 = vld [vmem:[%s14638_s9 + $0x28] sm:$0xff]  }
 0x22f   : > { %2830 = vst [vmem:[#allocation2 + $0x490] sm:$0xff] %v2670_v8  ;;  %v2674_v29 = vadd.f32 %v2514_v15, %v2001_v56  ;;  %v2116_v0 = vpop.f32.mrf.mxu0  ;;  %v2398_v15 = vld [vmem:[#allocation2 + $0x110] sm:$0xff] }
 0x230   : > { %v2003_v9 = vpop.f32.mrf.mxu1  ;;  %2756 = vst [vmem:[#allocation2 + $0x240] sm:$0xff] %v2596_v43  ;;  %v2597_v31 = vadd.f32 %v2437_v16, %v2116_v0  ;;  %v2457_v16 = vld [vmem:[#allocation2 + $0x2e8] sm:$0xff] }
 0x231   : > { %2834 = vst [vmem:[#allocation2 + $0x4b0] sm:$0xff] %v2674_v29  ;;  %v2675_v23 = vadd.f32 %v2515_v21, %v2003_v9  ;;  %v2118_v36 = vpop.f32.mrf.mxu0  ;;  %v13751_v29 = vld [vmem:[#allocation8 + $0x20] sm:$0xff]  }
 0x232   : > { %v2005_v33 = vpop.f32.mrf.mxu1  ;;  %2757 = vst [vmem:[#allocation2 + $0x248] sm:$0xff] %v2597_v31  ;;  %v2601_v28 = vadd.f32 %v2441_v25, %v2118_v36  ;;  %v14324_v9 = vld [vmem:[%s14638_s9 + $0x30] sm:$0xff]  }
 0x233   : > { %2835 = vst [vmem:[#allocation2 + $0x4b8] sm:$0xff] %v2675_v23  ;;  %v2679_v34 = vadd.f32 %v2519_v45, %v2005_v33  ;;  %v2120_v10 = vpop.f32.mrf.mxu0  ;;  %v2388_v25 = vld [vmem:[#allocation2 + $0xc0] sm:$0xff]  ;;  %v2461_v23 = vld [vmem:[#allocation2 + $0x308] sm:$0xff] }
 0x234   : > { %v2007_v30 = vpop.f32.mrf.mxu1  ;;  %2761 = vst [vmem:[#allocation2 + $0x268] sm:$0xff] %v2601_v28  ;;  %v2602_v51 = vadd.f32 %v2442_v11, %v2120_v10  ;;  %v13753_v31 = vld [vmem:[#allocation8 + $0x58] sm:$0xff]  }
 0x235   : > { %2839 = vst [vmem:[#allocation2 + $0x4d8] sm:$0xff] %v2679_v34  ;;  %v2680_v39 = vadd.f32 %v2520_v37, %v2007_v30  ;;  %v2124_v46 = vpop.f32.mrf.mxu0  ;;  %13292 = vmatmul.mubr.msk.bf16.vlgmr.msra.gmra.mxu0 %vm723_vm1, %v14321_v62  ;;  %v2462_v34 = vld [vmem:[#allocation2 + $0x310] sm:$0xff]  ;;  %v13754_v28 = vld [vmem:[#allocation8 + $0x18] sm:$0xff]  }
 0x236   : > { %v13251_v48 = vpop.f32.mrf.mxu1  ;;  %2762 = vst [vmem:[#allocation2 + $0x270] sm:$0xff] %v2602_v51  ;;  %v2606_v7 = vadd.f32 %v2446_v41, %v2124_v46  ;;  %13295 = vmatprep.mubr.msk.bf16.mxu0 %vm723_vm1, %v14322_v17  ;;  %12463 = vmatpush3.bf16.msra.mxu0 %v13744_v6  ;;  %v2403_v6 = vld [vmem:[#allocation2 + $0x138] sm:$0xff] }
 0x237   : > { %2840 = vst [vmem:[#allocation2 + $0x4e0] sm:$0xff] %v2680_v39  ;;  %v2538_v14 = vadd.f32 %v13251_v48, %v2378_v40  ;;  %v2126_v42 = vpop.f32.mrf.mxu0  ;;  %12464 = vmatprep.subr.bf16.mxu0 %v13745_v35  ;;  %v2393_v35 = vld [vmem:[#allocation2 + $0xe8] sm:$0xff]  ;;  %v2466_v39 = vld [vmem:[#allocation2 + $0x330] sm:$0xff] }
 0x238   : > { %v2237_v57 = vpop.f32.mrf.mxu1  ;;  %2766 = vst [vmem:[#allocation2 + $0x290] sm:$0xff] %v2606_v7  ;;  %v2607_v5 = vadd.f32 %v2447_v12, %v2126_v42  ;;  %v13757_v51 = vld [vmem:[#allocation8 + $0x50] sm:$0xff]  }
 0x239   : > { %2698 = vst.msk [vmem:[#allocation2 + $0x70] sm:$0xff] %vm1339_vm2, %v2538_v14  ;;  %v2528_v20 = vadd.f32 %v2368_v52, %v2237_v57  ;;  %v2128_v47 = vpop.f32.mrf.mxu0  ;;  %v2418_v12 = vld [vmem:[#allocation2 + $0x1b0] sm:$0xff]  ;;  %v2467_v7 = vld [vmem:[#allocation2 + $0x338] sm:$0xff] }
 0x23a   : > { %v13252_v60 = vpop.f32.mrf.mxu1  ;;  %2767 = vst [vmem:[#allocation2 + $0x298] sm:$0xff] %v2607_v5  ;;  %v2611_v32 = vadd.f32 %v2451_v55, %v2128_v47  ;;  %12465 = vmatpush3.bf16.msra.mxu0 %v13746_v53  ;;  %v14325_v53 = vld [vmem:[%s14638_s9 + $0x38] sm:$0xff]   ;;  %v14326_v57 = vld [vmem:[%s14638_s9 + $0x40] sm:$0xff]  }
 0x23b   : > { %2688 = vst.msk [vmem:[#allocation2 + $0x20] sm:$0xff] %vm1339_vm2, %v2528_v20  ;;  %v2543_v59 = vadd.f32 %v13252_v60, %v2383_v63  ;;  %v2130_v22 = vpop.f32.mrf.mxu0  ;;  %12466 = vmatprep.subr.bf16.mxu0 %v13747_v19  ;;  %v13758_v14 = vld [vmem:[#allocation8 + $0x10] sm:$0xff]   ;;  %v2408_v19 = vld [vmem:[#allocation2 + $0x160] sm:$0xff]  ;;  %v13761_v20 = vld [vmem:[#allocation8 + $0x48] sm:$0xff]  }
 0x23c   : > { %v2240_v24 = vpop.f32.mrf.mxu1  ;;  %2771 = vst [vmem:[#allocation2 + $0x2b8] sm:$0xff] %v2611_v32  ;;  %v2612_v27 = vadd.f32 %v2452_v58, %v2130_v22  ;;  %v2471_v5 = vld [vmem:[#allocation2 + $0x358] sm:$0xff]  ;;  %v2472_v32 = vld [vmem:[#allocation2 + $0x360] sm:$0xff] }
 0x23d   : > { %2703 = vst.msk [vmem:[#allocation2 + $0x98] sm:$0xff] %vm1339_vm2, %v2543_v59  ;;  %v2533_v8 = vadd.f32 %v2373_v2, %v2240_v24  ;;  %v2134_v38 = vpop.f32.mrf.mxu0  ;;  %13296 = vmatmul.mubr.msk.bf16.gmra.mxu0 %vm723_vm1, %v14323_v13  ;;  %v13762_v59 = vld [vmem:[#allocation8 + $0x8] sm:$0xff]  }
 0x23e   : > { %v13255_v56 = vpop.f32.mrf.mxu1  ;;  %2772 = vst [vmem:[#allocation2 + $0x2c0] sm:$0xff] %v2612_v27  ;;  %v2616_v43 = vadd.f32 %v2456_v18, %v2134_v38  ;;  %13299 = vmatprep.mubr.msk.bf16.mxu0 %vm723_vm1, %v14324_v9  ;;  %12467 = vmatpush3.bf16.msra.mxu0 %v13748_v4  ;;  %v2423_v4 = vld [vmem:[#allocation2 + $0x1d8] sm:$0xff]  ;;  %v2476_v27 = vld [vmem:[#allocation2 + $0x380] sm:$0xff] }
 0x23f   : > { %2693 = vst.msk [vmem:[#allocation2 + $0x48] sm:$0xff] %vm1339_vm2, %v2533_v8  ;;  %v2558_v26 = vadd.f32 %v13255_v56, %v2398_v15  ;;  %v2136_v21 = vpop.f32.mrf.mxu0  ;;  %12468 = vmatprep.subr.bf16.mxu0 %v13749_v44  ;;  %v2413_v44 = vld [vmem:[#allocation2 + $0x188] sm:$0xff] }
 0x240   : > { %v2253_v0 = vpop.f32.mrf.mxu1  ;;  %2776 = vst [vmem:[#allocation2 + $0x2e0] sm:$0xff] %v2616_v43  ;;  %v2617_v33 = vadd.f32 %v2457_v16, %v2136_v21  ;;  %v13765_v8 = vld [vmem:[#allocation8 + $0x40] sm:$0xff]   ;;  %v2438_v16 = vld [vmem:[#allocation2 + $0x250] sm:$0xff] }
 0x241   : > { %2718 = vst.msk [vmem:[#allocation2 + $0x110] sm:$0xff] %vm1339_vm2, %v2558_v26  ;;  %v2548_v45 = vadd.f32 %v2388_v25, %v2253_v0  ;;  %v2138_v36 = vpop.f32.mrf.mxu0  ;;  %v13766_v43 = vld [vmem:[#allocation8] sm:$0xff]  }
 0x242   : > { %v13256_v11 = vpop.f32.mrf.mxu1  ;;  %2777 = vst [vmem:[#allocation2 + $0x2e8] sm:$0xff] %v2617_v33  ;;  %v2621_v30 = vadd.f32 %v2461_v23, %v2138_v36  ;;  %12469 = vmatpush3.bf16.msra.mxu0 %v13751_v29  ;;  %v14327_v29 = vld [vmem:[%s14638_s9 + $0x48] sm:$0xff]   ;;  %v14328_v21 = vld [vmem:[%s14638_s9 + $0x50] sm:$0xff]  }
 0x243   : > { %2708 = vst.msk [vmem:[#allocation2 + $0xc0] sm:$0xff] %vm1339_vm2, %v2548_v45  ;;  %v2563_v37 = vadd.f32 %v13256_v11, %v2403_v6  ;;  %v2140_v10 = vpop.f32.mrf.mxu0  ;;  %12470 = vmatprep.subr.bf16.mxu0 %v13753_v31  ;;  %v2477_v25 = vld [vmem:[#allocation2 + $0x388] sm:$0xff]  ;;  %v2428_v31 = vld [vmem:[#allocation2 + $0x200] sm:$0xff] }
 0x244   : > { %v2256_v41 = vpop.f32.mrf.mxu1  ;;  %2781 = vst [vmem:[#allocation2 + $0x308] sm:$0xff] %v2621_v30  ;;  %v2622_v46 = vadd.f32 %v2462_v34, %v2140_v10  ;;  %v2481_v11 = vld [vmem:[#allocation2 + $0x3a8] sm:$0xff]  ;;  %v2443_v34 = vld [vmem:[#allocation2 + $0x278] sm:$0xff]  ;;  %v2482_v10 = vld [vmem:[#allocation2 + $0x3b0] sm:$0xff] }
 0x245   : > { %2723 = vst.msk [vmem:[#allocation2 + $0x138] sm:$0xff] %vm1339_vm2, %v2563_v37  ;;  %v2553_v48 = vadd.f32 %v2393_v35, %v2256_v41  ;;  %v2144_v40 = vpop.f32.mrf.mxu0  ;;  %13300 = vmatmul.mubr.msk.bf16.gmra.mxu0 %vm723_vm1, %v14325_v53  ;;  %v2433_v35 = vld [vmem:[#allocation2 + $0x228] sm:$0xff] }
 0x246   : > { %v13259_v62 = vpop.f32.mrf.mxu1  ;;  %2782 = vst [vmem:[#allocation2 + $0x310] sm:$0xff] %v2622_v46  ;;  %v2626_v17 = vadd.f32 %v2466_v39, %v2144_v40  ;;  %13303 = vmatprep.mubr.msk.bf16.mxu0 %vm723_vm1, %v14326_v57  ;;  %12471 = vmatpush3.bf16.msra.mxu0 %v13754_v28 }
 0x247   : > { %2713 = vst.msk [vmem:[#allocation2 + $0xe8] sm:$0xff] %vm1339_vm2, %v2553_v48  ;;  %v2578_v42 = vadd.f32 %v13259_v62, %v2418_v12  ;;  %v2146_v52 = vpop.f32.mrf.mxu0  ;;  %12472 = vmatprep.subr.bf16.mxu0 %v13757_v51  ;;  %v2486_v48 = vld [vmem:[#allocation2 + $0x3d0] sm:$0xff]  ;;  %v14329_v12 = vld [vmem:[%s14638_s9 + $0x58] sm:$0xff]  }
 0x248   : > { %v2269_v55 = vpop.f32.mrf.mxu1  ;;  %2786 = vst [vmem:[#allocation2 + $0x330] sm:$0xff] %v2626_v17  ;;  %v2627_v47 = vadd.f32 %v2467_v7, %v2146_v52  ;;  %v2458_v62 = vld [vmem:[#allocation2 + $0x2f0] sm:$0xff]  ;;  %v2448_v52 = vld [vmem:[#allocation2 + $0x2a0] sm:$0xff] }
 0x249   : > { %2738 = vst.msk [vmem:[#allocation2 + $0x1b0] sm:$0xff] %vm1339_vm2, %v2578_v42  ;;  %v2568_v60 = vadd.f32 %v2408_v19, %v2269_v55  ;;  %v2148_v63 = vpop.f32.mrf.mxu0  ;;  %v2487_v42 = vld [vmem:[#allocation2 + $0x3d8] sm:$0xff] }
 0x24a   : > { %v13260_v58 = vpop.f32.mrf.mxu1  ;;  %2787 = vst [vmem:[#allocation2 + $0x338] sm:$0xff] %v2627_v47  ;;  %v2631_v22 = vadd.f32 %v2471_v5, %v2148_v63  ;;  %12473 = vmatpush3.bf16.msra.mxu0 %v13758_v14  ;;  %v14330_v14 = vld [vmem:[%s14638_s9 + $0x60] sm:$0xff]  }
 0x24b   : > { %2728 = vst.msk [vmem:[#allocation2 + $0x160] sm:$0xff] %vm1339_vm2, %v2568_v60  ;;  %v2583_v24 = vadd.f32 %v13260_v58, %v2423_v4  ;;  %v2150_v2 = vpop.f32.mrf.mxu0  ;;  %12474 = vmatprep.subr.bf16.mxu0 %v13761_v20  ;;  %v2491_v20 = vld [vmem:[#allocation2 + $0x3f8] sm:$0xff] }
 0x24c   : > { %v2272_v18 = vpop.f32.mrf.mxu1  ;;  %2791 = vst [vmem:[#allocation2 + $0x358] sm:$0xff] %v2631_v22  ;;  %v2632_v38 = vadd.f32 %v2472_v32, %v2150_v2  ;;  %v2463_v60 = vld [vmem:[#allocation2 + $0x318] sm:$0xff]  ;;  %v2492_v32 = vld [vmem:[#allocation2 + $0x400] sm:$0xff]  ;;  %v2453_v22 = vld [vmem:[#allocation2 + $0x2c8] sm:$0xff] }
 0x24d   : > { %2743 = vst.msk [vmem:[#allocation2 + $0x1d8] sm:$0xff] %vm1339_vm2, %v2583_v24  ;;  %v2573_v56 = vadd.f32 %v2413_v44, %v2272_v18  ;;  %v2154_v15 = vpop.f32.mrf.mxu0  ;;  %13304 = vmatmul.mubr.msk.bf16.gmra.mxu0 %vm723_vm1, %v14327_v29  ;;  %v2496_v44 = vld [vmem:[#allocation2 + $0x420] sm:$0xff] }
 0x24e   : > { %v13263_v13 = vpop.f32.mrf.mxu1  ;;  %2792 = vst [vmem:[#allocation2 + $0x360] sm:$0xff] %v2632_v38  ;;  %v2636_v26 = vadd.f32 %v2476_v27, %v2154_v15  ;;  %13307 = vmatprep.mubr.msk.bf16.mxu0 %vm723_vm1, %v14328_v21  ;;  %12475 = vmatpush3.bf16.msra.mxu0 %v13762_v59  ;;  %v14331_v38 = vld [vmem:[%s14638_s9 + $0x68] sm:$0xff]  }
 0x24f   : > { %2733 = vst.msk [vmem:[#allocation2 + $0x188] sm:$0xff] %vm1339_vm2, %v2573_v56  ;;  %v2598_v9 = vadd.f32 %v13263_v13, %v2438_v16  ;;  %v2156_v0 = vpop.f32.mrf.mxu0  ;;  %12476 = vmatprep.subr.bf16.mxu0 %v13765_v8  ;;  %v2478_v8 = vld [vmem:[#allocation2 + $0x390] sm:$0xff]  ;;  %v2497_v16 = vld [vmem:[#allocation2 + $0x428] sm:$0xff] }
 0x250   : > { %v2285_v23 = vpop.f32.mrf.mxu1  ;;  %2796 = vst [vmem:[#allocation2 + $0x380] sm:$0xff] %v2636_v26  ;;  %v2637_v33 = vadd.f32 %v2477_v25, %v2156_v0  ;;  %v2501_v0 = vld [vmem:[#allocation2 + $0x448] sm:$0xff] }
 0x251   : > { %2758 = vst.msk [vmem:[#allocation2 + $0x250] sm:$0xff] %vm1339_vm2, %v2598_v9  ;;  %v2588_v45 = vadd.f32 %v2428_v31, %v2285_v23  ;;  %v2158_v36 = vpop.f32.mrf.mxu0  ;;  %v2483_v23 = vld [vmem:[#allocation2 + $0x3b8] sm:$0xff] }
 0x252   : > { %v13264_v6 = vpop.f32.mrf.mxu1  ;;  %2797 = vst [vmem:[#allocation2 + $0x388] sm:$0xff] %v2637_v33  ;;  %v2641_v28 = vadd.f32 %v2481_v11, %v2158_v36  ;;  %12477 = vmatpush3.bf16.msra.mxu0 %v13766_v43  ;;  %v2468_v43 = vld [vmem:[#allocation2 + $0x340] sm:$0xff]  ;;  %v2473_v11 = vld [vmem:[#allocation2 + $0x368] sm:$0xff] }
 0x253   : > { %2748 = vst.msk [vmem:[#allocation2 + $0x200] sm:$0xff] %vm1339_vm2, %v2588_v45  ;;  %v2603_v30 = vadd.f32 %v13264_v6, %v2443_v34  ;;  %v2160_v37 = vpop.f32.mrf.mxu0 }
 0x254   : > { %v2288_v41 = vpop.f32.mrf.mxu1  ;;  %2801 = vst [vmem:[#allocation2 + $0x3a8] sm:$0xff] %v2641_v28  ;;  %v2642_v39 = vadd.f32 %v2482_v10, %v2160_v37  ;;  %v2498_v10 = vld [vmem:[#allocation2 + $0x430] sm:$0xff] }
 0x255   : > { %2763 = vst.msk [vmem:[#allocation2 + $0x278] sm:$0xff] %vm1339_vm2, %v2603_v30  ;;  %v2593_v51 = vadd.f32 %v2433_v35, %v2288_v41  ;;  %v2164_v46 = vpop.f32.mrf.mxu0  ;;  %13308 = vmatmul.mubr.msk.bf16.gmra.mxu0 %vm723_vm1, %v14329_v12  ;;  %v2506_v30 = vld [vmem:[#allocation2 + $0x470] sm:$0xff] }
 0x256   : > { %v13267_v40 = vpop.f32.mrf.mxu1  ;;  %2802 = vst [vmem:[#allocation2 + $0x3b0] sm:$0xff] %v2642_v39  ;;  %v2646_v53 = vadd.f32 %v2486_v48, %v2164_v46  ;;  %13311 = vmatprep.mubr.msk.bf16.mxu0 %vm723_vm1, %v14330_v14  ;;  %v2488_v48 = vld [vmem:[#allocation2 + $0x3e0] sm:$0xff] }
 0x257   : > { %2753 = vst.msk [vmem:[#allocation2 + $0x228] sm:$0xff] %vm1339_vm2, %v2593_v51  ;;  %v2618_v7 = vadd.f32 %v13267_v40, %v2458_v62  ;;  %v2166_v17 = vpop.f32.mrf.mxu0  ;;  %v2507_v51 = vld [vmem:[#allocation2 + $0x478] sm:$0xff] }
 0x258   : > { %v2301_v57 = vpop.f32.mrf.mxu1  ;;  %2806 = vst [vmem:[#allocation2 + $0x3d0] sm:$0xff] %v2646_v53  ;;  %v2647_v55 = vadd.f32 %v2487_v42, %v2166_v17  ;;  %v2511_v53 = vld [vmem:[#allocation2 + $0x498] sm:$0xff] }
 0x259   : > { %2778 = vst.msk [vmem:[#allocation2 + $0x2f0] sm:$0xff] %vm1339_vm2, %v2618_v7  ;;  %v2608_v19 = vadd.f32 %v2448_v52, %v2301_v57  ;;  %v2168_v5 = vpop.f32.mrf.mxu0  ;;  %v2503_v7 = vld [vmem:[#allocation2 + $0x458] sm:$0xff]  ;;  %v2493_v52 = vld [vmem:[#allocation2 + $0x408] sm:$0xff] }
 0x25a   : > { %v13268_v47 = vpop.f32.mrf.mxu1  ;;  %2807 = vst [vmem:[#allocation2 + $0x3d8] sm:$0xff] %v2647_v55  ;;  %v2651_v63 = vadd.f32 %v2491_v20, %v2168_v5  ;;  %v2516_v20 = vld [vmem:[#allocation2 + $0x4c0] sm:$0xff] }
 0x25b   : > { %2768 = vst.msk [vmem:[#allocation2 + $0x2a0] sm:$0xff] %vm1339_vm2, %v2608_v19  ;;  %v2623_v58 = vadd.f32 %v13268_v47, %v2463_v60  ;;  %v2170_v4 = vpop.f32.mrf.mxu0  ;;  %v2518_v60 = vld [vmem:[#allocation2 + $0x4d0] sm:$0xff] }
 0x25c   : > { %v2304_v59 = vpop.f32.mrf.mxu1  ;;  %2811 = vst [vmem:[#allocation2 + $0x3f8] sm:$0xff] %v2651_v63  ;;  %v2652_v24 = vadd.f32 %v2492_v32, %v2170_v4  ;;  %v2517_v32 = vld [vmem:[#allocation2 + $0x4c8] sm:$0xff] }
 0x25d   : > { %2783 = vst.msk [vmem:[#allocation2 + $0x318] sm:$0xff] %vm1339_vm2, %v2623_v58  ;;  %v2613_v2 = vadd.f32 %v2453_v22, %v2304_v59  ;;  %v2174_v18 = vpop.f32.mrf.mxu0  ;;  %13312 = vmatmul.mubr.msk.bf16.gmra.mxu0 %vm723_vm1, %v14331_v38  ;;  %v2508_v22 = vld [vmem:[#allocation2 + $0x480] sm:$0xff] }
 0x25e   : > { %v13271_v27 = vpop.f32.mrf.mxu1  ;;  %2812 = vst [vmem:[#allocation2 + $0x400] sm:$0xff] %v2652_v24  ;;  %v2656_v56 = vadd.f32 %v2496_v44, %v2174_v18  ;;  %13315 = vmatprep.mubr.msk.bf16.mxu0 %vm723_vm1, %v15260_v54  ;;  %v2502_v54 = vld [vmem:[#allocation2 + $0x450] sm:$0xff]  ;;  %v2521_v44 = vld [vmem:[#allocation2 + $0x4e8] sm:$0xff] }
 0x25f   : > { %2773 = vst.msk [vmem:[#allocation2 + $0x2c8] sm:$0xff] %vm1339_vm2, %v2613_v2  ;;  %v2638_v15 = vadd.f32 %v13271_v27, %v2478_v8  ;;  %v2176_v13 = vpop.f32.mrf.mxu0  ;;  %v2523_v8 = vld [vmem:[#allocation2 + $0x4f8] sm:$0xff] }
 0x260   : > { %v2317_v29 = vpop.f32.mrf.mxu1  ;;  %2816 = vst [vmem:[#allocation2 + $0x420] sm:$0xff] %v2656_v56  ;;  %v2657_v26 = vadd.f32 %v2497_v16, %v2176_v13  ;;  %v2513_v16 = vld [vmem:[#allocation2 + $0x4a8] sm:$0xff] }
 0x261   : > { %2798 = vst.msk [vmem:[#allocation2 + $0x390] sm:$0xff] %vm1339_vm2, %v2638_v15  ;;  %v2628_v9 = vadd.f32 %v2468_v43, %v2317_v29  ;;  %v2178_v21 = vpop.f32.mrf.mxu0  ;;  %v2522_v15 = vld [vmem:[#allocation2 + $0x4f0] sm:$0xff] }
 0x262   : > { %v13272_v25 = vpop.f32.mrf.mxu1  ;;  %2817 = vst [vmem:[#allocation2 + $0x428] sm:$0xff] %v2657_v26  ;;  %v2661_v31 = vadd.f32 %v2501_v0, %v2178_v21  ;;  %v3714_v0 = vld [vmem:[#allocation2 + $0x10] sm:$0xff] }
 0x263   : > { %2788 = vst.msk [vmem:[#allocation2 + $0x340] sm:$0xff] %vm1339_vm2, %v2628_v9  ;;  %v2643_v33 = vadd.f32 %v13272_v25, %v2483_v23  ;;  %v2180_v45 = vpop.f32.mrf.mxu0  ;;  %v3712_v9 = vld [vmem:[#allocation2] sm:$0xff]  ;;  %v4210_v25 = vsub.s32 1, %v15250_v3 }
 0x264   : > { %v2320_v36 = vpop.f32.mrf.mxu1  ;;  %2821 = vst [vmem:[#allocation2 + $0x448] sm:$0xff] %v2661_v31  ;;  %v2662_v6 = vadd.f32 %v2502_v54, %v2180_v45  ;;  %v3713_v45 = vld [vmem:[#allocation2 + $0x8] sm:$0xff] }
 0x265   : > { %2803 = vst.msk [vmem:[#allocation2 + $0x3b8] sm:$0xff] %vm1339_vm2, %v2643_v33  ;;  %v2633_v34 = vadd.f32 %v2473_v11, %v2320_v36  ;;  %v2184_v28 = vpop.f32.mrf.mxu0  ;;  %13316 = vmatmul.mubr.msk.bf16.gmra.mxu0 %vm723_vm1, %v15269_v61  ;;  %v3715_v36 = vld [vmem:[#allocation2 + $0x18] sm:$0xff]  ;;  %v4206_v11 = vsub.s32 0, %v15250_v3 }
 0x266   : > { %v13275_v37 = vpop.f32.mrf.mxu1  ;;  %2822 = vst [vmem:[#allocation2 + $0x450] sm:$0xff] %v2662_v6  ;;  %v2666_v41 = vadd.f32 %v2506_v30, %v2184_v28  ;;  %13319 = vmatprep.mubr.msk.bf16.mxu0 %vm723_vm1, %v15278_v49  ;;  %v2512_v49 = vld [vmem:[#allocation2 + $0x4a0] sm:$0xff]  ;;  %v14482_v28 = vmov 0.0  }
 0x267   : > { %2793 = vst.msk [vmem:[#allocation2 + $0x368] sm:$0xff] %vm1339_vm2, %v2633_v34  ;;  %v2658_v35 = vadd.f32 %v13275_v37, %v2498_v10  ;;  %v2186_v39 = vpop.f32.mrf.mxu0  ;;  %13335 = vmatprep.subr.bf16.mxu0 %v14482_v28  ;;  %v3717_v37 = vld [vmem:[#allocation2 + $0x28] sm:$0xff] }
 0x268   : > { %v2333_v46 = vpop.f32.mrf.mxu1  ;;  %2826 = vst [vmem:[#allocation2 + $0x470] sm:$0xff] %v2666_v41  ;;  %v2667_v40 = vadd.f32 %v2507_v51, %v2186_v39  ;;  %v3719_v41 = vld [vmem:[#allocation2 + $0x38] sm:$0xff] }
 0x269   : > { %2818 = vst.msk [vmem:[#allocation2 + $0x430] sm:$0xff] %vm1339_vm2, %v2658_v35  ;;  %v2648_v62 = vadd.f32 %v2488_v48, %v2333_v46  ;;  %v2188_v12 = vpop.f32.mrf.mxu0  ;;  %v15360_v51 = vld [vmem:[#allocation6] sm:$0x1f] }
 0x26a   : > { %v13276_v61 = vpop.f32.mrf.mxu1  ;;  %2827 = vst [vmem:[#allocation2 + $0x478] sm:$0xff] %v2667_v40  ;;  %v2671_v14 = vadd.f32 %v2511_v53, %v2188_v12  ;;  %v15363_v46 = vrot.slane %v15360_v51, %v4210_v25  ;;  %v3718_v40 = vld [vmem:[#allocation2 + $0x30] sm:$0xff]  ;;  %v3720_v12 = vld [vmem:[#allocation2 + $0x40] sm:$0xff]  ;;  %v15366_v53 = vrot.slane %v15360_v51, %v4206_v11 }
 0x26b   : > { %2808 = vst.msk [vmem:[#allocation2 + $0x3e0] sm:$0xff] %vm1339_vm2, %v2648_v62  ;;  %v2663_v17 = vadd.f32 %v13276_v61, %v2503_v7  ;;  %v2190_v42 = vpop.f32.mrf.mxu0 }
 0x26c   : > { %v2336_v57 = vpop.f32.mrf.mxu1  ;;  %2831 = vst [vmem:[#allocation2 + $0x498] sm:$0xff] %v2671_v14  ;;  %v2672_v55 = vadd.f32 %v2512_v49, %v2190_v42  ;;  %v3724_v49 = vld [vmem:[#allocation2 + $0x60] sm:$0xff] }
 0x26d   : > { %2823 = vst.msk [vmem:[#allocation2 + $0x458] sm:$0xff] %vm1339_vm2, %v2663_v17  ;;  %v2653_v19 = vadd.f32 %v2493_v52, %v2336_v57  ;;  %v2194_v5 = vpop.f32.mrf.mxu0  ;;  %13320 = vmatmul.mubr.msk.bf16.gmra.mxu0 %vm723_vm1, %v15287_v1  ;;  %v3722_v17 = vld [vmem:[#allocation2 + $0x50] sm:$0xff]  ;;  %v3723_v57 = vld [vmem:[#allocation2 + $0x58] sm:$0xff] }
 0x26e   : > { %v13279_v47 = vpop.f32.mrf.mxu1  ;;  %2832 = vst [vmem:[#allocation2 + $0x4a0] sm:$0xff] %v2672_v55  ;;  %v2676_v63 = vadd.f32 %v2516_v20, %v2194_v5 }
 0x26f   : > { %2813 = vst.msk [vmem:[#allocation2 + $0x408] sm:$0xff] %vm1339_vm2, %v2653_v19  ;;  %v2678_v58 = vadd.f32 %v13279_v47, %v2518_v60  ;;  %v2196_v4 = vpop.f32.mrf.mxu0 }
 0x270   : > { %v2349_v59 = vpop.f32.mrf.mxu1  ;;  %2836 = vst [vmem:[#allocation2 + $0x4c0] sm:$0xff] %v2676_v63  ;;  %v2677_v24 = vadd.f32 %v2517_v32, %v2196_v4  ;;  %v3725_v63 = vld [vmem:[#allocation2 + $0x68] sm:$0xff]  ;;  %v4218_v32 = vsub.s32 3, %v15250_v3 }
 0x271   : > { %2838 = vst.msk [vmem:[#allocation2 + $0x4d0] sm:$0xff] %vm1339_vm2, %v2678_v58  ;;  %v2668_v2 = vadd.f32 %v2508_v22, %v2349_v59  ;;  %v2198_v18 = vpop.f32.mrf.mxu0  ;;  %v3727_v58 = vld [vmem:[#allocation2 + $0x78] sm:$0xff] }
 0x272   : > { %v13280_v27 = vpop.f32.mrf.mxu1  ;;  %2837 = vst [vmem:[#allocation2 + $0x4c8] sm:$0xff] %v2677_v24  ;;  %v2681_v1 = vadd.f32 %v2521_v44, %v2198_v18  ;;  %v13788_v59 = vld [vmem:[#allocation8 + $0x118] sm:$0xff]  }
 0x273   : > { %2828 = vst.msk [vmem:[#allocation2 + $0x480] sm:$0xff] %vm1339_vm2, %v2668_v2  ;;  %v2683_v38 = vadd.f32 %v13280_v27, %v2523_v8  ;;  %v2200_v56 = vpop.f32.mrf.mxu0  ;;  %v3729_v27 = vld [vmem:[#allocation2 + $0x88] sm:$0xff]  ;;  %v3728_v8 = vld [vmem:[#allocation2 + $0x80] sm:$0xff] }
 0x274   : > { %v2352_v13 = vpop.f32.mrf.mxu1  ;;  %2841 = vst [vmem:[#allocation2 + $0x4e8] sm:$0xff] %v2681_v1  ;;  %v2682_v29 = vadd.f32 %v2522_v15, %v2200_v56 }
 0x275   : > { %2843 = vst.msk [vmem:[#allocation2 + $0x4f8] sm:$0xff] %vm1339_vm2, %v2683_v38  ;;  %v2673_v43 = vadd.f32 %v2513_v16, %v2352_v13  ;;  %v3199_v26 = vpop.f32.mrf.mxu0  ;;  %v3730_v16 = vld [vmem:[#allocation2 + $0x90] sm:$0xff] }
 0x276   : > { %v3392_v21 = vpop.f32.mrf.mxu1  ;;  %2842 = vst [vmem:[#allocation2 + $0x4f0] sm:$0xff] %v2682_v29  ;;  %v3872_v23 = vadd.f32 %v3712_v9, %v3199_v26  ;;  %v3732_v29 = vld [vmem:[#allocation2 + $0xa0] sm:$0xff]  ;;  %v13790_v26 = vld [vmem:[#allocation8 + $0x110] sm:$0xff]  }
 0x277   : > { %2833 = vst.msk [vmem:[#allocation2 + $0x4a8] sm:$0xff] %vm1339_vm2, %v2673_v43  ;;  %v3874_v31 = vadd.f32 %v3714_v0, %v3392_v21  ;;  %v3201_v33 = vpop.f32.mrf.mxu0  ;;  %v15379_v43 = vrot.slane %v15360_v51, %v4218_v32 }
 0x278   : > { %v3394_v54 = vpop.f32.mrf.mxu1  ;;  %4032 = vst [vmem:[#allocation2] sm:$0xff] %v3872_v23  ;;  %v3873_v6 = vadd.f32 %v3713_v45, %v3201_v33  ;;  %v4229_v4 = vadd.f32 %v15366_v53, %v3872_v23  ;;  %v3734_v23 = vld [vmem:[#allocation2 + $0xb0] sm:$0xff] }
 0x279   : > { %4034 = vst [vmem:[#allocation2 + $0x10] sm:$0xff] %v3874_v31  ;;  %v3875_v34 = vadd.f32 %v3715_v36, %v3394_v54  ;;  %v3203_v30 = vpop.f32.mrf.mxu0  ;;  %v3733_v31 = vld [vmem:[#allocation2 + $0xa8] sm:$0xff] }
 0x27a   : > { %v3396_v10 = vpop.f32.mrf.mxu1  ;;  %4033 = vst [vmem:[#allocation2 + $0x8] sm:$0xff] %v3873_v6  ;;  %v3877_v35 = vadd.f32 %v3717_v37, %v3203_v30  ;;  %v4230_v5 = vadd.f32 %v15363_v46, %v3873_v6  ;;  %v13772_v6 = vld [vmem:[#allocation8 + $0x1d8] sm:$0xff]  }
 0x27b   : > { %4035 = vst [vmem:[#allocation2 + $0x18] sm:$0xff] %v3875_v34  ;;  %v3879_v39 = vadd.f32 %v3719_v41, %v3396_v10  ;;  %v3205_v48 = vpop.f32.mrf.mxu0  ;;  %v3735_v37 = vld [vmem:[#allocation2 + $0xb8] sm:$0xff]  ;;  %v3737_v10 = vld [vmem:[#allocation2 + $0xc8] sm:$0xff] }
 0x27c   : > { %v3398_v62 = vpop.f32.mrf.mxu1  ;;  %4037 = vst [vmem:[#allocation2 + $0x28] sm:$0xff] %v3877_v35  ;;  %v3878_v61 = vadd.f32 %v3718_v40, %v3205_v48  ;;  %v4234_v52 = vadd.f32 %v15366_v53, %v3877_v35  ;;  %v13773_v48 = vld [vmem:[#allocation8 + $0x210] sm:$0xff]  }
 0x27d   : > { %4039 = vst [vmem:[#allocation2 + $0x38] sm:$0xff] %v3879_v39  ;;  %v3880_v7 = vadd.f32 %v3720_v12, %v3398_v62  ;;  %v3209_v14 = vpop.f32.mrf.mxu0  ;;  %v3739_v12 = vld [vmem:[#allocation2 + $0xd8] sm:$0xff] }
 0x27e   : > { %v3402_v42 = vpop.f32.mrf.mxu1  ;;  %4038 = vst [vmem:[#allocation2 + $0x30] sm:$0xff] %v3878_v61  ;;  %v3882_v55 = vadd.f32 %v3722_v17, %v3209_v14  ;;  %v4235_v20 = vadd.f32 %v15363_v46, %v3878_v61  ;;  %v4239_v1 = vpack.c.bf16 %v4234_v52, %v4229_v4  ;;  %v3738_v17 = vld [vmem:[#allocation2 + $0xd0] sm:$0xff] }
 0x27f   : > { %4040 = vst [vmem:[#allocation2 + $0x40] sm:$0xff] %v3880_v7  ;;  %v15369_v19 = vadd.f32 %v3724_v49, %v3402_v42  ;;  %v3211_v47 = vpop.f32.mrf.mxu0  ;;  %v13792_v49 = vld [vmem:[#allocation8 + $0x108] sm:$0xff]  }
 0x280   : > { %v3404_v60 = vpop.f32.mrf.mxu1  ;;  %4042 = vst [vmem:[#allocation2 + $0x50] sm:$0xff] %v3882_v55  ;;  %v3883_v22 = vadd.f32 %v3723_v57, %v3211_v47  ;;  %v4240_v2 = vpack.c.bf16 %v4235_v20, %v4230_v5  ;;  %v4326_v41 = vadd.f32 %v15366_v53, %v3882_v55  ;;  %v13774_v5 = vld [vmem:[#allocation8 + $0x1d0] sm:$0xff]  }
 0x281   : > { %4044 = vst [vmem:[#allocation2 + $0x60] sm:$0xff] %v15369_v19  ;;  %v3885_v24 = vadd.f32 %v3725_v63, %v3404_v60  ;;  %v3213_v18 = vpop.f32.mrf.mxu0  ;;  %v3740_v60 = vld [vmem:[#allocation2 + $0xe0] sm:$0xff]  ;;  %v3742_v63 = vld [vmem:[#allocation2 + $0xf0] sm:$0xff] }
 0x282   : > { %v3406_v44 = vpop.f32.mrf.mxu1  ;;  %4043 = vst [vmem:[#allocation2 + $0x58] sm:$0xff] %v3883_v22  ;;  %v3887_v38 = vadd.f32 %v3727_v58, %v3213_v18  ;;  %5007 = vmatprep.mubr.bf16.mxu0 %v4240_v2  ;;  %v4327_v36 = vadd.f32 %v15363_v46, %v3883_v22  ;;  %v13775_v58 = vld [vmem:[#allocation8 + $0x208] sm:$0xff]   ;;  %v13794_v2 = vld [vmem:[#allocation8 + $0x100] sm:$0xff]  }
 0x283   : > { %4045 = vst [vmem:[#allocation2 + $0x68] sm:$0xff] %v3885_v24  ;;  %v15376_v56 = vadd.f32 %v3729_v27, %v3406_v44  ;;  %v3215_v15 = vpop.f32.mrf.mxu0  ;;  %5008 = vmatmul.mubr.bf16.vlgmr.msra.gmra.mxu0 %v4239_v1  ;;  %v4329_v35 = vadd.f32 %v15379_v43, %v3885_v24  ;;  %v13797_v27 = vld [vmem:[#allocation8 + $0x2b8] sm:$0xff]  }
 0x284   : > { %v3408_v13 = vpop.f32.mrf.mxu1  ;;  %4047 = vst [vmem:[#allocation2 + $0x78] sm:$0xff] %v3887_v38  ;;  %v3888_v9 = vadd.f32 %v3728_v8, %v3215_v15  ;;  %13336 = vmatpush3.bf16.msra.mxu0 %v13788_v59  ;;  %v4331_v33 = vadd.f32 %v15366_v53, %v3887_v38  ;;  %13343 = vmatprep.mubr.msk.bf16.mxu0 %vm14483_vm3, %v14482_v28  ;;  %v3744_v59 = vld [vmem:[#allocation2 + $0x100] sm:$0xff]  ;;  %v3743_v1 = vld [vmem:[#allocation2 + $0xf8] sm:$0xff]  ;;  %v3745_v15 = vld [vmem:[#allocation2 + $0x108] sm:$0xff] }
 0x285   : > { %4049 = vst [vmem:[#allocation2 + $0x88] sm:$0xff] %v15376_v56  ;;  %v3890_v21 = vadd.f32 %v3730_v16, %v3408_v13  ;;  %v3219_v0 = vpop.f32.mrf.mxu0  ;;  %13337 = vmatprep.subr.bf16.mxu0 %v14482_v28 }
 0x286   : > { %v3412_v25 = vpop.f32.mrf.mxu1  ;;  %4048 = vst [vmem:[#allocation2 + $0x80] sm:$0xff] %v3888_v9  ;;  %v3892_v45 = vadd.f32 %v3732_v29, %v3219_v0  ;;  %v4332_v11 = vadd.f32 %v15363_v46, %v3888_v9  ;;  %v4336_v42 = vpack.c.bf16 %v4331_v33, %v4326_v41  ;;  %v13776_v29 = vld [vmem:[#allocation8 + $0x1c8] sm:$0xff]   ;;  %v3747_v9 = vld [vmem:[#allocation2 + $0x118] sm:$0xff] }
 0x287   : > { %4050 = vst [vmem:[#allocation2 + $0x90] sm:$0xff] %v3890_v21  ;;  %v3894_v54 = vadd.f32 %v3734_v23, %v3412_v25  ;;  %v3221_v34 = vpop.f32.mrf.mxu0  ;;  %v4334_v39 = vadd.f32 %v15379_v43, %v3890_v21  ;;  %v3749_v0 = vld [vmem:[#allocation2 + $0x128] sm:$0xff]  ;;  %v3754_v41 = vld [vmem:[#allocation2 + $0x150] sm:$0xff] }
 0x288   : > { %v3414_v30 = vpop.f32.mrf.mxu1  ;;  %4052 = vst [vmem:[#allocation2 + $0xa0] sm:$0xff] %v3892_v45  ;;  %v3893_v40 = vadd.f32 %v3733_v31, %v3221_v34  ;;  %v4337_v61 = vpack.c.bf16 %v4332_v11, %v4327_v36  ;;  %13338 = vmatpush3.bf16.msra.mxu0 %v13790_v26  ;;  %v13777_v25 = vld [vmem:[#allocation8 + $0x200] sm:$0xff]   ;;  %v3750_v36 = vld [vmem:[#allocation2 + $0x130] sm:$0xff] }
 0x289   : > { %4054 = vst [vmem:[#allocation2 + $0xb0] sm:$0xff] %v3894_v54  ;;  %v3895_v62 = vadd.f32 %v3735_v37, %v3414_v30  ;;  %v3223_v7 = vpop.f32.mrf.mxu0  ;;  %13339 = vmatprep.subr.bf16.mxu0 %v14482_v28  ;;  %v4339_v55 = vpack.c.bf16 %v4334_v39, %v4329_v35  ;;  %v3748_v45 = vld [vmem:[#allocation2 + $0x120] sm:$0xff] }
 0x28a   : > { %v3416_v14 = vpop.f32.mrf.mxu1  ;;  %4053 = vst [vmem:[#allocation2 + $0xa8] sm:$0xff] %v3893_v40  ;;  %v3897_v57 = vadd.f32 %v3737_v10, %v3223_v7  ;;  %4665 = vmatprep.mubr.bf16.mxu1 %v4337_v61  ;;  %v13778_v34 = vld [vmem:[#allocation8 + $0x1c0] sm:$0xff]   ;;  %v13779_v35 = vld [vmem:[#allocation8 + $0x1f8] sm:$0xff]  }
 0x28b   : > { %4055 = vst [vmem:[#allocation2 + $0xb8] sm:$0xff] %v3895_v62  ;;  %v3899_v52 = vadd.f32 %v3739_v12, %v3416_v14  ;;  %v3225_v20 = vpop.f32.mrf.mxu0  ;;  %4666 = vmatmul.mubr.bf16.vlgmr.msra.gmra.mxu1 %v4336_v42  ;;  %v3752_v37 = vld [vmem:[#allocation2 + $0x140] sm:$0xff]  ;;  %v3753_v62 = vld [vmem:[#allocation2 + $0x148] sm:$0xff]  ;;  %v3755_v61 = vld [vmem:[#allocation2 + $0x158] sm:$0xff] }
 0x28c   : > { %v3418_v47 = vpop.f32.mrf.mxu1  ;;  %4057 = vst [vmem:[#allocation2 + $0xc8] sm:$0xff] %v3897_v57  ;;  %v3898_v4 = vadd.f32 %v3738_v17, %v3225_v20  ;;  %12436 = vmatpush3.bf16.msra.mxu1 %v13772_v6  ;;  %4706 = vmatprep.mubr.bf16.mxu1 %v4339_v55  ;;  %v13780_v17 = vld [vmem:[#allocation8 + $0x1b8] sm:$0xff]   ;;  %v13781_v55 = vld [vmem:[#allocation8 + $0x1f0] sm:$0xff]  }
 0x28d   : > { %4059 = vst [vmem:[#allocation2 + $0xd8] sm:$0xff] %v3899_v52  ;;  %v3900_v32 = vadd.f32 %v3740_v60, %v3418_v47  ;;  %v3229_v22 = vpop.f32.mrf.mxu0  ;;  %12437 = vmatprep.subr.bf16.mxu1 %v13773_v48  ;;  %13340 = vmatpush3.bf16.msra.mxu0 %v13792_v49  ;;  %v3757_v49 = vld [vmem:[#allocation2 + $0x168] sm:$0xff]  ;;  %v3759_v52 = vld [vmem:[#allocation2 + $0x178] sm:$0xff]  ;;  %v3758_v60 = vld [vmem:[#allocation2 + $0x170] sm:$0xff] }
 0x28e   : > { %v3422_v24 = vpop.f32.mrf.mxu1  ;;  %4058 = vst [vmem:[#allocation2 + $0xd0] sm:$0xff] %v3898_v4  ;;  %v3902_v18 = vadd.f32 %v3742_v63, %v3229_v22  ;;  %13341 = vmatprep.subr.bf16.mxu0 %v14482_v28 }
 0x28f   : > { %4060 = vst [vmem:[#allocation2 + $0xe0] sm:$0xff] %v3900_v32  ;;  %v3904_v44 = vadd.f32 %v3744_v59, %v3422_v24  ;;  %v3231_v8 = vpop.f32.mrf.mxu0  ;;  %v13782_v59 = vld [vmem:[#allocation8 + $0x1b0] sm:$0xff]  }
 0x290   : > { %v3424_v38 = vpop.f32.mrf.mxu1  ;;  %4062 = vst [vmem:[#allocation2 + $0xf0] sm:$0xff] %v3902_v18  ;;  %v3903_v13 = vadd.f32 %v3743_v1, %v3231_v8  ;;  %12438 = vmatpush3.bf16.msra.mxu1 %v13774_v5  ;;  %v3762_v24 = vld [vmem:[#allocation2 + $0x190] sm:$0xff]  ;;  %v3764_v18 = vld [vmem:[#allocation2 + $0x1a0] sm:$0xff] }
 0x291   : > { %4064 = vst [vmem:[#allocation2 + $0x100] sm:$0xff] %v3904_v44  ;;  %v3905_v16 = vadd.f32 %v3745_v15, %v3424_v38  ;;  %v3233_v26 = vpop.f32.mrf.mxu0  ;;  %12439 = vmatprep.subr.bf16.mxu1 %v13775_v58  ;;  %13342 = vmatpush3.bf16.msra.mxu0 %v13794_v2  ;;  %v3760_v58 = vld [vmem:[#allocation2 + $0x180] sm:$0xff]  ;;  %v13783_v44 = vld [vmem:[#allocation8 + $0x1e8] sm:$0xff]   ;;  %v3763_v38 = vld [vmem:[#allocation2 + $0x198] sm:$0xff] }
 0x292   : > { %v3426_v21 = vpop.f32.mrf.mxu1  ;;  %4063 = vst [vmem:[#allocation2 + $0xf8] sm:$0xff] %v3903_v13  ;;  %v3907_v23 = vadd.f32 %v3747_v9, %v3233_v26  ;;  %12511 = vmatprep.subr.bf16.mxu0 %v13797_v27  ;;  %v3765_v13 = vld [vmem:[#allocation2 + $0x1a8] sm:$0xff] }
 0x293   : > { %4065 = vst [vmem:[#allocation2 + $0x108] sm:$0xff] %v3905_v16  ;;  %v3909_v31 = vadd.f32 %v3749_v0, %v3426_v21  ;;  %v3235_v33 = vpop.f32.mrf.mxu0  ;;  %v4214_v16 = vsub.s32 2, %v15250_v3  ;;  %v13784_v9 = vld [vmem:[#allocation8 + $0x1a8] sm:$0xff]   ;;  %v3767_v0 = vld [vmem:[#allocation2 + $0x1b8] sm:$0xff] }
 0x294   : > { %v3428_v54 = vpop.f32.mrf.mxu1  ;;  %4067 = vst [vmem:[#allocation2 + $0x118] sm:$0xff] %v3907_v23  ;;  %v3908_v11 = vadd.f32 %v3748_v45, %v3235_v33  ;;  %12440 = vmatpush3.bf16.msra.mxu1 %v13776_v29  ;;  %v3769_v23 = vld [vmem:[#allocation2 + $0x1c8] sm:$0xff]  ;;  %v3770_v3 = vld [vmem:[#allocation2 + $0x1d0] sm:$0xff] }
 0x295   : > { %4069 = vst [vmem:[#allocation2 + $0x128] sm:$0xff] %v3909_v31  ;;  %v3910_v6 = vadd.f32 %v3750_v36, %v3428_v54  ;;  %v3239_v30 = vpop.f32.mrf.mxu0  ;;  %12441 = vmatprep.subr.bf16.mxu1 %v13777_v25  ;;  %v13785_v31 = vld [vmem:[#allocation8 + $0x1e0] sm:$0xff]  }
 0x296   : > { %v3432_v10 = vpop.f32.mrf.mxu1  ;;  %4068 = vst [vmem:[#allocation2 + $0x120] sm:$0xff] %v3908_v11  ;;  %v3912_v39 = vadd.f32 %v3752_v37, %v3239_v30  ;;  %v3768_v36 = vld [vmem:[#allocation2 + $0x1c0] sm:$0xff] }
 0x297   : > { %4070 = vst [vmem:[#allocation2 + $0x130] sm:$0xff] %v3910_v6  ;;  %v3914_v48 = vadd.f32 %v3754_v41, %v3432_v10  ;;  %v3241_v40 = vpop.f32.mrf.mxu0  ;;  %v15395_v6 = vrot.slane %v15360_v51, %v4214_v16  ;;  %v13786_v37 = vld [vmem:[#allocation8 + $0x1a0] sm:$0xff]  }
 0x298   : > { %v3434_v12 = vpop.f32.mrf.mxu1  ;;  %4072 = vst [vmem:[#allocation2 + $0x140] sm:$0xff] %v3912_v39  ;;  %v3913_v7 = vadd.f32 %v3753_v62, %v3241_v40  ;;  %12442 = vmatpush3.bf16.msra.mxu1 %v13778_v34  ;;  %v3772_v41 = vld [vmem:[#allocation2 + $0x1e0] sm:$0xff]  ;;  %v3774_v39 = vld [vmem:[#allocation2 + $0x1f0] sm:$0xff] }
 0x299   : > { %4074 = vst [vmem:[#allocation2 + $0x150] sm:$0xff] %v3914_v48  ;;  %v3915_v14 = vadd.f32 %v3755_v61, %v3434_v12  ;;  %v3243_v42 = vpop.f32.mrf.mxu0  ;;  %12443 = vmatprep.subr.bf16.mxu1 %v13779_v35  ;;  %v4333_v48 = vadd.f32 %v15395_v6, %v15376_v56  ;;  %v3773_v12 = vld [vmem:[#allocation2 + $0x1e8] sm:$0xff] }
 0x29a   : > { %v3436_v57 = vpop.f32.mrf.mxu1  ;;  %4073 = vst [vmem:[#allocation2 + $0x148] sm:$0xff] %v3913_v7  ;;  %v3917_v5 = vadd.f32 %v3757_v49, %v3243_v42  ;;  %v3775_v7 = vld [vmem:[#allocation2 + $0x1f8] sm:$0xff] }
 0x29b   : > { %4075 = vst [vmem:[#allocation2 + $0x158] sm:$0xff] %v3915_v14  ;;  %v3919_v20 = vadd.f32 %v3759_v52, %v3436_v57  ;;  %v3245_v47 = vpop.f32.mrf.mxu0  ;;  %v4328_v14 = vadd.f32 %v15395_v6, %v15369_v19  ;;  %v13787_v49 = vld [vmem:[#allocation8 + $0x238] sm:$0xff]   ;;  %v3777_v52 = vld [vmem:[#allocation2 + $0x208] sm:$0xff] }
 0x29c   : > { %v3438_v63 = vpop.f32.mrf.mxu1  ;;  %4077 = vst [vmem:[#allocation2 + $0x168] sm:$0xff] %v3917_v5  ;;  %v3918_v4 = vadd.f32 %v3758_v60, %v3245_v47  ;;  %12444 = vmatpush3.bf16.msra.mxu1 %v13780_v17 }
 0x29d   : > { %4079 = vst [vmem:[#allocation2 + $0x178] sm:$0xff] %v3919_v20  ;;  %v3920_v32 = vadd.f32 %v3760_v58, %v3438_v63  ;;  %v3249_v22 = vpop.f32.mrf.mxu0  ;;  %12445 = vmatprep.subr.bf16.mxu1 %v13781_v55  ;;  %v3779_v55 = vld [vmem:[#allocation2 + $0x218] sm:$0xff]  ;;  %v4338_v5 = vpack.c.bf16 %v4333_v48, %v4328_v14  ;;  %v3778_v63 = vld [vmem:[#allocation2 + $0x210] sm:$0xff]  ;;  %v3780_v58 = vld [vmem:[#allocation2 + $0x220] sm:$0xff] }
 0x29e   : > { %v3442_v2 = vpop.f32.mrf.mxu1  ;;  %4078 = vst [vmem:[#allocation2 + $0x170] sm:$0xff] %v3918_v4  ;;  %v3922_v27 = vadd.f32 %v3762_v24, %v3249_v22  ;;  %v3782_v24 = vld [vmem:[#allocation2 + $0x230] sm:$0xff]  ;;  %v3797_v14 = vld [vmem:[#allocation2 + $0x2a8] sm:$0xff] }
 0x29f   : > { %4080 = vst [vmem:[#allocation2 + $0x180] sm:$0xff] %v3920_v32  ;;  %v3924_v8 = vadd.f32 %v3764_v18, %v3442_v2  ;;  %v3251_v1 = vpop.f32.mrf.mxu0  ;;  %v3784_v18 = vld [vmem:[#allocation2 + $0x240] sm:$0xff] }
 0x2a0   : > { %v3444_v15 = vpop.f32.mrf.mxu1  ;;  %4082 = vst [vmem:[#allocation2 + $0x190] sm:$0xff] %v3922_v27  ;;  %v3923_v29 = vadd.f32 %v3763_v38, %v3251_v1  ;;  %12446 = vmatpush3.bf16.msra.mxu1 %v13782_v59  ;;  %v13789_v59 = vld [vmem:[#allocation8 + $0x230] sm:$0xff]  }
 0x2a1   : > { %4084 = vst [vmem:[#allocation2 + $0x1a0] sm:$0xff] %v3924_v8  ;;  %v3925_v26 = vadd.f32 %v3765_v13, %v3444_v15  ;;  %v3253_v21 = vpop.f32.mrf.mxu0  ;;  %12447 = vmatprep.subr.bf16.mxu1 %v13783_v44  ;;  %v3783_v1 = vld [vmem:[#allocation2 + $0x238] sm:$0xff]  ;;  %v3785_v15 = vld [vmem:[#allocation2 + $0x248] sm:$0xff] }
 0x2a2   : > { %v3446_v25 = vpop.f32.mrf.mxu1  ;;  %4083 = vst [vmem:[#allocation2 + $0x198] sm:$0xff] %v3923_v29  ;;  %v3927_v33 = vadd.f32 %v3767_v0, %v3253_v21  ;;  %v13791_v29 = vld [vmem:[#allocation8 + $0x228] sm:$0xff]  }
 0x2a3   : > { %4085 = vst [vmem:[#allocation2 + $0x1a8] sm:$0xff] %v3925_v26  ;;  %v3929_v45 = vadd.f32 %v3769_v23, %v3446_v25  ;;  %v3255_v54 = vpop.f32.mrf.mxu0  ;;  %v3789_v0 = vld [vmem:[#allocation2 + $0x268] sm:$0xff] }
 0x2a4   : > { %v3448_v11 = vpop.f32.mrf.mxu1  ;;  %4087 = vst [vmem:[#allocation2 + $0x1b8] sm:$0xff] %v3927_v33  ;;  %v3928_v34 = vadd.f32 %v3768_v36, %v3255_v54  ;;  %12448 = vmatpush3.bf16.msra.mxu1 %v13784_v9  ;;  %v3787_v9 = vld [vmem:[#allocation2 + $0x258] sm:$0xff]  ;;  %v3788_v33 = vld [vmem:[#allocation2 + $0x260] sm:$0xff]  ;;  %v3790_v54 = vld [vmem:[#allocation2 + $0x270] sm:$0xff] }
 0x2a5   : > { %4089 = vst [vmem:[#allocation2 + $0x1c8] sm:$0xff] %v3929_v45  ;;  %v3930_v30 = vadd.f32 %v3770_v3, %v3448_v11  ;;  %v3259_v10 = vpop.f32.mrf.mxu0  ;;  %12449 = vmatprep.subr.bf16.mxu1 %v13785_v31  ;;  %v13793_v3 = vld [vmem:[#allocation8 + $0x220] sm:$0xff]  }
 0x2a6   : > { %v3452_v35 = vpop.f32.mrf.mxu1  ;;  %4088 = vst [vmem:[#allocation2 + $0x1c0] sm:$0xff] %v3928_v34  ;;  %v3932_v40 = vadd.f32 %v3772_v41, %v3259_v10  ;;  %v3794_v10 = vld [vmem:[#allocation2 + $0x290] sm:$0xff]  ;;  %v13795_v41 = vld [vmem:[#allocation8 + $0xf8] sm:$0xff]  }
 0x2a7   : > { %4090 = vst [vmem:[#allocation2 + $0x1d0] sm:$0xff] %v3930_v30  ;;  %v3934_v62 = vadd.f32 %v3774_v39, %v3452_v35  ;;  %v3261_v51 = vpop.f32.mrf.mxu0  ;;  %v3792_v30 = vld [vmem:[#allocation2 + $0x280] sm:$0xff] }
 0x2a8   : > { %v3454_v61 = vpop.f32.mrf.mxu1  ;;  %4092 = vst [vmem:[#allocation2 + $0x1e0] sm:$0xff] %v3932_v40  ;;  %v3933_v17 = vadd.f32 %v3773_v12, %v3261_v51  ;;  %12450 = vmatpush3.bf16.msra.mxu1 %v13786_v37  ;;  %v3793_v40 = vld [vmem:[#allocation2 + $0x288] sm:$0xff]  ;;  %v3795_v51 = vld [vmem:[#allocation2 + $0x298] sm:$0xff] }
 0x2a9   : > { %4094 = vst [vmem:[#allocation2 + $0x1f0] sm:$0xff] %v3934_v62  ;;  %v3935_v42 = vadd.f32 %v3775_v7, %v3454_v61  ;;  %v3263_v57 = vpop.f32.mrf.mxu0  ;;  %13323 = vmatprep.subr.bf16.mxu1 %v14482_v28 }
 0x2aa   : > { %v3456_v56 = vpop.f32.mrf.mxu1  ;;  %4093 = vst [vmem:[#allocation2 + $0x1e8] sm:$0xff] %v3933_v17  ;;  %v3937_v20 = vadd.f32 %v3777_v52, %v3263_v57 }
 0x2ab   : > { %4095 = vst [vmem:[#allocation2 + $0x1f8] sm:$0xff] %v3935_v42  ;;  %v3939_v47 = vadd.f32 %v3779_v55, %v3456_v56  ;;  %v3265_v60 = vpop.f32.mrf.mxu0  ;;  %4707 = vmatmul.mubr.bf16.vlgmr.msra.gmra.mxu1 %v4338_v5  ;;  %v3799_v42 = vld [vmem:[#allocation2 + $0x2b8] sm:$0xff]  ;;  %v3798_v56 = vld [vmem:[#allocation2 + $0x2b0] sm:$0xff]  ;;  %v3800_v5 = vld [vmem:[#allocation2 + $0x2c0] sm:$0xff] }
 0x2ac   : > { %v3458_v19 = vpop.f32.mrf.mxu1  ;;  %4097 = vst [vmem:[#allocation2 + $0x208] sm:$0xff] %v3937_v20  ;;  %v3938_v4 = vadd.f32 %v3778_v63, %v3265_v60  ;;  %13324 = vmatpush3.bf16.msra.mxu1 %v13787_v49  ;;  %13331 = vmatprep.mubr.msk.bf16.mxu1 %vm14483_vm3, %v14482_v28  ;;  %v3802_v63 = vld [vmem:[#allocation2 + $0x2d0] sm:$0xff] }
 0x2ad   : > { %4099 = vst [vmem:[#allocation2 + $0x218] sm:$0xff] %v3939_v47  ;;  %v3940_v32 = vadd.f32 %v3780_v58, %v3458_v19  ;;  %v3269_v22 = vpop.f32.mrf.mxu0  ;;  %13325 = vmatprep.subr.bf16.mxu1 %v14482_v28  ;;  %v3804_v58 = vld [vmem:[#allocation2 + $0x2e0] sm:$0xff] }
 0x2ae   : > { %v3462_v2 = vpop.f32.mrf.mxu1  ;;  %4098 = vst [vmem:[#allocation2 + $0x210] sm:$0xff] %v3938_v4  ;;  %v3942_v44 = vadd.f32 %v3782_v24, %v3269_v22  ;;  %v3803_v22 = vld [vmem:[#allocation2 + $0x2d8] sm:$0xff] }
 0x2af   : > { %4100 = vst [vmem:[#allocation2 + $0x220] sm:$0xff] %v3940_v32  ;;  %v3944_v27 = vadd.f32 %v3784_v18, %v3462_v2  ;;  %v3271_v8 = vpop.f32.mrf.mxu0  ;;  %v3805_v2 = vld [vmem:[#allocation2 + $0x2e8] sm:$0xff] }
 0x2b0   : > { %v3464_v38 = vpop.f32.mrf.mxu1  ;;  %4102 = vst [vmem:[#allocation2 + $0x230] sm:$0xff] %v3942_v44  ;;  %v3943_v13 = vadd.f32 %v3783_v1, %v3271_v8  ;;  %13326 = vmatpush3.bf16.msra.mxu1 %v13789_v59  ;;  %v3807_v8 = vld [vmem:[#allocation2 + $0x2f8] sm:$0xff] }
 0x2b1   : > { %4104 = vst [vmem:[#allocation2 + $0x240] sm:$0xff] %v3944_v27  ;;  %v3945_v16 = vadd.f32 %v3785_v15, %v3464_v38  ;;  %v3273_v26 = vpop.f32.mrf.mxu0  ;;  %13327 = vmatprep.subr.bf16.mxu1 %v14482_v28  ;;  %v3809_v38 = vld [vmem:[#allocation2 + $0x308] sm:$0xff] }
 0x2b2   : > { %v3466_v21 = vpop.f32.mrf.mxu1  ;;  %4103 = vst [vmem:[#allocation2 + $0x238] sm:$0xff] %v3943_v13  ;;  %v3947_v25 = vadd.f32 %v3787_v9, %v3273_v26  ;;  %v3810_v9 = vld [vmem:[#allocation2 + $0x310] sm:$0xff] }
 0x2b3   : > { %4105 = vst [vmem:[#allocation2 + $0x248] sm:$0xff] %v3945_v16  ;;  %v3949_v23 = vadd.f32 %v3789_v0, %v3466_v21  ;;  %v3275_v31 = vpop.f32.mrf.mxu0 }
 0x2b4   : > { %v3468_v45 = vpop.f32.mrf.mxu1  ;;  %4107 = vst [vmem:[#allocation2 + $0x258] sm:$0xff] %v3947_v25  ;;  %v3948_v36 = vadd.f32 %v3788_v33, %v3275_v31  ;;  %13328 = vmatpush3.bf16.msra.mxu1 %v13791_v29  ;;  %v3808_v29 = vld [vmem:[#allocation2 + $0x300] sm:$0xff]  ;;  %v3814_v33 = vld [vmem:[#allocation2 + $0x330] sm:$0xff] }
 0x2b5   : > { %4109 = vst [vmem:[#allocation2 + $0x268] sm:$0xff] %v3949_v23  ;;  %v3950_v11 = vadd.f32 %v3790_v54, %v3468_v45  ;;  %v3279_v34 = vpop.f32.mrf.mxu0  ;;  %13329 = vmatprep.subr.bf16.mxu1 %v14482_v28  ;;  %v3812_v23 = vld [vmem:[#allocation2 + $0x320] sm:$0xff] }
 0x2b6   : > { %v3472_v37 = vpop.f32.mrf.mxu1  ;;  %4108 = vst [vmem:[#allocation2 + $0x260] sm:$0xff] %v3948_v36  ;;  %v3952_v35 = vadd.f32 %v3792_v30, %v3279_v34  ;;  %v3815_v34 = vld [vmem:[#allocation2 + $0x338] sm:$0xff] }
 0x2b7   : > { %4110 = vst [vmem:[#allocation2 + $0x270] sm:$0xff] %v3950_v11  ;;  %v3954_v39 = vadd.f32 %v3794_v10, %v3472_v37  ;;  %v3281_v48 = vpop.f32.mrf.mxu0  ;;  %v3813_v11 = vld [vmem:[#allocation2 + $0x328] sm:$0xff] }
 0x2b8   : > { %v3474_v62 = vpop.f32.mrf.mxu1  ;;  %4112 = vst [vmem:[#allocation2 + $0x280] sm:$0xff] %v3952_v35  ;;  %v3953_v12 = vadd.f32 %v3793_v40, %v3281_v48  ;;  %13330 = vmatpush3.bf16.msra.mxu1 %v13793_v3 }
 0x2b9   : > { %4114 = vst [vmem:[#allocation2 + $0x290] sm:$0xff] %v3954_v39  ;;  %v3955_v61 = vadd.f32 %v3795_v51, %v3474_v62  ;;  %v3283_v7 = vpop.f32.mrf.mxu0  ;;  %12484 = vmatprep.subr.bf16.mxu1 %v13795_v41  ;;  %v3817_v41 = vld [vmem:[#allocation2 + $0x348] sm:$0xff]  ;;  %v3819_v39 = vld [vmem:[#allocation2 + $0x358] sm:$0xff]  ;;  %v3818_v51 = vld [vmem:[#allocation2 + $0x350] sm:$0xff] }
 0x2ba   : > { %v3476_v17 = vpop.f32.mrf.mxu1  ;;  %4113 = vst [vmem:[#allocation2 + $0x288] sm:$0xff] %v3953_v12  ;;  %v3957_v49 = vadd.f32 %v3797_v14, %v3283_v7 }
 0x2bb   : > { %4115 = vst [vmem:[#allocation2 + $0x298] sm:$0xff] %v3955_v61  ;;  %v3959_v57 = vadd.f32 %v3799_v42, %v3476_v17  ;;  %v3285_v52 = vpop.f32.mrf.mxu0  ;;  %v3820_v61 = vld [vmem:[#allocation2 + $0x360] sm:$0xff]  ;;  %v3822_v42 = vld [vmem:[#allocation2 + $0x370] sm:$0xff] }
 0x2bc   : > { %v3478_v55 = vpop.f32.mrf.mxu1  ;;  %4117 = vst [vmem:[#allocation2 + $0x2a8] sm:$0xff] %v3957_v49  ;;  %v3958_v20 = vadd.f32 %v3798_v56, %v3285_v52 }
 0x2bd   : > { %4119 = vst [vmem:[#allocation2 + $0x2b8] sm:$0xff] %v3959_v57  ;;  %v3960_v47 = vadd.f32 %v3800_v5, %v3478_v55  ;;  %v3289_v60 = vpop.f32.mrf.mxu0  ;;  %v3824_v57 = vld [vmem:[#allocation2 + $0x380] sm:$0xff]  ;;  %v3823_v5 = vld [vmem:[#allocation2 + $0x378] sm:$0xff] }
 0x2be   : > { %v3482_v19 = vpop.f32.mrf.mxu1  ;;  %4118 = vst [vmem:[#allocation2 + $0x2b0] sm:$0xff] %v3958_v20  ;;  %v3962_v4 = vadd.f32 %v3802_v63, %v3289_v60 }
 0x2bf   : > { %4120 = vst [vmem:[#allocation2 + $0x2c0] sm:$0xff] %v3960_v47  ;;  %v3964_v32 = vadd.f32 %v3804_v58, %v3482_v19  ;;  %v3291_v59 = vpop.f32.mrf.mxu0  ;;  %v3825_v47 = vld [vmem:[#allocation2 + $0x388] sm:$0xff]  ;;  %v3827_v58 = vld [vmem:[#allocation2 + $0x398] sm:$0xff] }
 0x2c0   : > { %v3484_v24 = vpop.f32.mrf.mxu1  ;;  %4122 = vst [vmem:[#allocation2 + $0x2d0] sm:$0xff] %v3962_v4  ;;  %v3963_v18 = vadd.f32 %v3803_v22, %v3291_v59 }
 0x2c1   : > { %4124 = vst [vmem:[#allocation2 + $0x2e0] sm:$0xff] %v3964_v32  ;;  %v3965_v44 = vadd.f32 %v3805_v2, %v3484_v24  ;;  %v3293_v27 = vpop.f32.mrf.mxu0  ;;  %v3829_v32 = vld [vmem:[#allocation2 + $0x3a8] sm:$0xff]  ;;  %v3828_v2 = vld [vmem:[#allocation2 + $0x3a0] sm:$0xff] }
 0x2c2   : > { %v3486_v1 = vpop.f32.mrf.mxu1  ;;  %4123 = vst [vmem:[#allocation2 + $0x2d8] sm:$0xff] %v3963_v18  ;;  %v3967_v15 = vadd.f32 %v3807_v8, %v3293_v27 }
 0x2c3   : > { %4125 = vst [vmem:[#allocation2 + $0x2e8] sm:$0xff] %v3965_v44  ;;  %v3969_v13 = vadd.f32 %v3809_v38, %v3486_v1  ;;  %v3295_v16 = vpop.f32.mrf.mxu0  ;;  %v3830_v44 = vld [vmem:[#allocation2 + $0x3b0] sm:$0xff]  ;;  %v3832_v38 = vld [vmem:[#allocation2 + $0x3c0] sm:$0xff] }
 0x2c4   : > { %v3488_v26 = vpop.f32.mrf.mxu1  ;;  %4127 = vst [vmem:[#allocation2 + $0x2f8] sm:$0xff] %v3967_v15  ;;  %v3968_v21 = vadd.f32 %v3808_v29, %v3295_v16 }
 0x2c5   : > { %4129 = vst [vmem:[#allocation2 + $0x308] sm:$0xff] %v3969_v13  ;;  %v3970_v0 = vadd.f32 %v3810_v9, %v3488_v26  ;;  %v3299_v25 = vpop.f32.mrf.mxu0  ;;  %v3834_v13 = vld [vmem:[#allocation2 + $0x3d0] sm:$0xff]  ;;  %v3833_v9 = vld [vmem:[#allocation2 + $0x3c8] sm:$0xff] }
 0x2c6   : > { %v3492_v31 = vpop.f32.mrf.mxu1  ;;  %4128 = vst [vmem:[#allocation2 + $0x300] sm:$0xff] %v3968_v21  ;;  %v3972_v45 = vadd.f32 %v3812_v23, %v3299_v25 }
 0x2c7   : > { %4130 = vst [vmem:[#allocation2 + $0x310] sm:$0xff] %v3970_v0  ;;  %v3974_v54 = vadd.f32 %v3814_v33, %v3492_v31  ;;  %v3301_v36 = vpop.f32.mrf.mxu0  ;;  %v3835_v0 = vld [vmem:[#allocation2 + $0x3d8] sm:$0xff]  ;;  %v3837_v33 = vld [vmem:[#allocation2 + $0x3e8] sm:$0xff] }
 0x2c8   : > { %v3494_v3 = vpop.f32.mrf.mxu1  ;;  %4132 = vst [vmem:[#allocation2 + $0x320] sm:$0xff] %v3972_v45  ;;  %v3973_v30 = vadd.f32 %v3813_v11, %v3301_v36 }
 0x2c9   : > { %4134 = vst [vmem:[#allocation2 + $0x330] sm:$0xff] %v3974_v54  ;;  %v3975_v37 = vadd.f32 %v3815_v34, %v3494_v3  ;;  %v3303_v10 = vpop.f32.mrf.mxu0  ;;  %v3839_v54 = vld [vmem:[#allocation2 + $0x3f8] sm:$0xff]  ;;  %v3838_v34 = vld [vmem:[#allocation2 + $0x3f0] sm:$0xff] }
 0x2ca   : > { %v3496_v35 = vpop.f32.mrf.mxu1  ;;  %4133 = vst [vmem:[#allocation2 + $0x328] sm:$0xff] %v3973_v30  ;;  %v3977_v48 = vadd.f32 %v3817_v41, %v3303_v10 }
 0x2cb   : > { %4135 = vst [vmem:[#allocation2 + $0x338] sm:$0xff] %v3975_v37  ;;  %v3979_v40 = vadd.f32 %v3819_v39, %v3496_v35  ;;  %v3305_v62 = vpop.f32.mrf.mxu0  ;;  %v3840_v37 = vld [vmem:[#allocation2 + $0x400] sm:$0xff]  ;;  %v3842_v39 = vld [vmem:[#allocation2 + $0x410] sm:$0xff] }
 0x2cc   : > { %v3498_v12 = vpop.f32.mrf.mxu1  ;;  %4137 = vst [vmem:[#allocation2 + $0x348] sm:$0xff] %v3977_v48  ;;  %v3978_v7 = vadd.f32 %v3818_v51, %v3305_v62 }
 0x2cd   : > { %4139 = vst [vmem:[#allocation2 + $0x358] sm:$0xff] %v3979_v40  ;;  %v3980_v14 = vadd.f32 %v3820_v61, %v3498_v12  ;;  %v3309_v17 = vpop.f32.mrf.mxu0  ;;  %v3844_v40 = vld [vmem:[#allocation2 + $0x420] sm:$0xff]  ;;  %v3843_v61 = vld [vmem:[#allocation2 + $0x418] sm:$0xff] }
 0x2ce   : > { %v3502_v49 = vpop.f32.mrf.mxu1  ;;  %4138 = vst [vmem:[#allocation2 + $0x350] sm:$0xff] %v3978_v7  ;;  %v3982_v52 = vadd.f32 %v3822_v42, %v3309_v17 }
 0x2cf   : > { %4140 = vst [vmem:[#allocation2 + $0x360] sm:$0xff] %v3980_v14  ;;  %v3984_v56 = vadd.f32 %v3824_v57, %v3502_v49  ;;  %v3311_v55 = vpop.f32.mrf.mxu0  ;;  %v3845_v14 = vld [vmem:[#allocation2 + $0x428] sm:$0xff]  ;;  %v3847_v57 = vld [vmem:[#allocation2 + $0x438] sm:$0xff] }
 0x2d0   : > { %v3504_v20 = vpop.f32.mrf.mxu1  ;;  %4142 = vst [vmem:[#allocation2 + $0x370] sm:$0xff] %v3982_v52  ;;  %v3983_v60 = vadd.f32 %v3823_v5, %v3311_v55 }
 0x2d1   : > { %4144 = vst [vmem:[#allocation2 + $0x380] sm:$0xff] %v3984_v56  ;;  %v3985_v63 = vadd.f32 %v3825_v47, %v3504_v20  ;;  %v3313_v19 = vpop.f32.mrf.mxu0  ;;  %v3849_v56 = vld [vmem:[#allocation2 + $0x448] sm:$0xff]  ;;  %v3848_v47 = vld [vmem:[#allocation2 + $0x440] sm:$0xff] }
 0x2d2   : > { %v3506_v4 = vpop.f32.mrf.mxu1  ;;  %4143 = vst [vmem:[#allocation2 + $0x378] sm:$0xff] %v3983_v60  ;;  %v3987_v59 = vadd.f32 %v3827_v58, %v3313_v19 }
 0x2d3   : > { %4145 = vst [vmem:[#allocation2 + $0x388] sm:$0xff] %v3985_v63  ;;  %v3989_v22 = vadd.f32 %v3829_v32, %v3506_v4  ;;  %v3315_v24 = vpop.f32.mrf.mxu0  ;;  %v3850_v63 = vld [vmem:[#allocation2 + $0x450] sm:$0xff]  ;;  %v3852_v32 = vld [vmem:[#allocation2 + $0x460] sm:$0xff] }
 0x2d4   : > { %v3508_v18 = vpop.f32.mrf.mxu1  ;;  %4147 = vst [vmem:[#allocation2 + $0x398] sm:$0xff] %v3987_v59  ;;  %v3988_v27 = vadd.f32 %v3828_v2, %v3315_v24 }
 0x2d5   : > { %4149 = vst [vmem:[#allocation2 + $0x3a8] sm:$0xff] %v3989_v22  ;;  %v3990_v8 = vadd.f32 %v3830_v44, %v3508_v18  ;;  %v3319_v1 = vpop.f32.mrf.mxu0  ;;  %v3854_v22 = vld [vmem:[#allocation2 + $0x470] sm:$0xff]  ;;  %v3853_v44 = vld [vmem:[#allocation2 + $0x468] sm:$0xff] }
 0x2d6   : > { %v3512_v15 = vpop.f32.mrf.mxu1  ;;  %4148 = vst [vmem:[#allocation2 + $0x3a0] sm:$0xff] %v3988_v27  ;;  %v3992_v16 = vadd.f32 %v3832_v38, %v3319_v1 }
 0x2d7   : > { %4150 = vst [vmem:[#allocation2 + $0x3b0] sm:$0xff] %v3990_v8  ;;  %v3994_v29 = vadd.f32 %v3834_v13, %v3512_v15  ;;  %v3321_v26 = vpop.f32.mrf.mxu0  ;;  %v3855_v8 = vld [vmem:[#allocation2 + $0x478] sm:$0xff]  ;;  %v3857_v13 = vld [vmem:[#allocation2 + $0x488] sm:$0xff] }
 0x2d8   : > { %v3514_v21 = vpop.f32.mrf.mxu1  ;;  %4152 = vst [vmem:[#allocation2 + $0x3c0] sm:$0xff] %v3992_v16  ;;  %v3993_v25 = vadd.f32 %v3833_v9, %v3321_v26 }
 0x2d9   : > { %4154 = vst [vmem:[#allocation2 + $0x3d0] sm:$0xff] %v3994_v29  ;;  %v3995_v23 = vadd.f32 %v3835_v0, %v3514_v21  ;;  %v3323_v31 = vpop.f32.mrf.mxu0  ;;  %v3859_v29 = vld [vmem:[#allocation2 + $0x498] sm:$0xff]  ;;  %v3858_v0 = vld [vmem:[#allocation2 + $0x490] sm:$0xff] }
 0x2da   : > { %v3516_v45 = vpop.f32.mrf.mxu1  ;;  %4153 = vst [vmem:[#allocation2 + $0x3c8] sm:$0xff] %v3993_v25  ;;  %v3997_v36 = vadd.f32 %v3837_v33, %v3323_v31 }
 0x2db   : > { %4155 = vst [vmem:[#allocation2 + $0x3d8] sm:$0xff] %v3995_v23  ;;  %v3999_v11 = vadd.f32 %v3839_v54, %v3516_v45  ;;  %v3325_v3 = vpop.f32.mrf.mxu0  ;;  %v3860_v23 = vld [vmem:[#allocation2 + $0x4a0] sm:$0xff]  ;;  %v3862_v54 = vld [vmem:[#allocation2 + $0x4b0] sm:$0xff] }
 0x2dc   : > { %v3518_v30 = vpop.f32.mrf.mxu1  ;;  %4157 = vst [vmem:[#allocation2 + $0x3e8] sm:$0xff] %v3997_v36  ;;  %v3998_v10 = vadd.f32 %v3838_v34, %v3325_v3 }
 0x2dd   : > { %4159 = vst [vmem:[#allocation2 + $0x3f8] sm:$0xff] %v3999_v11  ;;  %v4000_v41 = vadd.f32 %v3840_v37, %v3518_v30  ;;  %v3329_v35 = vpop.f32.mrf.mxu0  ;;  %v3864_v11 = vld [vmem:[#allocation2 + $0x4c0] sm:$0xff]  ;;  %v3863_v37 = vld [vmem:[#allocation2 + $0x4b8] sm:$0xff] }
 0x2de   : > { %v3522_v48 = vpop.f32.mrf.mxu1  ;;  %4158 = vst [vmem:[#allocation2 + $0x3f0] sm:$0xff] %v3998_v10  ;;  %v4002_v62 = vadd.f32 %v3842_v39, %v3329_v35 }
 0x2df   : > { %4160 = vst [vmem:[#allocation2 + $0x400] sm:$0xff] %v4000_v41  ;;  %v4004_v51 = vadd.f32 %v3844_v40, %v3522_v48  ;;  %v3331_v12 = vpop.f32.mrf.mxu0  ;;  %v3865_v41 = vld [vmem:[#allocation2 + $0x4c8] sm:$0xff]  ;;  %v3867_v40 = vld [vmem:[#allocation2 + $0x4d8] sm:$0xff] }
 0x2e0   : > { %v3524_v7 = vpop.f32.mrf.mxu1  ;;  %4162 = vst [vmem:[#allocation2 + $0x410] sm:$0xff] %v4002_v62  ;;  %v4003_v17 = vadd.f32 %v3843_v61, %v3331_v12 }
 0x2e1   : > { %4164 = vst [vmem:[#allocation2 + $0x420] sm:$0xff] %v4004_v51  ;;  %v4005_v42 = vadd.f32 %v3845_v14, %v3524_v7  ;;  %v3333_v49 = vpop.f32.mrf.mxu0  ;;  %v3869_v51 = vld [vmem:[#allocation2 + $0x4e8] sm:$0xff]  ;;  %v3868_v14 = vld [vmem:[#allocation2 + $0x4e0] sm:$0xff] }
 0x2e2   : > { %v3526_v52 = vpop.f32.mrf.mxu1  ;;  %4163 = vst [vmem:[#allocation2 + $0x418] sm:$0xff] %v4003_v17  ;;  %v4007_v55 = vadd.f32 %v3847_v57, %v3333_v49 }
 0x2e3   : > { %4165 = vst [vmem:[#allocation2 + $0x428] sm:$0xff] %v4005_v42  ;;  %v4009_v5 = vadd.f32 %v3849_v56, %v3526_v52  ;;  %v3335_v20 = vpop.f32.mrf.mxu0  ;;  %v3870_v42 = vld [vmem:[#allocation2 + $0x4f0] sm:$0xff] }
 0x2e4   : > { %v3528_v60 = vpop.f32.mrf.mxu1  ;;  %4167 = vst [vmem:[#allocation2 + $0x438] sm:$0xff] %v4007_v55  ;;  %v4008_v19 = vadd.f32 %v3848_v47, %v3335_v20  ;;  %v3726_v56 = vld [vmem:[#allocation2 + $0x70] sm:$0xff]  ;;  %v3716_v20 = vld [vmem:[#allocation2 + $0x20] sm:$0xff] }
 0x2e5   : > { %4169 = vst [vmem:[#allocation2 + $0x448] sm:$0xff] %v4009_v5  ;;  %v4010_v58 = vadd.f32 %v3850_v63, %v3528_v60  ;;  %v3339_v4 = vpop.f32.mrf.mxu0  ;;  %v3731_v63 = vld [vmem:[#allocation2 + $0x98] sm:$0xff] }
 0x2e6   : > { %v3532_v59 = vpop.f32.mrf.mxu1  ;;  %4168 = vst [vmem:[#allocation2 + $0x440] sm:$0xff] %v4008_v19  ;;  %v4012_v24 = vadd.f32 %v3852_v32, %v3339_v4  ;;  %v3721_v4 = vld [vmem:[#allocation2 + $0x48] sm:$0xff] }
 0x2e7   : > { %4170 = vst [vmem:[#allocation2 + $0x450] sm:$0xff] %v4010_v58  ;;  %v4014_v2 = vadd.f32 %v3854_v22, %v3532_v59  ;;  %v3341_v18 = vpop.f32.mrf.mxu0  ;;  %v3746_v22 = vld [vmem:[#allocation2 + $0x110] sm:$0xff] }
 0x2e8   : > { %v3534_v27 = vpop.f32.mrf.mxu1  ;;  %4172 = vst [vmem:[#allocation2 + $0x460] sm:$0xff] %v4012_v24  ;;  %v4013_v1 = vadd.f32 %v3853_v44, %v3341_v18  ;;  %v3736_v18 = vld [vmem:[#allocation2 + $0xc0] sm:$0xff] }
 0x2e9   : > { %4174 = vst [vmem:[#allocation2 + $0x470] sm:$0xff] %v4014_v2  ;;  %v4015_v38 = vadd.f32 %v3855_v8, %v3534_v27  ;;  %v3343_v15 = vpop.f32.mrf.mxu0  ;;  %v4200_v27 = vld [vmem:[#allocation2 + $0x40] sm:$0xff] }
 0x2ea   : > { %v3536_v16 = vpop.f32.mrf.mxu1  ;;  %4173 = vst [vmem:[#allocation2 + $0x468] sm:$0xff] %v4013_v1  ;;  %v4017_v26 = vadd.f32 %v3857_v13, %v3343_v15  ;;  %v3751_v1 = vld [vmem:[#allocation2 + $0x138] sm:$0xff] }
 0x2eb   : > { %4175 = vst [vmem:[#allocation2 + $0x478] sm:$0xff] %v4015_v38  ;;  %v4019_v9 = vadd.f32 %v3859_v29, %v3536_v16  ;;  %v3345_v21 = vpop.f32.mrf.mxu0  ;;  %v4195_v13 = vld [vmem:[#allocation2 + $0x18] sm:$0xff]  ;;  %v5104_v16 = vld [vmem:[#allocation2 + $0xd0] sm:$0xff] }
 0x2ec   : > { %v3538_v25 = vpop.f32.mrf.mxu1  ;;  %4177 = vst [vmem:[#allocation2 + $0x488] sm:$0xff] %v4017_v26  ;;  %v4018_v31 = vadd.f32 %v3858_v0, %v3345_v21  ;;  %v3741_v26 = vld [vmem:[#allocation2 + $0xe8] sm:$0xff]  ;;  %v4237_v21 = vadd.f32 %v15379_v43, %v4200_v27 }
 0x2ed   : > { %4179 = vst [vmem:[#allocation2 + $0x498] sm:$0xff] %v4019_v9  ;;  %v4020_v33 = vadd.f32 %v3860_v23, %v3538_v25  ;;  %v3349_v45 = vpop.f32.mrf.mxu0  ;;  %v13808_v27 = vld [vmem:[#allocation8 + $0xa0] sm:$0xff]  }
 0x2ee   : > { %v3542_v36 = vpop.f32.mrf.mxu1  ;;  %4178 = vst [vmem:[#allocation2 + $0x490] sm:$0xff] %v4018_v31  ;;  %v4022_v3 = vadd.f32 %v3862_v54, %v3349_v45  ;;  %v3766_v54 = vld [vmem:[#allocation2 + $0x1b0] sm:$0xff] }
 0x2ef   : > { %4180 = vst [vmem:[#allocation2 + $0x4a0] sm:$0xff] %v4020_v33  ;;  %v4024_v34 = vadd.f32 %v3864_v11, %v3542_v36  ;;  %v3351_v30 = vpop.f32.mrf.mxu0  ;;  %v5099_v33 = vld [vmem:[#allocation2 + $0xa8] sm:$0xff]  ;;  %v13796_v36 = vld [vmem:[#allocation8 + $0xb8] sm:$0xff]   ;;  %v4232_v11 = vadd.f32 %v15379_v43, %v4195_v13 }
 0x2f0   : > { %v3544_v10 = vpop.f32.mrf.mxu1  ;;  %4182 = vst [vmem:[#allocation2 + $0x4b0] sm:$0xff] %v4022_v3  ;;  %v4023_v35 = vadd.f32 %v3863_v37, %v3351_v30  ;;  %v13810_v13 = vld [vmem:[#allocation8 + $0x260] sm:$0xff]  }
 0x2f1   : > { %4184 = vst [vmem:[#allocation2 + $0x4c0] sm:$0xff] %v4024_v34  ;;  %v4025_v39 = vadd.f32 %v3865_v41, %v3544_v10  ;;  %v3353_v48 = vpop.f32.mrf.mxu0  ;;  %v5114_v34 = vadd.f32 %v5104_v16, %v15363_v46 }
 0x2f2   : > { %v3546_v62 = vpop.f32.mrf.mxu1  ;;  %4183 = vst [vmem:[#allocation2 + $0x4b8] sm:$0xff] %v4023_v35  ;;  %v4027_v12 = vadd.f32 %v3867_v40, %v3353_v48  ;;  %v13799_v35 = vld [vmem:[#allocation8 + $0xf0] sm:$0xff]   ;;  %v3756_v48 = vld [vmem:[#allocation2 + $0x160] sm:$0xff]  ;;  %v4242_v40 = vpack.c.bf16 %v4237_v21, %v4232_v11 }
 0x2f3   : > { %4185 = vst [vmem:[#allocation2 + $0x4c8] sm:$0xff] %v4025_v39  ;;  %v4029_v61 = vadd.f32 %v3869_v51, %v3546_v62  ;;  %v3355_v7 = vpop.f32.mrf.mxu0  ;;  %v13798_v62 = vld [vmem:[#allocation8 + $0x278] sm:$0xff]   ;;  %v5109_v51 = vadd.f32 %v5099_v33, %v15363_v46 }
 0x2f4   : > { %v3548_v17 = vpop.f32.mrf.mxu1  ;;  %4187 = vst [vmem:[#allocation2 + $0x4d8] sm:$0xff] %v4027_v12  ;;  %v4028_v49 = vadd.f32 %v3868_v14, %v3355_v7  ;;  %v13801_v7 = vld [vmem:[#allocation8 + $0x2b0] sm:$0xff]   ;;  %v13812_v21 = vld [vmem:[#allocation8 + $0x98] sm:$0xff]  }
 0x2f5   : > { %4189 = vst [vmem:[#allocation2 + $0x4e8] sm:$0xff] %v4029_v61  ;;  %v4030_v57 = vadd.f32 %v3870_v42, %v3548_v17  ;;  %v13293_v52 = vpop.f32.mrf.mxu0  ;;  %v3771_v17 = vld [vmem:[#allocation2 + $0x1d8] sm:$0xff]  ;;  %v5119_v42 = vpack.c.bf16 %v5114_v34, %v5109_v51 }
 0x2f6   : > { %4188 = vst [vmem:[#allocation2 + $0x4e0] sm:$0xff] %v4028_v49  ;;  %v3886_v55 = vadd.f32 %v13293_v52, %v3726_v56  ;;  %v13800_v49 = vld [vmem:[#allocation8 + $0xb0] sm:$0xff]   ;;  %v13803_v52 = vld [vmem:[#allocation8 + $0xe8] sm:$0xff]   ;;  %v13814_v33 = vld [vmem:[#allocation8 + $0x258] sm:$0xff]  }
 0x2f7   : > { %4190 = vst [vmem:[#allocation2 + $0x4f0] sm:$0xff] %v4030_v57  ;;  %v3585_v5 = vpop.f32.mrf.mxu0  ;;  %v3811_v11 = vld [vmem:[#allocation2 + $0x318] sm:$0xff] }
 0x2f8   : > { %4046 = vst.msk [vmem:[#allocation2 + $0x70] sm:$0xff] %vm1339_vm2, %v3886_v55  ;;  %v3876_v47 = vadd.f32 %v3716_v20, %v3585_v5  ;;  %v3761_v55 = vld [vmem:[#allocation2 + $0x188] sm:$0xff]  ;;  %v13802_v5 = vld [vmem:[#allocation8 + $0x270] sm:$0xff]  }
 0x2f9   : > { %v13294_v60 = vpop.f32.mrf.mxu0 }
 0x2fa   : > { %4036 = vst.msk [vmem:[#allocation2 + $0x20] sm:$0xff] %vm1339_vm2, %v3876_v47  ;;  %v3891_v19 = vadd.f32 %v13294_v60, %v3731_v63  ;;  %v13805_v47 = vld [vmem:[#allocation8 + $0x2a8] sm:$0xff]  }
 0x2fb   : > { %v3588_v58 = vpop.f32.mrf.mxu0  ;;  %v3786_v63 = vld [vmem:[#allocation2 + $0x250] sm:$0xff] }
 0x2fc   : > { %4051 = vst.msk [vmem:[#allocation2 + $0x98] sm:$0xff] %vm1339_vm2, %v3891_v19  ;;  %v3881_v32 = vadd.f32 %v3721_v4, %v3588_v58  ;;  %v13804_v19 = vld [vmem:[#allocation8 + $0xa8] sm:$0xff]   ;;  %v13807_v4 = vld [vmem:[#allocation8 + $0xe0] sm:$0xff]  }
 0x2fd   : > { %v13297_v59 = vpop.f32.mrf.mxu0 }
 0x2fe   : > { %4041 = vst.msk [vmem:[#allocation2 + $0x48] sm:$0xff] %vm1339_vm2, %v3881_v32  ;;  %v3906_v24 = vadd.f32 %v13297_v59, %v3746_v22  ;;  %v3776_v59 = vld [vmem:[#allocation2 + $0x200] sm:$0xff]  ;;  %v13806_v22 = vld [vmem:[#allocation8 + $0x268] sm:$0xff]  }
 0x2ff   : > { %v3601_v2 = vpop.f32.mrf.mxu0  ;;  %v4320_v38 = vld [vmem:[#allocation2 + $0x70] sm:$0xff] }
 0x300   : > { %4066 = vst.msk [vmem:[#allocation2 + $0x110] sm:$0xff] %vm1339_vm2, %v3906_v24  ;;  %v3896_v44 = vadd.f32 %v3736_v18, %v3601_v2  ;;  %v4330_v23 = vadd.f32 %v4320_v38, %v15257_v50  ;;  %v13809_v2 = vld [vmem:[#allocation8 + $0x2a0] sm:$0xff]  }
 0x301   : > { %v13298_v8 = vpop.f32.mrf.mxu0  ;;  %v4196_v0 = vld [vmem:[#allocation2 + $0x20] sm:$0xff] }
 0x302   : > { %4056 = vst.msk [vmem:[#allocation2 + $0xc0] sm:$0xff] %vm1339_vm2, %v3896_v44  ;;  %v3911_v15 = vadd.f32 %v13298_v8, %v3751_v1  ;;  %v4233_v10 = vadd.f32 %v15257_v50, %v4196_v0  ;;  %v3791_v44 = vld [vmem:[#allocation2 + $0x278] sm:$0xff] }
 0x303   : > { %v3604_v29 = vpop.f32.mrf.mxu0  ;;  %v4325_v9 = vld [vmem:[#allocation2 + $0x98] sm:$0xff] }
 0x304   : > { %4071 = vst.msk [vmem:[#allocation2 + $0x138] sm:$0xff] %vm1339_vm2, %v3911_v15  ;;  %v3901_v25 = vadd.f32 %v3741_v26, %v3604_v29  ;;  %v4335_v31 = vadd.f32 %v4325_v9, %v15257_v50  ;;  %v13811_v1 = vld [vmem:[#allocation8 + $0xd8] sm:$0xff]   ;;  %v3781_v15 = vld [vmem:[#allocation2 + $0x228] sm:$0xff]  ;;  %v3806_v9 = vld [vmem:[#allocation2 + $0x2f0] sm:$0xff] }
 0x305   : > { %v13301_v45 = vpop.f32.mrf.mxu0  ;;  %v4201_v3 = vld [vmem:[#allocation2 + $0x48] sm:$0xff]  ;;  %v13813_v29 = vld [vmem:[#allocation8 + $0x298] sm:$0xff]  }
 0x306   : > { %4061 = vst.msk [vmem:[#allocation2 + $0xe8] sm:$0xff] %vm1339_vm2, %v3901_v25  ;;  %v3926_v30 = vadd.f32 %v13301_v45, %v3766_v54  ;;  %v4340_v37 = vpack.c.bf16 %v4335_v31, %v4330_v23  ;;  %v4238_v41 = vadd.f32 %v15257_v50, %v4201_v3  ;;  %v13815_v25 = vld [vmem:[#allocation8 + $0xd0] sm:$0xff]   ;;  %v3796_v31 = vld [vmem:[#allocation2 + $0x2a0] sm:$0xff] }
 0x307   : > { %v3617_v39 = vpop.f32.mrf.mxu0  ;;  %v13817_v54 = vld [vmem:[#allocation8 + $0x290] sm:$0xff]  }
 0x308   : > { %4086 = vst.msk [vmem:[#allocation2 + $0x1b0] sm:$0xff] %vm1339_vm2, %v3926_v30  ;;  %v3916_v12 = vadd.f32 %v3756_v48, %v3617_v39  ;;  %13332 = vmatmul.mubr.msk.bf16.vlgmr.msra.gmra.mxu1 %vm1339_vm2, %v4340_v37  ;;  %v4243_v61 = vpack.c.bf16 %v4238_v41, %v4233_v10  ;;  %v13816_v3 = vld [vmem:[#allocation8 + $0x90] sm:$0xff]   ;;  %v13819_v30 = vld [vmem:[#allocation8 + $0xc8] sm:$0xff]  }
 0x309   : > { %12485 = vmatpush3.bf16.msra.mxu1 %v13796_v36  ;;  %v13302_v14 = vpop.f32.mrf.mxu0  ;;  %5048 = vmatprep.mubr.bf16.mxu1 %v4242_v40  ;;  %v3801_v10 = vld [vmem:[#allocation2 + $0x2c8] sm:$0xff]  ;;  %v13818_v41 = vld [vmem:[#allocation8 + $0x250] sm:$0xff]  }
 0x30a   : > { %4076 = vst.msk [vmem:[#allocation2 + $0x160] sm:$0xff] %vm1339_vm2, %v3916_v12  ;;  %v3931_v57 = vadd.f32 %v13302_v14, %v3771_v17  ;;  %13344 = vmatmul.mubr.msk.bf16.vlgmr.msra.gmra.mxu0 %vm1339_vm2, %v4243_v61  ;;  %12486 = vmatprep.subr.bf16.mxu1 %v13799_v35  ;;  %v13821_v39 = vld [vmem:[#allocation8 + $0x288] sm:$0xff]   ;;  %v13823_v12 = vld [vmem:[#allocation8 + $0xc0] sm:$0xff]   ;;  %v4199_v17 = vld [vmem:[#allocation2 + $0x38] sm:$0xff] }
 0x30b   : > { %12512 = vmatpush3.bf16.msra.mxu0 %v13798_v62  ;;  %v3620_v56 = vpop.f32.mrf.mxu0  ;;  %5447 = vmatprep.mubr.bf16.mxu0 %v5119_v42  ;;  %v3826_v40 = vld [vmem:[#allocation2 + $0x390] sm:$0xff] }
 0x30c   : > { %4091 = vst.msk [vmem:[#allocation2 + $0x1d8] sm:$0xff] %vm1339_vm2, %v3931_v57  ;;  %v3921_v20 = vadd.f32 %v3761_v55, %v3620_v56  ;;  %12513 = vmatprep.subr.bf16.mxu0 %v13801_v7  ;;  %v13820_v62 = vld [vmem:[#allocation8 + $0x88] sm:$0xff]   ;;  %v3816_v7 = vld [vmem:[#allocation2 + $0x340] sm:$0xff] }
 0x30d   : > { %12487 = vmatpush3.bf16.msra.mxu1 %v13800_v49  ;;  %v13305_v60 = vpop.f32.mrf.mxu0  ;;  %v13822_v14 = vld [vmem:[#allocation8 + $0x248] sm:$0xff]   ;;  %v3831_v49 = vld [vmem:[#allocation2 + $0x3b8] sm:$0xff]  ;;  %v13825_v57 = vld [vmem:[#allocation8 + $0x280] sm:$0xff]  }
 0x30e   : > { %4081 = vst.msk [vmem:[#allocation2 + $0x188] sm:$0xff] %vm1339_vm2, %v3921_v20  ;;  %v3946_v58 = vadd.f32 %v13305_v60, %v3786_v63  ;;  %12488 = vmatprep.subr.bf16.mxu1 %v13803_v52  ;;  %v5106_v52 = vld [vmem:[#allocation2 + $0xe0] sm:$0xff]  ;;  %v5103_v20 = vld [vmem:[#allocation2 + $0xc8] sm:$0xff]  ;;  %v4236_v60 = vadd.f32 %v15395_v6, %v4199_v17 }
 0x30f   : > { %12514 = vmatpush3.bf16.msra.mxu0 %v13802_v5  ;;  %v3633_v32 = vpop.f32.mrf.mxu0  ;;  %v13824_v55 = vld [vmem:[#allocation8 + $0x80] sm:$0xff]   ;;  %v4194_v5 = vld [vmem:[#allocation2 + $0x10] sm:$0xff]  ;;  %v13827_v63 = vld [vmem:[#allocation8 + $0x338] sm:$0xff]  }
 0x310   : > { %4106 = vst.msk [vmem:[#allocation2 + $0x250] sm:$0xff] %vm1339_vm2, %v3946_v58  ;;  %v3936_v24 = vadd.f32 %v3776_v59, %v3633_v32  ;;  %12515 = vmatprep.subr.bf16.mxu0 %v13805_v47  ;;  %v13826_v32 = vld [vmem:[#allocation8 + $0x240] sm:$0xff]   ;;  %v5116_v59 = vadd.f32 %v5106_v52, %v15379_v43  ;;  %v13839_v17 = vld [vmem:[#allocation8 + $0x318] sm:$0xff]  }
 0x311   : > { %12489 = vmatpush3.bf16.msra.mxu1 %v13804_v19  ;;  %v13306_v18 = vpop.f32.mrf.mxu0  ;;  %v5101_v19 = vld [vmem:[#allocation2 + $0xb8] sm:$0xff]  ;;  %v13838_v52 = vld [vmem:[#allocation8 + $0x340] sm:$0xff]  }
 0x312   : > { %4096 = vst.msk [vmem:[#allocation2 + $0x200] sm:$0xff] %vm1339_vm2, %v3936_v24  ;;  %v3951_v8 = vadd.f32 %v13306_v18, %v3791_v44  ;;  %12490 = vmatprep.subr.bf16.mxu1 %v13807_v4  ;;  %v3821_v4 = vld [vmem:[#allocation2 + $0x368] sm:$0xff]  ;;  %v5113_v18 = vadd.f32 %v5103_v20, %v15366_v53  ;;  %v13841_v20 = vld [vmem:[#allocation8 + $0x458] sm:$0xff]  }
 0x313   : > { %12516 = vmatpush3.bf16.msra.mxu0 %v13806_v22  ;;  %v3636_v38 = vpop.f32.mrf.mxu0  ;;  %v5098_v22 = vld [vmem:[#allocation2 + $0xa0] sm:$0xff] }
 0x314   : > { %4111 = vst.msk [vmem:[#allocation2 + $0x278] sm:$0xff] %vm1339_vm2, %v3951_v8  ;;  %v3941_v16 = vadd.f32 %v3781_v15, %v3636_v38  ;;  %12517 = vmatprep.subr.bf16.mxu0 %v13809_v2  ;;  %v4231_v2 = vadd.f32 %v15395_v6, %v4194_v5  ;;  %v13828_v8 = vld [vmem:[#allocation8 + $0x2f8] sm:$0xff]  }
 0x315   : > { %12491 = vmatpush3.bf16.msra.mxu1 %v13808_v27  ;;  %v13309_v26 = vpop.f32.mrf.mxu0  ;;  %v3846_v27 = vld [vmem:[#allocation2 + $0x430] sm:$0xff] }
 0x316   : > { %4101 = vst.msk [vmem:[#allocation2 + $0x228] sm:$0xff] %vm1339_vm2, %v3941_v16  ;;  %v3966_v0 = vadd.f32 %v13309_v26, %v3806_v9  ;;  %12492 = vmatprep.subr.bf16.mxu1 %v13811_v1  ;;  %v5111_v1 = vadd.f32 %v5101_v19, %v15379_v43  ;;  %v4241_v15 = vpack.c.bf16 %v4236_v60, %v4231_v2  ;;  %v13830_v16 = vld [vmem:[#allocation8 + $0x330] sm:$0xff]   ;;  %v3836_v26 = vld [vmem:[#allocation2 + $0x3e0] sm:$0xff] }
 0x317   : > { %12518 = vmatpush3.bf16.msra.mxu0 %v13810_v13  ;;  %v3649_v23 = vpop.f32.mrf.mxu0  ;;  %v5108_v13 = vadd.f32 %v5098_v22, %v15366_v53  ;;  %v13840_v60 = vld [vmem:[#allocation8 + $0x2d8] sm:$0xff]   ;;  %v13845_v22 = vld [vmem:[#allocation8 + $0x450] sm:$0xff]  }
 0x318   : > { %4126 = vst.msk [vmem:[#allocation2 + $0x2f0] sm:$0xff] %vm1339_vm2, %v3966_v0  ;;  %v3956_v45 = vadd.f32 %v3796_v31, %v3649_v23  ;;  %12519 = vmatprep.subr.bf16.mxu0 %v13813_v29  ;;  %v5121_v9 = vpack.c.bf16 %v5116_v59, %v5111_v1  ;;  %v3851_v31 = vld [vmem:[#allocation2 + $0x458] sm:$0xff]  ;;  %v13851_v1 = vld [vmem:[#allocation8 + $0x300] sm:$0xff]  }
 0x319   : > { %12493 = vmatpush3.bf16.msra.mxu1 %v13812_v21  ;;  %v13310_v36 = vpop.f32.mrf.mxu0  ;;  %v13829_v21 = vld [vmem:[#allocation8 + $0x358] sm:$0xff]   ;;  %v13844_v2 = vld [vmem:[#allocation8 + $0x2d0] sm:$0xff]  }
 0x31a   : > { %4116 = vst.msk [vmem:[#allocation2 + $0x2a0] sm:$0xff] %vm1339_vm2, %v3956_v45  ;;  %v3971_v34 = vadd.f32 %v13310_v36, %v3811_v11  ;;  %12494 = vmatprep.subr.bf16.mxu1 %v13815_v25  ;;  %v5118_v25 = vpack.c.bf16 %v5113_v18, %v5108_v13  ;;  %v3841_v11 = vld [vmem:[#allocation2 + $0x408] sm:$0xff] }
 0x31b   : > { %12520 = vmatpush3.bf16.msra.mxu0 %v13814_v33  ;;  %v3652_v37 = vpop.f32.mrf.mxu0  ;;  %v13831_v33 = vld [vmem:[#allocation8 + $0x2f0] sm:$0xff]   ;;  %v13847_v18 = vld [vmem:[#allocation8 + $0x308] sm:$0xff]   ;;  %v13853_v13 = vld [vmem:[#allocation8 + $0x440] sm:$0xff]  }
 0x31c   : > { %4131 = vst.msk [vmem:[#allocation2 + $0x318] sm:$0xff] %vm1339_vm2, %v3971_v34  ;;  %v3961_v35 = vadd.f32 %v3801_v10, %v3652_v37  ;;  %12521 = vmatprep.subr.bf16.mxu0 %v13817_v54  ;;  %v13833_v54 = vld [vmem:[#allocation8 + $0x328] sm:$0xff]  }
 0x31d   : > { %12495 = vmatpush3.bf16.msra.mxu1 %v13816_v3  ;;  %v13313_v48 = vpop.f32.mrf.mxu0  ;;  %v13832_v3 = vld [vmem:[#allocation8 + $0x350] sm:$0xff]   ;;  %v13834_v10 = vld [vmem:[#allocation8 + $0x2e8] sm:$0xff]  }
 0x31e   : > { %4121 = vst.msk [vmem:[#allocation2 + $0x2c8] sm:$0xff] %vm1339_vm2, %v3961_v35  ;;  %v3986_v51 = vadd.f32 %v13313_v48, %v3826_v40  ;;  %12496 = vmatprep.subr.bf16.mxu1 %v13819_v30  ;;  %v3866_v37 = vld [vmem:[#allocation2 + $0x4d0] sm:$0xff]  ;;  %v13836_v35 = vld [vmem:[#allocation8 + $0x320] sm:$0xff]  }
 0x31f   : > { %12522 = vmatpush3.bf16.msra.mxu0 %v13818_v41  ;;  %v3665_v61 = vpop.f32.mrf.mxu0  ;;  %v3856_v48 = vld [vmem:[#allocation2 + $0x480] sm:$0xff]  ;;  %v13835_v40 = vld [vmem:[#allocation8 + $0x348] sm:$0xff]  }
 0x320   : > { %4146 = vst.msk [vmem:[#allocation2 + $0x390] sm:$0xff] %vm1339_vm2, %v3986_v51  ;;  %v3976_v42 = vadd.f32 %v3816_v7, %v3665_v61  ;;  %12523 = vmatprep.subr.bf16.mxu0 %v13821_v39  ;;  %v13837_v61 = vld [vmem:[#allocation8 + $0x2e0] sm:$0xff]  }
 0x321   : > { %12497 = vmatpush3.bf16.msra.mxu1 %v13820_v62  ;;  %v13314_v56 = vpop.f32.mrf.mxu0  ;;  %v5107_v7 = vld [vmem:[#allocation2 + $0xe8] sm:$0xff] }
 0x322   : > { %4136 = vst.msk [vmem:[#allocation2 + $0x340] sm:$0xff] %vm1339_vm2, %v3976_v42  ;;  %v3991_v47 = vadd.f32 %v13314_v56, %v3831_v49  ;;  %12498 = vmatprep.subr.bf16.mxu1 %v13823_v12  ;;  %v3871_v12 = vld [vmem:[#allocation2 + $0x4f8] sm:$0xff]  ;;  %v5548_v42 = vld [vmem:[#allocation2 + $0x130] sm:$0xff]  ;;  %v5102_v56 = vld [vmem:[#allocation2 + $0xc0] sm:$0xff]  ;;  %v5117_v5 = vadd.f32 %v5107_v7, %v15257_v50 }
 0x323   : > { %12524 = vmatpush3.bf16.msra.mxu0 %v13822_v14  ;;  %v3668_v58 = vpop.f32.mrf.mxu0  ;;  %v5112_v19 = vadd.f32 %v5102_v56, %v15257_v50  ;;  %v13871_v56 = vld [vmem:[#allocation8 + $0x3b8] sm:$0xff]  }
 0x324   : > { %4151 = vst.msk [vmem:[#allocation2 + $0x3b8] sm:$0xff] %vm1339_vm2, %v3991_v47  ;;  %v3981_v24 = vadd.f32 %v3821_v4, %v3668_v58  ;;  %12525 = vmatprep.subr.bf16.mxu0 %v13825_v57  ;;  %v3861_v57 = vld [vmem:[#allocation2 + $0x4a8] sm:$0xff]  ;;  %v13843_v58 = vld [vmem:[#allocation8 + $0x310] sm:$0xff]   ;;  %v13842_v4 = vld [vmem:[#allocation8 + $0x418] sm:$0xff]  }
 0x325   : > { %12499 = vmatpush3.bf16.msra.mxu1 %v13824_v55  ;;  %v13317_v44 = vpop.f32.mrf.mxu0  ;;  %v5543_v47 = vld [vmem:[#allocation2 + $0x108] sm:$0xff]  ;;  %v5122_v59 = vpack.c.bf16 %v5117_v5, %v5112_v19  ;;  %v5988_v5 = vld [vmem:[#allocation2 + $0x170] sm:$0xff] }
 0x326   : > { %4141 = vst.msk [vmem:[#allocation2 + $0x368] sm:$0xff] %vm1339_vm2, %v3981_v24  ;;  %v4006_v38 = vadd.f32 %v13317_v44, %v3846_v27  ;;  %12533 = vmatprep.subr.bf16.mxu1 %v13827_v63  ;;  %v5558_v63 = vadd.f32 %v5548_v42, %v15379_v43  ;;  %v13846_v44 = vld [vmem:[#allocation8 + $0x410] sm:$0xff]   ;;  %v13849_v27 = vld [vmem:[#allocation8 + $0x448] sm:$0xff]   ;;  %v13869_v42 = vld [vmem:[#allocation8 + $0x420] sm:$0xff]  }
 0x327   : > { %12526 = vmatpush3.bf16.msra.mxu0 %v13826_v32  ;;  %v3681_v29 = vpop.f32.mrf.mxu0  ;;  %v5553_v32 = vadd.f32 %v5543_v47, %v15379_v43  ;;  %v5542_v47 = vld [vmem:[#allocation2 + $0x100] sm:$0xff]  ;;  %v5983_v19 = vld [vmem:[#allocation2 + $0x148] sm:$0xff] }
 0x328   : > { %4166 = vst.msk [vmem:[#allocation2 + $0x430] sm:$0xff] %vm1339_vm2, %v4006_v38  ;;  %v3996_v0 = vadd.f32 %v3836_v26, %v3681_v29  ;;  %5049 = vmatmul.mubr.bf16.vlgmr.msra.gmra.mxu1 %v4241_v15  ;;  %13347 = vmatprep.subr.bf16.mxu0 %v14482_v28  ;;  %v13850_v38 = vld [vmem:[#allocation8 + $0x408] sm:$0xff]   ;;  %v5105_v15 = vld [vmem:[#allocation2 + $0xd8] sm:$0xff]  ;;  %v13852_v29 = vld [vmem:[#allocation8 + $0x2c0] sm:$0xff]  }
 0x329   : > { %12534 = vmatpush3.bf16.msra.mxu1 %v13828_v8  ;;  %5488 = vmatprep.mubr.bf16.mxu1 %v5121_v9  ;;  %v13318_v23 = vpop.f32.mrf.mxu0  ;;  %v5563_v24 = vpack.c.bf16 %v5558_v63, %v5553_v32  ;;  %v13848_v8 = vld [vmem:[#allocation8 + $0x2c8] sm:$0xff]   ;;  %v5115_v9 = vadd.f32 %v5105_v15, %v15395_v6  ;;  %v13873_v63 = vld [vmem:[#allocation8 + $0x4f8] sm:$0xff]   ;;  %v5552_v32 = vadd.f32 %v5542_v47, %v15395_v6 }
 0x32a   : > { %4156 = vst.msk [vmem:[#allocation2 + $0x3e0] sm:$0xff] %vm1339_vm2, %v3996_v0  ;;  %v4011_v45 = vadd.f32 %v13318_v23, %v3851_v31  ;;  %5448 = vmatmul.mubr.bf16.vlgmr.msra.gmra.mxu0 %v5118_v25  ;;  %12535 = vmatprep.subr.bf16.mxu1 %v13830_v16  ;;  %v5546_v16 = vld [vmem:[#allocation2 + $0x120] sm:$0xff]  ;;  %v5100_v26 = vld [vmem:[#allocation2 + $0xb0] sm:$0xff]  ;;  %v5541_v0 = vld [vmem:[#allocation2 + $0xf8] sm:$0xff] }
 0x32b   : > { %13348 = vmatpush3.bf16.msra.mxu0 %v13829_v21  ;;  %v3684_v36 = vpop.f32.mrf.mxu0  ;;  %13355 = vmatprep.mubr.msk.bf16.mxu0 %vm14483_vm3, %v14482_v28  ;;  %v13855_v21 = vld [vmem:[#allocation8 + $0x3d8] sm:$0xff]   ;;  %v13854_v25 = vld [vmem:[#allocation8 + $0x400] sm:$0xff]   ;;  %v5556_v23 = vadd.f32 %v5546_v16, %v15363_v46  ;;  %v13880_v15 = vld [vmem:[#allocation8 + $0x368] sm:$0xff]  }
 0x32c   : > { %4171 = vst.msk [vmem:[#allocation2 + $0x458] sm:$0xff] %vm1339_vm2, %v4011_v45  ;;  %v4001_v34 = vadd.f32 %v3841_v11, %v3684_v36  ;;  %13349 = vmatprep.subr.bf16.mxu0 %v14482_v28  ;;  %v13857_v45 = vld [vmem:[#allocation8 + $0x438] sm:$0xff]   ;;  %v5551_v36 = vadd.f32 %v5541_v0, %v15363_v46  ;;  %v13882_v16 = vld [vmem:[#allocation8 + $0x4a8] sm:$0xff]  }
 0x32d   : > { %12536 = vmatpush3.bf16.msra.mxu1 %v13831_v33  ;;  %v13321_v30 = vpop.f32.mrf.mxu0  ;;  %v5110_v33 = vadd.f32 %v5100_v26, %v15395_v6  ;;  %v13885_v26 = vld [vmem:[#allocation8 + $0x4e0] sm:$0xff]  }
 0x32e   : > { %4161 = vst.msk [vmem:[#allocation2 + $0x408] sm:$0xff] %vm1339_vm2, %v4001_v34  ;;  %v4026_v41 = vadd.f32 %v13321_v30, %v3866_v37  ;;  %12537 = vmatprep.subr.bf16.mxu1 %v13833_v54  ;;  %v13856_v54 = vld [vmem:[#allocation8 + $0x398] sm:$0xff]   ;;  %v13859_v34 = vld [vmem:[#allocation8 + $0x3d0] sm:$0xff]   ;;  %v5561_v37 = vpack.c.bf16 %v5556_v23, %v5551_v36 }
 0x32f   : > { %13350 = vmatpush3.bf16.msra.mxu0 %v13832_v3  ;;  %v3697_v39 = vpop.f32.mrf.mxu0  ;;  %v5120_v3 = vpack.c.bf16 %v5115_v9, %v5110_v33  ;;  %v13884_v9 = vld [vmem:[#allocation8 + $0x360] sm:$0xff]   ;;  %v13887_v33 = vld [vmem:[#allocation8 + $0x478] sm:$0xff]   ;;  %v13891_v36 = vld [vmem:[#allocation8 + $0x4d0] sm:$0xff]  }
 0x330   : > { %4186 = vst.msk [vmem:[#allocation2 + $0x4d0] sm:$0xff] %vm1339_vm2, %v4026_v41  ;;  %v4016_v62 = vadd.f32 %v3856_v48, %v3697_v39  ;;  %13351 = vmatprep.subr.bf16.mxu0 %v14482_v28  ;;  %v13861_v41 = vld [vmem:[#allocation8 + $0x430] sm:$0xff]   ;;  %v13863_v39 = vld [vmem:[#allocation8 + $0x3c8] sm:$0xff]   ;;  %v5982_v47 = vld [vmem:[#allocation2 + $0x140] sm:$0xff] }
 0x331   : > { %12538 = vmatpush3.bf16.msra.mxu1 %v13834_v10  ;;  %v13322_v51 = vpop.f32.mrf.mxu0  ;;  %v13858_v10 = vld [vmem:[#allocation8 + $0x3f8] sm:$0xff]   ;;  %v13862_v48 = vld [vmem:[#allocation8 + $0x3f0] sm:$0xff]  }
 0x332   : > { %4176 = vst.msk [vmem:[#allocation2 + $0x480] sm:$0xff] %vm1339_vm2, %v4016_v62  ;;  %v4031_v14 = vadd.f32 %v13322_v51, %v3871_v12  ;;  %12539 = vmatprep.subr.bf16.mxu1 %v13836_v35  ;;  %v13860_v35 = vld [vmem:[#allocation8 + $0x390] sm:$0xff]   ;;  %v13865_v62 = vld [vmem:[#allocation8 + $0x428] sm:$0xff]  }
 0x333   : > { %13352 = vmatpush3.bf16.msra.mxu0 %v13835_v40  ;;  %v3700_v49 = vpop.f32.mrf.mxu0  ;;  %v13864_v51 = vld [vmem:[#allocation8 + $0x388] sm:$0xff]  }
 0x334   : > { %4191 = vst.msk [vmem:[#allocation2 + $0x4f8] sm:$0xff] %vm1339_vm2, %v4031_v14  ;;  %v4021_v55 = vadd.f32 %v3861_v57, %v3700_v49  ;;  %13353 = vmatprep.subr.bf16.mxu0 %v14482_v28  ;;  %v13866_v14 = vld [vmem:[#allocation8 + $0x3e8] sm:$0xff]   ;;  %v13868_v49 = vld [vmem:[#allocation8 + $0x380] sm:$0xff]  }
 0x335   : > { %12540 = vmatpush3.bf16.msra.mxu1 %v13837_v61  ;;  %v13867_v61 = vld [vmem:[#allocation8 + $0x3c0] sm:$0xff]  }
 0x336   : > { %4181 = vst.msk [vmem:[#allocation2 + $0x4a8] sm:$0xff] %vm1339_vm2, %v4021_v55  ;;  %12541 = vmatprep.subr.bf16.mxu1 %v13839_v17 }
 0x337   : > { %13354 = vmatpush3.bf16.msra.mxu0 %v13838_v52  ;;  %v5547_v52 = vld [vmem:[#allocation2 + $0x128] sm:$0xff] }
 0x338   : > { %12582 = vmatprep.subr.bf16.mxu0 %v13841_v20  ;;  %v13870_v20 = vld [vmem:[#allocation8 + $0x3e0] sm:$0xff]  }
 0x339   : > { %12542 = vmatpush3.bf16.msra.mxu1 %v13840_v60  ;;  %v5557_v60 = vadd.f32 %v5547_v52, %v15395_v6 }
 0x33a   : > { %13356 = vmatmul.mubr.msk.bf16.vlgmr.msra.gmra.mxu0 %vm1339_vm2, %v5122_v59  ;;  %12543 = vmatprep.subr.bf16.mxu1 %v13843_v58  ;;  %v13872_v58 = vld [vmem:[#allocation8 + $0x378] sm:$0xff]   ;;  %v13875_v59 = vld [vmem:[#allocation8 + $0x3b0] sm:$0xff]  }
 0x33b   : > { %12583 = vmatpush3.bf16.msra.mxu0 %v13842_v4  ;;  %5930 = vmatprep.mubr.bf16.mxu0 %v5563_v24  ;;  %v5998_v4 = vadd.f32 %v5988_v5, %v15363_v46  ;;  %v5993_v24 = vadd.f32 %v5983_v19, %v15363_v46  ;;  %v13898_v5 = vld [vmem:[#allocation8 + $0x480] sm:$0xff]   ;;  %v13900_v19 = vld [vmem:[#allocation8 + $0x538] sm:$0xff]  }
 0x33c   : > { %12584 = vmatprep.subr.bf16.mxu0 %v13845_v22  ;;  %v13874_v22 = vld [vmem:[#allocation8 + $0x4b8] sm:$0xff]  }
 0x33d   : > { %12544 = vmatpush3.bf16.msra.mxu1 %v13844_v2  ;;  %v5562_v2 = vpack.c.bf16 %v5557_v60, %v5552_v32  ;;  %v5992_v32 = vadd.f32 %v5982_v47, %v15366_v53 }
 0x33e   : > { %12545 = vmatprep.subr.bf16.mxu1 %v13847_v18  ;;  %v13877_v18 = vld [vmem:[#allocation8 + $0x4f0] sm:$0xff]  }
 0x33f   : > { %12585 = vmatpush3.bf16.msra.mxu0 %v13846_v44  ;;  %v6003_v44 = vpack.c.bf16 %v5998_v4, %v5993_v24  ;;  %v13901_v24 = vld [vmem:[#allocation8 + $0x598] sm:$0xff]  }
 0x340   : > { %12586 = vmatprep.subr.bf16.mxu0 %v13849_v27  ;;  %v13876_v27 = vld [vmem:[#allocation8 + $0x370] sm:$0xff]  }
 0x341   : > { %12546 = vmatpush3.bf16.msra.mxu1 %v13848_v8  ;;  %v13879_v8 = vld [vmem:[#allocation8 + $0x3a8] sm:$0xff]  }
 0x342   : > { %12547 = vmatprep.subr.bf16.mxu1 %v13851_v1  ;;  %v13878_v1 = vld [vmem:[#allocation8 + $0x4b0] sm:$0xff]  }
 0x343   : > { %12587 = vmatpush3.bf16.msra.mxu0 %v13850_v38  ;;  %v12478_v31 = vpop.f32.mrf.mxu0  ;;  %v13881_v38 = vld [vmem:[#allocation8 + $0x4e8] sm:$0xff]  }
 0x344   : > { %12588 = vmatprep.subr.bf16.mxu0 %v13853_v13  ;;  %v13883_v13 = vld [vmem:[#allocation8 + $0x3a0] sm:$0xff]  }
 0x345   : > { %12548 = vmatpush3.bf16.msra.mxu1 %v13852_v29  ;;  %v12479_v11 = vpop.f32.mrf.mxu0  ;;  %v5545_v29 = vld [vmem:[#allocation2 + $0x118] sm:$0xff] }
 0x346   : > { %12560 = vmatprep.subr.bf16.mxu1 %v13855_v21  ;;  %v15470_v30 = vadd.f32 %v12479_v11, %v12478_v31  ;;  %v5540_v21 = vld [vmem:[#allocation2 + $0xf0] sm:$0xff]  ;;  %v5555_v0 = vadd.f32 %v5545_v29, %v15366_v53  ;;  %v13888_v31 = vld [vmem:[#allocation8 + $0x4d8] sm:$0xff]   ;;  %v13910_v29 = vld [vmem:[#allocation8 + $0x580] sm:$0xff]  }
 0x347   : > { %12589 = vmatpush3.bf16.msra.mxu0 %v13854_v25  ;;  %v13886_v25 = vld [vmem:[#allocation8 + $0x4a0] sm:$0xff]   ;;  %v5550_v23 = vadd.f32 %v5540_v21, %v15366_v53  ;;  %v13890_v11 = vld [vmem:[#allocation8 + $0x470] sm:$0xff]   ;;  %v13913_v21 = vld [vmem:[#allocation8 + $0x698] sm:$0xff]  }
 0x348   : > { %5489 = vmatmul.mubr.bf16.vlgmr.msra.gmra.mxu1 %v5120_v3  ;;  %12590 = vmatprep.subr.bf16.mxu0 %v13857_v45  ;;  %v13892_v3 = vld [vmem:[#allocation8 + $0x490] sm:$0xff]  }
 0x349   : > { %12561 = vmatpush3.bf16.msra.mxu1 %v13856_v54  ;;  %5889 = vmatprep.mubr.bf16.mxu1 %v5561_v37  ;;  %v5560_v45 = vpack.c.bf16 %v5555_v0, %v5550_v23  ;;  %v13889_v54 = vld [vmem:[#allocation8 + $0x498] sm:$0xff]   ;;  %v13894_v37 = vld [vmem:[#allocation8 + $0x4c8] sm:$0xff]  }
 0x34a   : > { %12562 = vmatprep.subr.bf16.mxu1 %v13859_v34  ;;  %v6427_v0 = vld [vmem:[#allocation2 + $0x1a8] sm:$0xff] }
 0x34b   : > { %12591 = vmatpush3.bf16.msra.mxu0 %v13858_v10  ;;  %v12429_v40 = vpop.f32.mrf.mxu1  ;;  %v13893_v10 = vld [vmem:[#allocation8 + $0x468] sm:$0xff]  }
 0x34c   : > { %12592 = vmatprep.subr.bf16.mxu0 %v13861_v41 }
 0x34d   : > { %12563 = vmatpush3.bf16.msra.mxu1 %v13860_v35  ;;  %v12430_v12 = vpop.f32.mrf.mxu1 }
 0x34e   : > { %12564 = vmatprep.subr.bf16.mxu1 %v13863_v39  ;;  %v15472_v7 = vadd.f32 %v12430_v12, %v12429_v40  ;;  %v13895_v39 = vld [vmem:[#allocation8 + $0x488] sm:$0xff]   ;;  %v5549_v40 = vld [vmem:[#allocation2 + $0x138] sm:$0xff] }
 0x34f   : > { %12593 = vmatpush3.bf16.msra.mxu0 %v13862_v48  ;;  %v12432_v17 = vpop.f32.mrf.mxu1 }
 0x350   : > { %12594 = vmatprep.subr.bf16.mxu0 %v13865_v62  ;;  %v13897_v62 = vld [vmem:[#allocation8 + $0x4c0] sm:$0xff]  }
 0x351   : > { %12565 = vmatpush3.bf16.msra.mxu1 %v13864_v51  ;;  %v12433_v57 = vpop.f32.mrf.mxu1  ;;  %v5990_v51 = vld [vmem:[#allocation2 + $0x180] sm:$0xff] }
 0x352   : > { %12566 = vmatprep.subr.bf16.mxu1 %v13867_v61  ;;  %v15474_v55 = vadd.f32 %v12433_v57, %v12432_v17  ;;  %v13896_v61 = vld [vmem:[#allocation8 + $0x460] sm:$0xff]   ;;  %v13899_v57 = vld [vmem:[#allocation8 + $0x578] sm:$0xff]  }
 0x353   : > { %12595 = vmatpush3.bf16.msra.mxu0 %v13866_v14  ;;  %v5544_v14 = vld [vmem:[#allocation2 + $0x110] sm:$0xff] }
 0x354   : > { %12596 = vmatprep.subr.bf16.mxu0 %v13869_v42  ;;  %v5987_v42 = vld [vmem:[#allocation2 + $0x168] sm:$0xff] }
 0x355   : > { %12567 = vmatpush3.bf16.msra.mxu1 %v13868_v49  ;;  %v5559_v49 = vadd.f32 %v5549_v40, %v15257_v50  ;;  %v5997_v60 = vadd.f32 %v5987_v42, %v15366_v53  ;;  %v5989_v40 = vld [vmem:[#allocation2 + $0x178] sm:$0xff] }
 0x356   : > { %12568 = vmatprep.subr.bf16.mxu1 %v13871_v56  ;;  %v5985_v56 = vld [vmem:[#allocation2 + $0x158] sm:$0xff] }
 0x357   : > { %12597 = vmatpush3.bf16.msra.mxu0 %v13870_v20  ;;  %v6000_v20 = vadd.f32 %v5990_v51, %v15379_v43  ;;  %v6430_v51 = vld [vmem:[#allocation2 + $0x1c0] sm:$0xff] }
 0x358   : > { %12609 = vmatprep.subr.bf16.mxu0 %v13873_v63  ;;  %v13927_v42 = vld [vmem:[#allocation8 + $0x618] sm:$0xff]  }
 0x359   : > { %12569 = vmatpush3.bf16.msra.mxu1 %v13872_v58  ;;  %v5995_v58 = vadd.f32 %v5985_v56, %v15379_v43 }
 0x35a   : > { %5931 = vmatmul.mubr.bf16.vlgmr.msra.gmra.mxu0 %v5562_v2  ;;  %12570 = vmatprep.subr.bf16.mxu1 %v13875_v59  ;;  %v13902_v59 = vld [vmem:[#allocation8 + $0x570] sm:$0xff]   ;;  %v6002_v2 = vpack.c.bf16 %v5997_v60, %v5992_v32 }
 0x35b   : > { %12610 = vmatpush3.bf16.msra.mxu0 %v13874_v22  ;;  %6331 = vmatprep.mubr.bf16.mxu0 %v6003_v44  ;;  %v6005_v22 = vpack.c.bf16 %v6000_v20, %v5995_v58  ;;  %v13904_v44 = vld [vmem:[#allocation8 + $0x590] sm:$0xff]   ;;  %v13928_v20 = vld [vmem:[#allocation8 + $0x5d8] sm:$0xff]  }
 0x35c   : > { %12611 = vmatprep.subr.bf16.mxu0 %v13877_v18  ;;  %v13905_v18 = vld [vmem:[#allocation8 + $0x568] sm:$0xff]   ;;  %v13931_v60 = vld [vmem:[#allocation8 + $0x610] sm:$0xff]   ;;  %v13930_v58 = vld [vmem:[#allocation8 + $0x638] sm:$0xff]  }
 0x35d   : > { %12571 = vmatpush3.bf16.msra.mxu1 %v13876_v27  ;;  %v13906_v27 = vld [vmem:[#allocation8 + $0x528] sm:$0xff]   ;;  %v13932_v32 = vld [vmem:[#allocation8 + $0x5d0] sm:$0xff]  }
 0x35e   : > { %12572 = vmatprep.subr.bf16.mxu1 %v13879_v8  ;;  %v13908_v8 = vld [vmem:[#allocation8 + $0x560] sm:$0xff]  }
 0x35f   : > { %12612 = vmatpush3.bf16.msra.mxu0 %v13878_v1  ;;  %v13907_v1 = vld [vmem:[#allocation8 + $0x588] sm:$0xff]  }
 0x360   : > { %12613 = vmatprep.subr.bf16.mxu0 %v13881_v38  ;;  %v13909_v38 = vld [vmem:[#allocation8 + $0x520] sm:$0xff]  }
 0x361   : > { %12573 = vmatpush3.bf16.msra.mxu1 %v13880_v15  ;;  %v5991_v15 = vld [vmem:[#allocation2 + $0x188] sm:$0xff] }
 0x362   : > { %12574 = vmatprep.subr.bf16.mxu1 %v13883_v13  ;;  %v13911_v13 = vld [vmem:[#allocation8 + $0x558] sm:$0xff]  }
 0x363   : > { %12614 = vmatpush3.bf16.msra.mxu0 %v13882_v16  ;;  %v6432_v16 = vld [vmem:[#allocation2 + $0x1d0] sm:$0xff] }
 0x364   : > { %12615 = vmatprep.subr.bf16.mxu0 %v13885_v26  ;;  %v5986_v26 = vld [vmem:[#allocation2 + $0x160] sm:$0xff]  ;;  %v6442_v23 = vadd.f32 %v6432_v16, %v15379_v43 }
 0x365   : > { %12575 = vmatpush3.bf16.msra.mxu1 %v13884_v9  ;;  %v6001_v9 = vadd.f32 %v5991_v15, %v15257_v50  ;;  %v13942_v15 = vld [vmem:[#allocation8 + $0x620] sm:$0xff]  }
 0x366   : > { %13359 = vmatprep.subr.bf16.mxu1 %v14482_v28 }
 0x367   : > { %12616 = vmatpush3.bf16.msra.mxu0 %v13886_v25  ;;  %v13912_v25 = vld [vmem:[#allocation8 + $0x518] sm:$0xff]  }
 0x368   : > { %5890 = vmatmul.mubr.bf16.vlgmr.msra.gmra.mxu1 %v5560_v45  ;;  %12617 = vmatprep.subr.bf16.mxu0 %v13888_v31  ;;  %v5996_v31 = vadd.f32 %v5986_v26, %v15257_v50  ;;  %v13914_v45 = vld [vmem:[#allocation8 + $0x658] sm:$0xff]   ;;  %v6867_v26 = vld [vmem:[#allocation2 + $0x1e8] sm:$0xff] }
 0x369   : > { %13360 = vmatpush3.bf16.msra.mxu1 %v13887_v33  ;;  %13367 = vmatprep.mubr.msk.bf16.mxu1 %vm14483_vm3, %v14482_v28  ;;  %v13915_v33 = vld [vmem:[#allocation8 + $0x550] sm:$0xff]  }
 0x36a   : > { %13361 = vmatprep.subr.bf16.mxu1 %v14482_v28 }
 0x36b   : > { %12618 = vmatpush3.bf16.msra.mxu0 %v13889_v54  ;;  %v12451_v34 = vpop.f32.mrf.mxu1  ;;  %v6437_v54 = vadd.f32 %v6427_v0, %v15379_v43 }
 0x36c   : > { %12619 = vmatprep.subr.bf16.mxu0 %v13891_v36  ;;  %v6006_v36 = vpack.c.bf16 %v6001_v9, %v5996_v31  ;;  %v13944_v9 = vld [vmem:[#allocation8 + $0x5b8] sm:$0xff]   ;;  %v6877_v31 = vadd.f32 %v6867_v26, %v15363_v46 }
 0x36d   : > { %13362 = vmatpush3.bf16.msra.mxu1 %v13890_v11  ;;  %v12452_v41 = vpop.f32.mrf.mxu1  ;;  %v13917_v11 = vld [vmem:[#allocation8 + $0x690] sm:$0xff]   ;;  %v13973_v26 = vld [vmem:[#allocation8 + $0x7d8] sm:$0xff]  }
 0x36e   : > { %13363 = vmatprep.subr.bf16.mxu1 %v14482_v28  ;;  %v12453_v35 = vadd.f32 %v12452_v41, %v12451_v34  ;;  %v13916_v34 = vld [vmem:[#allocation8 + $0x510] sm:$0xff]   ;;  %v13921_v41 = vld [vmem:[#allocation8 + $0x688] sm:$0xff]  }
 0x36f   : > { %12620 = vmatpush3.bf16.msra.mxu0 %v13892_v3  ;;  %v12454_v48 = vpop.f32.mrf.mxu1  ;;  %v6447_v3 = vpack.c.bf16 %v6442_v23, %v6437_v54  ;;  %v13946_v23 = vld [vmem:[#allocation8 + $0x6f8] sm:$0xff]  }
 0x370   : > { %12621 = vmatprep.subr.bf16.mxu0 %v13894_v37  ;;  %v15488_v12 = vadd.f32 %v12453_v35, %v15472_v7  ;;  %v5554_v7 = vadd.f32 %v5544_v14, %v15257_v50  ;;  %v13919_v37 = vld [vmem:[#allocation8 + $0x548] sm:$0xff]  }
 0x371   : > { %13364 = vmatpush3.bf16.msra.mxu1 %v13893_v10  ;;  %v12455_v17 = vpop.f32.mrf.mxu1  ;;  %v13918_v10 = vld [vmem:[#allocation8 + $0x650] sm:$0xff]   ;;  %v13920_v35 = vld [vmem:[#allocation8 + $0x508] sm:$0xff]  }
 0x372   : > { %13365 = vmatprep.subr.bf16.mxu1 %v14482_v28  ;;  %v12456_v52 = vadd.f32 %v12455_v17, %v12454_v48  ;;  %v5564_v4 = vpack.c.bf16 %v5559_v49, %v5554_v7  ;;  %v13922_v48 = vld [vmem:[#allocation8 + $0x648] sm:$0xff]   ;;  %v5999_v17 = vadd.f32 %v5989_v40, %v15395_v6  ;;  %v6425_v49 = vld [vmem:[#allocation2 + $0x198] sm:$0xff] }
 0x373   : > { %12622 = vmatpush3.bf16.msra.mxu0 %v13895_v39  ;;  %v13923_v39 = vld [vmem:[#allocation8 + $0x540] sm:$0xff]   ;;  %v5984_v14 = vld [vmem:[#allocation2 + $0x150] sm:$0xff]  ;;  %v6435_v47 = vadd.f32 %v6425_v49, %v15363_v46  ;;  %v13961_v49 = vld [vmem:[#allocation8 + $0x6d8] sm:$0xff]  }
 0x374   : > { %12623 = vmatprep.subr.bf16.mxu0 %v13897_v62  ;;  %v15496_v63 = vadd.f32 %v12456_v52, %v15474_v55  ;;  %v13903_v55 = vld [vmem:[#allocation8 + $0x530] sm:$0xff]   ;;  %v13925_v62 = vld [vmem:[#allocation8 + $0x680] sm:$0xff]   ;;  %v6440_v52 = vadd.f32 %v6430_v51, %v15363_v46  ;;  %v5994_v56 = vadd.f32 %v5984_v14, %v15395_v6  ;;  %v13960_v14 = vld [vmem:[#allocation8 + $0x718] sm:$0xff]  }
 0x375   : > { %13366 = vmatpush3.bf16.msra.mxu1 %v13896_v61  ;;  %v13924_v61 = vld [vmem:[#allocation8 + $0x500] sm:$0xff]   ;;  %v6424_v40 = vld [vmem:[#allocation2 + $0x190] sm:$0xff] }
 0x376   : > { %12631 = vmatprep.subr.bf16.mxu1 %v13899_v57  ;;  %v13926_v57 = vld [vmem:[#allocation8 + $0x640] sm:$0xff]   ;;  %v6004_v7 = vpack.c.bf16 %v5999_v17, %v5994_v56  ;;  %v13959_v17 = vld [vmem:[#allocation8 + $0x6b8] sm:$0xff]   ;;  %v13964_v56 = vld [vmem:[#allocation8 + $0x6d0] sm:$0xff]  }
 0x377   : > { %12624 = vmatpush3.bf16.msra.mxu0 %v13898_v5  ;;  %v13929_v5 = vld [vmem:[#allocation8 + $0x678] sm:$0xff]   ;;  %v13958_v51 = vld [vmem:[#allocation8 + $0x6e0] sm:$0xff]  }
 0x378   : > { %13368 = vmatmul.mubr.msk.bf16.vlgmr.msra.gmra.mxu1 %vm1339_vm2, %v5564_v4  ;;  %13371 = vmatprep.subr.bf16.mxu0 %v14482_v28  ;;  %v13933_v4 = vld [vmem:[#allocation8 + $0x670] sm:$0xff]  }
 0x379   : > { %12632 = vmatpush3.bf16.msra.mxu1 %v13900_v19  ;;  %6372 = vmatprep.mubr.bf16.mxu1 %v6005_v22  ;;  %v6445_v19 = vpack.c.bf16 %v6440_v52, %v6435_v47  ;;  %v13934_v22 = vld [vmem:[#allocation8 + $0x630] sm:$0xff]   ;;  %v13967_v47 = vld [vmem:[#allocation8 + $0x6c8] sm:$0xff]  }
 0x37a   : > { %6332 = vmatmul.mubr.bf16.vlgmr.msra.gmra.mxu0 %v6002_v2  ;;  %12633 = vmatprep.subr.bf16.mxu1 %v13902_v59  ;;  %v13935_v59 = vld [vmem:[#allocation8 + $0x608] sm:$0xff]   ;;  %v13962_v52 = vld [vmem:[#allocation8 + $0x6b0] sm:$0xff]  }
 0x37b   : > { %13372 = vmatpush3.bf16.msra.mxu0 %v13901_v24  ;;  %13379 = vmatprep.mubr.msk.bf16.mxu0 %vm14483_vm3, %v14482_v28  ;;  %v13937_v24 = vld [vmem:[#allocation8 + $0x668] sm:$0xff]  }
 0x37c   : > { %13373 = vmatprep.subr.bf16.mxu0 %v14482_v28  ;;  %v13936_v2 = vld [vmem:[#allocation8 + $0x5c8] sm:$0xff]  }
 0x37d   : > { %12634 = vmatpush3.bf16.msra.mxu1 %v13903_v55  ;;  %v13939_v55 = vld [vmem:[#allocation8 + $0x600] sm:$0xff]  }
 0x37e   : > { %12635 = vmatprep.subr.bf16.mxu1 %v13905_v18  ;;  %v13938_v18 = vld [vmem:[#allocation8 + $0x628] sm:$0xff]  }
 0x37f   : > { %13374 = vmatpush3.bf16.msra.mxu0 %v13904_v44  ;;  %v13941_v44 = vld [vmem:[#allocation8 + $0x660] sm:$0xff]  }
 0x380   : > { %13375 = vmatprep.subr.bf16.mxu0 %v14482_v28 }
 0x381   : > { %12636 = vmatpush3.bf16.msra.mxu1 %v13906_v27  ;;  %v13940_v27 = vld [vmem:[#allocation8 + $0x5c0] sm:$0xff]  }
 0x382   : > { %12637 = vmatprep.subr.bf16.mxu1 %v13908_v8  ;;  %v6431_v8 = vld [vmem:[#allocation2 + $0x1c8] sm:$0xff] }
 0x383   : > { %13376 = vmatpush3.bf16.msra.mxu0 %v13907_v1  ;;  %v13943_v1 = vld [vmem:[#allocation8 + $0x5f8] sm:$0xff]   ;;  %v6441_v16 = vadd.f32 %v6431_v8, %v15395_v6 }
 0x384   : > { %13377 = vmatprep.subr.bf16.mxu0 %v14482_v28 }
 0x385   : > { %12638 = vmatpush3.bf16.msra.mxu1 %v13909_v38  ;;  %v6872_v38 = vld [vmem:[#allocation2 + $0x210] sm:$0xff] }
 0x386   : > { %12639 = vmatprep.subr.bf16.mxu1 %v13911_v13  ;;  %v6426_v13 = vld [vmem:[#allocation2 + $0x1a0] sm:$0xff] }
 0x387   : > { %13378 = vmatpush3.bf16.msra.mxu0 %v13910_v29  ;;  %v13945_v29 = vld [vmem:[#allocation8 + $0x738] sm:$0xff]   ;;  %v6436_v0 = vadd.f32 %v6426_v13, %v15395_v6 }
 0x388   : > { %12680 = vmatprep.subr.bf16.mxu0 %v13913_v21  ;;  %v6882_v21 = vadd.f32 %v6872_v38, %v15363_v46 }
 0x389   : > { %12640 = vmatpush3.bf16.msra.mxu1 %v13912_v25  ;;  %v13947_v25 = vld [vmem:[#allocation8 + $0x5f0] sm:$0xff]  }
 0x38a   : > { %13380 = vmatmul.mubr.msk.bf16.vlgmr.msra.gmra.mxu0 %vm1339_vm2, %v6006_v36  ;;  %12641 = vmatprep.subr.bf16.mxu1 %v13915_v33  ;;  %v6446_v33 = vpack.c.bf16 %v6441_v16, %v6436_v0  ;;  %v6887_v54 = vpack.c.bf16 %v6882_v21, %v6877_v31  ;;  %v13948_v36 = vld [vmem:[#allocation8 + $0x5b0] sm:$0xff]  }
 0x38b   : > { %12681 = vmatpush3.bf16.msra.mxu0 %v13914_v45  ;;  %6814 = vmatprep.mubr.bf16.mxu0 %v6447_v3  ;;  %v13949_v45 = vld [vmem:[#allocation8 + $0x730] sm:$0xff]  }
 0x38c   : > { %12682 = vmatprep.subr.bf16.mxu0 %v13917_v11  ;;  %v13951_v11 = vld [vmem:[#allocation8 + $0x5e8] sm:$0xff]   ;;  %v13950_v3 = vld [vmem:[#allocation8 + $0x6f0] sm:$0xff]  }
 0x38d   : > { %12642 = vmatpush3.bf16.msra.mxu1 %v13916_v34  ;;  %v13953_v34 = vld [vmem:[#allocation8 + $0x728] sm:$0xff]   ;;  %v13974_v16 = vld [vmem:[#allocation8 + $0x7b0] sm:$0xff]  }
 0x38e   : > { %12643 = vmatprep.subr.bf16.mxu1 %v13919_v37  ;;  %v13952_v37 = vld [vmem:[#allocation8 + $0x5a8] sm:$0xff]  }
 0x38f   : > { %12683 = vmatpush3.bf16.msra.mxu0 %v13918_v10  ;;  %v13955_v10 = vld [vmem:[#allocation8 + $0x5e0] sm:$0xff]  }
 0x390   : > { %12684 = vmatprep.subr.bf16.mxu0 %v13921_v41  ;;  %v13954_v41 = vld [vmem:[#allocation8 + $0x6e8] sm:$0xff]  }
 0x391   : > { %12644 = vmatpush3.bf16.msra.mxu1 %v13920_v35  ;;  %v6429_v35 = vld [vmem:[#allocation2 + $0x1b8] sm:$0xff] }
 0x392   : > { %12645 = vmatprep.subr.bf16.mxu1 %v13923_v39  ;;  %v13957_v39 = vld [vmem:[#allocation8 + $0x720] sm:$0xff]  }
 0x393   : > { %12685 = vmatpush3.bf16.msra.mxu0 %v13922_v48  ;;  %v13956_v48 = vld [vmem:[#allocation8 + $0x5a0] sm:$0xff]  }
 0x394   : > { %12686 = vmatprep.subr.bf16.mxu0 %v13925_v62  ;;  %v6439_v62 = vadd.f32 %v6429_v35, %v15366_v53 }
 0x395   : > { %12646 = vmatpush3.bf16.msra.mxu1 %v13924_v61  ;;  %v6434_v61 = vadd.f32 %v6424_v40, %v15366_v53  ;;  %v13981_v40 = vld [vmem:[#allocation8 + $0x760] sm:$0xff]  }
 0x396   : > { %12658 = vmatprep.subr.bf16.mxu1 %v13927_v42 }
 0x397   : > { %12687 = vmatpush3.bf16.msra.mxu0 %v13926_v57  ;;  %v6444_v42 = vpack.c.bf16 %v6439_v62, %v6434_v61  ;;  %v13963_v57 = vld [vmem:[#allocation8 + $0x710] sm:$0xff]   ;;  %v6875_v62 = vld [vmem:[#allocation2 + $0x228] sm:$0xff] }
 0x398   : > { %6373 = vmatmul.mubr.bf16.vlgmr.msra.gmra.mxu1 %v6004_v7  ;;  %12688 = vmatprep.subr.bf16.mxu0 %v13929_v5  ;;  %v13966_v5 = vld [vmem:[#allocation8 + $0x708] sm:$0xff]   ;;  %v6433_v7 = vld [vmem:[#allocation2 + $0x1d8] sm:$0xff]  ;;  %v13982_v61 = vld [vmem:[#allocation8 + $0x7c0] sm:$0xff]  }
 0x399   : > { %12659 = vmatpush3.bf16.msra.mxu1 %v13928_v20  ;;  %6773 = vmatprep.mubr.bf16.mxu1 %v6445_v19  ;;  %v13965_v20 = vld [vmem:[#allocation8 + $0x6a8] sm:$0xff]   ;;  %v6874_v19 = vld [vmem:[#allocation2 + $0x220] sm:$0xff] }
 0x39a   : > { %12660 = vmatprep.subr.bf16.mxu1 %v13931_v60  ;;  %v13969_v60 = vld [vmem:[#allocation8 + $0x700] sm:$0xff]  }
 0x39b   : > { %12689 = vmatpush3.bf16.msra.mxu0 %v13930_v58  ;;  %v13968_v58 = vld [vmem:[#allocation8 + $0x6a0] sm:$0xff]  }
 0x39c   : > { %12690 = vmatprep.subr.bf16.mxu0 %v13933_v4  ;;  %v6428_v4 = vld [vmem:[#allocation2 + $0x1b0] sm:$0xff] }
 0x39d   : > { %12661 = vmatpush3.bf16.msra.mxu1 %v13932_v32  ;;  %v6871_v32 = vld [vmem:[#allocation2 + $0x208] sm:$0xff] }
 0x39e   : > { %12662 = vmatprep.subr.bf16.mxu1 %v13935_v59  ;;  %v6443_v59 = vadd.f32 %v6433_v7, %v15257_v50  ;;  %v6881_v8 = vadd.f32 %v6871_v32, %v15366_v53  ;;  %v13990_v32 = vld [vmem:[#allocation8 + $0x890] sm:$0xff]  }
 0x39f   : > { %12691 = vmatpush3.bf16.msra.mxu0 %v13934_v22  ;;  %v13971_v22 = vld [vmem:[#allocation8 + $0x7b8] sm:$0xff]  }
 0x3a0   : > { %12692 = vmatprep.subr.bf16.mxu0 %v13937_v24  ;;  %v6869_v24 = vld [vmem:[#allocation2 + $0x1f8] sm:$0xff] }
 0x3a1   : > { %12663 = vmatpush3.bf16.msra.mxu1 %v13936_v2  ;;  %v13970_v2 = vld [vmem:[#allocation8 + $0x6c0] sm:$0xff]   ;;  %v6879_v38 = vadd.f32 %v6869_v24, %v15379_v43 }
 0x3a2   : > { %12664 = vmatprep.subr.bf16.mxu1 %v13939_v55  ;;  %v6884_v55 = vadd.f32 %v6874_v19, %v15379_v43  ;;  %v13995_v24 = vld [vmem:[#allocation8 + $0x780] sm:$0xff]  }
 0x3a3   : > { %12693 = vmatpush3.bf16.msra.mxu0 %v13938_v18  ;;  %v6866_v18 = vld [vmem:[#allocation2 + $0x1e0] sm:$0xff] }
 0x3a4   : > { %12694 = vmatprep.subr.bf16.mxu0 %v13941_v44  ;;  %v12481_v44 = vpop.f32.mrf.mxu0  ;;  %v6876_v13 = vadd.f32 %v6866_v18, %v15366_v53  ;;  %v13997_v18 = vld [vmem:[#allocation8 + $0x8c0] sm:$0xff]  }
 0x3a5   : > { %12665 = vmatpush3.bf16.msra.mxu1 %v13940_v27  ;;  %v6438_v27 = vadd.f32 %v6428_v4, %v15257_v50  ;;  %v13991_v4 = vld [vmem:[#allocation8 + $0x788] sm:$0xff]  }
 0x3a6   : > { %12666 = vmatprep.subr.bf16.mxu1 %v13943_v1  ;;  %v13972_v1 = vld [vmem:[#allocation8 + $0x778] sm:$0xff]   ;;  %v6886_v0 = vpack.c.bf16 %v6881_v8, %v6876_v13  ;;  %v6868_v8 = vld [vmem:[#allocation2 + $0x1f0] sm:$0xff]  ;;  %v13998_v13 = vld [vmem:[#allocation8 + $0x880] sm:$0xff]  }
 0x3a7   : > { %12695 = vmatpush3.bf16.msra.mxu0 %v13942_v15  ;;  %v6448_v15 = vpack.c.bf16 %v6443_v59, %v6438_v27  ;;  %v13993_v59 = vld [vmem:[#allocation8 + $0x8c8] sm:$0xff]   ;;  %v13996_v27 = vld [vmem:[#allocation8 + $0x740] sm:$0xff]  }
 0x3a8   : > { %12707 = vmatprep.subr.bf16.mxu0 %v13945_v29  ;;  %v6889_v29 = vpack.c.bf16 %v6884_v55, %v6879_v38  ;;  %v6873_v55 = vld [vmem:[#allocation2 + $0x218] sm:$0xff] }
 0x3a9   : > { %12667 = vmatpush3.bf16.msra.mxu1 %v13944_v9  ;;  %v12482_v9 = vpop.f32.mrf.mxu0  ;;  %v13999_v38 = vld [vmem:[#allocation8 + $0x858] sm:$0xff]  }
 0x3aa   : > { %6815 = vmatmul.mubr.bf16.vlgmr.msra.gmra.mxu0 %v6446_v33  ;;  %12668 = vmatprep.subr.bf16.mxu1 %v13947_v25 }
 0x3ab   : > { %12708 = vmatpush3.bf16.msra.mxu0 %v13946_v23  ;;  %7215 = vmatprep.mubr.bf16.mxu0 %v6887_v54  ;;  %v13975_v23 = vld [vmem:[#allocation8 + $0x770] sm:$0xff]  }
 0x3ac   : > { %12709 = vmatprep.subr.bf16.mxu0 %v13949_v45  ;;  %v13977_v45 = vld [vmem:[#allocation8 + $0x7a8] sm:$0xff]  }
 0x3ad   : > { %12669 = vmatpush3.bf16.msra.mxu1 %v13948_v36  ;;  %v13976_v36 = vld [vmem:[#allocation8 + $0x7d0] sm:$0xff]  }
 0x3ae   : > { %12670 = vmatprep.subr.bf16.mxu1 %v13951_v11 }
 0x3af   : > { %12710 = vmatpush3.bf16.msra.mxu0 %v13950_v3 }
 0x3b0   : > { %12711 = vmatprep.subr.bf16.mxu0 %v13953_v34 }
 0x3b1   : > { %12671 = vmatpush3.bf16.msra.mxu1 %v13952_v37  ;;  %v13978_v37 = vld [vmem:[#allocation8 + $0x768] sm:$0xff]  }
 0x3b2   : > { %12672 = vmatprep.subr.bf16.mxu1 %v13955_v10 }
 0x3b3   : > { %12712 = vmatpush3.bf16.msra.mxu0 %v13954_v41 }
 0x3b4   : > { %12713 = vmatprep.subr.bf16.mxu0 %v13957_v39  ;;  %v13979_v39 = vld [vmem:[#allocation8 + $0x7c8] sm:$0xff]  }
 0x3b5   : > { %12673 = vmatpush3.bf16.msra.mxu1 %v13956_v48 }
 0x3b6   : > { %13383 = vmatprep.subr.bf16.mxu1 %v14482_v28 }
 0x3b7   : > { %12714 = vmatpush3.bf16.msra.mxu0 %v13958_v51  ;;  %v13983_v51 = vld [vmem:[#allocation8 + $0x798] sm:$0xff]  }
 0x3b8   : > { %6774 = vmatmul.mubr.bf16.vlgmr.msra.gmra.mxu1 %v6444_v42  ;;  %12715 = vmatprep.subr.bf16.mxu0 %v13960_v14  ;;  %v6870_v14 = vld [vmem:[#allocation2 + $0x200] sm:$0xff] }
 0x3b9   : > { %13384 = vmatpush3.bf16.msra.mxu1 %v13959_v17  ;;  %13391 = vmatprep.mubr.msk.bf16.mxu1 %vm14483_vm3, %v14482_v28  ;;  %v6885_v17 = vadd.f32 %v6875_v62, %v15257_v50  ;;  %v13985_v42 = vld [vmem:[#allocation8 + $0x8d8] sm:$0xff]  }
 0x3ba   : > { %13385 = vmatprep.subr.bf16.mxu1 %v14482_v28 }
 0x3bb   : > { %12716 = vmatpush3.bf16.msra.mxu0 %v13961_v49  ;;  %v7311_v49 = vld [vmem:[#allocation2 + $0x248] sm:$0xff] }
 0x3bc   : > { %12717 = vmatprep.subr.bf16.mxu0 %v13963_v57  ;;  %v13984_v57 = vld [vmem:[#allocation8 + $0x758] sm:$0xff]  }
 0x3bd   : > { %13386 = vmatpush3.bf16.msra.mxu1 %v13962_v52 }
 0x3be   : > { %13387 = vmatprep.subr.bf16.mxu1 %v14482_v28 }
 0x3bf   : > { %12718 = vmatpush3.bf16.msra.mxu0 %v13964_v56  ;;  %v6880_v56 = vadd.f32 %v6870_v14, %v15257_v50  ;;  %v14011_v14 = vld [vmem:[#allocation8 + $0x840] sm:$0xff]  }
 0x3c0   : > { %12719 = vmatprep.subr.bf16.mxu0 %v13966_v5  ;;  %v13987_v5 = vld [vmem:[#allocation8 + $0x790] sm:$0xff]  }
 0x3c1   : > { %13388 = vmatpush3.bf16.msra.mxu1 %v13965_v20  ;;  %v13986_v20 = vld [vmem:[#allocation8 + $0x898] sm:$0xff]   ;;  %v6890_v7 = vpack.c.bf16 %v6885_v17, %v6880_v56 }
 0x3c2   : > { %13389 = vmatprep.subr.bf16.mxu1 %v14482_v28 }
 0x3c3   : > { %12720 = vmatpush3.bf16.msra.mxu0 %v13967_v47  ;;  %v7321_v47 = vadd.f32 %v7311_v49, %v15379_v43  ;;  %v14010_v49 = vld [vmem:[#allocation8 + $0x868] sm:$0xff]  }
 0x3c4   : > { %12721 = vmatprep.subr.bf16.mxu0 %v13969_v60  ;;  %v13989_v60 = vld [vmem:[#allocation8 + $0x8d0] sm:$0xff]  }
 0x3c5   : > { %13390 = vmatpush3.bf16.msra.mxu1 %v13968_v58  ;;  %v13988_v58 = vld [vmem:[#allocation8 + $0x750] sm:$0xff]  }
 0x3c6   : > { %12729 = vmatprep.subr.bf16.mxu1 %v13971_v22  ;;  %v13992_v22 = vld [vmem:[#allocation8 + $0x748] sm:$0xff]  }
 0x3c7   : > { %12722 = vmatpush3.bf16.msra.mxu0 %v13970_v2  ;;  %v13994_v2 = vld [vmem:[#allocation8 + $0x888] sm:$0xff]  }
 0x3c8   : > { %13392 = vmatmul.mubr.msk.bf16.vlgmr.msra.gmra.mxu1 %vm1339_vm2, %v6448_v15  ;;  %v4749_v21 = vpop.f32.mrf.mxu1  ;;  %13395 = vmatprep.subr.bf16.mxu0 %v14482_v28  ;;  %v7309_v15 = vld [vmem:[#allocation2 + $0x238] sm:$0xff] }
 0x3c9   : > { %v4750_v25 = vadd.f32 %v4749_v21, %v15488_v12  ;;  %12730 = vmatpush3.bf16.msra.mxu1 %v13972_v1  ;;  %7256 = vmatprep.mubr.bf16.mxu1 %v6889_v29  ;;  %v12483_v12 = vadd.f32 %v12482_v9, %v12481_v44  ;;  %v7314_v44 = vld [vmem:[#allocation2 + $0x260] sm:$0xff]  ;;  %v6883_v1 = vadd.f32 %v6873_v55, %v15395_v6 }
 0x3ca   : > { %7216 = vmatmul.mubr.bf16.vlgmr.msra.gmra.mxu0 %v6886_v0  ;;  %v13333_v31 = vpop.f32.mrf.mxu1  ;;  %v15537_v33 = vpop.f32.mrf.mxu0  ;;  %12731 = vmatprep.subr.bf16.mxu1 %v13974_v16  ;;  %v7324_v16 = vadd.f32 %v7314_v44, %v15363_v46  ;;  %v6878_v29 = vadd.f32 %v6868_v8, %v15395_v6  ;;  %v14000_v9 = vld [vmem:[#allocation8 + $0x818] sm:$0xff]   ;;  %v7319_v21 = vadd.f32 %v7309_v15, %v15363_v46 }
 0x3cb   : > { %v15540_v54 = vadd.f32 %v15470_v30, %v4750_v25  ;;  %13396 = vmatpush3.bf16.msra.mxu0 %v13973_v26  ;;  %13403 = vmatprep.mubr.msk.bf16.mxu0 %vm14483_vm3, %v14482_v28  ;;  %v13980_v30 = vld [vmem:[#allocation8 + $0x7a0] sm:$0xff]   ;;  %v14001_v26 = vld [vmem:[#allocation8 + $0x8b8] sm:$0xff]   ;;  %v14003_v25 = vld [vmem:[#allocation8 + $0x850] sm:$0xff]  }
 0x3cc   : > { %v4752_v11 = vpop.f32.mrf.mxu1  ;;  %v13345_v3 = vpop.f32.mrf.mxu0  ;;  %13397 = vmatprep.subr.bf16.mxu0 %v14482_v28  ;;  %v6888_v0 = vpack.c.bf16 %v6883_v1, %v6878_v29  ;;  %v14002_v31 = vld [vmem:[#allocation8 + $0x878] sm:$0xff]   ;;  %v14023_v1 = vld [vmem:[#allocation8 + $0x828] sm:$0xff]  }
 0x3cd   : > { %v4753_v34 = vadd.f32 %v4752_v11, %v15496_v63  ;;  %12732 = vmatpush3.bf16.msra.mxu1 %v13975_v23  ;;  %v7316_v63 = vld [vmem:[#allocation2 + $0x270] sm:$0xff]  ;;  %v7329_v23 = vpack.c.bf16 %v7324_v16, %v7319_v21  ;;  %v7313_v21 = vld [vmem:[#allocation2 + $0x258] sm:$0xff] }
 0x3ce   : > { %v13334_v10 = vpop.f32.mrf.mxu1  ;;  %v15546_v41 = vpop.f32.mrf.mxu0  ;;  %12733 = vmatprep.subr.bf16.mxu1 %v13977_v45  ;;  %v7326_v52 = vadd.f32 %v7316_v63, %v15379_v43  ;;  %v14004_v11 = vld [vmem:[#allocation8 + $0x810] sm:$0xff]   ;;  %v14024_v16 = vld [vmem:[#allocation8 + $0x7e8] sm:$0xff]  }
 0x3cf   : > { %v15548_v35 = vadd.f32 %v12483_v12, %v4753_v34  ;;  %13398 = vmatpush3.bf16.msra.mxu0 %v13976_v36  ;;  %v14005_v36 = vld [vmem:[#allocation8 + $0x8b0] sm:$0xff]   ;;  %v14007_v34 = vld [vmem:[#allocation8 + $0x848] sm:$0xff]  }
 0x3d0   : > { %v13346_v48 = vpop.f32.mrf.mxu0  ;;  %13399 = vmatprep.subr.bf16.mxu0 %v14482_v28  ;;  %v7331_v19 = vpack.c.bf16 %v7326_v52, %v7321_v47  ;;  %v14006_v10 = vld [vmem:[#allocation8 + $0x870] sm:$0xff]   ;;  %v14013_v52 = vld [vmem:[#allocation8 + $0x8a0] sm:$0xff]   ;;  %v14015_v47 = vld [vmem:[#allocation8 + $0x838] sm:$0xff]  }
 0x3d1   : > { %12734 = vmatpush3.bf16.msra.mxu1 %v13978_v37  ;;  %v14009_v48 = vld [vmem:[#allocation8 + $0x8a8] sm:$0xff]  }
 0x3d2   : > { %12735 = vmatprep.subr.bf16.mxu1 %v13980_v30 }
 0x3d3   : > { %13400 = vmatpush3.bf16.msra.mxu0 %v13979_v39 }
 0x3d4   : > { %13401 = vmatprep.subr.bf16.mxu0 %v14482_v28 }
 0x3d5   : > { %12736 = vmatpush3.bf16.msra.mxu1 %v13981_v40 }
 0x3d6   : > { %12737 = vmatprep.subr.bf16.mxu1 %v13983_v51  ;;  %v14008_v51 = vld [vmem:[#allocation8 + $0x808] sm:$0xff]  }
 0x3d7   : > { %13402 = vmatpush3.bf16.msra.mxu0 %v13982_v61 }
 0x3d8   : > { %12778 = vmatprep.subr.bf16.mxu0 %v13985_v42 }
 0x3d9   : > { %12738 = vmatpush3.bf16.msra.mxu1 %v13984_v57 }
 0x3da   : > { %13404 = vmatmul.mubr.msk.bf16.vlgmr.msra.gmra.mxu0 %vm1339_vm2, %v6890_v7  ;;  %12739 = vmatprep.subr.bf16.mxu1 %v13987_v5  ;;  %v14012_v5 = vld [vmem:[#allocation8 + $0x800] sm:$0xff]   ;;  %v7756_v7 = vld [vmem:[#allocation2 + $0x2b0] sm:$0xff] }
 0x3db   : > { %12779 = vmatpush3.bf16.msra.mxu0 %v13986_v20  ;;  %7698 = vmatprep.mubr.bf16.mxu0 %v7331_v19  ;;  %v7315_v20 = vld [vmem:[#allocation2 + $0x268] sm:$0xff]  ;;  %v7310_v19 = vld [vmem:[#allocation2 + $0x240] sm:$0xff] }
 0x3dc   : > { %12780 = vmatprep.subr.bf16.mxu0 %v13989_v60 }
 0x3dd   : > { %12740 = vmatpush3.bf16.msra.mxu1 %v13988_v58  ;;  %v7325_v58 = vadd.f32 %v7315_v20, %v15395_v6  ;;  %v14041_v20 = vld [vmem:[#allocation8 + $0x940] sm:$0xff]  }
 0x3de   : > { %12741 = vmatprep.subr.bf16.mxu1 %v13991_v4  ;;  %v14017_v4 = vld [vmem:[#allocation8 + $0x978] sm:$0xff]  }
 0x3df   : > { %12781 = vmatpush3.bf16.msra.mxu0 %v13990_v32  ;;  %v7751_v32 = vld [vmem:[#allocation2 + $0x288] sm:$0xff] }
 0x3e0   : > { %12782 = vmatprep.subr.bf16.mxu0 %v13993_v59  ;;  %v7766_v59 = vadd.f32 %v7756_v7, %v15363_v46 }
 0x3e1   : > { %12742 = vmatpush3.bf16.msra.mxu1 %v13992_v22  ;;  %v7320_v22 = vadd.f32 %v7310_v19, %v15395_v6  ;;  %v7312_v19 = vld [vmem:[#allocation2 + $0x250] sm:$0xff] }
 0x3e2   : > { %12743 = vmatprep.subr.bf16.mxu1 %v13995_v24  ;;  %v14019_v24 = vld [vmem:[#allocation8 + $0x830] sm:$0xff]  }
 0x3e3   : > { %12783 = vmatpush3.bf16.msra.mxu0 %v13994_v2  ;;  %v14018_v2 = vld [vmem:[#allocation8 + $0x938] sm:$0xff]   ;;  %v7330_v55 = vpack.c.bf16 %v7325_v58, %v7320_v22  ;;  %v7755_v58 = vld [vmem:[#allocation2 + $0x2a8] sm:$0xff] }
 0x3e4   : > { %12784 = vmatprep.subr.bf16.mxu0 %v13997_v18  ;;  %v14021_v18 = vld [vmem:[#allocation8 + $0x970] sm:$0xff]   ;;  %v14042_v22 = vld [vmem:[#allocation8 + $0x900] sm:$0xff]  }
 0x3e5   : > { %12744 = vmatpush3.bf16.msra.mxu1 %v13996_v27  ;;  %v14020_v27 = vld [vmem:[#allocation8 + $0x7f0] sm:$0xff]  }
 0x3e6   : > { %12756 = vmatprep.subr.bf16.mxu1 %v13999_v38  ;;  %v14022_v38 = vld [vmem:[#allocation8 + $0x930] sm:$0xff]  }
 0x3e7   : > { %12785 = vmatpush3.bf16.msra.mxu0 %v13998_v13  ;;  %v14025_v13 = vld [vmem:[#allocation8 + $0x968] sm:$0xff]  }
 0x3e8   : > { %v12500_v45 = vpop.f32.mrf.mxu1  ;;  %7257 = vmatmul.mubr.bf16.vlgmr.msra.gmra.mxu1 %v6888_v0  ;;  %12786 = vmatprep.subr.bf16.mxu0 %v14001_v26  ;;  %v14027_v26 = vld [vmem:[#allocation8 + $0x820] sm:$0xff]  }
 0x3e9   : > { %12757 = vmatpush3.bf16.msra.mxu1 %v14000_v9  ;;  %7657 = vmatprep.mubr.bf16.mxu1 %v7329_v23  ;;  %v14026_v9 = vld [vmem:[#allocation8 + $0x928] sm:$0xff]   ;;  %v14028_v23 = vld [vmem:[#allocation8 + $0x7e0] sm:$0xff]  }
 0x3ea   : > { %v12501_v3 = vpop.f32.mrf.mxu1  ;;  %v12527_v12 = vpop.f32.mrf.mxu0  ;;  %12758 = vmatprep.subr.bf16.mxu1 %v14003_v25  ;;  %v14029_v25 = vld [vmem:[#allocation8 + $0x960] sm:$0xff]  }
 0x3eb   : > { %v12502_v37 = vadd.f32 %v12501_v3, %v12500_v45  ;;  %12787 = vmatpush3.bf16.msra.mxu0 %v14002_v31  ;;  %v7308_v31 = vld [vmem:[#allocation2 + $0x230] sm:$0xff]  ;;  %v7323_v45 = vadd.f32 %v7313_v21, %v15366_v53  ;;  %v14032_v3 = vld [vmem:[#allocation8 + $0x958] sm:$0xff]  }
 0x3ec   : > { %v12503_v30 = vpop.f32.mrf.mxu1  ;;  %v12528_v39 = vpop.f32.mrf.mxu0  ;;  %12788 = vmatprep.subr.bf16.mxu0 %v14005_v36  ;;  %v14030_v36 = vld [vmem:[#allocation8 + $0x920] sm:$0xff]   ;;  %v14050_v21 = vld [vmem:[#allocation8 + $0x9a8] sm:$0xff]  }
 0x3ed   : > { %v5051_v40 = vadd.f32 %v12502_v37, %v15540_v54  ;;  %v15562_v62 = vadd.f32 %v12528_v39, %v12527_v12  ;;  %12759 = vmatpush3.bf16.msra.mxu1 %v14004_v11  ;;  %v7318_v11 = vadd.f32 %v7308_v31, %v15366_v53  ;;  %v14031_v12 = vld [vmem:[#allocation8 + $0x8f8] sm:$0xff]   ;;  %v14034_v39 = vld [vmem:[#allocation8 + $0x8f0] sm:$0xff]  }
 0x3ee   : > { %v12504_v63 = vpop.f32.mrf.mxu1  ;;  %v12530_v61 = vpop.f32.mrf.mxu0  ;;  %12760 = vmatprep.subr.bf16.mxu1 %v14007_v34  ;;  %v14033_v37 = vld [vmem:[#allocation8 + $0x918] sm:$0xff]  }
 0x3ef   : > { %v15565_v17 = vadd.f32 %v15537_v33, %v5051_v40  ;;  %v12505_v42 = vadd.f32 %v12504_v63, %v12503_v30  ;;  %12789 = vmatpush3.bf16.msra.mxu0 %v14006_v10  ;;  %v14014_v33 = vld [vmem:[#allocation8 + $0x860] sm:$0xff]   ;;  %v7328_v34 = vpack.c.bf16 %v7323_v45, %v7318_v11  ;;  %v14035_v30 = vld [vmem:[#allocation8 + $0x950] sm:$0xff]  }
 0x3f0   : > { %v12531_v57 = vpop.f32.mrf.mxu0  ;;  %12790 = vmatprep.subr.bf16.mxu0 %v14009_v48  ;;  %v7759_v11 = vld [vmem:[#allocation2 + $0x2c8] sm:$0xff] }
 0x3f1   : > { %v5054_v56 = vadd.f32 %v12505_v42, %v15548_v35  ;;  %v15568_v54 = vadd.f32 %v12531_v57, %v12530_v61  ;;  %12761 = vmatpush3.bf16.msra.mxu1 %v14008_v51  ;;  %v14016_v35 = vld [vmem:[#allocation8 + $0x7f8] sm:$0xff]   ;;  %v14036_v51 = vld [vmem:[#allocation8 + $0x910] sm:$0xff]   ;;  %v14038_v61 = vld [vmem:[#allocation8 + $0x948] sm:$0xff]  }
 0x3f2   : > { %12762 = vmatprep.subr.bf16.mxu1 %v14011_v14  ;;  %v14037_v42 = vld [vmem:[#allocation8 + $0x8e8] sm:$0xff]  }
 0x3f3   : > { %v15571_v60 = vadd.f32 %v15546_v41, %v5054_v56  ;;  %12791 = vmatpush3.bf16.msra.mxu0 %v14010_v49  ;;  %v7761_v41 = vadd.f32 %v7751_v32, %v15363_v46  ;;  %v14039_v56 = vld [vmem:[#allocation8 + $0x908] sm:$0xff]   ;;  %v14043_v32 = vld [vmem:[#allocation8 + $0x9f8] sm:$0xff]  }
 0x3f4   : > { %12792 = vmatprep.subr.bf16.mxu0 %v14013_v52 }
 0x3f5   : > { %12763 = vmatpush3.bf16.msra.mxu1 %v14012_v5  ;;  %v7771_v44 = vpack.c.bf16 %v7766_v59, %v7761_v41  ;;  %v7317_v5 = vld [vmem:[#allocation2 + $0x278] sm:$0xff]  ;;  %v7765_v41 = vadd.f32 %v7755_v58, %v15366_v53  ;;  %v14064_v58 = vld [vmem:[#allocation8 + $0x988] sm:$0xff]  }
 0x3f6   : > { %12764 = vmatprep.subr.bf16.mxu1 %v14015_v47  ;;  %v7758_v47 = vld [vmem:[#allocation2 + $0x2c0] sm:$0xff] }
 0x3f7   : > { %12793 = vmatpush3.bf16.msra.mxu0 %v14014_v33  ;;  %v14040_v33 = vld [vmem:[#allocation8 + $0x8e0] sm:$0xff]  }
 0x3f8   : > { %12805 = vmatprep.subr.bf16.mxu0 %v14017_v4  ;;  %v7327_v4 = vadd.f32 %v7317_v5, %v15257_v50 }
 0x3f9   : > { %12765 = vmatpush3.bf16.msra.mxu1 %v14016_v35  ;;  %v7753_v35 = vld [vmem:[#allocation2 + $0x298] sm:$0xff] }
 0x3fa   : > { %v5531_v8 = vpop.f32.mrf.mxu0  ;;  %7699 = vmatmul.mubr.bf16.vlgmr.msra.gmra.mxu0 %v7330_v55  ;;  %12766 = vmatprep.subr.bf16.mxu1 %v14019_v24  ;;  %v7768_v24 = vadd.f32 %v7758_v47, %v15379_v43  ;;  %v7763_v55 = vadd.f32 %v7753_v35, %v15379_v43  ;;  %v14067_v35 = vld [vmem:[#allocation8 + $0x9c0] sm:$0xff]  }
 0x3fb   : > { %12806 = vmatpush3.bf16.msra.mxu0 %v14018_v2  ;;  %8099 = vmatprep.mubr.bf16.mxu0 %v7771_v44  ;;  %v7322_v2 = vadd.f32 %v7312_v19, %v15257_v50  ;;  %v14065_v19 = vld [vmem:[#allocation8 + $0xb08] sm:$0xff]  }
 0x3fc   : > { %v13357_v15 = vpop.f32.mrf.mxu0  ;;  %12807 = vmatprep.subr.bf16.mxu0 %v14021_v18 }
 0x3fd   : > { %12767 = vmatpush3.bf16.msra.mxu1 %v14020_v27  ;;  %v7332_v44 = vpack.c.bf16 %v7327_v4, %v7322_v2  ;;  %v8198_v2 = vld [vmem:[#allocation2 + $0x300] sm:$0xff] }
 0x3fe   : > { %v15577_v29 = vpop.f32.mrf.mxu0  ;;  %12768 = vmatprep.subr.bf16.mxu1 %v14023_v1  ;;  %v7773_v1 = vpack.c.bf16 %v7768_v24, %v7763_v55  ;;  %v7757_v24 = vld [vmem:[#allocation2 + $0x2b8] sm:$0xff] }
 0x3ff   : > { %12808 = vmatpush3.bf16.msra.mxu0 %v14022_v38  ;;  %v14045_v38 = vld [vmem:[#allocation8 + $0xa18] sm:$0xff]  }
 0x400   : > { %v13358_v0 = vpop.f32.mrf.mxu0  ;;  %12809 = vmatprep.subr.bf16.mxu0 %v14025_v13  ;;  %v14047_v13 = vld [vmem:[#allocation8 + $0x9b0] sm:$0xff]  }
 0x401   : > { %12769 = vmatpush3.bf16.msra.mxu1 %v14024_v16 }
 0x402   : > { %12770 = vmatprep.subr.bf16.mxu1 %v14027_v26 }
 0x403   : > { %12810 = vmatpush3.bf16.msra.mxu0 %v14026_v9 }
 0x404   : > { %12811 = vmatprep.subr.bf16.mxu0 %v14029_v25  ;;  %v14052_v25 = vld [vmem:[#allocation8 + $0x9e0] sm:$0xff]  }
 0x405   : > { %12771 = vmatpush3.bf16.msra.mxu1 %v14028_v23  ;;  %v14051_v23 = vld [vmem:[#allocation8 + $0xa08] sm:$0xff]  }
 0x406   : > { %13407 = vmatprep.subr.bf16.mxu1 %v14482_v28 }
 0x407   : > { %12812 = vmatpush3.bf16.msra.mxu0 %v14030_v36  ;;  %v14053_v36 = vld [vmem:[#allocation8 + $0x9a0] sm:$0xff]  }
 0x408   : > { %v12549_v10 = vpop.f32.mrf.mxu1  ;;  %7658 = vmatmul.mubr.bf16.vlgmr.msra.gmra.mxu1 %v7328_v34  ;;  %12813 = vmatprep.subr.bf16.mxu0 %v14032_v3  ;;  %v14055_v3 = vld [vmem:[#allocation8 + $0x9d8] sm:$0xff]   ;;  %v14054_v34 = vld [vmem:[#allocation8 + $0xa00] sm:$0xff]  }
 0x409   : > { %13408 = vmatpush3.bf16.msra.mxu1 %v14031_v12  ;;  %13415 = vmatprep.mubr.msk.bf16.mxu1 %vm14483_vm3, %v14482_v28  ;;  %v8200_v12 = vld [vmem:[#allocation2 + $0x310] sm:$0xff] }
 0x40a   : > { %v12550_v48 = vpop.f32.mrf.mxu1  ;;  %13409 = vmatprep.subr.bf16.mxu1 %v14482_v28 }
 0x40b   : > { %v12551_v40 = vadd.f32 %v12550_v48, %v12549_v10  ;;  %12814 = vmatpush3.bf16.msra.mxu0 %v14033_v37  ;;  %v7754_v37 = vld [vmem:[#allocation2 + $0x2a0] sm:$0xff]  ;;  %v7769_v10 = vadd.f32 %v7759_v11, %v15257_v50  ;;  %v14079_v11 = vld [vmem:[#allocation8 + $0xa88] sm:$0xff]  }
 0x40c   : > { %v12552_v63 = vpop.f32.mrf.mxu1  ;;  %12815 = vmatprep.subr.bf16.mxu0 %v14035_v30  ;;  %v14057_v30 = vld [vmem:[#allocation8 + $0xb18] sm:$0xff]  }
 0x40d   : > { %v5491_v14 = vadd.f32 %v12551_v40, %v15562_v62  ;;  %13410 = vmatpush3.bf16.msra.mxu1 %v14034_v39  ;;  %v8195_v39 = vld [vmem:[#allocation2 + $0x2e8] sm:$0xff]  ;;  %v14056_v48 = vld [vmem:[#allocation8 + $0x998] sm:$0xff]   ;;  %v8210_v40 = vadd.f32 %v8200_v12, %v15379_v43  ;;  %v14078_v12 = vld [vmem:[#allocation8 + $0xab0] sm:$0xff]  }
 0x40e   : > { %v12553_v49 = vpop.f32.mrf.mxu1  ;;  %13411 = vmatprep.subr.bf16.mxu1 %v14482_v28 }
 0x40f   : > { %v5532_v57 = vadd.f32 %v5531_v8, %v5491_v14  ;;  %v12554_v52 = vadd.f32 %v12553_v49, %v12552_v63  ;;  %12816 = vmatpush3.bf16.msra.mxu0 %v14036_v51  ;;  %v14046_v8 = vld [vmem:[#allocation8 + $0x9f0] sm:$0xff]   ;;  %v7764_v51 = vadd.f32 %v7754_v37, %v15257_v50  ;;  %v8205_v14 = vadd.f32 %v8195_v39, %v15379_v43 }
 0x410   : > { %12817 = vmatprep.subr.bf16.mxu0 %v14038_v61  ;;  %v14059_v63 = vld [vmem:[#allocation8 + $0x9d0] sm:$0xff]   ;;  %v14058_v61 = vld [vmem:[#allocation8 + $0xad8] sm:$0xff]  }
 0x411   : > { %v5494_v7 = vadd.f32 %v12554_v52, %v15568_v54  ;;  %13412 = vmatpush3.bf16.msra.mxu1 %v14037_v42  ;;  %v15589_v62 = vadd.f32 %v5532_v57, %v15565_v17  ;;  %v7750_v54 = vld [vmem:[#allocation2 + $0x280] sm:$0xff]  ;;  %v7774_v49 = vpack.c.bf16 %v7769_v10, %v7764_v51  ;;  %v14061_v57 = vld [vmem:[#allocation8 + $0xb10] sm:$0xff]   ;;  %v8215_v52 = vpack.c.bf16 %v8210_v40, %v8205_v14  ;;  %v14081_v10 = vld [vmem:[#allocation8 + $0xae8] sm:$0xff]  }
 0x412   : > { %13413 = vmatprep.subr.bf16.mxu1 %v14482_v28  ;;  %v14044_v17 = vld [vmem:[#allocation8 + $0x9b8] sm:$0xff]   ;;  %v7760_v27 = vadd.f32 %v7750_v54, %v15366_v53  ;;  %v14069_v54 = vld [vmem:[#allocation8 + $0xb00] sm:$0xff]  }
 0x413   : > { %v5535_v59 = vadd.f32 %v15577_v29, %v5494_v7  ;;  %12818 = vmatpush3.bf16.msra.mxu0 %v14039_v56  ;;  %v14048_v29 = vld [vmem:[#allocation8 + $0xa10] sm:$0xff]  }
 0x414   : > { %12819 = vmatprep.subr.bf16.mxu0 %v14041_v20  ;;  %v7770_v15 = vpack.c.bf16 %v7765_v41, %v7760_v27  ;;  %v14060_v56 = vld [vmem:[#allocation8 + $0x990] sm:$0xff]   ;;  %v14063_v20 = vld [vmem:[#allocation8 + $0x9c8] sm:$0xff]   ;;  %v14068_v41 = vld [vmem:[#allocation8 + $0x980] sm:$0xff]  }
 0x415   : > { %13414 = vmatpush3.bf16.msra.mxu1 %v14040_v33  ;;  %v15599_v18 = vadd.f32 %v5535_v59, %v15571_v60  ;;  %v14049_v60 = vld [vmem:[#allocation8 + $0x9e8] sm:$0xff]   ;;  %v14062_v7 = vld [vmem:[#allocation8 + $0xad0] sm:$0xff]   ;;  %v14071_v27 = vld [vmem:[#allocation8 + $0xa98] sm:$0xff]  }
 0x416   : > { %12827 = vmatprep.subr.bf16.mxu1 %v14043_v32 }
 0x417   : > { %12820 = vmatpush3.bf16.msra.mxu0 %v14042_v22  ;;  %v14066_v22 = vld [vmem:[#allocation8 + $0xac8] sm:$0xff]  }
 0x418   : > { %13416 = vmatmul.mubr.msk.bf16.vlgmr.msra.gmra.mxu1 %vm1339_vm2, %v7332_v44  ;;  %13419 = vmatprep.subr.bf16.mxu0 %v14482_v28  ;;  %v7767_v44 = vadd.f32 %v7757_v24, %v15395_v6  ;;  %v14093_v24 = vld [vmem:[#allocation8 + $0xbb0] sm:$0xff]  }
 0x419   : > { %12828 = vmatpush3.bf16.msra.mxu1 %v14044_v17  ;;  %8140 = vmatprep.mubr.bf16.mxu1 %v7773_v1  ;;  %v7752_v17 = vld [vmem:[#allocation2 + $0x290] sm:$0xff]  ;;  %v14070_v1 = vld [vmem:[#allocation8 + $0xac0] sm:$0xff]  }
 0x41a   : > { %v12598_v16 = vpop.f32.mrf.mxu0  ;;  %8100 = vmatmul.mubr.bf16.vlgmr.msra.gmra.mxu0 %v7770_v15  ;;  %12829 = vmatprep.subr.bf16.mxu1 %v14046_v8  ;;  %v8193_v8 = vld [vmem:[#allocation2 + $0x2d8] sm:$0xff]  ;;  %v7762_v15 = vadd.f32 %v7752_v17, %v15395_v6  ;;  %v14095_v17 = vld [vmem:[#allocation8 + $0xa68] sm:$0xff]  }
 0x41b   : > { %13420 = vmatpush3.bf16.msra.mxu0 %v14045_v38  ;;  %13427 = vmatprep.mubr.msk.bf16.mxu0 %vm14483_vm3, %v14482_v28  ;;  %v8208_v38 = vadd.f32 %v8198_v2, %v15363_v46  ;;  %v14092_v2 = vld [vmem:[#allocation8 + $0xa30] sm:$0xff]  }
 0x41c   : > { %v12599_v26 = vpop.f32.mrf.mxu0  ;;  %13421 = vmatprep.subr.bf16.mxu0 %v14482_v28 }
 0x41d   : > { %v12600_v9 = vadd.f32 %v12599_v26, %v12598_v16  ;;  %12830 = vmatpush3.bf16.msra.mxu1 %v14047_v13  ;;  %v14073_v13 = vld [vmem:[#allocation8 + $0xaf8] sm:$0xff]   ;;  %v14075_v26 = vld [vmem:[#allocation8 + $0xa90] sm:$0xff]  }
 0x41e   : > { %v12601_v0 = vpop.f32.mrf.mxu0  ;;  %12831 = vmatprep.subr.bf16.mxu1 %v14049_v60  ;;  %v14072_v16 = vld [vmem:[#allocation8 + $0xa58] sm:$0xff]   ;;  %v8203_v60 = vadd.f32 %v8193_v8, %v15363_v46  ;;  %v14096_v8 = vld [vmem:[#allocation8 + $0xa28] sm:$0xff]  }
 0x41f   : > { %13422 = vmatpush3.bf16.msra.mxu0 %v14048_v29  ;;  %v7772_v29 = vpack.c.bf16 %v7767_v44, %v7762_v15  ;;  %v14098_v15 = vld [vmem:[#allocation8 + $0xb68] sm:$0xff]  }
 0x420   : > { %v12602_v31 = vpop.f32.mrf.mxu0  ;;  %13423 = vmatprep.subr.bf16.mxu0 %v14482_v28 }
 0x421   : > { %v12603_v45 = vadd.f32 %v12602_v31, %v12601_v0  ;;  %12832 = vmatpush3.bf16.msra.mxu1 %v14050_v21  ;;  %v14074_v21 = vld [vmem:[#allocation8 + $0xab8] sm:$0xff]   ;;  %v14076_v31 = vld [vmem:[#allocation8 + $0xa50] sm:$0xff]  }
 0x422   : > { %12833 = vmatprep.subr.bf16.mxu1 %v14052_v25  ;;  %v14077_v25 = vld [vmem:[#allocation8 + $0xaf0] sm:$0xff]  }
 0x423   : > { %13424 = vmatpush3.bf16.msra.mxu0 %v14051_v23 }
 0x424   : > { %13425 = vmatprep.subr.bf16.mxu0 %v14482_v28 }
 0x425   : > { %12834 = vmatpush3.bf16.msra.mxu1 %v14053_v36 }
 0x426   : > { %12835 = vmatprep.subr.bf16.mxu1 %v14055_v3 }
 0x427   : > { %13426 = vmatpush3.bf16.msra.mxu0 %v14054_v34 }
 0x428   : > { %v12576_v42 = vpop.f32.mrf.mxu1  ;;  %12876 = vmatprep.subr.bf16.mxu0 %v14057_v30 }
 0x429   : > { %12836 = vmatpush3.bf16.msra.mxu1 %v14056_v48  ;;  %v14080_v48 = vld [vmem:[#allocation8 + $0xa48] sm:$0xff]  }
 0x42a   : > { %v12577_v5 = vpop.f32.mrf.mxu1  ;;  %13428 = vmatmul.mubr.msk.bf16.vlgmr.msra.gmra.mxu0 %vm1339_vm2, %v7774_v49  ;;  %12837 = vmatprep.subr.bf16.mxu1 %v14059_v63  ;;  %v14083_v63 = vld [vmem:[#allocation8 + $0xa80] sm:$0xff]  }
 0x42b   : > { %v12578_v47 = vadd.f32 %v12577_v5, %v12576_v42  ;;  %12877 = vmatpush3.bf16.msra.mxu0 %v14058_v61  ;;  %8582 = vmatprep.mubr.bf16.mxu0 %v8215_v52  ;;  %v14085_v42 = vld [vmem:[#allocation8 + $0xae0] sm:$0xff]   ;;  %v8640_v5 = vld [vmem:[#allocation2 + $0x350] sm:$0xff] }
 0x42c   : > { %v12579_v33 = vpop.f32.mrf.mxu1  ;;  %12878 = vmatprep.subr.bf16.mxu0 %v14061_v57  ;;  %v14084_v57 = vld [vmem:[#allocation8 + $0xa40] sm:$0xff]  }
 0x42d   : > { %12838 = vmatpush3.bf16.msra.mxu1 %v14060_v56  ;;  %v5933_v4 = vadd.f32 %v12600_v9, %v12578_v47  ;;  %v8213_v9 = vpack.c.bf16 %v8208_v38, %v8203_v60  ;;  %v8199_v52 = vld [vmem:[#allocation2 + $0x308] sm:$0xff]  ;;  %v14087_v56 = vld [vmem:[#allocation8 + $0xa78] sm:$0xff]  }
 0x42e   : > { %v12580_v32 = vpop.f32.mrf.mxu1  ;;  %12839 = vmatprep.subr.bf16.mxu1 %v14063_v20  ;;  %v14086_v20 = vld [vmem:[#allocation8 + $0xaa0] sm:$0xff]  }
 0x42f   : > { %v12581_v59 = vadd.f32 %v12580_v32, %v12579_v33  ;;  %12879 = vmatpush3.bf16.msra.mxu0 %v14062_v7  ;;  %v8194_v47 = vld [vmem:[#allocation2 + $0x2e0] sm:$0xff]  ;;  %v8635_v33 = vld [vmem:[#allocation2 + $0x328] sm:$0xff]  ;;  %v14091_v32 = vld [vmem:[#allocation8 + $0xa70] sm:$0xff]  }
 0x430   : > { %12880 = vmatprep.subr.bf16.mxu0 %v14065_v19  ;;  %v14089_v7 = vld [vmem:[#allocation8 + $0xbb8] sm:$0xff]   ;;  %v14099_v38 = vld [vmem:[#allocation8 + $0xa60] sm:$0xff]  }
 0x431   : > { %12840 = vmatpush3.bf16.msra.mxu1 %v14064_v58  ;;  %v5936_v55 = vadd.f32 %v12603_v45, %v12581_v59  ;;  %v14088_v19 = vld [vmem:[#allocation8 + $0xa38] sm:$0xff]   ;;  %v8650_v58 = vadd.f32 %v8640_v5, %v15363_v46  ;;  %v8645_v59 = vadd.f32 %v8635_v33, %v15363_v46  ;;  %v14101_v60 = vld [vmem:[#allocation8 + $0xba0] sm:$0xff]  }
 0x432   : > { %12841 = vmatprep.subr.bf16.mxu1 %v14067_v35  ;;  %v14090_v35 = vld [vmem:[#allocation8 + $0xb78] sm:$0xff]  }
 0x433   : > { %12881 = vmatpush3.bf16.msra.mxu0 %v14066_v22  ;;  %v14115_v33 = vld [vmem:[#allocation8 + $0xc38] sm:$0xff]  }
 0x434   : > { %12882 = vmatprep.subr.bf16.mxu0 %v14069_v54  ;;  %v8655_v54 = vpack.c.bf16 %v8650_v58, %v8645_v59 }
 0x435   : > { %12842 = vmatpush3.bf16.msra.mxu1 %v14068_v41 }
 0x436   : > { %12854 = vmatprep.subr.bf16.mxu1 %v14071_v27  ;;  %v14097_v27 = vld [vmem:[#allocation8 + $0xba8] sm:$0xff]  }
 0x437   : > { %12883 = vmatpush3.bf16.msra.mxu0 %v14070_v1 }
 0x438   : > { %v5973_v0 = vpop.f32.mrf.mxu1  ;;  %8141 = vmatmul.mubr.bf16.vlgmr.msra.gmra.mxu1 %v7772_v29  ;;  %12884 = vmatprep.subr.bf16.mxu0 %v14073_v13  ;;  %v8197_v13 = vld [vmem:[#allocation2 + $0x2f8] sm:$0xff]  ;;  %v14100_v29 = vld [vmem:[#allocation8 + $0xa20] sm:$0xff]  }
 0x439   : > { %v5974_v23 = vadd.f32 %v5973_v0, %v5933_v4  ;;  %12855 = vmatpush3.bf16.msra.mxu1 %v14072_v16  ;;  %8541 = vmatprep.mubr.bf16.mxu1 %v8213_v9  ;;  %v8204_v4 = vadd.f32 %v8194_v47, %v15395_v6  ;;  %v8207_v9 = vadd.f32 %v8197_v13, %v15366_v53  ;;  %v8196_v47 = vld [vmem:[#allocation2 + $0x2f0] sm:$0xff] }
 0x43a   : > { %v13369_v45 = vpop.f32.mrf.mxu1  ;;  %v12625_v36 = vpop.f32.mrf.mxu0  ;;  %12856 = vmatprep.subr.bf16.mxu1 %v14075_v26  ;;  %v8192_v26 = vld [vmem:[#allocation2 + $0x2d0] sm:$0xff] }
 0x43b   : > { %v15619_v3 = vadd.f32 %v5974_v23, %v15589_v62  ;;  %12885 = vmatpush3.bf16.msra.mxu0 %v14074_v21  ;;  %v14082_v62 = vld [vmem:[#allocation8 + $0xaa8] sm:$0xff]   ;;  %v14102_v21 = vld [vmem:[#allocation8 + $0xb60] sm:$0xff]   ;;  %v8202_v0 = vadd.f32 %v8192_v26, %v15366_v53  ;;  %v14103_v23 = vld [vmem:[#allocation8 + $0xb38] sm:$0xff]  }
 0x43c   : > { %v5976_v34 = vpop.f32.mrf.mxu1  ;;  %v12626_v37 = vpop.f32.mrf.mxu0  ;;  %12886 = vmatprep.subr.bf16.mxu0 %v14077_v25  ;;  %v14104_v25 = vld [vmem:[#allocation8 + $0xb98] sm:$0xff]   ;;  %v14122_v13 = vld [vmem:[#allocation8 + $0xbe8] sm:$0xff]  }
 0x43d   : > { %v5977_v30 = vadd.f32 %v5976_v34, %v5936_v55  ;;  %v15621_v39 = vadd.f32 %v12626_v37, %v12625_v36  ;;  %12857 = vmatpush3.bf16.msra.mxu1 %v14076_v31  ;;  %v14094_v55 = vld [vmem:[#allocation8 + $0xb70] sm:$0xff]   ;;  %v8212_v31 = vpack.c.bf16 %v8207_v9, %v8202_v0  ;;  %v14105_v45 = vld [vmem:[#allocation8 + $0xb58] sm:$0xff]   ;;  %v8643_v0 = vld [vmem:[#allocation2 + $0x368] sm:$0xff] }
 0x43e   : > { %v13370_v40 = vpop.f32.mrf.mxu1  ;;  %v12628_v51 = vpop.f32.mrf.mxu0  ;;  %12858 = vmatprep.subr.bf16.mxu1 %v14079_v11  ;;  %v14107_v11 = vld [vmem:[#allocation8 + $0xb90] sm:$0xff]  }
 0x43f   : > { %v15624_v61 = vadd.f32 %v5977_v30, %v15599_v18  ;;  %12887 = vmatpush3.bf16.msra.mxu0 %v14078_v12  ;;  %v8209_v18 = vadd.f32 %v8199_v52, %v15395_v6  ;;  %v14106_v12 = vld [vmem:[#allocation8 + $0xb30] sm:$0xff]   ;;  %v14113_v52 = vld [vmem:[#allocation8 + $0xb80] sm:$0xff]  }
 0x440   : > { %v12629_v14 = vpop.f32.mrf.mxu0  ;;  %12888 = vmatprep.subr.bf16.mxu0 %v14081_v10  ;;  %v14108_v10 = vld [vmem:[#allocation8 + $0xb50] sm:$0xff]  }
 0x441   : > { %v15626_v49 = vadd.f32 %v12629_v14, %v12628_v51  ;;  %12859 = vmatpush3.bf16.msra.mxu1 %v14080_v48  ;;  %v8214_v22 = vpack.c.bf16 %v8209_v18, %v8204_v4  ;;  %v14110_v48 = vld [vmem:[#allocation8 + $0xb88] sm:$0xff]   ;;  %v14114_v4 = vld [vmem:[#allocation8 + $0xb40] sm:$0xff]  }
 0x442   : > { %12860 = vmatprep.subr.bf16.mxu1 %v14083_v63  ;;  %v14109_v51 = vld [vmem:[#allocation8 + $0xb28] sm:$0xff]  }
 0x443   : > { %12889 = vmatpush3.bf16.msra.mxu0 %v14082_v62  ;;  %v8639_v18 = vld [vmem:[#allocation2 + $0x348] sm:$0xff] }
 0x444   : > { %12890 = vmatprep.subr.bf16.mxu0 %v14085_v42  ;;  %v14111_v42 = vld [vmem:[#allocation8 + $0xb48] sm:$0xff]   ;;  %v8649_v59 = vadd.f32 %v8639_v18, %v15366_v53 }
 0x445   : > { %12861 = vmatpush3.bf16.msra.mxu1 %v14084_v57  ;;  %v8201_v57 = vld [vmem:[#allocation2 + $0x318] sm:$0xff]  ;;  %v14136_v18 = vld [vmem:[#allocation8 + $0xbc8] sm:$0xff]  }
 0x446   : > { %12862 = vmatprep.subr.bf16.mxu1 %v14087_v56  ;;  %v8642_v56 = vld [vmem:[#allocation2 + $0x360] sm:$0xff] }
 0x447   : > { %12891 = vmatpush3.bf16.msra.mxu0 %v14086_v20  ;;  %v14112_v20 = vld [vmem:[#allocation8 + $0xb20] sm:$0xff]  }
 0x448   : > { %12903 = vmatprep.subr.bf16.mxu0 %v14089_v7  ;;  %v8211_v7 = vadd.f32 %v8201_v57, %v15257_v50 }
 0x449   : > { %12863 = vmatpush3.bf16.msra.mxu1 %v14088_v19  ;;  %v8637_v19 = vld [vmem:[#allocation2 + $0x338] sm:$0xff] }
 0x44a   : > { %v6415_v41 = vpop.f32.mrf.mxu0  ;;  %8583 = vmatmul.mubr.bf16.vlgmr.msra.gmra.mxu0 %v8214_v22  ;;  %12864 = vmatprep.subr.bf16.mxu1 %v14091_v32  ;;  %v8652_v32 = vadd.f32 %v8642_v56, %v15379_v43  ;;  %v8647_v22 = vadd.f32 %v8637_v19, %v15379_v43  ;;  %v14139_v19 = vld [vmem:[#allocation8 + $0xc00] sm:$0xff]  }
 0x44b   : > { %12904 = vmatpush3.bf16.msra.mxu0 %v14090_v35  ;;  %8983 = vmatprep.mubr.bf16.mxu0 %v8655_v54  ;;  %v8206_v35 = vadd.f32 %v8196_v47, %v15257_v50  ;;  %v14137_v47 = vld [vmem:[#allocation8 + $0xd48] sm:$0xff]  }
 0x44c   : > { %v13381_v44 = vpop.f32.mrf.mxu0  ;;  %12905 = vmatprep.subr.bf16.mxu0 %v14093_v24 }
 0x44d   : > { %12865 = vmatpush3.bf16.msra.mxu1 %v14092_v2  ;;  %v8216_v54 = vpack.c.bf16 %v8211_v7, %v8206_v35  ;;  %v9082_v35 = vld [vmem:[#allocation2 + $0x3a0] sm:$0xff] }
 0x44e   : > { %v15632_v1 = vpop.f32.mrf.mxu0  ;;  %12866 = vmatprep.subr.bf16.mxu1 %v14095_v17  ;;  %v8657_v17 = vpack.c.bf16 %v8652_v32, %v8647_v22  ;;  %v8641_v32 = vld [vmem:[#allocation2 + $0x358] sm:$0xff] }
 0x44f   : > { %12906 = vmatpush3.bf16.msra.mxu0 %v14094_v55  ;;  %v14117_v55 = vld [vmem:[#allocation8 + $0xc58] sm:$0xff]  }
 0x450   : > { %v13382_v16 = vpop.f32.mrf.mxu0  ;;  %12907 = vmatprep.subr.bf16.mxu0 %v14097_v27  ;;  %v14119_v27 = vld [vmem:[#allocation8 + $0xbf0] sm:$0xff]  }
 0x451   : > { %12867 = vmatpush3.bf16.msra.mxu1 %v14096_v8 }
 0x452   : > { %12868 = vmatprep.subr.bf16.mxu1 %v14099_v38 }
 0x453   : > { %12908 = vmatpush3.bf16.msra.mxu0 %v14098_v15 }
 0x454   : > { %12909 = vmatprep.subr.bf16.mxu0 %v14101_v60  ;;  %v14124_v60 = vld [vmem:[#allocation8 + $0xc20] sm:$0xff]  }
 0x455   : > { %12869 = vmatpush3.bf16.msra.mxu1 %v14100_v29  ;;  %v14123_v29 = vld [vmem:[#allocation8 + $0xc48] sm:$0xff]  }
 0x456   : > { %13431 = vmatprep.subr.bf16.mxu1 %v14482_v28 }
 0x457   : > { %12910 = vmatpush3.bf16.msra.mxu0 %v14102_v21  ;;  %v14125_v21 = vld [vmem:[#allocation8 + $0xbe0] sm:$0xff]  }
 0x458   : > { %v12647_v36 = vpop.f32.mrf.mxu1  ;;  %8542 = vmatmul.mubr.bf16.vlgmr.msra.gmra.mxu1 %v8212_v31  ;;  %12911 = vmatprep.subr.bf16.mxu0 %v14104_v25  ;;  %v14127_v25 = vld [vmem:[#allocation8 + $0xc18] sm:$0xff]   ;;  %v14126_v31 = vld [vmem:[#allocation8 + $0xc40] sm:$0xff]  }
 0x459   : > { %13432 = vmatpush3.bf16.msra.mxu1 %v14103_v23  ;;  %13439 = vmatprep.mubr.msk.bf16.mxu1 %vm14483_vm3, %v14482_v28  ;;  %v9084_v23 = vld [vmem:[#allocation2 + $0x3b0] sm:$0xff] }
 0x45a   : > { %v12648_v34 = vpop.f32.mrf.mxu1  ;;  %13433 = vmatprep.subr.bf16.mxu1 %v14482_v28 }
 0x45b   : > { %v12649_v37 = vadd.f32 %v12648_v34, %v12647_v36  ;;  %12912 = vmatpush3.bf16.msra.mxu0 %v14105_v45  ;;  %v8638_v45 = vld [vmem:[#allocation2 + $0x340] sm:$0xff]  ;;  %v8653_v36 = vadd.f32 %v8643_v0, %v15257_v50  ;;  %v14151_v0 = vld [vmem:[#allocation8 + $0xcc8] sm:$0xff]  }
 0x45c   : > { %v12650_v30 = vpop.f32.mrf.mxu1  ;;  %12913 = vmatprep.subr.bf16.mxu0 %v14107_v11  ;;  %v14129_v11 = vld [vmem:[#allocation8 + $0xd58] sm:$0xff]  }
 0x45d   : > { %v6375_v40 = vadd.f32 %v12649_v37, %v15621_v39  ;;  %13434 = vmatpush3.bf16.msra.mxu1 %v14106_v12  ;;  %v9079_v12 = vld [vmem:[#allocation2 + $0x388] sm:$0xff]  ;;  %v14128_v34 = vld [vmem:[#allocation8 + $0xbd8] sm:$0xff]   ;;  %v9094_v37 = vadd.f32 %v9084_v23, %v15379_v43  ;;  %v14150_v23 = vld [vmem:[#allocation8 + $0xcf0] sm:$0xff]  }
 0x45e   : > { %v12651_v63 = vpop.f32.mrf.mxu1  ;;  %13435 = vmatprep.subr.bf16.mxu1 %v14482_v28 }
 0x45f   : > { %v6416_v62 = vadd.f32 %v6415_v41, %v6375_v40  ;;  %v12652_v14 = vadd.f32 %v12651_v63, %v12650_v30  ;;  %12914 = vmatpush3.bf16.msra.mxu0 %v14108_v10  ;;  %v14118_v41 = vld [vmem:[#allocation8 + $0xc30] sm:$0xff]   ;;  %v8648_v10 = vadd.f32 %v8638_v45, %v15257_v50  ;;  %v9089_v40 = vadd.f32 %v9079_v12, %v15379_v43 }
 0x460   : > { %12915 = vmatprep.subr.bf16.mxu0 %v14110_v48  ;;  %v14131_v30 = vld [vmem:[#allocation8 + $0xc10] sm:$0xff]   ;;  %v14130_v48 = vld [vmem:[#allocation8 + $0xd18] sm:$0xff]  }
 0x461   : > { %v6378_v5 = vadd.f32 %v12652_v14, %v15626_v49  ;;  %13436 = vmatpush3.bf16.msra.mxu1 %v14109_v51  ;;  %v15644_v39 = vadd.f32 %v6416_v62, %v15619_v3  ;;  %v8634_v49 = vld [vmem:[#allocation2 + $0x320] sm:$0xff]  ;;  %v8658_v63 = vpack.c.bf16 %v8653_v36, %v8648_v10  ;;  %v14133_v62 = vld [vmem:[#allocation8 + $0xd50] sm:$0xff]   ;;  %v9099_v14 = vpack.c.bf16 %v9094_v37, %v9089_v40  ;;  %v14153_v36 = vld [vmem:[#allocation8 + $0xd28] sm:$0xff]  }
 0x462   : > { %13437 = vmatprep.subr.bf16.mxu1 %v14482_v28  ;;  %v14116_v3 = vld [vmem:[#allocation8 + $0xbf8] sm:$0xff]   ;;  %v8644_v2 = vadd.f32 %v8634_v49, %v15366_v53  ;;  %v14141_v49 = vld [vmem:[#allocation8 + $0xd40] sm:$0xff]  }
 0x463   : > { %v6419_v58 = vadd.f32 %v15632_v1, %v6378_v5  ;;  %12916 = vmatpush3.bf16.msra.mxu0 %v14111_v42  ;;  %v14120_v1 = vld [vmem:[#allocation8 + $0xc50] sm:$0xff]  }
 0x464   : > { %12917 = vmatprep.subr.bf16.mxu0 %v14113_v52  ;;  %v8654_v44 = vpack.c.bf16 %v8649_v59, %v8644_v2  ;;  %v14132_v42 = vld [vmem:[#allocation8 + $0xbd0] sm:$0xff]   ;;  %v14135_v52 = vld [vmem:[#allocation8 + $0xc08] sm:$0xff]   ;;  %v14140_v59 = vld [vmem:[#allocation8 + $0xbc0] sm:$0xff]  }
 0x465   : > { %13438 = vmatpush3.bf16.msra.mxu1 %v14112_v20  ;;  %v15654_v24 = vadd.f32 %v6419_v58, %v15624_v61  ;;  %v14121_v61 = vld [vmem:[#allocation8 + $0xc28] sm:$0xff]   ;;  %v14134_v5 = vld [vmem:[#allocation8 + $0xd10] sm:$0xff]   ;;  %v14143_v2 = vld [vmem:[#allocation8 + $0xcd8] sm:$0xff]  }
 0x466   : > { %12925 = vmatprep.subr.bf16.mxu1 %v14115_v33 }
 0x467   : > { %12918 = vmatpush3.bf16.msra.mxu0 %v14114_v4  ;;  %v14138_v4 = vld [vmem:[#allocation8 + $0xd08] sm:$0xff]  }
 0x468   : > { %13440 = vmatmul.mubr.msk.bf16.vlgmr.msra.gmra.mxu1 %vm1339_vm2, %v8216_v54  ;;  %13443 = vmatprep.subr.bf16.mxu0 %v14482_v28  ;;  %v8651_v54 = vadd.f32 %v8641_v32, %v15395_v6  ;;  %v14165_v32 = vld [vmem:[#allocation8 + $0xdf0] sm:$0xff]  }
 0x469   : > { %12926 = vmatpush3.bf16.msra.mxu1 %v14116_v3  ;;  %9024 = vmatprep.mubr.bf16.mxu1 %v8657_v17  ;;  %v8636_v3 = vld [vmem:[#allocation2 + $0x330] sm:$0xff]  ;;  %v14142_v17 = vld [vmem:[#allocation8 + $0xd00] sm:$0xff]  }
 0x46a   : > { %v12696_v8 = vpop.f32.mrf.mxu0  ;;  %8984 = vmatmul.mubr.bf16.vlgmr.msra.gmra.mxu0 %v8654_v44  ;;  %12927 = vmatprep.subr.bf16.mxu1 %v14118_v41  ;;  %v9077_v41 = vld [vmem:[#allocation2 + $0x378] sm:$0xff]  ;;  %v8646_v44 = vadd.f32 %v8636_v3, %v15395_v6  ;;  %v14167_v3 = vld [vmem:[#allocation8 + $0xca8] sm:$0xff]  }
 0x46b   : > { %13444 = vmatpush3.bf16.msra.mxu0 %v14117_v55  ;;  %13451 = vmatprep.mubr.msk.bf16.mxu0 %vm14483_vm3, %v14482_v28  ;;  %v9092_v55 = vadd.f32 %v9082_v35, %v15363_v46  ;;  %v14164_v35 = vld [vmem:[#allocation8 + $0xc70] sm:$0xff]  }
 0x46c   : > { %v12697_v38 = vpop.f32.mrf.mxu0  ;;  %13445 = vmatprep.subr.bf16.mxu0 %v14482_v28 }
 0x46d   : > { %v12698_v15 = vadd.f32 %v12697_v38, %v12696_v8  ;;  %12928 = vmatpush3.bf16.msra.mxu1 %v14119_v27  ;;  %v14145_v27 = vld [vmem:[#allocation8 + $0xd38] sm:$0xff]   ;;  %v14147_v38 = vld [vmem:[#allocation8 + $0xcd0] sm:$0xff]  }
 0x46e   : > { %v12699_v16 = vpop.f32.mrf.mxu0  ;;  %12929 = vmatprep.subr.bf16.mxu1 %v14121_v61  ;;  %v14144_v8 = vld [vmem:[#allocation8 + $0xc98] sm:$0xff]   ;;  %v9087_v61 = vadd.f32 %v9077_v41, %v15363_v46  ;;  %v14168_v41 = vld [vmem:[#allocation8 + $0xc68] sm:$0xff]  }
 0x46f   : > { %13446 = vmatpush3.bf16.msra.mxu0 %v14120_v1  ;;  %v8656_v1 = vpack.c.bf16 %v8651_v54, %v8646_v44  ;;  %v14170_v44 = vld [vmem:[#allocation8 + $0xda8] sm:$0xff]  }
 0x470   : > { %v12700_v26 = vpop.f32.mrf.mxu0  ;;  %13447 = vmatprep.subr.bf16.mxu0 %v14482_v28 }
 0x471   : > { %v12701_v9 = vadd.f32 %v12700_v26, %v12699_v16  ;;  %12930 = vmatpush3.bf16.msra.mxu1 %v14122_v13  ;;  %v14146_v13 = vld [vmem:[#allocation8 + $0xcf8] sm:$0xff]   ;;  %v14148_v26 = vld [vmem:[#allocation8 + $0xc90] sm:$0xff]  }
 0x472   : > { %12931 = vmatprep.subr.bf16.mxu1 %v14124_v60  ;;  %v14149_v60 = vld [vmem:[#allocation8 + $0xd30] sm:$0xff]  }
 0x473   : > { %13448 = vmatpush3.bf16.msra.mxu0 %v14123_v29 }
 0x474   : > { %13449 = vmatprep.subr.bf16.mxu0 %v14482_v28 }
 0x475   : > { %12932 = vmatpush3.bf16.msra.mxu1 %v14125_v21 }
 0x476   : > { %12933 = vmatprep.subr.bf16.mxu1 %v14127_v25 }
 0x477   : > { %13450 = vmatpush3.bf16.msra.mxu0 %v14126_v31 }
 0x478   : > { %v12674_v51 = vpop.f32.mrf.mxu1  ;;  %12974 = vmatprep.subr.bf16.mxu0 %v14129_v11 }
 0x479   : > { %12934 = vmatpush3.bf16.msra.mxu1 %v14128_v34  ;;  %v14152_v34 = vld [vmem:[#allocation8 + $0xc88] sm:$0xff]  }
 0x47a   : > { %v12675_v57 = vpop.f32.mrf.mxu1  ;;  %13452 = vmatmul.mubr.msk.bf16.vlgmr.msra.gmra.mxu0 %vm1339_vm2, %v8658_v63  ;;  %12935 = vmatprep.subr.bf16.mxu1 %v14131_v30  ;;  %v14155_v30 = vld [vmem:[#allocation8 + $0xcc0] sm:$0xff]  }
 0x47b   : > { %v12676_v56 = vadd.f32 %v12675_v57, %v12674_v51  ;;  %12975 = vmatpush3.bf16.msra.mxu0 %v14130_v48  ;;  %9466 = vmatprep.mubr.bf16.mxu0 %v9099_v14  ;;  %v14157_v51 = vld [vmem:[#allocation8 + $0xd20] sm:$0xff]   ;;  %v9524_v57 = vld [vmem:[#allocation2 + $0x3f0] sm:$0xff] }
 0x47c   : > { %v12677_v20 = vpop.f32.mrf.mxu1  ;;  %12976 = vmatprep.subr.bf16.mxu0 %v14133_v62  ;;  %v14156_v62 = vld [vmem:[#allocation8 + $0xc80] sm:$0xff]  }
 0x47d   : > { %12936 = vmatpush3.bf16.msra.mxu1 %v14132_v42  ;;  %v6817_v7 = vadd.f32 %v12698_v15, %v12676_v56  ;;  %v9097_v15 = vpack.c.bf16 %v9092_v55, %v9087_v61  ;;  %v9083_v14 = vld [vmem:[#allocation2 + $0x3a8] sm:$0xff]  ;;  %v14159_v42 = vld [vmem:[#allocation8 + $0xcb8] sm:$0xff]  }
 0x47e   : > { %v12678_v33 = vpop.f32.mrf.mxu1  ;;  %12937 = vmatprep.subr.bf16.mxu1 %v14135_v52  ;;  %v14158_v52 = vld [vmem:[#allocation8 + $0xce0] sm:$0xff]  }
 0x47f   : > { %v12679_v58 = vadd.f32 %v12678_v33, %v12677_v20  ;;  %12977 = vmatpush3.bf16.msra.mxu0 %v14134_v5  ;;  %v9078_v56 = vld [vmem:[#allocation2 + $0x380] sm:$0xff]  ;;  %v9519_v20 = vld [vmem:[#allocation2 + $0x3c8] sm:$0xff]  ;;  %v14163_v33 = vld [vmem:[#allocation8 + $0xcb0] sm:$0xff]  }
 0x480   : > { %12978 = vmatprep.subr.bf16.mxu0 %v14137_v47  ;;  %v14161_v5 = vld [vmem:[#allocation8 + $0xdf8] sm:$0xff]   ;;  %v14171_v55 = vld [vmem:[#allocation8 + $0xca0] sm:$0xff]  }
 0x481   : > { %12938 = vmatpush3.bf16.msra.mxu1 %v14136_v18  ;;  %v6820_v22 = vadd.f32 %v12701_v9, %v12679_v58  ;;  %v14160_v47 = vld [vmem:[#allocation8 + $0xc78] sm:$0xff]   ;;  %v9534_v18 = vadd.f32 %v9524_v57, %v15363_v46  ;;  %v9529_v58 = vadd.f32 %v9519_v20, %v15363_v46  ;;  %v14173_v61 = vld [vmem:[#allocation8 + $0xde0] sm:$0xff]  }
 0x482   : > { %12939 = vmatprep.subr.bf16.mxu1 %v14139_v19  ;;  %v14162_v19 = vld [vmem:[#allocation8 + $0xdb8] sm:$0xff]  }
 0x483   : > { %12979 = vmatpush3.bf16.msra.mxu0 %v14138_v4  ;;  %v14187_v20 = vld [vmem:[#allocation8 + $0xe78] sm:$0xff]  }
 0x484   : > { %12980 = vmatprep.subr.bf16.mxu0 %v14141_v49  ;;  %v9539_v49 = vpack.c.bf16 %v9534_v18, %v9529_v58 }
 0x485   : > { %12940 = vmatpush3.bf16.msra.mxu1 %v14140_v59 }
 0x486   : > { %12952 = vmatprep.subr.bf16.mxu1 %v14143_v2  ;;  %v14169_v2 = vld [vmem:[#allocation8 + $0xde8] sm:$0xff]  }
 0x487   : > { %12981 = vmatpush3.bf16.msra.mxu0 %v14142_v17 }
 0x488   : > { %v6857_v16 = vpop.f32.mrf.mxu1  ;;  %9025 = vmatmul.mubr.bf16.vlgmr.msra.gmra.mxu1 %v8656_v1  ;;  %12982 = vmatprep.subr.bf16.mxu0 %v14145_v27  ;;  %v9081_v27 = vld [vmem:[#allocation2 + $0x398] sm:$0xff]  ;;  %v14172_v1 = vld [vmem:[#allocation8 + $0xc60] sm:$0xff]  }
 0x489   : > { %v6858_v29 = vadd.f32 %v6857_v16, %v6817_v7  ;;  %12953 = vmatpush3.bf16.msra.mxu1 %v14144_v8  ;;  %9425 = vmatprep.mubr.bf16.mxu1 %v9097_v15  ;;  %v9088_v7 = vadd.f32 %v9078_v56, %v15395_v6  ;;  %v9091_v15 = vadd.f32 %v9081_v27, %v15366_v53  ;;  %v9080_v56 = vld [vmem:[#allocation2 + $0x390] sm:$0xff] }
 0x48a   : > { %v13393_v9 = vpop.f32.mrf.mxu1  ;;  %v12723_v21 = vpop.f32.mrf.mxu0  ;;  %12954 = vmatprep.subr.bf16.mxu1 %v14147_v38  ;;  %v9076_v38 = vld [vmem:[#allocation2 + $0x370] sm:$0xff] }
 0x48b   : > { %v15674_v25 = vadd.f32 %v6858_v29, %v15644_v39  ;;  %12983 = vmatpush3.bf16.msra.mxu0 %v14146_v13  ;;  %v14154_v39 = vld [vmem:[#allocation8 + $0xce8] sm:$0xff]   ;;  %v14174_v13 = vld [vmem:[#allocation8 + $0xda0] sm:$0xff]   ;;  %v9086_v16 = vadd.f32 %v9076_v38, %v15366_v53  ;;  %v14175_v29 = vld [vmem:[#allocation8 + $0xd78] sm:$0xff]  }
 0x48c   : > { %v6860_v31 = vpop.f32.mrf.mxu1  ;;  %v12724_v45 = vpop.f32.mrf.mxu0  ;;  %12984 = vmatprep.subr.bf16.mxu0 %v14149_v60  ;;  %v14176_v60 = vld [vmem:[#allocation8 + $0xdd8] sm:$0xff]   ;;  %v14194_v27 = vld [vmem:[#allocation8 + $0xe28] sm:$0xff]  }
 0x48d   : > { %v6861_v11 = vadd.f32 %v6860_v31, %v6820_v22  ;;  %v15676_v12 = vadd.f32 %v12724_v45, %v12723_v21  ;;  %12955 = vmatpush3.bf16.msra.mxu1 %v14148_v26  ;;  %v14166_v22 = vld [vmem:[#allocation8 + $0xdb0] sm:$0xff]   ;;  %v9096_v26 = vpack.c.bf16 %v9091_v15, %v9086_v16  ;;  %v14177_v9 = vld [vmem:[#allocation8 + $0xd98] sm:$0xff]   ;;  %v9527_v16 = vld [vmem:[#allocation2 + $0x408] sm:$0xff] }
 0x48e   : > { %v13394_v37 = vpop.f32.mrf.mxu1  ;;  %v12726_v10 = vpop.f32.mrf.mxu0  ;;  %12956 = vmatprep.subr.bf16.mxu1 %v14151_v0  ;;  %v14179_v0 = vld [vmem:[#allocation8 + $0xdd0] sm:$0xff]  }
 0x48f   : > { %v15679_v48 = vadd.f32 %v6861_v11, %v15654_v24  ;;  %12985 = vmatpush3.bf16.msra.mxu0 %v14150_v23  ;;  %v9093_v24 = vadd.f32 %v9083_v14, %v15395_v6  ;;  %v14178_v23 = vld [vmem:[#allocation8 + $0xd70] sm:$0xff]   ;;  %v14185_v14 = vld [vmem:[#allocation8 + $0xdc0] sm:$0xff]  }
 0x490   : > { %v12727_v40 = vpop.f32.mrf.mxu0  ;;  %12986 = vmatprep.subr.bf16.mxu0 %v14153_v36  ;;  %v14180_v36 = vld [vmem:[#allocation8 + $0xd90] sm:$0xff]  }
 0x491   : > { %v15681_v63 = vadd.f32 %v12727_v40, %v12726_v10  ;;  %12957 = vmatpush3.bf16.msra.mxu1 %v14152_v34  ;;  %v9098_v4 = vpack.c.bf16 %v9093_v24, %v9088_v7  ;;  %v14182_v34 = vld [vmem:[#allocation8 + $0xdc8] sm:$0xff]   ;;  %v14186_v7 = vld [vmem:[#allocation8 + $0xd80] sm:$0xff]  }
 0x492   : > { %12958 = vmatprep.subr.bf16.mxu1 %v14155_v30  ;;  %v14181_v10 = vld [vmem:[#allocation8 + $0xd68] sm:$0xff]  }
 0x493   : > { %12987 = vmatpush3.bf16.msra.mxu0 %v14154_v39  ;;  %v9523_v24 = vld [vmem:[#allocation2 + $0x3e8] sm:$0xff] }
 0x494   : > { %12988 = vmatprep.subr.bf16.mxu0 %v14157_v51  ;;  %v14183_v51 = vld [vmem:[#allocation8 + $0xd88] sm:$0xff]   ;;  %v9533_v58 = vadd.f32 %v9523_v24, %v15366_v53 }
 0x495   : > { %12959 = vmatpush3.bf16.msra.mxu1 %v14156_v62  ;;  %v9085_v62 = vld [vmem:[#allocation2 + $0x3b8] sm:$0xff]  ;;  %v14208_v24 = vld [vmem:[#allocation8 + $0xe08] sm:$0xff]  }
 0x496   : > { %12960 = vmatprep.subr.bf16.mxu1 %v14159_v42  ;;  %v9526_v42 = vld [vmem:[#allocation2 + $0x400] sm:$0xff] }
 0x497   : > { %12989 = vmatpush3.bf16.msra.mxu0 %v14158_v52  ;;  %v14184_v52 = vld [vmem:[#allocation8 + $0xd60] sm:$0xff]  }
 0x498   : > { %13001 = vmatprep.subr.bf16.mxu0 %v14161_v5  ;;  %v9095_v5 = vadd.f32 %v9085_v62, %v15257_v50 }
 0x499   : > { %12961 = vmatpush3.bf16.msra.mxu1 %v14160_v47  ;;  %v9521_v47 = vld [vmem:[#allocation2 + $0x3d8] sm:$0xff] }
 0x49a   : > { %v7299_v59 = vpop.f32.mrf.mxu0  ;;  %9467 = vmatmul.mubr.bf16.vlgmr.msra.gmra.mxu0 %v9098_v4  ;;  %12962 = vmatprep.subr.bf16.mxu1 %v14163_v33  ;;  %v9536_v33 = vadd.f32 %v9526_v42, %v15379_v43  ;;  %v9531_v4 = vadd.f32 %v9521_v47, %v15379_v43  ;;  %v14211_v47 = vld [vmem:[#allocation8 + $0xe40] sm:$0xff]  }
 0x49b   : > { %13002 = vmatpush3.bf16.msra.mxu0 %v14162_v19  ;;  %9867 = vmatprep.mubr.bf16.mxu0 %v9539_v49  ;;  %v9090_v19 = vadd.f32 %v9080_v56, %v15257_v50  ;;  %v14209_v56 = vld [vmem:[#allocation8 + $0xf88] sm:$0xff]  }
 0x49c   : > { %v13405_v54 = vpop.f32.mrf.mxu0  ;;  %13003 = vmatprep.subr.bf16.mxu0 %v14165_v32 }
 0x49d   : > { %12963 = vmatpush3.bf16.msra.mxu1 %v14164_v35  ;;  %v9100_v49 = vpack.c.bf16 %v9095_v5, %v9090_v19  ;;  %v9966_v19 = vld [vmem:[#allocation2 + $0x440] sm:$0xff] }
 0x49e   : > { %v15687_v17 = vpop.f32.mrf.mxu0  ;;  %12964 = vmatprep.subr.bf16.mxu1 %v14167_v3  ;;  %v9541_v3 = vpack.c.bf16 %v9536_v33, %v9531_v4  ;;  %v9525_v33 = vld [vmem:[#allocation2 + $0x3f8] sm:$0xff] }
 0x49f   : > { %13004 = vmatpush3.bf16.msra.mxu0 %v14166_v22  ;;  %v14189_v22 = vld [vmem:[#allocation8 + $0xe98] sm:$0xff]  }
 0x4a0   : > { %v13406_v8 = vpop.f32.mrf.mxu0  ;;  %13005 = vmatprep.subr.bf16.mxu0 %v14169_v2  ;;  %v14191_v2 = vld [vmem:[#allocation8 + $0xe30] sm:$0xff]  }
 0x4a1   : > { %12965 = vmatpush3.bf16.msra.mxu1 %v14168_v41 }
 0x4a2   : > { %12966 = vmatprep.subr.bf16.mxu1 %v14171_v55 }
 0x4a3   : > { %13006 = vmatpush3.bf16.msra.mxu0 %v14170_v44 }
 0x4a4   : > { %13007 = vmatprep.subr.bf16.mxu0 %v14173_v61  ;;  %v14196_v61 = vld [vmem:[#allocation8 + $0xe60] sm:$0xff]  }
 0x4a5   : > { %12967 = vmatpush3.bf16.msra.mxu1 %v14172_v1  ;;  %v14195_v1 = vld [vmem:[#allocation8 + $0xe88] sm:$0xff]  }
 0x4a6   : > { %13455 = vmatprep.subr.bf16.mxu1 %v14482_v28 }
 0x4a7   : > { %13008 = vmatpush3.bf16.msra.mxu0 %v14174_v13  ;;  %v14197_v13 = vld [vmem:[#allocation8 + $0xe20] sm:$0xff]  }
 0x4a8   : > { %v12745_v21 = vpop.f32.mrf.mxu1  ;;  %9426 = vmatmul.mubr.bf16.vlgmr.msra.gmra.mxu1 %v9096_v26  ;;  %13009 = vmatprep.subr.bf16.mxu0 %v14176_v60  ;;  %v14199_v60 = vld [vmem:[#allocation8 + $0xe58] sm:$0xff]   ;;  %v14198_v26 = vld [vmem:[#allocation8 + $0xe80] sm:$0xff]  }
 0x4a9   : > { %13456 = vmatpush3.bf16.msra.mxu1 %v14175_v29  ;;  %13463 = vmatprep.mubr.msk.bf16.mxu1 %vm14483_vm3, %v14482_v28  ;;  %v9968_v29 = vld [vmem:[#allocation2 + $0x450] sm:$0xff] }
 0x4aa   : > { %v12746_v31 = vpop.f32.mrf.mxu1  ;;  %13457 = vmatprep.subr.bf16.mxu1 %v14482_v28 }
 0x4ab   : > { %v12747_v45 = vadd.f32 %v12746_v31, %v12745_v21  ;;  %13010 = vmatpush3.bf16.msra.mxu0 %v14177_v9  ;;  %v9522_v9 = vld [vmem:[#allocation2 + $0x3e0] sm:$0xff]  ;;  %v9537_v21 = vadd.f32 %v9527_v16, %v15257_v50  ;;  %v14223_v16 = vld [vmem:[#allocation8 + $0xf08] sm:$0xff]  }
 0x4ac   : > { %v12748_v11 = vpop.f32.mrf.mxu1  ;;  %13011 = vmatprep.subr.bf16.mxu0 %v14179_v0  ;;  %v14201_v0 = vld [vmem:[#allocation8 + $0xf98] sm:$0xff]  }
 0x4ad   : > { %v7259_v37 = vadd.f32 %v12747_v45, %v15676_v12  ;;  %13458 = vmatpush3.bf16.msra.mxu1 %v14178_v23  ;;  %v9963_v23 = vld [vmem:[#allocation2 + $0x428] sm:$0xff]  ;;  %v14200_v31 = vld [vmem:[#allocation8 + $0xe18] sm:$0xff]   ;;  %v9978_v45 = vadd.f32 %v9968_v29, %v15379_v43  ;;  %v14222_v29 = vld [vmem:[#allocation8 + $0xf30] sm:$0xff]  }
 0x4ae   : > { %v12749_v30 = vpop.f32.mrf.mxu1  ;;  %13459 = vmatprep.subr.bf16.mxu1 %v14482_v28 }
 0x4af   : > { %v7300_v39 = vadd.f32 %v7299_v59, %v7259_v37  ;;  %v12750_v40 = vadd.f32 %v12749_v30, %v12748_v11  ;;  %13012 = vmatpush3.bf16.msra.mxu0 %v14180_v36  ;;  %v14190_v59 = vld [vmem:[#allocation8 + $0xe70] sm:$0xff]   ;;  %v9532_v36 = vadd.f32 %v9522_v9, %v15257_v50  ;;  %v9973_v37 = vadd.f32 %v9963_v23, %v15379_v43 }
 0x4b0   : > { %13013 = vmatprep.subr.bf16.mxu0 %v14182_v34  ;;  %v14203_v11 = vld [vmem:[#allocation8 + $0xe50] sm:$0xff]   ;;  %v14202_v34 = vld [vmem:[#allocation8 + $0xf58] sm:$0xff]  }
 0x4b1   : > { %v7262_v57 = vadd.f32 %v12750_v40, %v15681_v63  ;;  %13460 = vmatpush3.bf16.msra.mxu1 %v14181_v10  ;;  %v15699_v12 = vadd.f32 %v7300_v39, %v15674_v25  ;;  %v9518_v63 = vld [vmem:[#allocation2 + $0x3c0] sm:$0xff]  ;;  %v9542_v30 = vpack.c.bf16 %v9537_v21, %v9532_v36  ;;  %v14205_v39 = vld [vmem:[#allocation8 + $0xf90] sm:$0xff]   ;;  %v9983_v40 = vpack.c.bf16 %v9978_v45, %v9973_v37  ;;  %v14225_v21 = vld [vmem:[#allocation8 + $0xf68] sm:$0xff]  }
 0x4b2   : > { %13461 = vmatprep.subr.bf16.mxu1 %v14482_v28  ;;  %v14188_v25 = vld [vmem:[#allocation8 + $0xe38] sm:$0xff]   ;;  %v9528_v35 = vadd.f32 %v9518_v63, %v15366_v53  ;;  %v14213_v63 = vld [vmem:[#allocation8 + $0xf80] sm:$0xff]  }
 0x4b3   : > { %v7303_v18 = vadd.f32 %v15687_v17, %v7262_v57  ;;  %13014 = vmatpush3.bf16.msra.mxu0 %v14183_v51  ;;  %v14192_v17 = vld [vmem:[#allocation8 + $0xe90] sm:$0xff]  }
 0x4b4   : > { %13015 = vmatprep.subr.bf16.mxu0 %v14185_v14  ;;  %v9538_v54 = vpack.c.bf16 %v9533_v58, %v9528_v35  ;;  %v14204_v51 = vld [vmem:[#allocation8 + $0xe10] sm:$0xff]   ;;  %v14207_v14 = vld [vmem:[#allocation8 + $0xe48] sm:$0xff]   ;;  %v14212_v58 = vld [vmem:[#allocation8 + $0xe00] sm:$0xff]  }
 0x4b5   : > { %13462 = vmatpush3.bf16.msra.mxu1 %v14184_v52  ;;  %v15709_v32 = vadd.f32 %v7303_v18, %v15679_v48  ;;  %v14193_v48 = vld [vmem:[#allocation8 + $0xe68] sm:$0xff]   ;;  %v14206_v57 = vld [vmem:[#allocation8 + $0xf50] sm:$0xff]   ;;  %v14215_v35 = vld [vmem:[#allocation8 + $0xf18] sm:$0xff]  }
 0x4b6   : > { %13023 = vmatprep.subr.bf16.mxu1 %v14187_v20 }
 0x4b7   : > { %13016 = vmatpush3.bf16.msra.mxu0 %v14186_v7  ;;  %v14210_v7 = vld [vmem:[#allocation8 + $0xf48] sm:$0xff]  }
 0x4b8   : > { %13464 = vmatmul.mubr.msk.bf16.vlgmr.msra.gmra.mxu1 %vm1339_vm2, %v9100_v49  ;;  %13467 = vmatprep.subr.bf16.mxu0 %v14482_v28  ;;  %v9535_v49 = vadd.f32 %v9525_v33, %v15395_v6  ;;  %v14237_v33 = vld [vmem:[#allocation8 + $0x1030] sm:$0xff]  }
 0x4b9   : > { %13024 = vmatpush3.bf16.msra.mxu1 %v14188_v25  ;;  %9908 = vmatprep.mubr.bf16.mxu1 %v9541_v3  ;;  %v9520_v25 = vld [vmem:[#allocation2 + $0x3d0] sm:$0xff]  ;;  %v14214_v3 = vld [vmem:[#allocation8 + $0xf40] sm:$0xff]  }
 0x4ba   : > { %v12794_v41 = vpop.f32.mrf.mxu0  ;;  %9868 = vmatmul.mubr.bf16.vlgmr.msra.gmra.mxu0 %v9538_v54  ;;  %13025 = vmatprep.subr.bf16.mxu1 %v14190_v59  ;;  %v9961_v59 = vld [vmem:[#allocation2 + $0x418] sm:$0xff]  ;;  %v9530_v54 = vadd.f32 %v9520_v25, %v15395_v6  ;;  %v14239_v25 = vld [vmem:[#allocation8 + $0xee8] sm:$0xff]  }
 0x4bb   : > { %13468 = vmatpush3.bf16.msra.mxu0 %v14189_v22  ;;  %13475 = vmatprep.mubr.msk.bf16.mxu0 %vm14483_vm3, %v14482_v28  ;;  %v9976_v22 = vadd.f32 %v9966_v19, %v15363_v46  ;;  %v14236_v19 = vld [vmem:[#allocation8 + $0xeb0] sm:$0xff]  }
 0x4bc   : > { %v12795_v55 = vpop.f32.mrf.mxu0  ;;  %13469 = vmatprep.subr.bf16.mxu0 %v14482_v28 }
 0x4bd   : > { %v12796_v44 = vadd.f32 %v12795_v55, %v12794_v41  ;;  %13026 = vmatpush3.bf16.msra.mxu1 %v14191_v2  ;;  %v14217_v2 = vld [vmem:[#allocation8 + $0xf78] sm:$0xff]   ;;  %v14219_v55 = vld [vmem:[#allocation8 + $0xf10] sm:$0xff]  }
 0x4be   : > { %v12797_v8 = vpop.f32.mrf.mxu0  ;;  %13027 = vmatprep.subr.bf16.mxu1 %v14193_v48  ;;  %v14216_v41 = vld [vmem:[#allocation8 + $0xed8] sm:$0xff]   ;;  %v9971_v48 = vadd.f32 %v9961_v59, %v15363_v46  ;;  %v14240_v59 = vld [vmem:[#allocation8 + $0xea8] sm:$0xff]  }
 0x4bf   : > { %13470 = vmatpush3.bf16.msra.mxu0 %v14192_v17  ;;  %v9540_v17 = vpack.c.bf16 %v9535_v49, %v9530_v54  ;;  %v14242_v54 = vld [vmem:[#allocation8 + $0xfe8] sm:$0xff]  }
 0x4c0   : > { %v12798_v38 = vpop.f32.mrf.mxu0  ;;  %13471 = vmatprep.subr.bf16.mxu0 %v14482_v28 }
 0x4c1   : > { %v12799_v15 = vadd.f32 %v12798_v38, %v12797_v8  ;;  %13028 = vmatpush3.bf16.msra.mxu1 %v14194_v27  ;;  %v14218_v27 = vld [vmem:[#allocation8 + $0xf38] sm:$0xff]   ;;  %v14220_v38 = vld [vmem:[#allocation8 + $0xed0] sm:$0xff]  }
 0x4c2   : > { %13029 = vmatprep.subr.bf16.mxu1 %v14196_v61  ;;  %v14221_v61 = vld [vmem:[#allocation8 + $0xf70] sm:$0xff]  }
 0x4c3   : > { %13472 = vmatpush3.bf16.msra.mxu0 %v14195_v1 }
 0x4c4   : > { %13473 = vmatprep.subr.bf16.mxu0 %v14482_v28 }
 0x4c5   : > { %13030 = vmatpush3.bf16.msra.mxu1 %v14197_v13 }
 0x4c6   : > { %13031 = vmatprep.subr.bf16.mxu1 %v14199_v60 }
 0x4c7   : > { %13474 = vmatpush3.bf16.msra.mxu0 %v14198_v26 }
 0x4c8   : > { %v12772_v10 = vpop.f32.mrf.mxu1  ;;  %13072 = vmatprep.subr.bf16.mxu0 %v14201_v0 }
 0x4c9   : > { %13032 = vmatpush3.bf16.msra.mxu1 %v14200_v31  ;;  %v14224_v31 = vld [vmem:[#allocation8 + $0xec8] sm:$0xff]  }
 0x4ca   : > { %v12773_v62 = vpop.f32.mrf.mxu1  ;;  %13476 = vmatmul.mubr.msk.bf16.vlgmr.msra.gmra.mxu0 %vm1339_vm2, %v9542_v30  ;;  %13033 = vmatprep.subr.bf16.mxu1 %v14203_v11  ;;  %v14227_v11 = vld [vmem:[#allocation8 + $0xf00] sm:$0xff]  }
 0x4cb   : > { %v12774_v42 = vadd.f32 %v12773_v62, %v12772_v10  ;;  %13073 = vmatpush3.bf16.msra.mxu0 %v14202_v34  ;;  %10350 = vmatprep.mubr.bf16.mxu0 %v9983_v40  ;;  %v14229_v10 = vld [vmem:[#allocation8 + $0xf60] sm:$0xff]   ;;  %v10408_v62 = vld [vmem:[#allocation2 + $0x490] sm:$0xff] }
 0x4cc   : > { %v12775_v52 = vpop.f32.mrf.mxu1  ;;  %13074 = vmatprep.subr.bf16.mxu0 %v14205_v39  ;;  %v14228_v39 = vld [vmem:[#allocation8 + $0xec0] sm:$0xff]  }
 0x4cd   : > { %13034 = vmatpush3.bf16.msra.mxu1 %v14204_v51  ;;  %v7701_v5 = vadd.f32 %v12796_v44, %v12774_v42  ;;  %v9981_v44 = vpack.c.bf16 %v9976_v22, %v9971_v48  ;;  %v9967_v40 = vld [vmem:[#allocation2 + $0x448] sm:$0xff]  ;;  %v14231_v51 = vld [vmem:[#allocation8 + $0xef8] sm:$0xff]  }
 0x4ce   : > { %v12776_v20 = vpop.f32.mrf.mxu1  ;;  %13035 = vmatprep.subr.bf16.mxu1 %v14207_v14  ;;  %v14230_v14 = vld [vmem:[#allocation8 + $0xf20] sm:$0xff]  }
 0x4cf   : > { %v12777_v18 = vadd.f32 %v12776_v20, %v12775_v52  ;;  %13075 = vmatpush3.bf16.msra.mxu0 %v14206_v57  ;;  %v9962_v42 = vld [vmem:[#allocation2 + $0x420] sm:$0xff]  ;;  %v10403_v52 = vld [vmem:[#allocation2 + $0x468] sm:$0xff]  ;;  %v14235_v20 = vld [vmem:[#allocation8 + $0xef0] sm:$0xff]  }
 0x4d0   : > { %13076 = vmatprep.subr.bf16.mxu0 %v14209_v56  ;;  %v14233_v57 = vld [vmem:[#allocation8 + $0x1038] sm:$0xff]   ;;  %v14243_v22 = vld [vmem:[#allocation8 + $0xee0] sm:$0xff]  }
 0x4d1   : > { %13036 = vmatpush3.bf16.msra.mxu1 %v14208_v24  ;;  %v7704_v4 = vadd.f32 %v12799_v15, %v12777_v18  ;;  %v14232_v56 = vld [vmem:[#allocation8 + $0xeb8] sm:$0xff]   ;;  %v10418_v24 = vadd.f32 %v10408_v62, %v15363_v46  ;;  %v10413_v18 = vadd.f32 %v10403_v52, %v15363_v46  ;;  %v14245_v48 = vld [vmem:[#allocation8 + $0x1020] sm:$0xff]  }
 0x4d2   : > { %13037 = vmatprep.subr.bf16.mxu1 %v14211_v47  ;;  %v14234_v47 = vld [vmem:[#allocation8 + $0xff8] sm:$0xff]  }
 0x4d3   : > { %13077 = vmatpush3.bf16.msra.mxu0 %v14210_v7  ;;  %v14259_v52 = vld [vmem:[#allocation8 + $0x10b8] sm:$0xff]  }
 0x4d4   : > { %13078 = vmatprep.subr.bf16.mxu0 %v14213_v63  ;;  %v10423_v63 = vpack.c.bf16 %v10418_v24, %v10413_v18 }
 0x4d5   : > { %13038 = vmatpush3.bf16.msra.mxu1 %v14212_v58 }
 0x4d6   : > { %13050 = vmatprep.subr.bf16.mxu1 %v14215_v35  ;;  %v14241_v35 = vld [vmem:[#allocation8 + $0x1028] sm:$0xff]  }
 0x4d7   : > { %13079 = vmatpush3.bf16.msra.mxu0 %v14214_v3 }
 0x4d8   : > { %v7741_v8 = vpop.f32.mrf.mxu1  ;;  %9909 = vmatmul.mubr.bf16.vlgmr.msra.gmra.mxu1 %v9540_v17  ;;  %13080 = vmatprep.subr.bf16.mxu0 %v14217_v2  ;;  %v9965_v2 = vld [vmem:[#allocation2 + $0x438] sm:$0xff]  ;;  %v14244_v17 = vld [vmem:[#allocation8 + $0xea0] sm:$0xff]  }
 0x4d9   : > { %v7742_v1 = vadd.f32 %v7741_v8, %v7701_v5  ;;  %13051 = vmatpush3.bf16.msra.mxu1 %v14216_v41  ;;  %10309 = vmatprep.mubr.bf16.mxu1 %v9981_v44  ;;  %v9972_v5 = vadd.f32 %v9962_v42, %v15395_v6  ;;  %v9975_v44 = vadd.f32 %v9965_v2, %v15366_v53  ;;  %v9964_v42 = vld [vmem:[#allocation2 + $0x430] sm:$0xff] }
 0x4da   : > { %v13417_v15 = vpop.f32.mrf.mxu1  ;;  %v12821_v13 = vpop.f32.mrf.mxu0  ;;  %13052 = vmatprep.subr.bf16.mxu1 %v14219_v55  ;;  %v9960_v55 = vld [vmem:[#allocation2 + $0x410] sm:$0xff] }
 0x4db   : > { %v15729_v60 = vadd.f32 %v7742_v1, %v15699_v12  ;;  %13081 = vmatpush3.bf16.msra.mxu0 %v14218_v27  ;;  %v14226_v12 = vld [vmem:[#allocation8 + $0xf28] sm:$0xff]   ;;  %v14246_v27 = vld [vmem:[#allocation8 + $0xfe0] sm:$0xff]   ;;  %v9970_v8 = vadd.f32 %v9960_v55, %v15366_v53  ;;  %v14247_v1 = vld [vmem:[#allocation8 + $0xfb8] sm:$0xff]  }
 0x4dc   : > { %v7744_v26 = vpop.f32.mrf.mxu1  ;;  %v12822_v9 = vpop.f32.mrf.mxu0  ;;  %13082 = vmatprep.subr.bf16.mxu0 %v14221_v61  ;;  %v14248_v61 = vld [vmem:[#allocation8 + $0x1018] sm:$0xff]   ;;  %v14266_v2 = vld [vmem:[#allocation8 + $0x1068] sm:$0xff]  }
 0x4dd   : > { %v7745_v0 = vadd.f32 %v7744_v26, %v7704_v4  ;;  %v15731_v23 = vadd.f32 %v12822_v9, %v12821_v13  ;;  %13053 = vmatpush3.bf16.msra.mxu1 %v14220_v38  ;;  %v14238_v4 = vld [vmem:[#allocation8 + $0xff0] sm:$0xff]   ;;  %v9980_v38 = vpack.c.bf16 %v9975_v44, %v9970_v8  ;;  %v14249_v15 = vld [vmem:[#allocation8 + $0xfd8] sm:$0xff]   ;;  %v10411_v8 = vld [vmem:[#allocation2 + $0x4a8] sm:$0xff] }
 0x4de   : > { %v13418_v45 = vpop.f32.mrf.mxu1  ;;  %v12824_v36 = vpop.f32.mrf.mxu0  ;;  %13054 = vmatprep.subr.bf16.mxu1 %v14223_v16  ;;  %v14251_v16 = vld [vmem:[#allocation8 + $0x1010] sm:$0xff]  }
 0x4df   : > { %v15734_v34 = vadd.f32 %v7745_v0, %v15709_v32  ;;  %13083 = vmatpush3.bf16.msra.mxu0 %v14222_v29  ;;  %v9977_v32 = vadd.f32 %v9967_v40, %v15395_v6  ;;  %v14250_v29 = vld [vmem:[#allocation8 + $0xfb0] sm:$0xff]   ;;  %v14257_v40 = vld [vmem:[#allocation8 + $0x1000] sm:$0xff]  }
 0x4e0   : > { %v12825_v37 = vpop.f32.mrf.mxu0  ;;  %13084 = vmatprep.subr.bf16.mxu0 %v14225_v21  ;;  %v14252_v21 = vld [vmem:[#allocation8 + $0xfd0] sm:$0xff]  }
 0x4e1   : > { %v15736_v30 = vadd.f32 %v12825_v37, %v12824_v36  ;;  %13055 = vmatpush3.bf16.msra.mxu1 %v14224_v31  ;;  %v9982_v7 = vpack.c.bf16 %v9977_v32, %v9972_v5  ;;  %v14254_v31 = vld [vmem:[#allocation8 + $0x1008] sm:$0xff]   ;;  %v14258_v5 = vld [vmem:[#allocation8 + $0xfc0] sm:$0xff]  }
 0x4e2   : > { %13056 = vmatprep.subr.bf16.mxu1 %v14227_v11  ;;  %v14253_v36 = vld [vmem:[#allocation8 + $0xfa8] sm:$0xff]  }
 0x4e3   : > { %13085 = vmatpush3.bf16.msra.mxu0 %v14226_v12  ;;  %v10407_v32 = vld [vmem:[#allocation2 + $0x488] sm:$0xff] }
 0x4e4   : > { %13086 = vmatprep.subr.bf16.mxu0 %v14229_v10  ;;  %v14255_v10 = vld [vmem:[#allocation8 + $0xfc8] sm:$0xff]   ;;  %v10417_v18 = vadd.f32 %v10407_v32, %v15366_v53 }
 0x4e5   : > { %13057 = vmatpush3.bf16.msra.mxu1 %v14228_v39  ;;  %v9969_v39 = vld [vmem:[#allocation2 + $0x458] sm:$0xff] }
 0x4e6   : > { %13058 = vmatprep.subr.bf16.mxu1 %v14231_v51  ;;  %v10410_v51 = vld [vmem:[#allocation2 + $0x4a0] sm:$0xff] }
 0x4e7   : > { %13087 = vmatpush3.bf16.msra.mxu0 %v14230_v14  ;;  %v14256_v14 = vld [vmem:[#allocation8 + $0xfa0] sm:$0xff]  }
 0x4e8   : > { %13099 = vmatprep.subr.bf16.mxu0 %v14233_v57  ;;  %v9979_v57 = vadd.f32 %v9969_v39, %v15257_v50 }
 0x4e9   : > { %13059 = vmatpush3.bf16.msra.mxu1 %v14232_v56  ;;  %v10405_v56 = vld [vmem:[#allocation2 + $0x478] sm:$0xff] }
 0x4ea   : > { %v8183_v58 = vpop.f32.mrf.mxu0  ;;  %10351 = vmatmul.mubr.bf16.vlgmr.msra.gmra.mxu0 %v9982_v7  ;;  %13060 = vmatprep.subr.bf16.mxu1 %v14235_v20  ;;  %v10420_v20 = vadd.f32 %v10410_v51, %v15379_v43  ;;  %v10415_v7 = vadd.f32 %v10405_v56, %v15379_v43 }
 0x4eb   : > { %13100 = vmatpush3.bf16.msra.mxu0 %v14234_v47  ;;  %10751 = vmatprep.mubr.bf16.mxu0 %v10423_v63  ;;  %v9974_v47 = vadd.f32 %v9964_v42, %v15257_v50  ;;  %v14281_v42 = vld [vmem:[#allocation8 + $0x11c8] sm:$0xff]  }
 0x4ec   : > { %v13429_v49 = vpop.f32.mrf.mxu0  ;;  %13101 = vmatprep.subr.bf16.mxu0 %v14237_v33 }
 0x4ed   : > { %13061 = vmatpush3.bf16.msra.mxu1 %v14236_v19  ;;  %v9984_v63 = vpack.c.bf16 %v9979_v57, %v9974_v47  ;;  %v14284_v47 = vld [vmem:[#allocation8 + $0x1040] sm:$0xff]  }
 0x4ee   : > { %v15742_v3 = vpop.f32.mrf.mxu0  ;;  %13062 = vmatprep.subr.bf16.mxu1 %v14239_v25  ;;  %v10425_v25 = vpack.c.bf16 %v10420_v20, %v10415_v7  ;;  %v14285_v20 = vld [vmem:[#allocation8 + $0x11c0] sm:$0xff]  }
 0x4ef   : > { %13102 = vmatpush3.bf16.msra.mxu0 %v14238_v4  ;;  %v14261_v4 = vld [vmem:[#allocation8 + $0x10d8] sm:$0xff]  }
 0x4f0   : > { %v13430_v41 = vpop.f32.mrf.mxu0  ;;  %13103 = vmatprep.subr.bf16.mxu0 %v14241_v35  ;;  %v14263_v35 = vld [vmem:[#allocation8 + $0x1070] sm:$0xff]  }
 0x4f1   : > { %13063 = vmatpush3.bf16.msra.mxu1 %v14240_v59 }
 0x4f2   : > { %13064 = vmatprep.subr.bf16.mxu1 %v14243_v22 }
 0x4f3   : > { %13104 = vmatpush3.bf16.msra.mxu0 %v14242_v54 }
 0x4f4   : > { %13105 = vmatprep.subr.bf16.mxu0 %v14245_v48  ;;  %v14268_v48 = vld [vmem:[#allocation8 + $0x10a0] sm:$0xff]  }
 0x4f5   : > { %13065 = vmatpush3.bf16.msra.mxu1 %v14244_v17  ;;  %v14267_v17 = vld [vmem:[#allocation8 + $0x10c8] sm:$0xff]  }
 0x4f6   : > { %13479 = vmatprep.subr.bf16.mxu1 %v14482_v28 }
 0x4f7   : > { %13106 = vmatpush3.bf16.msra.mxu0 %v14246_v27  ;;  %v14269_v27 = vld [vmem:[#allocation8 + $0x1060] sm:$0xff]  }
 0x4f8   : > { %v12843_v13 = vpop.f32.mrf.mxu1  ;;  %10310 = vmatmul.mubr.bf16.vlgmr.msra.gmra.mxu1 %v9980_v38  ;;  %13107 = vmatprep.subr.bf16.mxu0 %v14248_v61  ;;  %v14271_v61 = vld [vmem:[#allocation8 + $0x1098] sm:$0xff]   ;;  %v14270_v38 = vld [vmem:[#allocation8 + $0x10c0] sm:$0xff]  }
 0x4f9   : > { %13480 = vmatpush3.bf16.msra.mxu1 %v14247_v1  ;;  %13487 = vmatprep.mubr.msk.bf16.mxu1 %vm14483_vm3, %v14482_v28  ;;  %v10852_v1 = vld [vmem:[#allocation2 + $0x4f0] sm:$0xff] }
 0x4fa   : > { %v12844_v26 = vpop.f32.mrf.mxu1  ;;  %13481 = vmatprep.subr.bf16.mxu1 %v14482_v28 }
 0x4fb   : > { %v12845_v9 = vadd.f32 %v12844_v26, %v12843_v13  ;;  %13108 = vmatpush3.bf16.msra.mxu0 %v14249_v15  ;;  %v10406_v15 = vld [vmem:[#allocation2 + $0x480] sm:$0xff]  ;;  %v10421_v13 = vadd.f32 %v10411_v8, %v15257_v50  ;;  %v14294_v8 = vld [vmem:[#allocation8 + $0x1170] sm:$0xff]  }
 0x4fc   : > { %v12846_v0 = vpop.f32.mrf.mxu1  ;;  %13109 = vmatprep.subr.bf16.mxu0 %v14251_v16  ;;  %v14273_v16 = vld [vmem:[#allocation8 + $0x11d8] sm:$0xff]  }
 0x4fd   : > { %v8143_v45 = vadd.f32 %v12845_v9, %v15731_v23  ;;  %13482 = vmatpush3.bf16.msra.mxu1 %v14250_v29  ;;  %v10847_v29 = vld [vmem:[#allocation2 + $0x4c8] sm:$0xff]  ;;  %v14272_v26 = vld [vmem:[#allocation8 + $0x1058] sm:$0xff]   ;;  %v10862_v9 = vadd.f32 %v10852_v1, %v15379_v43 }
 0x4fe   : > { %v12847_v11 = vpop.f32.mrf.mxu1  ;;  %13483 = vmatprep.subr.bf16.mxu1 %v14482_v28 }
 0x4ff   : > { %v8184_v12 = vadd.f32 %v8183_v58, %v8143_v45  ;;  %v12848_v37 = vadd.f32 %v12847_v11, %v12846_v0  ;;  %13110 = vmatpush3.bf16.msra.mxu0 %v14252_v21  ;;  %v14262_v58 = vld [vmem:[#allocation8 + $0x10b0] sm:$0xff]   ;;  %v10416_v21 = vadd.f32 %v10406_v15, %v15257_v50  ;;  %v10857_v45 = vadd.f32 %v10847_v29, %v15379_v43  ;;  %v14280_v43 = vld [vmem:[#allocation8 + $0x1048] sm:$0xff]  }
 0x500   : > { %13111 = vmatprep.subr.bf16.mxu0 %v14254_v31  ;;  %v14275_v0 = vld [vmem:[#allocation8 + $0x1090] sm:$0xff]   ;;  %v14274_v31 = vld [vmem:[#allocation8 + $0x1198] sm:$0xff]  }
 0x501   : > { %v8146_v62 = vadd.f32 %v12848_v37, %v15736_v30  ;;  %13484 = vmatpush3.bf16.msra.mxu1 %v14253_v36  ;;  %v15754_v23 = vadd.f32 %v8184_v12, %v15729_v60  ;;  %v10402_v30 = vld [vmem:[#allocation2 + $0x460] sm:$0xff]  ;;  %v10426_v11 = vpack.c.bf16 %v10421_v13, %v10416_v21  ;;  %v14277_v12 = vld [vmem:[#allocation8 + $0x11d0] sm:$0xff]   ;;  %v10867_v37 = vpack.c.bf16 %v10862_v9, %v10857_v45 }
 0x502   : > { %13485 = vmatprep.subr.bf16.mxu1 %v14482_v28  ;;  %v14260_v60 = vld [vmem:[#allocation8 + $0x1078] sm:$0xff]   ;;  %v10412_v19 = vadd.f32 %v10402_v30, %v15366_v53  ;;  %v14299_v9 = vld [vmem:[#allocation8 + $0x1140] sm:$0xff]  }
 0x503   : > { %v8187_v24 = vadd.f32 %v15742_v3, %v8146_v62  ;;  %13112 = vmatpush3.bf16.msra.mxu0 %v14255_v10  ;;  %v14264_v3 = vld [vmem:[#allocation8 + $0x10d0] sm:$0xff]   ;;  %v10850_v30 = vld [vmem:[#allocation2 + $0x4e0] sm:$0xff] }
 0x504   : > { %13113 = vmatprep.subr.bf16.mxu0 %v14257_v40  ;;  %v10422_v49 = vpack.c.bf16 %v10417_v18, %v10412_v19  ;;  %v14276_v10 = vld [vmem:[#allocation8 + $0x1050] sm:$0xff]   ;;  %v14279_v40 = vld [vmem:[#allocation8 + $0x1088] sm:$0xff]  }
 0x505   : > { %13486 = vmatpush3.bf16.msra.mxu1 %v14256_v14  ;;  %v15764_v33 = vadd.f32 %v8187_v24, %v15734_v34  ;;  %v14265_v34 = vld [vmem:[#allocation8 + $0x10a8] sm:$0xff]   ;;  %v14278_v62 = vld [vmem:[#allocation8 + $0x1190] sm:$0xff]  }
 0x506   : > { %13121 = vmatprep.subr.bf16.mxu1 %v14259_v52  ;;  %v14283_v52 = vld [vmem:[#allocation8 + $0x1080] sm:$0xff]   ;;  %v14282_v24 = vld [vmem:[#allocation8 + $0x1188] sm:$0xff]   ;;  %v10845_v19 = vld [vmem:[#allocation2 + $0x4b8] sm:$0xff] }
 0x507   : > { %13114 = vmatpush3.bf16.msra.mxu0 %v14258_v5  ;;  %v10409_v5 = vld [vmem:[#allocation2 + $0x498] sm:$0xff]  ;;  %v10404_v18 = vld [vmem:[#allocation2 + $0x470] sm:$0xff] }
 0x508   : > { %13488 = vmatmul.mubr.msk.bf16.vlgmr.msra.gmra.mxu1 %vm1339_vm2, %v9984_v63  ;;  %13491 = vmatprep.subr.bf16.mxu0 %v14482_v28  ;;  %v10419_v7 = vadd.f32 %v10409_v5, %v15395_v6  ;;  %v14287_v63 = vld [vmem:[#allocation8 + $0x1158] sm:$0xff]  }
 0x509   : > { %13122 = vmatpush3.bf16.msra.mxu1 %v14260_v60  ;;  %10792 = vmatprep.mubr.bf16.mxu1 %v10425_v25  ;;  %v10860_v25 = vadd.f32 %v10850_v30, %v15363_v46 }
 0x50a   : > { %v12892_v59 = vpop.f32.mrf.mxu0  ;;  %10752 = vmatmul.mubr.bf16.vlgmr.msra.gmra.mxu0 %v10422_v49  ;;  %13123 = vmatprep.subr.bf16.mxu1 %v14262_v58  ;;  %v14286_v58 = vld [vmem:[#allocation8 + $0x1180] sm:$0xff]   ;;  %v14289_v49 = vld [vmem:[#allocation8 + $0x11b8] sm:$0xff]  }
 0x50b   : > { %13492 = vmatpush3.bf16.msra.mxu0 %v14261_v4  ;;  %13499 = vmatprep.mubr.msk.bf16.mxu0 %vm14483_vm3, %v14482_v28  ;;  %v10414_v4 = vadd.f32 %v10404_v18, %v15395_v6  ;;  %v14311_v18 = vld [vmem:[#allocation8 + $0x11f8] sm:$0xff]  }
 0x50c   : > { %v12893_v22 = vpop.f32.mrf.mxu0  ;;  %13493 = vmatprep.subr.bf16.mxu0 %v14482_v28 }
 0x50d   : > { %v12894_v54 = vadd.f32 %v12893_v22, %v12892_v59  ;;  %13124 = vmatpush3.bf16.msra.mxu1 %v14263_v35  ;;  %v14288_v35 = vld [vmem:[#allocation8 + $0x1118] sm:$0xff]   ;;  %v10855_v59 = vadd.f32 %v10845_v19, %v15363_v46 }
 0x50e   : > { %v12895_v41 = vpop.f32.mrf.mxu0  ;;  %13125 = vmatprep.subr.bf16.mxu1 %v14265_v34  ;;  %v10424_v34 = vpack.c.bf16 %v10419_v7, %v10414_v4 }
 0x50f   : > { %13494 = vmatpush3.bf16.msra.mxu0 %v14264_v3  ;;  %v14291_v3 = vld [vmem:[#allocation8 + $0x1150] sm:$0xff]   ;;  %v10865_v22 = vpack.c.bf16 %v10860_v25, %v10855_v59 }
 0x510   : > { %v12896_v55 = vpop.f32.mrf.mxu0  ;;  %13495 = vmatprep.subr.bf16.mxu0 %v14482_v28 }
 0x511   : > { %v12897_v44 = vadd.f32 %v12896_v55, %v12895_v41  ;;  %13126 = vmatpush3.bf16.msra.mxu1 %v14266_v2  ;;  %v14293_v41 = vld [vmem:[#allocation8 + $0x11b0] sm:$0xff]  }
 0x512   : > { %13127 = vmatprep.subr.bf16.mxu1 %v14268_v48 }
 0x513   : > { %13496 = vmatpush3.bf16.msra.mxu0 %v14267_v17  ;;  %v14292_v17 = vld [vmem:[#allocation8 + $0x1110] sm:$0xff]  }
 0x514   : > { %13497 = vmatprep.subr.bf16.mxu0 %v14482_v28 }
 0x515   : > { %13128 = vmatpush3.bf16.msra.mxu1 %v14269_v27  ;;  %v14295_v27 = vld [vmem:[#allocation8 + $0x1148] sm:$0xff]  }
 0x516   : > { %13129 = vmatprep.subr.bf16.mxu1 %v14271_v61 }
 0x517   : > { %13498 = vmatpush3.bf16.msra.mxu0 %v14270_v38  ;;  %v14297_v38 = vld [vmem:[#allocation8 + $0x11a8] sm:$0xff]  }
 0x518   : > { %v12870_v36 = vpop.f32.mrf.mxu1  ;;  %13170 = vmatprep.subr.bf16.mxu0 %v14273_v16  ;;  %v14296_v16 = vld [vmem:[#allocation8 + $0x1108] sm:$0xff]  }
 0x519   : > { %13130 = vmatpush3.bf16.msra.mxu1 %v14272_v26 }
 0x51a   : > { %v12871_v39 = vpop.f32.mrf.mxu1  ;;  %13500 = vmatmul.mubr.msk.bf16.vlgmr.msra.gmra.mxu0 %vm1339_vm2, %v10426_v11  ;;  %13131 = vmatprep.subr.bf16.mxu1 %v14275_v0  ;;  %v10851_v11 = vld [vmem:[#allocation2 + $0x4e8] sm:$0xff] }
 0x51b   : > { %v12872_v51 = vadd.f32 %v12871_v39, %v12870_v36  ;;  %13171 = vmatpush3.bf16.msra.mxu0 %v14274_v31  ;;  %11234 = vmatprep.mubr.bf16.mxu0 %v10867_v37  ;;  %v14301_v31 = vld [vmem:[#allocation8 + $0x11a0] sm:$0xff]   ;;  %v10861_v39 = vadd.f32 %v10851_v11, %v15395_v6 }
 0x51c   : > { %v12873_v14 = vpop.f32.mrf.mxu1  ;;  %13172 = vmatprep.subr.bf16.mxu0 %v14277_v12  ;;  %v14300_v36 = vld [vmem:[#allocation8 + $0x1100] sm:$0xff]   ;;  %v14303_v12 = vld [vmem:[#allocation8 + $0x1138] sm:$0xff]  }
 0x51d   : > { %13132 = vmatpush3.bf16.msra.mxu1 %v14276_v10  ;;  %v8585_v32 = vadd.f32 %v12894_v54, %v12872_v51  ;;  %v14290_v54 = vld [vmem:[#allocation8 + $0x1178] sm:$0xff]   ;;  %v14302_v37 = vld [vmem:[#allocation8 + $0x1160] sm:$0xff]   ;;  %v14305_v51 = vld [vmem:[#allocation8 + $0x1130] sm:$0xff]  }
 0x51e   : > { %v12874_v57 = vpop.f32.mrf.mxu1  ;;  %13133 = vmatprep.subr.bf16.mxu1 %v14279_v40  ;;  %v10846_v10 = vld [vmem:[#allocation2 + $0x4c0] sm:$0xff] }
 0x51f   : > { %v12875_v56 = vadd.f32 %v12874_v57, %v12873_v14  ;;  %13173 = vmatpush3.bf16.msra.mxu0 %v14278_v62  ;;  %v10856_v40 = vadd.f32 %v10846_v10, %v15395_v6  ;;  %v14306_v14 = vld [vmem:[#allocation8 + $0x10f0] sm:$0xff]   ;;  %v14308_v57 = vld [vmem:[#allocation8 + $0x10e8] sm:$0xff]  }
 0x520   : > { %13174 = vmatprep.subr.bf16.mxu0 %v14281_v42  ;;  %v10844_v6 = vld [vmem:[#allocation2 + $0x4b0] sm:$0xff] }
 0x521   : > { %13134 = vmatpush3.bf16.msra.mxu1 %v14280_v43  ;;  %v8588_v60 = vadd.f32 %v12897_v44, %v12875_v56  ;;  %v10866_v62 = vpack.c.bf16 %v10861_v39, %v10856_v40  ;;  %v14307_v43 = vld [vmem:[#allocation8 + $0x1128] sm:$0xff]   ;;  %v14309_v56 = vld [vmem:[#allocation8 + $0x1120] sm:$0xff]  }
 0x522   : > { %13135 = vmatprep.subr.bf16.mxu1 %v14283_v52 }
 0x523   : > { %13175 = vmatpush3.bf16.msra.mxu0 %v14282_v24  ;;  %v10849_v24 = vld [vmem:[#allocation2 + $0x4d8] sm:$0xff] }
 0x524   : > { %13176 = vmatprep.subr.bf16.mxu0 %v14285_v20  ;;  %v14310_v20 = vld [vmem:[#allocation8 + $0x10e0] sm:$0xff]   ;;  %v10859_v30 = vadd.f32 %v10849_v24, %v15366_v53 }
 0x525   : > { %13136 = vmatpush3.bf16.msra.mxu1 %v14284_v47  ;;  %v10854_v47 = vadd.f32 %v10844_v6, %v15366_v53  ;;  %v14313_v53 = vld [vmem:[#allocation8 + $0x11e8] sm:$0xff]  }
 0x526   : > { %13148 = vmatprep.subr.bf16.mxu1 %v14287_v63  ;;  %v14312_v63 = vld [vmem:[#allocation8 + $0x11f0] sm:$0xff]  }
 0x527   : > { %13177 = vmatpush3.bf16.msra.mxu0 %v14286_v58 }
 0x528   : > { %v8625_v2 = vpop.f32.mrf.mxu1  ;;  %10793 = vmatmul.mubr.bf16.vlgmr.msra.gmra.mxu1 %v10424_v34  ;;  %13178 = vmatprep.subr.bf16.mxu0 %v14289_v49  ;;  %v10853_v34 = vld [vmem:[#allocation2 + $0x4f8] sm:$0xff] }
 0x529   : > { %v8626_v48 = vadd.f32 %v8625_v2, %v8585_v32  ;;  %13149 = vmatpush3.bf16.msra.mxu1 %v14288_v35  ;;  %11193 = vmatprep.mubr.bf16.mxu1 %v10865_v22  ;;  %v14314_v22 = vld [vmem:[#allocation8 + $0x11e0] sm:$0xff]  }
 0x52a   : > { %v13441_v55 = vpop.f32.mrf.mxu1  ;;  %v12919_v44 = vpop.f32.mrf.mxu0  ;;  %13150 = vmatprep.subr.bf16.mxu1 %v14291_v3 }
 0x52b   : > { %v15784_v46 = vadd.f32 %v8626_v48, %v15754_v23  ;;  %13179 = vmatpush3.bf16.msra.mxu0 %v14290_v54  ;;  %v14298_v23 = vld [vmem:[#allocation8 + $0x1168] sm:$0xff]  }
 0x52c   : > { %v8628_v61 = vpop.f32.mrf.mxu1  ;;  %v12920_v1 = vpop.f32.mrf.mxu0  ;;  %13180 = vmatprep.subr.bf16.mxu0 %v14293_v41  ;;  %v10848_v54 = vld [vmem:[#allocation2 + $0x4d0] sm:$0xff]  ;;  %v10863_v41 = vadd.f32 %v10853_v34, %v15257_v50 }
 0x52d   : > { %v8629_v15 = vadd.f32 %v8628_v61, %v8588_v60  ;;  %v15786_v13 = vadd.f32 %v12920_v1, %v12919_v44  ;;  %13151 = vmatpush3.bf16.msra.mxu1 %v14292_v17  ;;  %v10864_v60 = vpack.c.bf16 %v10859_v30, %v10854_v47  ;;  %v10858_v17 = vadd.f32 %v10848_v54, %v15257_v50 }
 0x52e   : > { %v13442_v29 = vpop.f32.mrf.mxu1  ;;  %v12922_v26 = vpop.f32.mrf.mxu0  ;;  %13152 = vmatprep.subr.bf16.mxu1 %v14295_v27 }
 0x52f   : > { %v15789_v21 = vadd.f32 %v8629_v15, %v15764_v33  ;;  %13181 = vmatpush3.bf16.msra.mxu0 %v14294_v8  ;;  %v14304_v33 = vld [vmem:[#allocation8 + $0x10f8] sm:$0xff]   ;;  %v10868_v44 = vpack.c.bf16 %v10863_v41, %v10858_v17 }
 0x530   : > { %v12923_v0 = vpop.f32.mrf.mxu0  ;;  %13182 = vmatprep.subr.bf16.mxu0 %v14297_v38 }
 0x531   : > { %v12924_v45 = vadd.f32 %v12923_v0, %v12922_v26  ;;  %13153 = vmatpush3.bf16.msra.mxu1 %v14296_v16 }
 0x532   : > { %13154 = vmatprep.subr.bf16.mxu1 %v14299_v9 }
 0x533   : > { %13183 = vmatpush3.bf16.msra.mxu0 %v14298_v23 }
 0x534   : > { %13184 = vmatprep.subr.bf16.mxu0 %v14301_v31 }
 0x535   : > { %13155 = vmatpush3.bf16.msra.mxu1 %v14300_v36 }
 0x536   : > { %13156 = vmatprep.subr.bf16.mxu1 %v14303_v12 }
 0x537   : > { %13185 = vmatpush3.bf16.msra.mxu0 %v14302_v37 }
 0x539   : > { %13157 = vmatpush3.bf16.msra.mxu1 %v14304_v33 }
 0x53a   : > { %v9067_v42 = vpop.f32.mrf.mxu0  ;;  %11235 = vmatmul.mubr.bf16.vlgmr.msra.gmra.mxu0 %v10866_v62  ;;  %13158 = vmatprep.subr.bf16.mxu1 %v14305_v51 }
 0x53c   : > { %v13453_v32 = vpop.f32.mrf.mxu0 }
 0x53d   : > { %13159 = vmatpush3.bf16.msra.mxu1 %v14306_v14 }
 0x53e   : > { %v9070_v52 = vpop.f32.mrf.mxu0  ;;  %13160 = vmatprep.subr.bf16.mxu1 %v14307_v43 }
 0x540   : > { %v13454_v5 = vpop.f32.mrf.mxu0 }
 0x541   : > { %13161 = vmatpush3.bf16.msra.mxu1 %v14308_v57 }
 0x542   : > { %13162 = vmatprep.subr.bf16.mxu1 %v14309_v56 }
 0x545   : > { %13163 = vmatpush3.bf16.msra.mxu1 %v14310_v20 }
 0x546   : > { %13503 = vmatprep.subr.bf16.mxu1 %v14482_v28 }
 0x548   : > { %v12941_v7 = vpop.f32.mrf.mxu1  ;;  %11194 = vmatmul.mubr.bf16.vlgmr.msra.gmra.mxu1 %v10864_v60 }
 0x549   : > { %13504 = vmatpush3.bf16.msra.mxu1 %v14311_v18  ;;  %13511 = vmatprep.mubr.msk.bf16.mxu1 %vm14483_vm3, %v14482_v28 }
 0x54a   : > { %v12942_v19 = vpop.f32.mrf.mxu1  ;;  %13505 = vmatprep.subr.bf16.mxu1 %v14482_v28 }
 0x54b   : > { %v12943_v58 = vadd.f32 %v12942_v19, %v12941_v7 }
 0x54c   : > { %v12944_v25 = vpop.f32.mrf.mxu1 }
 0x54d   : > { %v9027_v4 = vadd.f32 %v12943_v58, %v15786_v13  ;;  %13506 = vmatpush3.bf16.msra.mxu1 %v14312_v63 }
 0x54e   : > { %v12945_v49 = vpop.f32.mrf.mxu1  ;;  %13507 = vmatprep.subr.bf16.mxu1 %v14482_v28 }
 0x54f   : > { %v9068_v35 = vadd.f32 %v9067_v42, %v9027_v4  ;;  %v12946_v59 = vadd.f32 %v12945_v49, %v12944_v25 }
 0x551   : > { %v9030_v3 = vadd.f32 %v12946_v59, %v12924_v45  ;;  %13508 = vmatpush3.bf16.msra.mxu1 %v14313_v53  ;;  %v9074_v2 = vadd.f32 %v9068_v35, %v15784_v46 }
 0x552   : > { %13509 = vmatprep.subr.bf16.mxu1 %v14482_v28 }
 0x553   : > { %v9071_v48 = vadd.f32 %v9070_v52, %v9030_v3 }
 0x555   : > { %13510 = vmatpush3.bf16.msra.mxu1 %v14314_v22  ;;  %v9075_v55 = vadd.f32 %v9071_v48, %v15789_v21 }
 0x558   : > { %13512 = vmatmul.mubr.msk.bf16.vlgmr.msra.gmra.mxu1 %vm1339_vm2, %v10868_v44 }
 0x55a   : > { %v12990_v27 = vpop.f32.mrf.mxu0 }
 0x55c   : > { %v12991_v8 = vpop.f32.mrf.mxu0 }
 0x55d   : > { %v12992_v61 = vadd.f32 %v12991_v8, %v12990_v27 }
 0x55e   : > { %v12993_v1 = vpop.f32.mrf.mxu0 }
 0x560   : > { %v12994_v38 = vpop.f32.mrf.mxu0 }
 0x561   : > { %v12995_v15 = vadd.f32 %v12994_v38, %v12993_v1 }
 0x568   : > { %v12968_v46 = vpop.f32.mrf.mxu1 }
 0x56a   : > { %v12969_v13 = vpop.f32.mrf.mxu1 }
 0x56b   : > { %v12970_v28 = vadd.f32 %v12969_v13, %v12968_v46 }
 0x56c   : > { %v12971_v16 = vpop.f32.mrf.mxu1 }
 0x56d   : > { %v9469_v29 = vadd.f32 %v12992_v61, %v12970_v28 }
 0x56e   : > { %v12972_v26 = vpop.f32.mrf.mxu1 }
 0x56f   : > { %v12973_v9 = vadd.f32 %v12972_v26, %v12971_v16 }
 0x571   : > { %v9472_v50 = vadd.f32 %v12995_v15, %v12973_v9 }
 0x578   : > { %v9509_v23 = vpop.f32.mrf.mxu1 }
 0x579   : > { %v9510_v0 = vadd.f32 %v9509_v23, %v9469_v29 }
 0x57a   : > { %v13465_v21 = vpop.f32.mrf.mxu1  ;;  %v13017_v31 = vpop.f32.mrf.mxu0 }
 0x57b   : > { %v9516_v45 = vadd.f32 %v9510_v0, %v9074_v2 }
 0x57c   : > { %v9512_v36 = vpop.f32.mrf.mxu1  ;;  %v13018_v11 = vpop.f32.mrf.mxu0 }
 0x57d   : > { %v9513_v12 = vadd.f32 %v9512_v36, %v9472_v50  ;;  %v13019_v37 = vadd.f32 %v13018_v11, %v13017_v31 }
 0x57e   : > { %v13466_v10 = vpop.f32.mrf.mxu1  ;;  %v13020_v39 = vpop.f32.mrf.mxu0 }
 0x57f   : > { %v9517_v33 = vadd.f32 %v9513_v12, %v9075_v55 }
 0x580   : > { %v13021_v40 = vpop.f32.mrf.mxu0 }
 0x581   : > { %v13022_v51 = vadd.f32 %v13021_v40, %v13020_v39 }
 0x58a   : > { %v9951_v62 = vpop.f32.mrf.mxu0 }
 0x58c   : > { %v13477_v14 = vpop.f32.mrf.mxu0 }
 0x58e   : > { %v9954_v42 = vpop.f32.mrf.mxu0 }
 0x590   : > { %v13478_v43 = vpop.f32.mrf.mxu0 }
 0x598   : > { %v13039_v32 = vpop.f32.mrf.mxu1 }
 0x59a   : > { %v13040_v57 = vpop.f32.mrf.mxu1 }
 0x59b   : > { %v13041_v52 = vadd.f32 %v13040_v57, %v13039_v32 }
 0x59c   : > { %v13042_v56 = vpop.f32.mrf.mxu1 }
 0x59d   : > { %v9911_v24 = vadd.f32 %v13041_v52, %v13019_v37 }
 0x59e   : > { %v13043_v5 = vpop.f32.mrf.mxu1 }
 0x59f   : > { %v9952_v20 = vadd.f32 %v9951_v62, %v9911_v24  ;;  %v13044_v6 = vadd.f32 %v13043_v5, %v13042_v56 }
 0x5a1   : > { %v9914_v30 = vadd.f32 %v13044_v6, %v13022_v51  ;;  %v9958_v47 = vadd.f32 %v9952_v20, %v9516_v45  ;;  %v12346_v6 = vld [vmem:[#allocation9] ss:$0 sm:$0xff] }
 0x5a3   : > { %v9955_v18 = vadd.f32 %v9954_v42, %v9914_v30 }
 0x5a5   : > { %v9959_v60 = vadd.f32 %v9955_v18, %v9517_v33 }
 0x5aa   : > { %v13088_v7 = vpop.f32.mrf.mxu0 }
 0x5ac   : > { %v13089_v63 = vpop.f32.mrf.mxu0 }
 0x5ad   : > { %v13090_v19 = vadd.f32 %v13089_v63, %v13088_v7 }
 0x5ae   : > { %v13091_v58 = vpop.f32.mrf.mxu0 }
 0x5b0   : > { %v13092_v25 = vpop.f32.mrf.mxu0 }
 0x5b1   : > { %v13093_v4 = vadd.f32 %v13092_v25, %v13091_v58 }
 0x5b8   : > { %v13066_v53 = vpop.f32.mrf.mxu1 }
 0x5ba   : > { %v13067_v49 = vpop.f32.mrf.mxu1 }
 0x5bb   : > { %v13068_v35 = vadd.f32 %v13067_v49, %v13066_v53 }
 0x5bc   : > { %v13069_v59 = vpop.f32.mrf.mxu1 }
 0x5bd   : > { %v10353_v34 = vadd.f32 %v13090_v19, %v13068_v35 }
 0x5be   : > { %v13070_v3 = vpop.f32.mrf.mxu1 }
 0x5bf   : > { %v13071_v22 = vadd.f32 %v13070_v3, %v13069_v59 }
 0x5c1   : > { %v10356_v54 = vadd.f32 %v13093_v4, %v13071_v22 }
 0x5c8   : > { %v10393_v2 = vpop.f32.mrf.mxu1 }
 0x5c9   : > { %v10394_v41 = vadd.f32 %v10393_v2, %v10353_v34 }
 0x5ca   : > { %v13489_v48 = vpop.f32.mrf.mxu1  ;;  %v13115_v55 = vpop.f32.mrf.mxu0 }
 0x5cb   : > { %v10400_v17 = vadd.f32 %v10394_v41, %v9958_v47 }
 0x5cc   : > { %v10396_v44 = vpop.f32.mrf.mxu1  ;;  %v13116_v1 = vpop.f32.mrf.mxu0 }
 0x5cd   : > { %v10397_v27 = vadd.f32 %v10396_v44, %v10356_v54  ;;  %v13117_v9 = vadd.f32 %v13116_v1, %v13115_v55 }
 0x5ce   : > { %v13490_v8 = vpop.f32.mrf.mxu1  ;;  %v13118_v38 = vpop.f32.mrf.mxu0 }
 0x5cf   : > { %v10401_v61 = vadd.f32 %v10397_v27, %v9959_v60 }
 0x5d0   : > { %v13119_v15 = vpop.f32.mrf.mxu0 }
 0x5d1   : > { %v13120_v31 = vadd.f32 %v13119_v15, %v13118_v38 }
 0x5da   : > { %v10835_v46 = vpop.f32.mrf.mxu0 }
 0x5dc   : > { %v13501_v13 = vpop.f32.mrf.mxu0 }
 0x5de   : > { %v10838_v28 = vpop.f32.mrf.mxu0 }
 0x5e0   : > { %v13502_v16 = vpop.f32.mrf.mxu0 }
 0x5e8   : > { %v13137_v29 = vpop.f32.mrf.mxu1 }
 0x5ea   : > { %v13138_v26 = vpop.f32.mrf.mxu1 }
 0x5eb   : > { %v13139_v50 = vadd.f32 %v13138_v26, %v13137_v29 }
 0x5ec   : > { %v13140_v23 = vpop.f32.mrf.mxu1 }
 0x5ed   : > { %v10795_v0 = vadd.f32 %v13139_v50, %v13117_v9 }
 0x5ee   : > { %v13141_v21 = vpop.f32.mrf.mxu1 }
 0x5ef   : > { %v10836_v45 = vadd.f32 %v10835_v46, %v10795_v0  ;;  %v13142_v36 = vadd.f32 %v13141_v21, %v13140_v23 }
 0x5f1   : > { %v10798_v11 = vadd.f32 %v13142_v36, %v13120_v31  ;;  %v10842_v12 = vadd.f32 %v10836_v45, %v10400_v17 }
 0x5f3   : > { %v10839_v37 = vadd.f32 %v10838_v28, %v10798_v11 }
 0x5f5   : > { %v10843_v10 = vadd.f32 %v10839_v37, %v10401_v61 }
 0x5fa   : > { %v13186_v33 = vpop.f32.mrf.mxu0 }
 0x5fc   : > { %v13187_v51 = vpop.f32.mrf.mxu0 }
 0x5fd   : > { %v13188_v32 = vadd.f32 %v13187_v51, %v13186_v33 }
 0x5fe   : > { %v13189_v14 = vpop.f32.mrf.mxu0 }
 0x600   : > { %v13190_v57 = vpop.f32.mrf.mxu0 }
 0x601   : > { %v13191_v5 = vadd.f32 %v13190_v57, %v13189_v14 }
 0x608   : > { %v13164_v39 = vpop.f32.mrf.mxu1 }
 0x60a   : > { %v13165_v40 = vpop.f32.mrf.mxu1 }
 0x60b   : > { %v13166_v42 = vadd.f32 %v13165_v40, %v13164_v39 }
 0x60c   : > { %v13167_v62 = vpop.f32.mrf.mxu1 }
 0x60d   : > { %v11237_v56 = vadd.f32 %v13188_v32, %v13166_v42 }
 0x60e   : > { %v13168_v43 = vpop.f32.mrf.mxu1 }
 0x60f   : > { %v13169_v52 = vadd.f32 %v13168_v43, %v13167_v62 }
 0x611   : > { %v11240_v18 = vadd.f32 %v13191_v5, %v13169_v52 }
 0x618   : > { %v11277_v24 = vpop.f32.mrf.mxu1 }
 0x619   : > { %v11278_v20 = vadd.f32 %v11277_v24, %v11237_v56 }
 0x61a   : > { %v13513_v30 = vpop.f32.mrf.mxu1 }
 0x61b   : > { %v11284_v47 = vadd.f32 %v11278_v20, %v10842_v12 }
 0x61c   : > { %v11280_v60 = vpop.f32.mrf.mxu1 }
 0x61d   : > { %v11293_v7 = vadd.f32 %v12346_v6, %v11284_v47  ;;  %v11281_v63 = vadd.f32 %v11280_v60, %v11240_v18 }
 0x61e   : > { %v13514_v19 = vpop.f32.mrf.mxu1 }
 0x61f   : > { %11295 = vst [vmem:[%s464_s28] sm:$0xff] %v11293_v7  ;;  %v11285_v58 = vadd.f32 %v11281_v63, %v10843_v10 }
 0x621   : > { %v11294_v25 = vadd.f32 %v12346_v6, %v11285_v58 }
 0x623   : > { %11296 = vst [vmem:[%s464_s28 + $0x8] sm:$0xff] %v11294_v25 }
 0x624 PF: > { %p15_p6 = scmp.ge.s32.totalorder %s14531_s22, 4   ;;  %s15832_s18 = smov %s14467_s19 }
 0x625   : > { %s15833_s19 = smov %s14541_s25  ;;  %s15834_s20 = smov %s14531_s22 }
 0x626   :  { %17 = sbr.rel (!%p15_p6) target bundleno = 4 (0x4), region = 152 }
 0x62b   :  { %11319 = vsyncpa [#allocation5], 1 }
 0x62c   :  { %11321 = vsyncpa [#allocation5 + $0x1], 1 }
 0x62d   :  { %11322 = vsyncpa [#allocation7], 1 }
 0x62e   :  { %11323 = vsyncpa [#allocation10], 1 }

</bundles_post_ra>
